<compile_context>
chip_gen: v5e
topology: v5e:2x2
jax: 0.10.0
libtpu: 0.0.40
codegen_flags: <defaults>
</compile_context>

<pallas_src>
from dataclasses import dataclass
from functools import partial

import numpy as np
import jax
import jax.numpy as jnp
from jax.experimental import pallas as pl
from jax.experimental.pallas import tpu as pltpu


# ----------------------------------------------------------------------------
# Config
# ----------------------------------------------------------------------------
@dataclass
class GranConfig:
    voc_size: int
    n_relation: int
    n_edge: int
    max_seq_len: int
    max_arity: int
    n_layer: int = 2
    n_head: int = 4
    emb_size: int = 32
    intermediate_size: int = 64
    hidden_act: str = "gelu"
    initializer_range: float = 0.02


# ----------------------------------------------------------------------------
# In-kernel math helpers (traced inside the Pallas kernel)
# ----------------------------------------------------------------------------
def _erf_approx(x):
    # Abramowitz & Stegun 7.1.26, max abs error ~1.5e-7 (stands in for exact erf)
    a1, a2, a3, a4, a5 = 0.254829592, -0.284496736, 1.421413741, -1.453152027, 1.061405429
    p = 0.3275911
    ax = jnp.abs(x)
    t = 1.0 / (1.0 + p * ax)
    poly = ((((a5 * t + a4) * t + a3) * t + a2) * t + a1) * t
    y = 1.0 - poly * jnp.exp(-ax * ax)
    return jnp.where(x >= 0, y, -y)


def _gelu(x):
    # torch.nn.functional.gelu (default, exact erf formulation)
    return 0.5 * x * (1.0 + _erf_approx(x * 0.7071067811865476))


_VMEM_SPEC = pl.BlockSpec(memory_space=pltpu.MemorySpace.VMEM)


# ----------------------------------------------------------------------------
# Fused kernel: seq-LN -> n_layer x (edge-aware MHA + dan + FFN + dan) -> LM head
# ----------------------------------------------------------------------------
def _gran_fused_kernel(
        # data
        emb_ref,      # [B, S, E]   gathered entity embeddings
        bias_ref,     # [B, S, S]   attention bias (same across heads)
        eoh_ref,      # [n_edge, S, S] one-hot edge-label masks
        msel_ref,     # [B, S]      one-hot mask-position selector
        ekT_ref,      # [D, n_edge] edge-key embedding, transposed
        ev_ref,       # [n_edge, D] edge-value embedding
        # pre_post_process_layer1 LN
        ln0s_ref, ln0b_ref,                             # [1, E]
        # stacked per-layer params (leading dim = n_layer)
        wq_ref, bq_ref, wk_ref, bk_ref, wv_ref, bv_ref,  # [L,E,E]/[L,1,E]
        wp_ref, bp_ref, ln1s_ref, ln1b_ref,              # [L,E,E]/[L,1,E]
        w1_ref, b1_ref, w2_ref, b2_ref,                  # [L,E,I]/[L,1,I]/[L,I,E]/[L,1,E]
        ln2s_ref, ln2b_ref,                              # [L,1,E]
        # masked-LM head
        mw_ref, mb_ref, mlns_ref, mlnb_ref,              # [E,E]/[1,E]/[1,E]/[1,E]
        embT_ref, lmb_ref,                               # [E,V]/[1,V]
        # output
        out_ref,      # [B, V]
        # scratch
        ctx_scr,      # VMEM [S, E]  per-head outputs combined here
        feat_scr,     # VMEM [B, E]  gathered mask features
        *, n_layer, n_head, n_edge):

    B, S, E = emb_ref.shape
    D = E // n_head
    scale = float(D) ** -0.5
    f32 = jnp.float32

    def mm(a, b):
        return jnp.dot(a, b, preferred_element_type=f32)

    def ln_rows(x2d, sc, bi, eps=1e-12):
        # GranLayerNorm: normalize over axis 0 of a [rows, E] slab,
        # scale/bias broadcast over the emb axis ([1, E]).
        mean = jnp.mean(x2d, axis=0, keepdims=True)
        sx = x2d - mean
        var = jnp.mean(sx * sx, axis=0, keepdims=True)
        return sx * jax.lax.rsqrt(var + eps) * sc + bi

    # -------- hoisted shared operands (reused across layers / batch / heads) --
    ekT = ekT_ref[...]                                            # [D, n_edge]
    eohs = [eoh_ref[e] for e in range(1, n_edge)]                 # [S, S] each (label 0 masked out)
    evs = [ev_ref[pl.ds(e, 1), :] for e in range(1, n_edge)]      # [1, D] each
    biases = [bias_ref[b] for b in range(B)]                      # [S, S] each
    ln0s, ln0b = ln0s_ref[...], ln0b_ref[...]

    # -------- pre_post_process_layer1 'nd': LN over seq axis, dropout=identity
    xs = [ln_rows(emb_ref[b], ln0s, ln0b) for b in range(B)]      # per-batch [S, E]

    # -------- encoder layers ------------------------------------------------
    for l in range(n_layer):
        wq, bq = wq_ref[l], bq_ref[l]
        wk, bk = wk_ref[l], bk_ref[l]
        wv, bv = wv_ref[l], bv_ref[l]
        wp, bp = wp_ref[l], bp_ref[l]
        w1, b1 = w1_ref[l], b1_ref[l]
        w2, b2 = w2_ref[l], b2_ref[l]
        ln1s, ln1b = ln1s_ref[l], ln1b_ref[l]
        ln2s, ln2b = ln2s_ref[l], ln2b_ref[l]

        new_xs = []
        for b in range(B):
            xb = xs[b]                                            # [S, E]
            q = mm(xb, wq) + bq
            k = mm(xb, wk) + bk
            v = mm(xb, wv) + bv

            for h in range(n_head):
                lo, hi = h * D, (h + 1) * D
                qh = q[:, lo:hi] * scale                          # [S, D] (scaled)
                kh = k[:, lo:hi]
                vh = v[:, lo:hi]

                prod = mm(qh, kh.T)                               # [S, S]
                # edge-key bias, factorized: qe = qh @ ek_emb.T  ([S, n_edge])
                qe = mm(qh, ekT)
                for e in range(1, n_edge):
                    prod = prod + qe[:, e:e + 1] * eohs[e - 1]
                prod = prod + biases[b]

                # softmax (EUP approximate reciprocal for the denominator)
                m = jnp.max(prod, axis=-1, keepdims=True)
                p = jnp.exp(prod - m)
                inv = pl.reciprocal(jnp.sum(p, axis=-1, keepdims=True), approx=True)
                w_att = p * inv

                outh = mm(w_att, vh)                              # [S, D]
                # edge-value bias, factorized over the n_edge table
                for e in range(1, n_edge):
                    outh = outh + (jnp.sum(w_att * eohs[e - 1], axis=-1, keepdims=True)
                                   * evs[e - 1])
                # combine heads into the [S, E] scratch slab (lane slice store)
                ctx_scr[:, pl.ds(lo, D)] = outh

            # single combined output projection (instead of per-head matmuls)
            attn_out = mm(ctx_scr[...], wp) + bp

            # post_process_layer2 'dan': residual + LN(over seq)
            y = ln_rows(attn_out + xb, ln1s, ln1b)

            # position-wise feed forward (gelu)
            hmid = _gelu(mm(y, w1) + b1)
            ffd = mm(hmid, w2) + b2

            # post_process_layer3 'dan'
            new_xs.append(ln_rows(ffd + y, ln2s, ln2b))
        xs = new_xs

    # -------- masked-position gather (one-hot matmul) + LM head --------------
    for b in range(B):
        feat_scr[pl.ds(b, 1), :] = mm(msel_ref[pl.ds(b, 1), :], xs[b])   # [1, E]

    feat = feat_scr[...]                                          # [B, E]
    h = _gelu(mm(feat, mw_ref[...]) + mb_ref[...])
    # GranLayerNorm(begin_axis=0): normalize over the BATCH axis
    mean = jnp.mean(h, axis=0, keepdims=True)
    sx = h - mean
    var = jnp.mean(sx * sx, axis=0, keepdims=True)
    hn = sx * jax.lax.rsqrt(var + 1e-12) * mlns_ref[...] + mlnb_ref[...]
    out_ref[...] = mm(hn, embT_ref[...]) + lmb_ref[...]           # [B, V]


# ----------------------------------------------------------------------------
# Parameter init (deterministic, shapes per module __init__; layers stacked)
# ----------------------------------------------------------------------------
def init_params(key, cfg: GranConfig):
    E, H, V, I, L = cfg.emb_size, cfg.n_head, cfg.voc_size, cfg.intermediate_size, cfg.n_layer
    D = E // H
    keys = iter(jax.random.split(key, 4 + 6 * L))
    r = cfg.initializer_range

    def tn(shape):
        return (r * jax.random.truncated_normal(next(keys), -2.0, 2.0, shape)).astype(jnp.float32)

    def linear(din, dout):
        return tn((din, dout)), jnp.full((1, dout), 0.01, jnp.float32)   # torch bias filled 0.01

    ones = lambda n: jnp.ones((1, n), jnp.float32)
    zeros = lambda n: jnp.zeros((1, n), jnp.float32)

    p = {
        "ent_emb": tn((V, E)),
        "edge_key_emb": tn((cfg.n_edge, D)),
        "edge_value_emb": tn((cfg.n_edge, D)),
        "ln0_scale": ones(E), "ln0_bias": zeros(E),
        "mask_ln_s": ones(E), "mask_ln_b": zeros(E),
        "lm_bias": jnp.zeros((1, V), jnp.float32),
    }
    p["mask_fc_w"], p["mask_fc_b"] = linear(E, E)

    names = ["wq", "bq", "wk", "bk", "wv", "bv", "wp", "bp",
             "ln1s", "ln1b", "w1", "b1", "w2", "b2", "ln2s", "ln2b"]
    per = {n: [] for n in names}
    for _ in range(L):
        for wname, bname, din, dout in [("wq", "bq", E, E), ("wk", "bk", E, E),
                                        ("wv", "bv", E, E), ("wp", "bp", E, E),
                                        ("w1", "b1", E, I), ("w2", "b2", I, E)]:
            w, b = linear(din, dout)
            per[wname].append(w)
            per[bname].append(b)
        per["ln1s"].append(ones(E)); per["ln1b"].append(zeros(E))
        per["ln2s"].append(ones(E)); per["ln2b"].append(zeros(E))
    p["layers"] = {n: jnp.stack(v) for n, v in per.items()}
    return p


def build_edge_labels(cfg: GranConfig):
    max_aux = cfg.max_arity - 2
    rows = []
    rows.append([0, 1, 2] + [3] * max_aux + [0] * max_aux)
    rows.append([1] + [0] * (cfg.max_seq_len - 1))
    rows.append([2] + [0] * (cfg.max_seq_len - 1))
    for idx in range(max_aux):
        rows.append([3, 0, 0] + [0] * max_aux + [0] * idx + [4] + [0] * (max_aux - idx - 1))
    for idx in range(max_aux):
        rows.append([0, 0, 0] + [0] * idx + [4] + [0] * (max_aux - idx - 1) + [0] * max_aux)
    return np.asarray(rows, dtype=np.int32).reshape(cfg.max_seq_len, cfg.max_seq_len)


# ----------------------------------------------------------------------------
# GranModel.forward
# ----------------------------------------------------------------------------
def gran_forward(params, cfg: GranConfig, input_ids, input_mask, mask_pos, mask_type):
    S, E, H, L, V = cfg.max_seq_len, cfg.emb_size, cfg.n_head, cfg.n_layer, cfg.voc_size
    B = input_ids.shape[0]

    # host-side constants: edge-label one-hot masks (label 0 never used in-kernel)
    edge_labels = build_edge_labels(cfg)                                        # np [S, S]
    edge_onehot = (edge_labels[None, :, :] ==
                   np.arange(cfg.n_edge, dtype=np.int32)[:, None, None]).astype(np.float32)
    edge_onehot = jnp.asarray(edge_onehot)                                      # [n_edge, S, S]

    # small XLA glue (embedding gather + mask prep stay outside the kernel)
    entity_emb = jnp.take(params["ent_emb"], input_ids, axis=0)                 # [B, S, E]
    attn_mask = jnp.matmul(input_mask, jnp.transpose(input_mask, (0, 2, 1)))    # [B, S, S]
    attn_bias = (1000000.0 * (attn_mask - 1.0)).astype(jnp.float32)             # same across heads
    mask_sel = jax.nn.one_hot(mask_pos, S, dtype=jnp.float32)                   # [B, S]

    lp = params["layers"]
    args = (entity_emb, attn_bias, edge_onehot, mask_sel,
            params["edge_key_emb"].T, params["edge_value_emb"],
            params["ln0_scale"], params["ln0_bias"],
            lp["wq"], lp["bq"], lp["wk"], lp["bk"], lp["wv"], lp["bv"],
            lp["wp"], lp["bp"], lp["ln1s"], lp["ln1b"],
            lp["w1"], lp["b1"], lp["w2"], lp["b2"], lp["ln2s"], lp["ln2b"],
            params["mask_fc_w"], params["mask_fc_b"],
            params["mask_ln_s"], params["mask_ln_b"],
            params["ent_emb"].T, params["lm_bias"])

    fc_out = pl.pallas_call(
        partial(_gran_fused_kernel, n_layer=L, n_head=H, n_edge=cfg.n_edge),
        out_shape=jax.ShapeDtypeStruct((B, V), jnp.float32),
        in_specs=[_VMEM_SPEC] * len(args),
        out_specs=_VMEM_SPEC,
        scratch_shapes=[pltpu.VMEM((S, E), jnp.float32),   # combined-heads slab
                        pltpu.VMEM((B, E), jnp.float32)],  # gathered mask features
    )(*args)

    # type-indicator masking (tiny [B, V] int/elementwise work, left in XLA)
    special = jnp.full((B, 2), -1, jnp.int32)
    relation = jnp.full((B, cfg.n_relation), -1, jnp.int32)
    entity = jnp.full((B, V - cfg.n_relation - 2), 1, jnp.int32)
    type_ind = jnp.concatenate([relation, entity], axis=-1) * mask_type.reshape(-1, 1)
    type_ind = jnp.concatenate([special, type_ind], axis=-1).astype(jnp.float32)
    type_ind = jax.nn.relu(type_ind)
    fc_out = fc_out + (type_ind - 1.0) * 1000000.0
    return fc_out, type_ind


# ----------------------------------------------------------------------------
# Main
# ----------------------------------------------------------------------------
if __name__ == "__main__":
    cfg = GranConfig(voc_size=40, n_relation=6, n_edge=5,
                     max_seq_len=9, max_arity=5,
                     n_layer=2, n_head=4, emb_size=32, intermediate_size=64)

    root = jax.random.PRNGKey(0)
    kp, kid = jax.random.split(root)
    params = init_params(kp, cfg)

    B = 2
    input_ids = jax.random.randint(kid, (B, cfg.max_seq_len), 0, cfg.voc_size, dtype=jnp.int32)
    input_mask = jnp.ones((B, cfg.max_seq_len, 1), jnp.float32)
    input_mask = input_mask.at[1, 7:, 0].set(0.0)          # pad last two tokens of sample 1
    mask_pos = jnp.array([1, 3], dtype=jnp.int32)
    mask_type = jnp.array([1, -1], dtype=jnp.int32)

    @jax.jit
    def run(ids, imask, mpos, mtype):
        return gran_forward(params, cfg, ids, imask, mpos, mtype)

    fc_out, type_indicator = run(input_ids, input_mask, mask_pos, mask_type)
    jax.block_until_ready(fc_out)
    jax.block_until_ready(type_indicator)
    assert fc_out.shape == (B, cfg.voc_size) and type_indicator.shape == (B, cfg.voc_size)
    print("KERNEL_OK")
</pallas_src>

<mosaic_0001>
module attributes {stable_mosaic.version = 11 : i64} {
  func.func @_gran_fused_kernel(%arg0: memref<2x9x32xf32, #tpu.memory_space<vmem>>, %arg1: memref<2x9x9xf32, #tpu.memory_space<vmem>>, %arg2: memref<5x9x9xf32, #tpu.memory_space<vmem>>, %arg3: memref<2x9xf32, #tpu.memory_space<vmem>>, %arg4: memref<8x5xf32, #tpu.memory_space<vmem>>, %arg5: memref<5x8xf32, #tpu.memory_space<vmem>>, %arg6: memref<1x32xf32, #tpu.memory_space<vmem>>, %arg7: memref<1x32xf32, #tpu.memory_space<vmem>>, %arg8: memref<2x32x32xf32, #tpu.memory_space<vmem>>, %arg9: memref<2x1x32xf32, #tpu.memory_space<vmem>>, %arg10: memref<2x32x32xf32, #tpu.memory_space<vmem>>, %arg11: memref<2x1x32xf32, #tpu.memory_space<vmem>>, %arg12: memref<2x32x32xf32, #tpu.memory_space<vmem>>, %arg13: memref<2x1x32xf32, #tpu.memory_space<vmem>>, %arg14: memref<2x32x32xf32, #tpu.memory_space<vmem>>, %arg15: memref<2x1x32xf32, #tpu.memory_space<vmem>>, %arg16: memref<2x1x32xf32, #tpu.memory_space<vmem>>, %arg17: memref<2x1x32xf32, #tpu.memory_space<vmem>>, %arg18: memref<2x32x64xf32, #tpu.memory_space<vmem>>, %arg19: memref<2x1x64xf32, #tpu.memory_space<vmem>>, %arg20: memref<2x64x32xf32, #tpu.memory_space<vmem>>, %arg21: memref<2x1x32xf32, #tpu.memory_space<vmem>>, %arg22: memref<2x1x32xf32, #tpu.memory_space<vmem>>, %arg23: memref<2x1x32xf32, #tpu.memory_space<vmem>>, %arg24: memref<32x32xf32, #tpu.memory_space<vmem>>, %arg25: memref<1x32xf32, #tpu.memory_space<vmem>>, %arg26: memref<1x32xf32, #tpu.memory_space<vmem>>, %arg27: memref<1x32xf32, #tpu.memory_space<vmem>>, %arg28: memref<32x40xf32, #tpu.memory_space<vmem>>, %arg29: memref<1x40xf32, #tpu.memory_space<vmem>>, %arg30: memref<2x40xf32, #tpu.memory_space<vmem>>, %arg31: memref<9x32xf32, #tpu.memory_space<vmem>>, %arg32: memref<2x32xf32, #tpu.memory_space<vmem>>) attributes {dimension_semantics = [], scalar_prefetch = 0 : i64, scratch_operands = 2 : i64, tpu.core_type = #tpu.core_type<tc>} {
    %c0 = arith.constant 0 : index
    %c0_0 = arith.constant 0 : index
    %0 = vector.load %arg4[%c0, %c0_0] : memref<8x5xf32, #tpu.memory_space<vmem>>, vector<8x5xf32>
    %c1 = arith.constant 1 : index
    %c0_1 = arith.constant 0 : index
    %c0_2 = arith.constant 0 : index
    %1 = vector.load %arg2[%c1, %c0_1, %c0_2] : memref<5x9x9xf32, #tpu.memory_space<vmem>>, vector<1x9x9xf32>
    %2 = vector.shape_cast %1 : vector<1x9x9xf32> to vector<9x9xf32>
    %c2 = arith.constant 2 : index
    %c0_3 = arith.constant 0 : index
    %c0_4 = arith.constant 0 : index
    %3 = vector.load %arg2[%c2, %c0_3, %c0_4] : memref<5x9x9xf32, #tpu.memory_space<vmem>>, vector<1x9x9xf32>
    %4 = vector.shape_cast %3 : vector<1x9x9xf32> to vector<9x9xf32>
    %c3 = arith.constant 3 : index
    %c0_5 = arith.constant 0 : index
    %c0_6 = arith.constant 0 : index
    %5 = vector.load %arg2[%c3, %c0_5, %c0_6] : memref<5x9x9xf32, #tpu.memory_space<vmem>>, vector<1x9x9xf32>
    %6 = vector.shape_cast %5 : vector<1x9x9xf32> to vector<9x9xf32>
    %c4 = arith.constant 4 : index
    %c0_7 = arith.constant 0 : index
    %c0_8 = arith.constant 0 : index
    %7 = vector.load %arg2[%c4, %c0_7, %c0_8] : memref<5x9x9xf32, #tpu.memory_space<vmem>>, vector<1x9x9xf32>
    %8 = vector.shape_cast %7 : vector<1x9x9xf32> to vector<9x9xf32>
    %c1_9 = arith.constant 1 : index
    %c0_10 = arith.constant 0 : index
    %9 = vector.load %arg5[%c1_9, %c0_10] : memref<5x8xf32, #tpu.memory_space<vmem>>, vector<1x8xf32>
    %c2_11 = arith.constant 2 : index
    %c0_12 = arith.constant 0 : index
    %10 = vector.load %arg5[%c2_11, %c0_12] : memref<5x8xf32, #tpu.memory_space<vmem>>, vector<1x8xf32>
    %c3_13 = arith.constant 3 : index
    %c0_14 = arith.constant 0 : index
    %11 = vector.load %arg5[%c3_13, %c0_14] : memref<5x8xf32, #tpu.memory_space<vmem>>, vector<1x8xf32>
    %c4_15 = arith.constant 4 : index
    %c0_16 = arith.constant 0 : index
    %12 = vector.load %arg5[%c4_15, %c0_16] : memref<5x8xf32, #tpu.memory_space<vmem>>, vector<1x8xf32>
    %c0_17 = arith.constant 0 : index
    %c0_18 = arith.constant 0 : index
    %c0_19 = arith.constant 0 : index
    %13 = vector.load %arg1[%c0_17, %c0_18, %c0_19] : memref<2x9x9xf32, #tpu.memory_space<vmem>>, vector<1x9x9xf32>
    %14 = vector.shape_cast %13 : vector<1x9x9xf32> to vector<9x9xf32>
    %c1_20 = arith.constant 1 : index
    %c0_21 = arith.constant 0 : index
    %c0_22 = arith.constant 0 : index
    %15 = vector.load %arg1[%c1_20, %c0_21, %c0_22] : memref<2x9x9xf32, #tpu.memory_space<vmem>>, vector<1x9x9xf32>
    %16 = vector.shape_cast %15 : vector<1x9x9xf32> to vector<9x9xf32>
    %c0_23 = arith.constant 0 : index
    %c0_24 = arith.constant 0 : index
    %17 = vector.load %arg6[%c0_23, %c0_24] : memref<1x32xf32, #tpu.memory_space<vmem>>, vector<1x32xf32>
    %c0_25 = arith.constant 0 : index
    %c0_26 = arith.constant 0 : index
    %18 = vector.load %arg7[%c0_25, %c0_26] : memref<1x32xf32, #tpu.memory_space<vmem>>, vector<1x32xf32>
    %c0_27 = arith.constant 0 : index
    %c0_28 = arith.constant 0 : index
    %c0_29 = arith.constant 0 : index
    %19 = vector.load %arg0[%c0_27, %c0_28, %c0_29] : memref<2x9x32xf32, #tpu.memory_space<vmem>>, vector<1x9x32xf32>
    %20 = vector.shape_cast %19 : vector<1x9x32xf32> to vector<9x32xf32>
    %cst = arith.constant dense<0.000000e+00> : vector<32xf32>
    %21 = vector.multi_reduction <add>, %20, %cst [0] : vector<9x32xf32> to vector<32xf32>
    %22 = vector.shape_cast %21 : vector<32xf32> to vector<1x32xf32>
    %cst_30 = arith.constant 9.000000e+00 : f32
    %23 = vector.broadcast %cst_30 : f32 to vector<1x32xf32>
    %24 = arith.divf %22, %23 : vector<1x32xf32>
    %25 = vector.broadcast %24 : vector<1x32xf32> to vector<9x32xf32>
    %26 = arith.subf %20, %25 : vector<9x32xf32>
    %27 = arith.mulf %26, %26 : vector<9x32xf32>
    %cst_31 = arith.constant dense<0.000000e+00> : vector<32xf32>
    %28 = vector.multi_reduction <add>, %27, %cst_31 [0] : vector<9x32xf32> to vector<32xf32>
    %29 = vector.shape_cast %28 : vector<32xf32> to vector<1x32xf32>
    %cst_32 = arith.constant 9.000000e+00 : f32
    %30 = vector.broadcast %cst_32 : f32 to vector<1x32xf32>
    %31 = arith.divf %29, %30 : vector<1x32xf32>
    %cst_33 = arith.constant 9.99999996E-13 : f32
    %32 = vector.broadcast %cst_33 : f32 to vector<1x32xf32>
    %33 = arith.addf %31, %32 : vector<1x32xf32>
    %34 = math.rsqrt %33 : vector<1x32xf32>
    %35 = vector.broadcast %34 : vector<1x32xf32> to vector<9x32xf32>
    %36 = arith.mulf %26, %35 : vector<9x32xf32>
    %37 = vector.broadcast %17 : vector<1x32xf32> to vector<9x32xf32>
    %38 = arith.mulf %36, %37 : vector<9x32xf32>
    %39 = vector.broadcast %18 : vector<1x32xf32> to vector<9x32xf32>
    %40 = arith.addf %38, %39 : vector<9x32xf32>
    %c1_34 = arith.constant 1 : index
    %c0_35 = arith.constant 0 : index
    %c0_36 = arith.constant 0 : index
    %41 = vector.load %arg0[%c1_34, %c0_35, %c0_36] : memref<2x9x32xf32, #tpu.memory_space<vmem>>, vector<1x9x32xf32>
    %42 = vector.shape_cast %41 : vector<1x9x32xf32> to vector<9x32xf32>
    %cst_37 = arith.constant dense<0.000000e+00> : vector<32xf32>
    %43 = vector.multi_reduction <add>, %42, %cst_37 [0] : vector<9x32xf32> to vector<32xf32>
    %44 = vector.shape_cast %43 : vector<32xf32> to vector<1x32xf32>
    %cst_38 = arith.constant 9.000000e+00 : f32
    %45 = vector.broadcast %cst_38 : f32 to vector<1x32xf32>
    %46 = arith.divf %44, %45 : vector<1x32xf32>
    %47 = vector.broadcast %46 : vector<1x32xf32> to vector<9x32xf32>
    %48 = arith.subf %42, %47 : vector<9x32xf32>
    %49 = arith.mulf %48, %48 : vector<9x32xf32>
    %cst_39 = arith.constant dense<0.000000e+00> : vector<32xf32>
    %50 = vector.multi_reduction <add>, %49, %cst_39 [0] : vector<9x32xf32> to vector<32xf32>
    %51 = vector.shape_cast %50 : vector<32xf32> to vector<1x32xf32>
    %cst_40 = arith.constant 9.000000e+00 : f32
    %52 = vector.broadcast %cst_40 : f32 to vector<1x32xf32>
    %53 = arith.divf %51, %52 : vector<1x32xf32>
    %cst_41 = arith.constant 9.99999996E-13 : f32
    %54 = vector.broadcast %cst_41 : f32 to vector<1x32xf32>
    %55 = arith.addf %53, %54 : vector<1x32xf32>
    %56 = math.rsqrt %55 : vector<1x32xf32>
    %57 = vector.broadcast %56 : vector<1x32xf32> to vector<9x32xf32>
    %58 = arith.mulf %48, %57 : vector<9x32xf32>
    %59 = vector.broadcast %17 : vector<1x32xf32> to vector<9x32xf32>
    %60 = arith.mulf %58, %59 : vector<9x32xf32>
    %61 = vector.broadcast %18 : vector<1x32xf32> to vector<9x32xf32>
    %62 = arith.addf %60, %61 : vector<9x32xf32>
    %c0_42 = arith.constant 0 : index
    %c0_43 = arith.constant 0 : index
    %c0_44 = arith.constant 0 : index
    %63 = vector.load %arg8[%c0_42, %c0_43, %c0_44] : memref<2x32x32xf32, #tpu.memory_space<vmem>>, vector<1x32x32xf32>
    %64 = vector.shape_cast %63 : vector<1x32x32xf32> to vector<32x32xf32>
    %c0_45 = arith.constant 0 : index
    %c0_46 = arith.constant 0 : index
    %c0_47 = arith.constant 0 : index
    %65 = vector.load %arg9[%c0_45, %c0_46, %c0_47] : memref<2x1x32xf32, #tpu.memory_space<vmem>>, vector<1x1x32xf32>
    %66 = vector.shape_cast %65 : vector<1x1x32xf32> to vector<1x32xf32>
    %c0_48 = arith.constant 0 : index
    %c0_49 = arith.constant 0 : index
    %c0_50 = arith.constant 0 : index
    %67 = vector.load %arg10[%c0_48, %c0_49, %c0_50] : memref<2x32x32xf32, #tpu.memory_space<vmem>>, vector<1x32x32xf32>
    %68 = vector.shape_cast %67 : vector<1x32x32xf32> to vector<32x32xf32>
    %c0_51 = arith.constant 0 : index
    %c0_52 = arith.constant 0 : index
    %c0_53 = arith.constant 0 : index
    %69 = vector.load %arg11[%c0_51, %c0_52, %c0_53] : memref<2x1x32xf32, #tpu.memory_space<vmem>>, vector<1x1x32xf32>
    %70 = vector.shape_cast %69 : vector<1x1x32xf32> to vector<1x32xf32>
    %c0_54 = arith.constant 0 : index
    %c0_55 = arith.constant 0 : index
    %c0_56 = arith.constant 0 : index
    %71 = vector.load %arg12[%c0_54, %c0_55, %c0_56] : memref<2x32x32xf32, #tpu.memory_space<vmem>>, vector<1x32x32xf32>
    %72 = vector.shape_cast %71 : vector<1x32x32xf32> to vector<32x32xf32>
    %c0_57 = arith.constant 0 : index
    %c0_58 = arith.constant 0 : index
    %c0_59 = arith.constant 0 : index
    %73 = vector.load %arg13[%c0_57, %c0_58, %c0_59] : memref<2x1x32xf32, #tpu.memory_space<vmem>>, vector<1x1x32xf32>
    %74 = vector.shape_cast %73 : vector<1x1x32xf32> to vector<1x32xf32>
    %c0_60 = arith.constant 0 : index
    %c0_61 = arith.constant 0 : index
    %c0_62 = arith.constant 0 : index
    %75 = vector.load %arg14[%c0_60, %c0_61, %c0_62] : memref<2x32x32xf32, #tpu.memory_space<vmem>>, vector<1x32x32xf32>
    %76 = vector.shape_cast %75 : vector<1x32x32xf32> to vector<32x32xf32>
    %c0_63 = arith.constant 0 : index
    %c0_64 = arith.constant 0 : index
    %c0_65 = arith.constant 0 : index
    %77 = vector.load %arg15[%c0_63, %c0_64, %c0_65] : memref<2x1x32xf32, #tpu.memory_space<vmem>>, vector<1x1x32xf32>
    %78 = vector.shape_cast %77 : vector<1x1x32xf32> to vector<1x32xf32>
    %c0_66 = arith.constant 0 : index
    %c0_67 = arith.constant 0 : index
    %c0_68 = arith.constant 0 : index
    %79 = vector.load %arg18[%c0_66, %c0_67, %c0_68] : memref<2x32x64xf32, #tpu.memory_space<vmem>>, vector<1x32x64xf32>
    %80 = vector.shape_cast %79 : vector<1x32x64xf32> to vector<32x64xf32>
    %c0_69 = arith.constant 0 : index
    %c0_70 = arith.constant 0 : index
    %c0_71 = arith.constant 0 : index
    %81 = vector.load %arg19[%c0_69, %c0_70, %c0_71] : memref<2x1x64xf32, #tpu.memory_space<vmem>>, vector<1x1x64xf32>
    %82 = vector.shape_cast %81 : vector<1x1x64xf32> to vector<1x64xf32>
    %c0_72 = arith.constant 0 : index
    %c0_73 = arith.constant 0 : index
    %c0_74 = arith.constant 0 : index
    %83 = vector.load %arg20[%c0_72, %c0_73, %c0_74] : memref<2x64x32xf32, #tpu.memory_space<vmem>>, vector<1x64x32xf32>
    %84 = vector.shape_cast %83 : vector<1x64x32xf32> to vector<64x32xf32>
    %c0_75 = arith.constant 0 : index
    %c0_76 = arith.constant 0 : index
    %c0_77 = arith.constant 0 : index
    %85 = vector.load %arg21[%c0_75, %c0_76, %c0_77] : memref<2x1x32xf32, #tpu.memory_space<vmem>>, vector<1x1x32xf32>
    %86 = vector.shape_cast %85 : vector<1x1x32xf32> to vector<1x32xf32>
    %c0_78 = arith.constant 0 : index
    %c0_79 = arith.constant 0 : index
    %c0_80 = arith.constant 0 : index
    %87 = vector.load %arg16[%c0_78, %c0_79, %c0_80] : memref<2x1x32xf32, #tpu.memory_space<vmem>>, vector<1x1x32xf32>
    %88 = vector.shape_cast %87 : vector<1x1x32xf32> to vector<1x32xf32>
    %c0_81 = arith.constant 0 : index
    %c0_82 = arith.constant 0 : index
    %c0_83 = arith.constant 0 : index
    %89 = vector.load %arg17[%c0_81, %c0_82, %c0_83] : memref<2x1x32xf32, #tpu.memory_space<vmem>>, vector<1x1x32xf32>
    %90 = vector.shape_cast %89 : vector<1x1x32xf32> to vector<1x32xf32>
    %c0_84 = arith.constant 0 : index
    %c0_85 = arith.constant 0 : index
    %c0_86 = arith.constant 0 : index
    %91 = vector.load %arg22[%c0_84, %c0_85, %c0_86] : memref<2x1x32xf32, #tpu.memory_space<vmem>>, vector<1x1x32xf32>
    %92 = vector.shape_cast %91 : vector<1x1x32xf32> to vector<1x32xf32>
    %c0_87 = arith.constant 0 : index
    %c0_88 = arith.constant 0 : index
    %c0_89 = arith.constant 0 : index
    %93 = vector.load %arg23[%c0_87, %c0_88, %c0_89] : memref<2x1x32xf32, #tpu.memory_space<vmem>>, vector<1x1x32xf32>
    %94 = vector.shape_cast %93 : vector<1x1x32xf32> to vector<1x32xf32>
    %cst_90 = arith.constant dense<0.000000e+00> : vector<9x32xf32>
    %95 = tpu.matmul %40, %64, %cst_90 {dimension_numbers = #tpu.dot_dimension_numbers<[1], [0], [0], [1], [0, 0, 1, 1], [], []>} : vector<9x32xf32>, vector<32x32xf32>, vector<9x32xf32> -> vector<9x32xf32>
    %96 = vector.broadcast %66 : vector<1x32xf32> to vector<9x32xf32>
    %97 = arith.addf %95, %96 : vector<9x32xf32>
    %cst_91 = arith.constant dense<0.000000e+00> : vector<9x32xf32>
    %98 = tpu.matmul %40, %68, %cst_91 {dimension_numbers = #tpu.dot_dimension_numbers<[1], [0], [0], [1], [0, 0, 1, 1], [], []>} : vector<9x32xf32>, vector<32x32xf32>, vector<9x32xf32> -> vector<9x32xf32>
    %99 = vector.broadcast %70 : vector<1x32xf32> to vector<9x32xf32>
    %100 = arith.addf %98, %99 : vector<9x32xf32>
    %cst_92 = arith.constant dense<0.000000e+00> : vector<9x32xf32>
    %101 = tpu.matmul %40, %72, %cst_92 {dimension_numbers = #tpu.dot_dimension_numbers<[1], [0], [0], [1], [0, 0, 1, 1], [], []>} : vector<9x32xf32>, vector<32x32xf32>, vector<9x32xf32> -> vector<9x32xf32>
    %102 = vector.broadcast %74 : vector<1x32xf32> to vector<9x32xf32>
    %103 = arith.addf %101, %102 : vector<9x32xf32>
    %104 = vector.extract_strided_slice %97 {offsets = [0, 0], sizes = [9, 8], strides = [1, 1]} : vector<9x32xf32> to vector<9x8xf32>
    %cst_93 = arith.constant 0.353553385 : f32
    %105 = vector.broadcast %cst_93 : f32 to vector<9x8xf32>
    %106 = arith.mulf %104, %105 : vector<9x8xf32>
    %107 = vector.extract_strided_slice %100 {offsets = [0, 0], sizes = [9, 8], strides = [1, 1]} : vector<9x32xf32> to vector<9x8xf32>
    %108 = vector.extract_strided_slice %103 {offsets = [0, 0], sizes = [9, 8], strides = [1, 1]} : vector<9x32xf32> to vector<9x8xf32>
    %109 = tpu.transpose %107, [1, 0] : vector<9x8xf32> -> vector<8x9xf32>
    %cst_94 = arith.constant dense<0.000000e+00> : vector<9x9xf32>
    %110 = tpu.matmul %106, %109, %cst_94 {dimension_numbers = #tpu.dot_dimension_numbers<[1], [0], [0], [1], [0, 0, 1, 1], [], []>} : vector<9x8xf32>, vector<8x9xf32>, vector<9x9xf32> -> vector<9x9xf32>
    %cst_95 = arith.constant dense<0.000000e+00> : vector<9x5xf32>
    %111 = tpu.matmul %106, %0, %cst_95 {dimension_numbers = #tpu.dot_dimension_numbers<[1], [0], [0], [1], [0, 0, 1, 1], [], []>} : vector<9x8xf32>, vector<8x5xf32>, vector<9x5xf32> -> vector<9x5xf32>
    %112 = vector.extract_strided_slice %111 {offsets = [0, 1], sizes = [9, 1], strides = [1, 1]} : vector<9x5xf32> to vector<9x1xf32>
    %113 = vector.broadcast %112 : vector<9x1xf32> to vector<9x9xf32>
    %114 = arith.mulf %113, %2 : vector<9x9xf32>
    %115 = arith.addf %110, %114 : vector<9x9xf32>
    %116 = vector.extract_strided_slice %111 {offsets = [0, 2], sizes = [9, 1], strides = [1, 1]} : vector<9x5xf32> to vector<9x1xf32>
    %117 = vector.broadcast %116 : vector<9x1xf32> to vector<9x9xf32>
    %118 = arith.mulf %117, %4 : vector<9x9xf32>
    %119 = arith.addf %115, %118 : vector<9x9xf32>
    %120 = vector.extract_strided_slice %111 {offsets = [0, 3], sizes = [9, 1], strides = [1, 1]} : vector<9x5xf32> to vector<9x1xf32>
    %121 = vector.broadcast %120 : vector<9x1xf32> to vector<9x9xf32>
    %122 = arith.mulf %121, %6 : vector<9x9xf32>
    %123 = arith.addf %119, %122 : vector<9x9xf32>
    %124 = vector.extract_strided_slice %111 {offsets = [0, 4], sizes = [9, 1], strides = [1, 1]} : vector<9x5xf32> to vector<9x1xf32>
    %125 = vector.broadcast %124 : vector<9x1xf32> to vector<9x9xf32>
    %126 = arith.mulf %125, %8 : vector<9x9xf32>
    %127 = arith.addf %123, %126 : vector<9x9xf32>
    %128 = arith.addf %127, %14 : vector<9x9xf32>
    %cst_96 = arith.constant dense<0xFF800000> : vector<9xf32>
    %129 = vector.multi_reduction <maximumf>, %128, %cst_96 [1] : vector<9x9xf32> to vector<9xf32>
    %130 = vector.shape_cast %129 : vector<9xf32> to vector<9x1xf32>
    %131 = vector.broadcast %130 : vector<9x1xf32> to vector<9x9xf32>
    %132 = arith.subf %128, %131 : vector<9x9xf32>
    %133 = math.exp %132 : vector<9x9xf32>
    %cst_97 = arith.constant dense<0.000000e+00> : vector<9xf32>
    %134 = vector.multi_reduction <add>, %133, %cst_97 [1] : vector<9x9xf32> to vector<9xf32>
    %135 = vector.shape_cast %134 : vector<9xf32> to vector<9x1xf32>
    %136 = tpu.reciprocal %135 {approx = true} : vector<9x1xf32> -> vector<9x1xf32>
    %137 = vector.broadcast %136 : vector<9x1xf32> to vector<9x9xf32>
    %138 = arith.mulf %133, %137 : vector<9x9xf32>
    %cst_98 = arith.constant dense<0.000000e+00> : vector<9x8xf32>
    %139 = tpu.matmul %138, %108, %cst_98 {dimension_numbers = #tpu.dot_dimension_numbers<[1], [0], [0], [1], [0, 0, 1, 1], [], []>} : vector<9x9xf32>, vector<9x8xf32>, vector<9x8xf32> -> vector<9x8xf32>
    %140 = arith.mulf %138, %2 : vector<9x9xf32>
    %cst_99 = arith.constant dense<0.000000e+00> : vector<9xf32>
    %141 = vector.multi_reduction <add>, %140, %cst_99 [1] : vector<9x9xf32> to vector<9xf32>
    %142 = vector.shape_cast %141 : vector<9xf32> to vector<9x1xf32>
    %143 = vector.broadcast %142 : vector<9x1xf32> to vector<9x8xf32>
    %144 = vector.broadcast %9 : vector<1x8xf32> to vector<9x8xf32>
    %145 = arith.mulf %143, %144 : vector<9x8xf32>
    %146 = arith.addf %139, %145 : vector<9x8xf32>
    %147 = arith.mulf %138, %4 : vector<9x9xf32>
    %cst_100 = arith.constant dense<0.000000e+00> : vector<9xf32>
    %148 = vector.multi_reduction <add>, %147, %cst_100 [1] : vector<9x9xf32> to vector<9xf32>
    %149 = vector.shape_cast %148 : vector<9xf32> to vector<9x1xf32>
    %150 = vector.broadcast %149 : vector<9x1xf32> to vector<9x8xf32>
    %151 = vector.broadcast %10 : vector<1x8xf32> to vector<9x8xf32>
    %152 = arith.mulf %150, %151 : vector<9x8xf32>
    %153 = arith.addf %146, %152 : vector<9x8xf32>
    %154 = arith.mulf %138, %6 : vector<9x9xf32>
    %cst_101 = arith.constant dense<0.000000e+00> : vector<9xf32>
    %155 = vector.multi_reduction <add>, %154, %cst_101 [1] : vector<9x9xf32> to vector<9xf32>
    %156 = vector.shape_cast %155 : vector<9xf32> to vector<9x1xf32>
    %157 = vector.broadcast %156 : vector<9x1xf32> to vector<9x8xf32>
    %158 = vector.broadcast %11 : vector<1x8xf32> to vector<9x8xf32>
    %159 = arith.mulf %157, %158 : vector<9x8xf32>
    %160 = arith.addf %153, %159 : vector<9x8xf32>
    %161 = arith.mulf %138, %8 : vector<9x9xf32>
    %cst_102 = arith.constant dense<0.000000e+00> : vector<9xf32>
    %162 = vector.multi_reduction <add>, %161, %cst_102 [1] : vector<9x9xf32> to vector<9xf32>
    %163 = vector.shape_cast %162 : vector<9xf32> to vector<9x1xf32>
    %164 = vector.broadcast %163 : vector<9x1xf32> to vector<9x8xf32>
    %165 = vector.broadcast %12 : vector<1x8xf32> to vector<9x8xf32>
    %166 = arith.mulf %164, %165 : vector<9x8xf32>
    %167 = arith.addf %160, %166 : vector<9x8xf32>
    %c0_103 = arith.constant 0 : index
    %c0_104 = arith.constant 0 : index
    %168 = vector.load %arg31[%c0_103, %c0_104] : memref<9x32xf32, #tpu.memory_space<vmem>>, vector<9x8xf32>
    tpu.vector_store %arg31[%c0_103, %c0_104], %167 {strides = array<i32>} : memref<9x32xf32, #tpu.memory_space<vmem>>, vector<9x8xf32>,
    %169 = vector.extract_strided_slice %97 {offsets = [0, 8], sizes = [9, 8], strides = [1, 1]} : vector<9x32xf32> to vector<9x8xf32>
    %cst_105 = arith.constant 0.353553385 : f32
    %170 = vector.broadcast %cst_105 : f32 to vector<9x8xf32>
    %171 = arith.mulf %169, %170 : vector<9x8xf32>
    %172 = vector.extract_strided_slice %100 {offsets = [0, 8], sizes = [9, 8], strides = [1, 1]} : vector<9x32xf32> to vector<9x8xf32>
    %173 = vector.extract_strided_slice %103 {offsets = [0, 8], sizes = [9, 8], strides = [1, 1]} : vector<9x32xf32> to vector<9x8xf32>
    %174 = tpu.transpose %172, [1, 0] : vector<9x8xf32> -> vector<8x9xf32>
    %cst_106 = arith.constant dense<0.000000e+00> : vector<9x9xf32>
    %175 = tpu.matmul %171, %174, %cst_106 {dimension_numbers = #tpu.dot_dimension_numbers<[1], [0], [0], [1], [0, 0, 1, 1], [], []>} : vector<9x8xf32>, vector<8x9xf32>, vector<9x9xf32> -> vector<9x9xf32>
    %cst_107 = arith.constant dense<0.000000e+00> : vector<9x5xf32>
    %176 = tpu.matmul %171, %0, %cst_107 {dimension_numbers = #tpu.dot_dimension_numbers<[1], [0], [0], [1], [0, 0, 1, 1], [], []>} : vector<9x8xf32>, vector<8x5xf32>, vector<9x5xf32> -> vector<9x5xf32>
    %177 = vector.extract_strided_slice %176 {offsets = [0, 1], sizes = [9, 1], strides = [1, 1]} : vector<9x5xf32> to vector<9x1xf32>
    %178 = vector.broadcast %177 : vector<9x1xf32> to vector<9x9xf32>
    %179 = arith.mulf %178, %2 : vector<9x9xf32>
    %180 = arith.addf %175, %179 : vector<9x9xf32>
    %181 = vector.extract_strided_slice %176 {offsets = [0, 2], sizes = [9, 1], strides = [1, 1]} : vector<9x5xf32> to vector<9x1xf32>
    %182 = vector.broadcast %181 : vector<9x1xf32> to vector<9x9xf32>
    %183 = arith.mulf %182, %4 : vector<9x9xf32>
    %184 = arith.addf %180, %183 : vector<9x9xf32>
    %185 = vector.extract_strided_slice %176 {offsets = [0, 3], sizes = [9, 1], strides = [1, 1]} : vector<9x5xf32> to vector<9x1xf32>
    %186 = vector.broadcast %185 : vector<9x1xf32> to vector<9x9xf32>
    %187 = arith.mulf %186, %6 : vector<9x9xf32>
    %188 = arith.addf %184, %187 : vector<9x9xf32>
    %189 = vector.extract_strided_slice %176 {offsets = [0, 4], sizes = [9, 1], strides = [1, 1]} : vector<9x5xf32> to vector<9x1xf32>
    %190 = vector.broadcast %189 : vector<9x1xf32> to vector<9x9xf32>
    %191 = arith.mulf %190, %8 : vector<9x9xf32>
    %192 = arith.addf %188, %191 : vector<9x9xf32>
    %193 = arith.addf %192, %14 : vector<9x9xf32>
    %cst_108 = arith.constant dense<0xFF800000> : vector<9xf32>
    %194 = vector.multi_reduction <maximumf>, %193, %cst_108 [1] : vector<9x9xf32> to vector<9xf32>
    %195 = vector.shape_cast %194 : vector<9xf32> to vector<9x1xf32>
    %196 = vector.broadcast %195 : vector<9x1xf32> to vector<9x9xf32>
    %197 = arith.subf %193, %196 : vector<9x9xf32>
    %198 = math.exp %197 : vector<9x9xf32>
    %cst_109 = arith.constant dense<0.000000e+00> : vector<9xf32>
    %199 = vector.multi_reduction <add>, %198, %cst_109 [1] : vector<9x9xf32> to vector<9xf32>
    %200 = vector.shape_cast %199 : vector<9xf32> to vector<9x1xf32>
    %201 = tpu.reciprocal %200 {approx = true} : vector<9x1xf32> -> vector<9x1xf32>
    %202 = vector.broadcast %201 : vector<9x1xf32> to vector<9x9xf32>
    %203 = arith.mulf %198, %202 : vector<9x9xf32>
    %cst_110 = arith.constant dense<0.000000e+00> : vector<9x8xf32>
    %204 = tpu.matmul %203, %173, %cst_110 {dimension_numbers = #tpu.dot_dimension_numbers<[1], [0], [0], [1], [0, 0, 1, 1], [], []>} : vector<9x9xf32>, vector<9x8xf32>, vector<9x8xf32> -> vector<9x8xf32>
    %205 = arith.mulf %203, %2 : vector<9x9xf32>
    %cst_111 = arith.constant dense<0.000000e+00> : vector<9xf32>
    %206 = vector.multi_reduction <add>, %205, %cst_111 [1] : vector<9x9xf32> to vector<9xf32>
    %207 = vector.shape_cast %206 : vector<9xf32> to vector<9x1xf32>
    %208 = vector.broadcast %207 : vector<9x1xf32> to vector<9x8xf32>
    %209 = vector.broadcast %9 : vector<1x8xf32> to vector<9x8xf32>
    %210 = arith.mulf %208, %209 : vector<9x8xf32>
    %211 = arith.addf %204, %210 : vector<9x8xf32>
    %212 = arith.mulf %203, %4 : vector<9x9xf32>
    %cst_112 = arith.constant dense<0.000000e+00> : vector<9xf32>
    %213 = vector.multi_reduction <add>, %212, %cst_112 [1] : vector<9x9xf32> to vector<9xf32>
    %214 = vector.shape_cast %213 : vector<9xf32> to vector<9x1xf32>
    %215 = vector.broadcast %214 : vector<9x1xf32> to vector<9x8xf32>
    %216 = vector.broadcast %10 : vector<1x8xf32> to vector<9x8xf32>
    %217 = arith.mulf %215, %216 : vector<9x8xf32>
    %218 = arith.addf %211, %217 : vector<9x8xf32>
    %219 = arith.mulf %203, %6 : vector<9x9xf32>
    %cst_113 = arith.constant dense<0.000000e+00> : vector<9xf32>
    %220 = vector.multi_reduction <add>, %219, %cst_113 [1] : vector<9x9xf32> to vector<9xf32>
    %221 = vector.shape_cast %220 : vector<9xf32> to vector<9x1xf32>
    %222 = vector.broadcast %221 : vector<9x1xf32> to vector<9x8xf32>
    %223 = vector.broadcast %11 : vector<1x8xf32> to vector<9x8xf32>
    %224 = arith.mulf %222, %223 : vector<9x8xf32>
    %225 = arith.addf %218, %224 : vector<9x8xf32>
    %226 = arith.mulf %203, %8 : vector<9x9xf32>
    %cst_114 = arith.constant dense<0.000000e+00> : vector<9xf32>
    %227 = vector.multi_reduction <add>, %226, %cst_114 [1] : vector<9x9xf32> to vector<9xf32>
    %228 = vector.shape_cast %227 : vector<9xf32> to vector<9x1xf32>
    %229 = vector.broadcast %228 : vector<9x1xf32> to vector<9x8xf32>
    %230 = vector.broadcast %12 : vector<1x8xf32> to vector<9x8xf32>
    %231 = arith.mulf %229, %230 : vector<9x8xf32>
    %232 = arith.addf %225, %231 : vector<9x8xf32>
    %c0_115 = arith.constant 0 : index
    %c8 = arith.constant 8 : index
    %233 = vector.load %arg31[%c0_115, %c8] : memref<9x32xf32, #tpu.memory_space<vmem>>, vector<9x8xf32>
    tpu.vector_store %arg31[%c0_115, %c8], %232 {strides = array<i32>} : memref<9x32xf32, #tpu.memory_space<vmem>>, vector<9x8xf32>,
    %234 = vector.extract_strided_slice %97 {offsets = [0, 16], sizes = [9, 8], strides = [1, 1]} : vector<9x32xf32> to vector<9x8xf32>
    %cst_116 = arith.constant 0.353553385 : f32
    %235 = vector.broadcast %cst_116 : f32 to vector<9x8xf32>
    %236 = arith.mulf %234, %235 : vector<9x8xf32>
    %237 = vector.extract_strided_slice %100 {offsets = [0, 16], sizes = [9, 8], strides = [1, 1]} : vector<9x32xf32> to vector<9x8xf32>
    %238 = vector.extract_strided_slice %103 {offsets = [0, 16], sizes = [9, 8], strides = [1, 1]} : vector<9x32xf32> to vector<9x8xf32>
    %239 = tpu.transpose %237, [1, 0] : vector<9x8xf32> -> vector<8x9xf32>
    %cst_117 = arith.constant dense<0.000000e+00> : vector<9x9xf32>
    %240 = tpu.matmul %236, %239, %cst_117 {dimension_numbers = #tpu.dot_dimension_numbers<[1], [0], [0], [1], [0, 0, 1, 1], [], []>} : vector<9x8xf32>, vector<8x9xf32>, vector<9x9xf32> -> vector<9x9xf32>
    %cst_118 = arith.constant dense<0.000000e+00> : vector<9x5xf32>
    %241 = tpu.matmul %236, %0, %cst_118 {dimension_numbers = #tpu.dot_dimension_numbers<[1], [0], [0], [1], [0, 0, 1, 1], [], []>} : vector<9x8xf32>, vector<8x5xf32>, vector<9x5xf32> -> vector<9x5xf32>
    %242 = vector.extract_strided_slice %241 {offsets = [0, 1], sizes = [9, 1], strides = [1, 1]} : vector<9x5xf32> to vector<9x1xf32>
    %243 = vector.broadcast %242 : vector<9x1xf32> to vector<9x9xf32>
    %244 = arith.mulf %243, %2 : vector<9x9xf32>
    %245 = arith.addf %240, %244 : vector<9x9xf32>
    %246 = vector.extract_strided_slice %241 {offsets = [0, 2], sizes = [9, 1], strides = [1, 1]} : vector<9x5xf32> to vector<9x1xf32>
    %247 = vector.broadcast %246 : vector<9x1xf32> to vector<9x9xf32>
    %248 = arith.mulf %247, %4 : vector<9x9xf32>
    %249 = arith.addf %245, %248 : vector<9x9xf32>
    %250 = vector.extract_strided_slice %241 {offsets = [0, 3], sizes = [9, 1], strides = [1, 1]} : vector<9x5xf32> to vector<9x1xf32>
    %251 = vector.broadcast %250 : vector<9x1xf32> to vector<9x9xf32>
    %252 = arith.mulf %251, %6 : vector<9x9xf32>
    %253 = arith.addf %249, %252 : vector<9x9xf32>
    %254 = vector.extract_strided_slice %241 {offsets = [0, 4], sizes = [9, 1], strides = [1, 1]} : vector<9x5xf32> to vector<9x1xf32>
    %255 = vector.broadcast %254 : vector<9x1xf32> to vector<9x9xf32>
    %256 = arith.mulf %255, %8 : vector<9x9xf32>
    %257 = arith.addf %253, %256 : vector<9x9xf32>
    %258 = arith.addf %257, %14 : vector<9x9xf32>
    %cst_119 = arith.constant dense<0xFF800000> : vector<9xf32>
    %259 = vector.multi_reduction <maximumf>, %258, %cst_119 [1] : vector<9x9xf32> to vector<9xf32>
    %260 = vector.shape_cast %259 : vector<9xf32> to vector<9x1xf32>
    %261 = vector.broadcast %260 : vector<9x1xf32> to vector<9x9xf32>
    %262 = arith.subf %258, %261 : vector<9x9xf32>
    %263 = math.exp %262 : vector<9x9xf32>
    %cst_120 = arith.constant dense<0.000000e+00> : vector<9xf32>
    %264 = vector.multi_reduction <add>, %263, %cst_120 [1] : vector<9x9xf32> to vector<9xf32>
    %265 = vector.shape_cast %264 : vector<9xf32> to vector<9x1xf32>
    %266 = tpu.reciprocal %265 {approx = true} : vector<9x1xf32> -> vector<9x1xf32>
    %267 = vector.broadcast %266 : vector<9x1xf32> to vector<9x9xf32>
    %268 = arith.mulf %263, %267 : vector<9x9xf32>
    %cst_121 = arith.constant dense<0.000000e+00> : vector<9x8xf32>
    %269 = tpu.matmul %268, %238, %cst_121 {dimension_numbers = #tpu.dot_dimension_numbers<[1], [0], [0], [1], [0, 0, 1, 1], [], []>} : vector<9x9xf32>, vector<9x8xf32>, vector<9x8xf32> -> vector<9x8xf32>
    %270 = arith.mulf %268, %2 : vector<9x9xf32>
    %cst_122 = arith.constant dense<0.000000e+00> : vector<9xf32>
    %271 = vector.multi_reduction <add>, %270, %cst_122 [1] : vector<9x9xf32> to vector<9xf32>
    %272 = vector.shape_cast %271 : vector<9xf32> to vector<9x1xf32>
    %273 = vector.broadcast %272 : vector<9x1xf32> to vector<9x8xf32>
    %274 = vector.broadcast %9 : vector<1x8xf32> to vector<9x8xf32>
    %275 = arith.mulf %273, %274 : vector<9x8xf32>
    %276 = arith.addf %269, %275 : vector<9x8xf32>
    %277 = arith.mulf %268, %4 : vector<9x9xf32>
    %cst_123 = arith.constant dense<0.000000e+00> : vector<9xf32>
    %278 = vector.multi_reduction <add>, %277, %cst_123 [1] : vector<9x9xf32> to vector<9xf32>
    %279 = vector.shape_cast %278 : vector<9xf32> to vector<9x1xf32>
    %280 = vector.broadcast %279 : vector<9x1xf32> to vector<9x8xf32>
    %281 = vector.broadcast %10 : vector<1x8xf32> to vector<9x8xf32>
    %282 = arith.mulf %280, %281 : vector<9x8xf32>
    %283 = arith.addf %276, %282 : vector<9x8xf32>
    %284 = arith.mulf %268, %6 : vector<9x9xf32>
    %cst_124 = arith.constant dense<0.000000e+00> : vector<9xf32>
    %285 = vector.multi_reduction <add>, %284, %cst_124 [1] : vector<9x9xf32> to vector<9xf32>
    %286 = vector.shape_cast %285 : vector<9xf32> to vector<9x1xf32>
    %287 = vector.broadcast %286 : vector<9x1xf32> to vector<9x8xf32>
    %288 = vector.broadcast %11 : vector<1x8xf32> to vector<9x8xf32>
    %289 = arith.mulf %287, %288 : vector<9x8xf32>
    %290 = arith.addf %283, %289 : vector<9x8xf32>
    %291 = arith.mulf %268, %8 : vector<9x9xf32>
    %cst_125 = arith.constant dense<0.000000e+00> : vector<9xf32>
    %292 = vector.multi_reduction <add>, %291, %cst_125 [1] : vector<9x9xf32> to vector<9xf32>
    %293 = vector.shape_cast %292 : vector<9xf32> to vector<9x1xf32>
    %294 = vector.broadcast %293 : vector<9x1xf32> to vector<9x8xf32>
    %295 = vector.broadcast %12 : vector<1x8xf32> to vector<9x8xf32>
    %296 = arith.mulf %294, %295 : vector<9x8xf32>
    %297 = arith.addf %290, %296 : vector<9x8xf32>
    %c0_126 = arith.constant 0 : index
    %c16 = arith.constant 16 : index
    %298 = vector.load %arg31[%c0_126, %c16] : memref<9x32xf32, #tpu.memory_space<vmem>>, vector<9x8xf32>
    tpu.vector_store %arg31[%c0_126, %c16], %297 {strides = array<i32>} : memref<9x32xf32, #tpu.memory_space<vmem>>, vector<9x8xf32>,
    %299 = vector.extract_strided_slice %97 {offsets = [0, 24], sizes = [9, 8], strides = [1, 1]} : vector<9x32xf32> to vector<9x8xf32>
    %cst_127 = arith.constant 0.353553385 : f32
    %300 = vector.broadcast %cst_127 : f32 to vector<9x8xf32>
    %301 = arith.mulf %299, %300 : vector<9x8xf32>
    %302 = vector.extract_strided_slice %100 {offsets = [0, 24], sizes = [9, 8], strides = [1, 1]} : vector<9x32xf32> to vector<9x8xf32>
    %303 = vector.extract_strided_slice %103 {offsets = [0, 24], sizes = [9, 8], strides = [1, 1]} : vector<9x32xf32> to vector<9x8xf32>
    %304 = tpu.transpose %302, [1, 0] : vector<9x8xf32> -> vector<8x9xf32>
    %cst_128 = arith.constant dense<0.000000e+00> : vector<9x9xf32>
    %305 = tpu.matmul %301, %304, %cst_128 {dimension_numbers = #tpu.dot_dimension_numbers<[1], [0], [0], [1], [0, 0, 1, 1], [], []>} : vector<9x8xf32>, vector<8x9xf32>, vector<9x9xf32> -> vector<9x9xf32>
    %cst_129 = arith.constant dense<0.000000e+00> : vector<9x5xf32>
    %306 = tpu.matmul %301, %0, %cst_129 {dimension_numbers = #tpu.dot_dimension_numbers<[1], [0], [0], [1], [0, 0, 1, 1], [], []>} : vector<9x8xf32>, vector<8x5xf32>, vector<9x5xf32> -> vector<9x5xf32>
    %307 = vector.extract_strided_slice %306 {offsets = [0, 1], sizes = [9, 1], strides = [1, 1]} : vector<9x5xf32> to vector<9x1xf32>
    %308 = vector.broadcast %307 : vector<9x1xf32> to vector<9x9xf32>
    %309 = arith.mulf %308, %2 : vector<9x9xf32>
    %310 = arith.addf %305, %309 : vector<9x9xf32>
    %311 = vector.extract_strided_slice %306 {offsets = [0, 2], sizes = [9, 1], strides = [1, 1]} : vector<9x5xf32> to vector<9x1xf32>
    %312 = vector.broadcast %311 : vector<9x1xf32> to vector<9x9xf32>
    %313 = arith.mulf %312, %4 : vector<9x9xf32>
    %314 = arith.addf %310, %313 : vector<9x9xf32>
    %315 = vector.extract_strided_slice %306 {offsets = [0, 3], sizes = [9, 1], strides = [1, 1]} : vector<9x5xf32> to vector<9x1xf32>
    %316 = vector.broadcast %315 : vector<9x1xf32> to vector<9x9xf32>
    %317 = arith.mulf %316, %6 : vector<9x9xf32>
    %318 = arith.addf %314, %317 : vector<9x9xf32>
    %319 = vector.extract_strided_slice %306 {offsets = [0, 4], sizes = [9, 1], strides = [1, 1]} : vector<9x5xf32> to vector<9x1xf32>
    %320 = vector.broadcast %319 : vector<9x1xf32> to vector<9x9xf32>
    %321 = arith.mulf %320, %8 : vector<9x9xf32>
    %322 = arith.addf %318, %321 : vector<9x9xf32>
    %323 = arith.addf %322, %14 : vector<9x9xf32>
    %cst_130 = arith.constant dense<0xFF800000> : vector<9xf32>
    %324 = vector.multi_reduction <maximumf>, %323, %cst_130 [1] : vector<9x9xf32> to vector<9xf32>
    %325 = vector.shape_cast %324 : vector<9xf32> to vector<9x1xf32>
    %326 = vector.broadcast %325 : vector<9x1xf32> to vector<9x9xf32>
    %327 = arith.subf %323, %326 : vector<9x9xf32>
    %328 = math.exp %327 : vector<9x9xf32>
    %cst_131 = arith.constant dense<0.000000e+00> : vector<9xf32>
    %329 = vector.multi_reduction <add>, %328, %cst_131 [1] : vector<9x9xf32> to vector<9xf32>
    %330 = vector.shape_cast %329 : vector<9xf32> to vector<9x1xf32>
    %331 = tpu.reciprocal %330 {approx = true} : vector<9x1xf32> -> vector<9x1xf32>
    %332 = vector.broadcast %331 : vector<9x1xf32> to vector<9x9xf32>
    %333 = arith.mulf %328, %332 : vector<9x9xf32>
    %cst_132 = arith.constant dense<0.000000e+00> : vector<9x8xf32>
    %334 = tpu.matmul %333, %303, %cst_132 {dimension_numbers = #tpu.dot_dimension_numbers<[1], [0], [0], [1], [0, 0, 1, 1], [], []>} : vector<9x9xf32>, vector<9x8xf32>, vector<9x8xf32> -> vector<9x8xf32>
    %335 = arith.mulf %333, %2 : vector<9x9xf32>
    %cst_133 = arith.constant dense<0.000000e+00> : vector<9xf32>
    %336 = vector.multi_reduction <add>, %335, %cst_133 [1] : vector<9x9xf32> to vector<9xf32>
    %337 = vector.shape_cast %336 : vector<9xf32> to vector<9x1xf32>
    %338 = vector.broadcast %337 : vector<9x1xf32> to vector<9x8xf32>
    %339 = vector.broadcast %9 : vector<1x8xf32> to vector<9x8xf32>
    %340 = arith.mulf %338, %339 : vector<9x8xf32>
    %341 = arith.addf %334, %340 : vector<9x8xf32>
    %342 = arith.mulf %333, %4 : vector<9x9xf32>
    %cst_134 = arith.constant dense<0.000000e+00> : vector<9xf32>
    %343 = vector.multi_reduction <add>, %342, %cst_134 [1] : vector<9x9xf32> to vector<9xf32>
    %344 = vector.shape_cast %343 : vector<9xf32> to vector<9x1xf32>
    %345 = vector.broadcast %344 : vector<9x1xf32> to vector<9x8xf32>
    %346 = vector.broadcast %10 : vector<1x8xf32> to vector<9x8xf32>
    %347 = arith.mulf %345, %346 : vector<9x8xf32>
    %348 = arith.addf %341, %347 : vector<9x8xf32>
    %349 = arith.mulf %333, %6 : vector<9x9xf32>
    %cst_135 = arith.constant dense<0.000000e+00> : vector<9xf32>
    %350 = vector.multi_reduction <add>, %349, %cst_135 [1] : vector<9x9xf32> to vector<9xf32>
    %351 = vector.shape_cast %350 : vector<9xf32> to vector<9x1xf32>
    %352 = vector.broadcast %351 : vector<9x1xf32> to vector<9x8xf32>
    %353 = vector.broadcast %11 : vector<1x8xf32> to vector<9x8xf32>
    %354 = arith.mulf %352, %353 : vector<9x8xf32>
    %355 = arith.addf %348, %354 : vector<9x8xf32>
    %356 = arith.mulf %333, %8 : vector<9x9xf32>
    %cst_136 = arith.constant dense<0.000000e+00> : vector<9xf32>
    %357 = vector.multi_reduction <add>, %356, %cst_136 [1] : vector<9x9xf32> to vector<9xf32>
    %358 = vector.shape_cast %357 : vector<9xf32> to vector<9x1xf32>
    %359 = vector.broadcast %358 : vector<9x1xf32> to vector<9x8xf32>
    %360 = vector.broadcast %12 : vector<1x8xf32> to vector<9x8xf32>
    %361 = arith.mulf %359, %360 : vector<9x8xf32>
    %362 = arith.addf %355, %361 : vector<9x8xf32>
    %c0_137 = arith.constant 0 : index
    %c24 = arith.constant 24 : index
    %363 = vector.load %arg31[%c0_137, %c24] : memref<9x32xf32, #tpu.memory_space<vmem>>, vector<9x8xf32>
    tpu.vector_store %arg31[%c0_137, %c24], %362 {strides = array<i32>} : memref<9x32xf32, #tpu.memory_space<vmem>>, vector<9x8xf32>,
    %c0_138 = arith.constant 0 : index
    %c0_139 = arith.constant 0 : index
    %364 = vector.load %arg31[%c0_138, %c0_139] : memref<9x32xf32, #tpu.memory_space<vmem>>, vector<9x32xf32>
    %cst_140 = arith.constant dense<0.000000e+00> : vector<9x32xf32>
    %365 = tpu.matmul %364, %76, %cst_140 {dimension_numbers = #tpu.dot_dimension_numbers<[1], [0], [0], [1], [0, 0, 1, 1], [], []>} : vector<9x32xf32>, vector<32x32xf32>, vector<9x32xf32> -> vector<9x32xf32>
    %366 = vector.broadcast %78 : vector<1x32xf32> to vector<9x32xf32>
    %367 = arith.addf %365, %366 : vector<9x32xf32>
    %368 = arith.addf %367, %40 : vector<9x32xf32>
    %cst_141 = arith.constant dense<0.000000e+00> : vector<32xf32>
    %369 = vector.multi_reduction <add>, %368, %cst_141 [0] : vector<9x32xf32> to vector<32xf32>
    %370 = vector.shape_cast %369 : vector<32xf32> to vector<1x32xf32>
    %cst_142 = arith.constant 9.000000e+00 : f32
    %371 = vector.broadcast %cst_142 : f32 to vector<1x32xf32>
    %372 = arith.divf %370, %371 : vector<1x32xf32>
    %373 = vector.broadcast %372 : vector<1x32xf32> to vector<9x32xf32>
    %374 = arith.subf %368, %373 : vector<9x32xf32>
    %375 = arith.mulf %374, %374 : vector<9x32xf32>
    %cst_143 = arith.constant dense<0.000000e+00> : vector<32xf32>
    %376 = vector.multi_reduction <add>, %375, %cst_143 [0] : vector<9x32xf32> to vector<32xf32>
    %377 = vector.shape_cast %376 : vector<32xf32> to vector<1x32xf32>
    %cst_144 = arith.constant 9.000000e+00 : f32
    %378 = vector.broadcast %cst_144 : f32 to vector<1x32xf32>
    %379 = arith.divf %377, %378 : vector<1x32xf32>
    %cst_145 = arith.constant 9.99999996E-13 : f32
    %380 = vector.broadcast %cst_145 : f32 to vector<1x32xf32>
    %381 = arith.addf %379, %380 : vector<1x32xf32>
    %382 = math.rsqrt %381 : vector<1x32xf32>
    %383 = vector.broadcast %382 : vector<1x32xf32> to vector<9x32xf32>
    %384 = arith.mulf %374, %383 : vector<9x32xf32>
    %385 = vector.broadcast %88 : vector<1x32xf32> to vector<9x32xf32>
    %386 = arith.mulf %384, %385 : vector<9x32xf32>
    %387 = vector.broadcast %90 : vector<1x32xf32> to vector<9x32xf32>
    %388 = arith.addf %386, %387 : vector<9x32xf32>
    %cst_146 = arith.constant dense<0.000000e+00> : vector<9x64xf32>
    %389 = tpu.matmul %388, %80, %cst_146 {dimension_numbers = #tpu.dot_dimension_numbers<[1], [0], [0], [1], [0, 0, 1, 1], [], []>} : vector<9x32xf32>, vector<32x64xf32>, vector<9x64xf32> -> vector<9x64xf32>
    %390 = vector.broadcast %82 : vector<1x64xf32> to vector<9x64xf32>
    %391 = arith.addf %389, %390 : vector<9x64xf32>
    %cst_147 = arith.constant 5.000000e-01 : f32
    %392 = vector.broadcast %cst_147 : f32 to vector<9x64xf32>
    %393 = arith.mulf %392, %391 : vector<9x64xf32>
    %cst_148 = arith.constant 0.707106769 : f32
    %394 = vector.broadcast %cst_148 : f32 to vector<9x64xf32>
    %395 = arith.mulf %391, %394 : vector<9x64xf32>
    %396 = math.absf %395 : vector<9x64xf32>
    %cst_149 = arith.constant 0.327591091 : f32
    %397 = vector.broadcast %cst_149 : f32 to vector<9x64xf32>
    %398 = arith.mulf %397, %396 : vector<9x64xf32>
    %cst_150 = arith.constant 1.000000e+00 : f32
    %399 = vector.broadcast %cst_150 : f32 to vector<9x64xf32>
    %400 = arith.addf %399, %398 : vector<9x64xf32>
    %cst_151 = arith.constant 1.000000e+00 : f32
    %401 = vector.broadcast %cst_151 : f32 to vector<9x64xf32>
    %402 = arith.divf %401, %400 : vector<9x64xf32>
    %cst_152 = arith.constant 1.06140542 : f32
    %403 = vector.broadcast %cst_152 : f32 to vector<9x64xf32>
    %404 = arith.mulf %403, %402 : vector<9x64xf32>
    %cst_153 = arith.constant -1.45315206 : f32
    %405 = vector.broadcast %cst_153 : f32 to vector<9x64xf32>
    %406 = arith.addf %404, %405 : vector<9x64xf32>
    %407 = arith.mulf %406, %402 : vector<9x64xf32>
    %cst_154 = arith.constant 1.42141378 : f32
    %408 = vector.broadcast %cst_154 : f32 to vector<9x64xf32>
    %409 = arith.addf %407, %408 : vector<9x64xf32>
    %410 = arith.mulf %409, %402 : vector<9x64xf32>
    %cst_155 = arith.constant -0.284496725 : f32
    %411 = vector.broadcast %cst_155 : f32 to vector<9x64xf32>
    %412 = arith.addf %410, %411 : vector<9x64xf32>
    %413 = arith.mulf %412, %402 : vector<9x64xf32>
    %cst_156 = arith.constant 0.254829586 : f32
    %414 = vector.broadcast %cst_156 : f32 to vector<9x64xf32>
    %415 = arith.addf %413, %414 : vector<9x64xf32>
    %416 = arith.mulf %415, %402 : vector<9x64xf32>
    %cst_157 = arith.constant 0.000000e+00 : f32
    %417 = vector.broadcast %cst_157 : f32 to vector<9x64xf32>
    %418 = arith.subf %417, %396 : vector<9x64xf32>
    %419 = arith.mulf %418, %396 : vector<9x64xf32>
    %420 = math.exp %419 : vector<9x64xf32>
    %421 = arith.mulf %416, %420 : vector<9x64xf32>
    %cst_158 = arith.constant 1.000000e+00 : f32
    %422 = vector.broadcast %cst_158 : f32 to vector<9x64xf32>
    %423 = arith.subf %422, %421 : vector<9x64xf32>
    %cst_159 = arith.constant 0.000000e+00 : f32
    %424 = vector.broadcast %cst_159 : f32 to vector<9x64xf32>
    %425 = arith.cmpf oge, %395, %424 : vector<9x64xf32>
    %cst_160 = arith.constant 0.000000e+00 : f32
    %426 = vector.broadcast %cst_160 : f32 to vector<9x64xf32>
    %427 = arith.subf %426, %423 : vector<9x64xf32>
    %428 = arith.select %425, %423, %427 : vector<9x64xi1>, vector<9x64xf32>
    %cst_161 = arith.constant 1.000000e+00 : f32
    %429 = vector.broadcast %cst_161 : f32 to vector<9x64xf32>
    %430 = arith.addf %429, %428 : vector<9x64xf32>
    %431 = arith.mulf %393, %430 : vector<9x64xf32>
    %cst_162 = arith.constant dense<0.000000e+00> : vector<9x32xf32>
    %432 = tpu.matmul %431, %84, %cst_162 {dimension_numbers = #tpu.dot_dimension_numbers<[1], [0], [0], [1], [0, 0, 1, 1], [], []>} : vector<9x64xf32>, vector<64x32xf32>, vector<9x32xf32> -> vector<9x32xf32>
    %433 = vector.broadcast %86 : vector<1x32xf32> to vector<9x32xf32>
    %434 = arith.addf %432, %433 : vector<9x32xf32>
    %435 = arith.addf %434, %388 : vector<9x32xf32>
    %cst_163 = arith.constant dense<0.000000e+00> : vector<32xf32>
    %436 = vector.multi_reduction <add>, %435, %cst_163 [0] : vector<9x32xf32> to vector<32xf32>
    %437 = vector.shape_cast %436 : vector<32xf32> to vector<1x32xf32>
    %cst_164 = arith.constant 9.000000e+00 : f32
    %438 = vector.broadcast %cst_164 : f32 to vector<1x32xf32>
    %439 = arith.divf %437, %438 : vector<1x32xf32>
    %440 = vector.broadcast %439 : vector<1x32xf32> to vector<9x32xf32>
    %441 = arith.subf %435, %440 : vector<9x32xf32>
    %442 = arith.mulf %441, %441 : vector<9x32xf32>
    %cst_165 = arith.constant dense<0.000000e+00> : vector<32xf32>
    %443 = vector.multi_reduction <add>, %442, %cst_165 [0] : vector<9x32xf32> to vector<32xf32>
    %444 = vector.shape_cast %443 : vector<32xf32> to vector<1x32xf32>
    %cst_166 = arith.constant 9.000000e+00 : f32
    %445 = vector.broadcast %cst_166 : f32 to vector<1x32xf32>
    %446 = arith.divf %444, %445 : vector<1x32xf32>
    %cst_167 = arith.constant 9.99999996E-13 : f32
    %447 = vector.broadcast %cst_167 : f32 to vector<1x32xf32>
    %448 = arith.addf %446, %447 : vector<1x32xf32>
    %449 = math.rsqrt %448 : vector<1x32xf32>
    %450 = vector.broadcast %449 : vector<1x32xf32> to vector<9x32xf32>
    %451 = arith.mulf %441, %450 : vector<9x32xf32>
    %452 = vector.broadcast %92 : vector<1x32xf32> to vector<9x32xf32>
    %453 = arith.mulf %451, %452 : vector<9x32xf32>
    %454 = vector.broadcast %94 : vector<1x32xf32> to vector<9x32xf32>
    %455 = arith.addf %453, %454 : vector<9x32xf32>
    %cst_168 = arith.constant dense<0.000000e+00> : vector<9x32xf32>
    %456 = tpu.matmul %62, %64, %cst_168 {dimension_numbers = #tpu.dot_dimension_numbers<[1], [0], [0], [1], [0, 0, 1, 1], [], []>} : vector<9x32xf32>, vector<32x32xf32>, vector<9x32xf32> -> vector<9x32xf32>
    %457 = vector.broadcast %66 : vector<1x32xf32> to vector<9x32xf32>
    %458 = arith.addf %456, %457 : vector<9x32xf32>
    %cst_169 = arith.constant dense<0.000000e+00> : vector<9x32xf32>
    %459 = tpu.matmul %62, %68, %cst_169 {dimension_numbers = #tpu.dot_dimension_numbers<[1], [0], [0], [1], [0, 0, 1, 1], [], []>} : vector<9x32xf32>, vector<32x32xf32>, vector<9x32xf32> -> vector<9x32xf32>
    %460 = vector.broadcast %70 : vector<1x32xf32> to vector<9x32xf32>
    %461 = arith.addf %459, %460 : vector<9x32xf32>
    %cst_170 = arith.constant dense<0.000000e+00> : vector<9x32xf32>
    %462 = tpu.matmul %62, %72, %cst_170 {dimension_numbers = #tpu.dot_dimension_numbers<[1], [0], [0], [1], [0, 0, 1, 1], [], []>} : vector<9x32xf32>, vector<32x32xf32>, vector<9x32xf32> -> vector<9x32xf32>
    %463 = vector.broadcast %74 : vector<1x32xf32> to vector<9x32xf32>
    %464 = arith.addf %462, %463 : vector<9x32xf32>
    %465 = vector.extract_strided_slice %458 {offsets = [0, 0], sizes = [9, 8], strides = [1, 1]} : vector<9x32xf32> to vector<9x8xf32>
    %cst_171 = arith.constant 0.353553385 : f32
    %466 = vector.broadcast %cst_171 : f32 to vector<9x8xf32>
    %467 = arith.mulf %465, %466 : vector<9x8xf32>
    %468 = vector.extract_strided_slice %461 {offsets = [0, 0], sizes = [9, 8], strides = [1, 1]} : vector<9x32xf32> to vector<9x8xf32>
    %469 = vector.extract_strided_slice %464 {offsets = [0, 0], sizes = [9, 8], strides = [1, 1]} : vector<9x32xf32> to vector<9x8xf32>
    %470 = tpu.transpose %468, [1, 0] : vector<9x8xf32> -> vector<8x9xf32>
    %cst_172 = arith.constant dense<0.000000e+00> : vector<9x9xf32>
    %471 = tpu.matmul %467, %470, %cst_172 {dimension_numbers = #tpu.dot_dimension_numbers<[1], [0], [0], [1], [0, 0, 1, 1], [], []>} : vector<9x8xf32>, vector<8x9xf32>, vector<9x9xf32> -> vector<9x9xf32>
    %cst_173 = arith.constant dense<0.000000e+00> : vector<9x5xf32>
    %472 = tpu.matmul %467, %0, %cst_173 {dimension_numbers = #tpu.dot_dimension_numbers<[1], [0], [0], [1], [0, 0, 1, 1], [], []>} : vector<9x8xf32>, vector<8x5xf32>, vector<9x5xf32> -> vector<9x5xf32>
    %473 = vector.extract_strided_slice %472 {offsets = [0, 1], sizes = [9, 1], strides = [1, 1]} : vector<9x5xf32> to vector<9x1xf32>
    %474 = vector.broadcast %473 : vector<9x1xf32> to vector<9x9xf32>
    %475 = arith.mulf %474, %2 : vector<9x9xf32>
    %476 = arith.addf %471, %475 : vector<9x9xf32>
    %477 = vector.extract_strided_slice %472 {offsets = [0, 2], sizes = [9, 1], strides = [1, 1]} : vector<9x5xf32> to vector<9x1xf32>
    %478 = vector.broadcast %477 : vector<9x1xf32> to vector<9x9xf32>
    %479 = arith.mulf %478, %4 : vector<9x9xf32>
    %480 = arith.addf %476, %479 : vector<9x9xf32>
    %481 = vector.extract_strided_slice %472 {offsets = [0, 3], sizes = [9, 1], strides = [1, 1]} : vector<9x5xf32> to vector<9x1xf32>
    %482 = vector.broadcast %481 : vector<9x1xf32> to vector<9x9xf32>
    %483 = arith.mulf %482, %6 : vector<9x9xf32>
    %484 = arith.addf %480, %483 : vector<9x9xf32>
    %485 = vector.extract_strided_slice %472 {offsets = [0, 4], sizes = [9, 1], strides = [1, 1]} : vector<9x5xf32> to vector<9x1xf32>
    %486 = vector.broadcast %485 : vector<9x1xf32> to vector<9x9xf32>
    %487 = arith.mulf %486, %8 : vector<9x9xf32>
    %488 = arith.addf %484, %487 : vector<9x9xf32>
    %489 = arith.addf %488, %16 : vector<9x9xf32>
    %cst_174 = arith.constant dense<0xFF800000> : vector<9xf32>
    %490 = vector.multi_reduction <maximumf>, %489, %cst_174 [1] : vector<9x9xf32> to vector<9xf32>
    %491 = vector.shape_cast %490 : vector<9xf32> to vector<9x1xf32>
    %492 = vector.broadcast %491 : vector<9x1xf32> to vector<9x9xf32>
    %493 = arith.subf %489, %492 : vector<9x9xf32>
    %494 = math.exp %493 : vector<9x9xf32>
    %cst_175 = arith.constant dense<0.000000e+00> : vector<9xf32>
    %495 = vector.multi_reduction <add>, %494, %cst_175 [1] : vector<9x9xf32> to vector<9xf32>
    %496 = vector.shape_cast %495 : vector<9xf32> to vector<9x1xf32>
    %497 = tpu.reciprocal %496 {approx = true} : vector<9x1xf32> -> vector<9x1xf32>
    %498 = vector.broadcast %497 : vector<9x1xf32> to vector<9x9xf32>
    %499 = arith.mulf %494, %498 : vector<9x9xf32>
    %cst_176 = arith.constant dense<0.000000e+00> : vector<9x8xf32>
    %500 = tpu.matmul %499, %469, %cst_176 {dimension_numbers = #tpu.dot_dimension_numbers<[1], [0], [0], [1], [0, 0, 1, 1], [], []>} : vector<9x9xf32>, vector<9x8xf32>, vector<9x8xf32> -> vector<9x8xf32>
    %501 = arith.mulf %499, %2 : vector<9x9xf32>
    %cst_177 = arith.constant dense<0.000000e+00> : vector<9xf32>
    %502 = vector.multi_reduction <add>, %501, %cst_177 [1] : vector<9x9xf32> to vector<9xf32>
    %503 = vector.shape_cast %502 : vector<9xf32> to vector<9x1xf32>
    %504 = vector.broadcast %503 : vector<9x1xf32> to vector<9x8xf32>
    %505 = vector.broadcast %9 : vector<1x8xf32> to vector<9x8xf32>
    %506 = arith.mulf %504, %505 : vector<9x8xf32>
    %507 = arith.addf %500, %506 : vector<9x8xf32>
    %508 = arith.mulf %499, %4 : vector<9x9xf32>
    %cst_178 = arith.constant dense<0.000000e+00> : vector<9xf32>
    %509 = vector.multi_reduction <add>, %508, %cst_178 [1] : vector<9x9xf32> to vector<9xf32>
    %510 = vector.shape_cast %509 : vector<9xf32> to vector<9x1xf32>
    %511 = vector.broadcast %510 : vector<9x1xf32> to vector<9x8xf32>
    %512 = vector.broadcast %10 : vector<1x8xf32> to vector<9x8xf32>
    %513 = arith.mulf %511, %512 : vector<9x8xf32>
    %514 = arith.addf %507, %513 : vector<9x8xf32>
    %515 = arith.mulf %499, %6 : vector<9x9xf32>
    %cst_179 = arith.constant dense<0.000000e+00> : vector<9xf32>
    %516 = vector.multi_reduction <add>, %515, %cst_179 [1] : vector<9x9xf32> to vector<9xf32>
    %517 = vector.shape_cast %516 : vector<9xf32> to vector<9x1xf32>
    %518 = vector.broadcast %517 : vector<9x1xf32> to vector<9x8xf32>
    %519 = vector.broadcast %11 : vector<1x8xf32> to vector<9x8xf32>
    %520 = arith.mulf %518, %519 : vector<9x8xf32>
    %521 = arith.addf %514, %520 : vector<9x8xf32>
    %522 = arith.mulf %499, %8 : vector<9x9xf32>
    %cst_180 = arith.constant dense<0.000000e+00> : vector<9xf32>
    %523 = vector.multi_reduction <add>, %522, %cst_180 [1] : vector<9x9xf32> to vector<9xf32>
    %524 = vector.shape_cast %523 : vector<9xf32> to vector<9x1xf32>
    %525 = vector.broadcast %524 : vector<9x1xf32> to vector<9x8xf32>
    %526 = vector.broadcast %12 : vector<1x8xf32> to vector<9x8xf32>
    %527 = arith.mulf %525, %526 : vector<9x8xf32>
    %528 = arith.addf %521, %527 : vector<9x8xf32>
    %c0_181 = arith.constant 0 : index
    %c0_182 = arith.constant 0 : index
    %529 = vector.load %arg31[%c0_181, %c0_182] : memref<9x32xf32, #tpu.memory_space<vmem>>, vector<9x8xf32>
    tpu.vector_store %arg31[%c0_181, %c0_182], %528 {strides = array<i32>} : memref<9x32xf32, #tpu.memory_space<vmem>>, vector<9x8xf32>,
    %530 = vector.extract_strided_slice %458 {offsets = [0, 8], sizes = [9, 8], strides = [1, 1]} : vector<9x32xf32> to vector<9x8xf32>
    %cst_183 = arith.constant 0.353553385 : f32
    %531 = vector.broadcast %cst_183 : f32 to vector<9x8xf32>
    %532 = arith.mulf %530, %531 : vector<9x8xf32>
    %533 = vector.extract_strided_slice %461 {offsets = [0, 8], sizes = [9, 8], strides = [1, 1]} : vector<9x32xf32> to vector<9x8xf32>
    %534 = vector.extract_strided_slice %464 {offsets = [0, 8], sizes = [9, 8], strides = [1, 1]} : vector<9x32xf32> to vector<9x8xf32>
    %535 = tpu.transpose %533, [1, 0] : vector<9x8xf32> -> vector<8x9xf32>
    %cst_184 = arith.constant dense<0.000000e+00> : vector<9x9xf32>
    %536 = tpu.matmul %532, %535, %cst_184 {dimension_numbers = #tpu.dot_dimension_numbers<[1], [0], [0], [1], [0, 0, 1, 1], [], []>} : vector<9x8xf32>, vector<8x9xf32>, vector<9x9xf32> -> vector<9x9xf32>
    %cst_185 = arith.constant dense<0.000000e+00> : vector<9x5xf32>
    %537 = tpu.matmul %532, %0, %cst_185 {dimension_numbers = #tpu.dot_dimension_numbers<[1], [0], [0], [1], [0, 0, 1, 1], [], []>} : vector<9x8xf32>, vector<8x5xf32>, vector<9x5xf32> -> vector<9x5xf32>
    %538 = vector.extract_strided_slice %537 {offsets = [0, 1], sizes = [9, 1], strides = [1, 1]} : vector<9x5xf32> to vector<9x1xf32>
    %539 = vector.broadcast %538 : vector<9x1xf32> to vector<9x9xf32>
    %540 = arith.mulf %539, %2 : vector<9x9xf32>
    %541 = arith.addf %536, %540 : vector<9x9xf32>
    %542 = vector.extract_strided_slice %537 {offsets = [0, 2], sizes = [9, 1], strides = [1, 1]} : vector<9x5xf32> to vector<9x1xf32>
    %543 = vector.broadcast %542 : vector<9x1xf32> to vector<9x9xf32>
    %544 = arith.mulf %543, %4 : vector<9x9xf32>
    %545 = arith.addf %541, %544 : vector<9x9xf32>
    %546 = vector.extract_strided_slice %537 {offsets = [0, 3], sizes = [9, 1], strides = [1, 1]} : vector<9x5xf32> to vector<9x1xf32>
    %547 = vector.broadcast %546 : vector<9x1xf32> to vector<9x9xf32>
    %548 = arith.mulf %547, %6 : vector<9x9xf32>
    %549 = arith.addf %545, %548 : vector<9x9xf32>
    %550 = vector.extract_strided_slice %537 {offsets = [0, 4], sizes = [9, 1], strides = [1, 1]} : vector<9x5xf32> to vector<9x1xf32>
    %551 = vector.broadcast %550 : vector<9x1xf32> to vector<9x9xf32>
    %552 = arith.mulf %551, %8 : vector<9x9xf32>
    %553 = arith.addf %549, %552 : vector<9x9xf32>
    %554 = arith.addf %553, %16 : vector<9x9xf32>
    %cst_186 = arith.constant dense<0xFF800000> : vector<9xf32>
    %555 = vector.multi_reduction <maximumf>, %554, %cst_186 [1] : vector<9x9xf32> to vector<9xf32>
    %556 = vector.shape_cast %555 : vector<9xf32> to vector<9x1xf32>
    %557 = vector.broadcast %556 : vector<9x1xf32> to vector<9x9xf32>
    %558 = arith.subf %554, %557 : vector<9x9xf32>
    %559 = math.exp %558 : vector<9x9xf32>
    %cst_187 = arith.constant dense<0.000000e+00> : vector<9xf32>
    %560 = vector.multi_reduction <add>, %559, %cst_187 [1] : vector<9x9xf32> to vector<9xf32>
    %561 = vector.shape_cast %560 : vector<9xf32> to vector<9x1xf32>
    %562 = tpu.reciprocal %561 {approx = true} : vector<9x1xf32> -> vector<9x1xf32>
    %563 = vector.broadcast %562 : vector<9x1xf32> to vector<9x9xf32>
    %564 = arith.mulf %559, %563 : vector<9x9xf32>
    %cst_188 = arith.constant dense<0.000000e+00> : vector<9x8xf32>
    %565 = tpu.matmul %564, %534, %cst_188 {dimension_numbers = #tpu.dot_dimension_numbers<[1], [0], [0], [1], [0, 0, 1, 1], [], []>} : vector<9x9xf32>, vector<9x8xf32>, vector<9x8xf32> -> vector<9x8xf32>
    %566 = arith.mulf %564, %2 : vector<9x9xf32>
    %cst_189 = arith.constant dense<0.000000e+00> : vector<9xf32>
    %567 = vector.multi_reduction <add>, %566, %cst_189 [1] : vector<9x9xf32> to vector<9xf32>
    %568 = vector.shape_cast %567 : vector<9xf32> to vector<9x1xf32>
    %569 = vector.broadcast %568 : vector<9x1xf32> to vector<9x8xf32>
    %570 = vector.broadcast %9 : vector<1x8xf32> to vector<9x8xf32>
    %571 = arith.mulf %569, %570 : vector<9x8xf32>
    %572 = arith.addf %565, %571 : vector<9x8xf32>
    %573 = arith.mulf %564, %4 : vector<9x9xf32>
    %cst_190 = arith.constant dense<0.000000e+00> : vector<9xf32>
    %574 = vector.multi_reduction <add>, %573, %cst_190 [1] : vector<9x9xf32> to vector<9xf32>
    %575 = vector.shape_cast %574 : vector<9xf32> to vector<9x1xf32>
    %576 = vector.broadcast %575 : vector<9x1xf32> to vector<9x8xf32>
    %577 = vector.broadcast %10 : vector<1x8xf32> to vector<9x8xf32>
    %578 = arith.mulf %576, %577 : vector<9x8xf32>
    %579 = arith.addf %572, %578 : vector<9x8xf32>
    %580 = arith.mulf %564, %6 : vector<9x9xf32>
    %cst_191 = arith.constant dense<0.000000e+00> : vector<9xf32>
    %581 = vector.multi_reduction <add>, %580, %cst_191 [1] : vector<9x9xf32> to vector<9xf32>
    %582 = vector.shape_cast %581 : vector<9xf32> to vector<9x1xf32>
    %583 = vector.broadcast %582 : vector<9x1xf32> to vector<9x8xf32>
    %584 = vector.broadcast %11 : vector<1x8xf32> to vector<9x8xf32>
    %585 = arith.mulf %583, %584 : vector<9x8xf32>
    %586 = arith.addf %579, %585 : vector<9x8xf32>
    %587 = arith.mulf %564, %8 : vector<9x9xf32>
    %cst_192 = arith.constant dense<0.000000e+00> : vector<9xf32>
    %588 = vector.multi_reduction <add>, %587, %cst_192 [1] : vector<9x9xf32> to vector<9xf32>
    %589 = vector.shape_cast %588 : vector<9xf32> to vector<9x1xf32>
    %590 = vector.broadcast %589 : vector<9x1xf32> to vector<9x8xf32>
    %591 = vector.broadcast %12 : vector<1x8xf32> to vector<9x8xf32>
    %592 = arith.mulf %590, %591 : vector<9x8xf32>
    %593 = arith.addf %586, %592 : vector<9x8xf32>
    %c0_193 = arith.constant 0 : index
    %c8_194 = arith.constant 8 : index
    %594 = vector.load %arg31[%c0_193, %c8_194] : memref<9x32xf32, #tpu.memory_space<vmem>>, vector<9x8xf32>
    tpu.vector_store %arg31[%c0_193, %c8_194], %593 {strides = array<i32>} : memref<9x32xf32, #tpu.memory_space<vmem>>, vector<9x8xf32>,
    %595 = vector.extract_strided_slice %458 {offsets = [0, 16], sizes = [9, 8], strides = [1, 1]} : vector<9x32xf32> to vector<9x8xf32>
    %cst_195 = arith.constant 0.353553385 : f32
    %596 = vector.broadcast %cst_195 : f32 to vector<9x8xf32>
    %597 = arith.mulf %595, %596 : vector<9x8xf32>
    %598 = vector.extract_strided_slice %461 {offsets = [0, 16], sizes = [9, 8], strides = [1, 1]} : vector<9x32xf32> to vector<9x8xf32>
    %599 = vector.extract_strided_slice %464 {offsets = [0, 16], sizes = [9, 8], strides = [1, 1]} : vector<9x32xf32> to vector<9x8xf32>
    %600 = tpu.transpose %598, [1, 0] : vector<9x8xf32> -> vector<8x9xf32>
    %cst_196 = arith.constant dense<0.000000e+00> : vector<9x9xf32>
    %601 = tpu.matmul %597, %600, %cst_196 {dimension_numbers = #tpu.dot_dimension_numbers<[1], [0], [0], [1], [0, 0, 1, 1], [], []>} : vector<9x8xf32>, vector<8x9xf32>, vector<9x9xf32> -> vector<9x9xf32>
    %cst_197 = arith.constant dense<0.000000e+00> : vector<9x5xf32>
    %602 = tpu.matmul %597, %0, %cst_197 {dimension_numbers = #tpu.dot_dimension_numbers<[1], [0], [0], [1], [0, 0, 1, 1], [], []>} : vector<9x8xf32>, vector<8x5xf32>, vector<9x5xf32> -> vector<9x5xf32>
    %603 = vector.extract_strided_slice %602 {offsets = [0, 1], sizes = [9, 1], strides = [1, 1]} : vector<9x5xf32> to vector<9x1xf32>
    %604 = vector.broadcast %603 : vector<9x1xf32> to vector<9x9xf32>
    %605 = arith.mulf %604, %2 : vector<9x9xf32>
    %606 = arith.addf %601, %605 : vector<9x9xf32>
    %607 = vector.extract_strided_slice %602 {offsets = [0, 2], sizes = [9, 1], strides = [1, 1]} : vector<9x5xf32> to vector<9x1xf32>
    %608 = vector.broadcast %607 : vector<9x1xf32> to vector<9x9xf32>
    %609 = arith.mulf %608, %4 : vector<9x9xf32>
    %610 = arith.addf %606, %609 : vector<9x9xf32>
    %611 = vector.extract_strided_slice %602 {offsets = [0, 3], sizes = [9, 1], strides = [1, 1]} : vector<9x5xf32> to vector<9x1xf32>
    %612 = vector.broadcast %611 : vector<9x1xf32> to vector<9x9xf32>
    %613 = arith.mulf %612, %6 : vector<9x9xf32>
    %614 = arith.addf %610, %613 : vector<9x9xf32>
    %615 = vector.extract_strided_slice %602 {offsets = [0, 4], sizes = [9, 1], strides = [1, 1]} : vector<9x5xf32> to vector<9x1xf32>
    %616 = vector.broadcast %615 : vector<9x1xf32> to vector<9x9xf32>
    %617 = arith.mulf %616, %8 : vector<9x9xf32>
    %618 = arith.addf %614, %617 : vector<9x9xf32>
    %619 = arith.addf %618, %16 : vector<9x9xf32>
    %cst_198 = arith.constant dense<0xFF800000> : vector<9xf32>
    %620 = vector.multi_reduction <maximumf>, %619, %cst_198 [1] : vector<9x9xf32> to vector<9xf32>
    %621 = vector.shape_cast %620 : vector<9xf32> to vector<9x1xf32>
    %622 = vector.broadcast %621 : vector<9x1xf32> to vector<9x9xf32>
    %623 = arith.subf %619, %622 : vector<9x9xf32>
    %624 = math.exp %623 : vector<9x9xf32>
    %cst_199 = arith.constant dense<0.000000e+00> : vector<9xf32>
    %625 = vector.multi_reduction <add>, %624, %cst_199 [1] : vector<9x9xf32> to vector<9xf32>
    %626 = vector.shape_cast %625 : vector<9xf32> to vector<9x1xf32>
    %627 = tpu.reciprocal %626 {approx = true} : vector<9x1xf32> -> vector<9x1xf32>
    %628 = vector.broadcast %627 : vector<9x1xf32> to vector<9x9xf32>
    %629 = arith.mulf %624, %628 : vector<9x9xf32>
    %cst_200 = arith.constant dense<0.000000e+00> : vector<9x8xf32>
    %630 = tpu.matmul %629, %599, %cst_200 {dimension_numbers = #tpu.dot_dimension_numbers<[1], [0], [0], [1], [0, 0, 1, 1], [], []>} : vector<9x9xf32>, vector<9x8xf32>, vector<9x8xf32> -> vector<9x8xf32>
    %631 = arith.mulf %629, %2 : vector<9x9xf32>
    %cst_201 = arith.constant dense<0.000000e+00> : vector<9xf32>
    %632 = vector.multi_reduction <add>, %631, %cst_201 [1] : vector<9x9xf32> to vector<9xf32>
    %633 = vector.shape_cast %632 : vector<9xf32> to vector<9x1xf32>
    %634 = vector.broadcast %633 : vector<9x1xf32> to vector<9x8xf32>
    %635 = vector.broadcast %9 : vector<1x8xf32> to vector<9x8xf32>
    %636 = arith.mulf %634, %635 : vector<9x8xf32>
    %637 = arith.addf %630, %636 : vector<9x8xf32>
    %638 = arith.mulf %629, %4 : vector<9x9xf32>
    %cst_202 = arith.constant dense<0.000000e+00> : vector<9xf32>
    %639 = vector.multi_reduction <add>, %638, %cst_202 [1] : vector<9x9xf32> to vector<9xf32>
    %640 = vector.shape_cast %639 : vector<9xf32> to vector<9x1xf32>
    %641 = vector.broadcast %640 : vector<9x1xf32> to vector<9x8xf32>
    %642 = vector.broadcast %10 : vector<1x8xf32> to vector<9x8xf32>
    %643 = arith.mulf %641, %642 : vector<9x8xf32>
    %644 = arith.addf %637, %643 : vector<9x8xf32>
    %645 = arith.mulf %629, %6 : vector<9x9xf32>
    %cst_203 = arith.constant dense<0.000000e+00> : vector<9xf32>
    %646 = vector.multi_reduction <add>, %645, %cst_203 [1] : vector<9x9xf32> to vector<9xf32>
    %647 = vector.shape_cast %646 : vector<9xf32> to vector<9x1xf32>
    %648 = vector.broadcast %647 : vector<9x1xf32> to vector<9x8xf32>
    %649 = vector.broadcast %11 : vector<1x8xf32> to vector<9x8xf32>
    %650 = arith.mulf %648, %649 : vector<9x8xf32>
    %651 = arith.addf %644, %650 : vector<9x8xf32>
    %652 = arith.mulf %629, %8 : vector<9x9xf32>
    %cst_204 = arith.constant dense<0.000000e+00> : vector<9xf32>
    %653 = vector.multi_reduction <add>, %652, %cst_204 [1] : vector<9x9xf32> to vector<9xf32>
    %654 = vector.shape_cast %653 : vector<9xf32> to vector<9x1xf32>
    %655 = vector.broadcast %654 : vector<9x1xf32> to vector<9x8xf32>
    %656 = vector.broadcast %12 : vector<1x8xf32> to vector<9x8xf32>
    %657 = arith.mulf %655, %656 : vector<9x8xf32>
    %658 = arith.addf %651, %657 : vector<9x8xf32>
    %c0_205 = arith.constant 0 : index
    %c16_206 = arith.constant 16 : index
    %659 = vector.load %arg31[%c0_205, %c16_206] : memref<9x32xf32, #tpu.memory_space<vmem>>, vector<9x8xf32>
    tpu.vector_store %arg31[%c0_205, %c16_206], %658 {strides = array<i32>} : memref<9x32xf32, #tpu.memory_space<vmem>>, vector<9x8xf32>,
    %660 = vector.extract_strided_slice %458 {offsets = [0, 24], sizes = [9, 8], strides = [1, 1]} : vector<9x32xf32> to vector<9x8xf32>
    %cst_207 = arith.constant 0.353553385 : f32
    %661 = vector.broadcast %cst_207 : f32 to vector<9x8xf32>
    %662 = arith.mulf %660, %661 : vector<9x8xf32>
    %663 = vector.extract_strided_slice %461 {offsets = [0, 24], sizes = [9, 8], strides = [1, 1]} : vector<9x32xf32> to vector<9x8xf32>
    %664 = vector.extract_strided_slice %464 {offsets = [0, 24], sizes = [9, 8], strides = [1, 1]} : vector<9x32xf32> to vector<9x8xf32>
    %665 = tpu.transpose %663, [1, 0] : vector<9x8xf32> -> vector<8x9xf32>
    %cst_208 = arith.constant dense<0.000000e+00> : vector<9x9xf32>
    %666 = tpu.matmul %662, %665, %cst_208 {dimension_numbers = #tpu.dot_dimension_numbers<[1], [0], [0], [1], [0, 0, 1, 1], [], []>} : vector<9x8xf32>, vector<8x9xf32>, vector<9x9xf32> -> vector<9x9xf32>
    %cst_209 = arith.constant dense<0.000000e+00> : vector<9x5xf32>
    %667 = tpu.matmul %662, %0, %cst_209 {dimension_numbers = #tpu.dot_dimension_numbers<[1], [0], [0], [1], [0, 0, 1, 1], [], []>} : vector<9x8xf32>, vector<8x5xf32>, vector<9x5xf32> -> vector<9x5xf32>
    %668 = vector.extract_strided_slice %667 {offsets = [0, 1], sizes = [9, 1], strides = [1, 1]} : vector<9x5xf32> to vector<9x1xf32>
    %669 = vector.broadcast %668 : vector<9x1xf32> to vector<9x9xf32>
    %670 = arith.mulf %669, %2 : vector<9x9xf32>
    %671 = arith.addf %666, %670 : vector<9x9xf32>
    %672 = vector.extract_strided_slice %667 {offsets = [0, 2], sizes = [9, 1], strides = [1, 1]} : vector<9x5xf32> to vector<9x1xf32>
    %673 = vector.broadcast %672 : vector<9x1xf32> to vector<9x9xf32>
    %674 = arith.mulf %673, %4 : vector<9x9xf32>
    %675 = arith.addf %671, %674 : vector<9x9xf32>
    %676 = vector.extract_strided_slice %667 {offsets = [0, 3], sizes = [9, 1], strides = [1, 1]} : vector<9x5xf32> to vector<9x1xf32>
    %677 = vector.broadcast %676 : vector<9x1xf32> to vector<9x9xf32>
    %678 = arith.mulf %677, %6 : vector<9x9xf32>
    %679 = arith.addf %675, %678 : vector<9x9xf32>
    %680 = vector.extract_strided_slice %667 {offsets = [0, 4], sizes = [9, 1], strides = [1, 1]} : vector<9x5xf32> to vector<9x1xf32>
    %681 = vector.broadcast %680 : vector<9x1xf32> to vector<9x9xf32>
    %682 = arith.mulf %681, %8 : vector<9x9xf32>
    %683 = arith.addf %679, %682 : vector<9x9xf32>
    %684 = arith.addf %683, %16 : vector<9x9xf32>
    %cst_210 = arith.constant dense<0xFF800000> : vector<9xf32>
    %685 = vector.multi_reduction <maximumf>, %684, %cst_210 [1] : vector<9x9xf32> to vector<9xf32>
    %686 = vector.shape_cast %685 : vector<9xf32> to vector<9x1xf32>
    %687 = vector.broadcast %686 : vector<9x1xf32> to vector<9x9xf32>
    %688 = arith.subf %684, %687 : vector<9x9xf32>
    %689 = math.exp %688 : vector<9x9xf32>
    %cst_211 = arith.constant dense<0.000000e+00> : vector<9xf32>
    %690 = vector.multi_reduction <add>, %689, %cst_211 [1] : vector<9x9xf32> to vector<9xf32>
    %691 = vector.shape_cast %690 : vector<9xf32> to vector<9x1xf32>
    %692 = tpu.reciprocal %691 {approx = true} : vector<9x1xf32> -> vector<9x1xf32>
    %693 = vector.broadcast %692 : vector<9x1xf32> to vector<9x9xf32>
    %694 = arith.mulf %689, %693 : vector<9x9xf32>
    %cst_212 = arith.constant dense<0.000000e+00> : vector<9x8xf32>
    %695 = tpu.matmul %694, %664, %cst_212 {dimension_numbers = #tpu.dot_dimension_numbers<[1], [0], [0], [1], [0, 0, 1, 1], [], []>} : vector<9x9xf32>, vector<9x8xf32>, vector<9x8xf32> -> vector<9x8xf32>
    %696 = arith.mulf %694, %2 : vector<9x9xf32>
    %cst_213 = arith.constant dense<0.000000e+00> : vector<9xf32>
    %697 = vector.multi_reduction <add>, %696, %cst_213 [1] : vector<9x9xf32> to vector<9xf32>
    %698 = vector.shape_cast %697 : vector<9xf32> to vector<9x1xf32>
    %699 = vector.broadcast %698 : vector<9x1xf32> to vector<9x8xf32>
    %700 = vector.broadcast %9 : vector<1x8xf32> to vector<9x8xf32>
    %701 = arith.mulf %699, %700 : vector<9x8xf32>
    %702 = arith.addf %695, %701 : vector<9x8xf32>
    %703 = arith.mulf %694, %4 : vector<9x9xf32>
    %cst_214 = arith.constant dense<0.000000e+00> : vector<9xf32>
    %704 = vector.multi_reduction <add>, %703, %cst_214 [1] : vector<9x9xf32> to vector<9xf32>
    %705 = vector.shape_cast %704 : vector<9xf32> to vector<9x1xf32>
    %706 = vector.broadcast %705 : vector<9x1xf32> to vector<9x8xf32>
    %707 = vector.broadcast %10 : vector<1x8xf32> to vector<9x8xf32>
    %708 = arith.mulf %706, %707 : vector<9x8xf32>
    %709 = arith.addf %702, %708 : vector<9x8xf32>
    %710 = arith.mulf %694, %6 : vector<9x9xf32>
    %cst_215 = arith.constant dense<0.000000e+00> : vector<9xf32>
    %711 = vector.multi_reduction <add>, %710, %cst_215 [1] : vector<9x9xf32> to vector<9xf32>
    %712 = vector.shape_cast %711 : vector<9xf32> to vector<9x1xf32>
    %713 = vector.broadcast %712 : vector<9x1xf32> to vector<9x8xf32>
    %714 = vector.broadcast %11 : vector<1x8xf32> to vector<9x8xf32>
    %715 = arith.mulf %713, %714 : vector<9x8xf32>
    %716 = arith.addf %709, %715 : vector<9x8xf32>
    %717 = arith.mulf %694, %8 : vector<9x9xf32>
    %cst_216 = arith.constant dense<0.000000e+00> : vector<9xf32>
    %718 = vector.multi_reduction <add>, %717, %cst_216 [1] : vector<9x9xf32> to vector<9xf32>
    %719 = vector.shape_cast %718 : vector<9xf32> to vector<9x1xf32>
    %720 = vector.broadcast %719 : vector<9x1xf32> to vector<9x8xf32>
    %721 = vector.broadcast %12 : vector<1x8xf32> to vector<9x8xf32>
    %722 = arith.mulf %720, %721 : vector<9x8xf32>
    %723 = arith.addf %716, %722 : vector<9x8xf32>
    %c0_217 = arith.constant 0 : index
    %c24_218 = arith.constant 24 : index
    %724 = vector.load %arg31[%c0_217, %c24_218] : memref<9x32xf32, #tpu.memory_space<vmem>>, vector<9x8xf32>
    tpu.vector_store %arg31[%c0_217, %c24_218], %723 {strides = array<i32>} : memref<9x32xf32, #tpu.memory_space<vmem>>, vector<9x8xf32>,
    %c0_219 = arith.constant 0 : index
    %c0_220 = arith.constant 0 : index
    %725 = vector.load %arg31[%c0_219, %c0_220] : memref<9x32xf32, #tpu.memory_space<vmem>>, vector<9x32xf32>
    %cst_221 = arith.constant dense<0.000000e+00> : vector<9x32xf32>
    %726 = tpu.matmul %725, %76, %cst_221 {dimension_numbers = #tpu.dot_dimension_numbers<[1], [0], [0], [1], [0, 0, 1, 1], [], []>} : vector<9x32xf32>, vector<32x32xf32>, vector<9x32xf32> -> vector<9x32xf32>
    %727 = vector.broadcast %78 : vector<1x32xf32> to vector<9x32xf32>
    %728 = arith.addf %726, %727 : vector<9x32xf32>
    %729 = arith.addf %728, %62 : vector<9x32xf32>
    %cst_222 = arith.constant dense<0.000000e+00> : vector<32xf32>
    %730 = vector.multi_reduction <add>, %729, %cst_222 [0] : vector<9x32xf32> to vector<32xf32>
    %731 = vector.shape_cast %730 : vector<32xf32> to vector<1x32xf32>
    %cst_223 = arith.constant 9.000000e+00 : f32
    %732 = vector.broadcast %cst_223 : f32 to vector<1x32xf32>
    %733 = arith.divf %731, %732 : vector<1x32xf32>
    %734 = vector.broadcast %733 : vector<1x32xf32> to vector<9x32xf32>
    %735 = arith.subf %729, %734 : vector<9x32xf32>
    %736 = arith.mulf %735, %735 : vector<9x32xf32>
    %cst_224 = arith.constant dense<0.000000e+00> : vector<32xf32>
    %737 = vector.multi_reduction <add>, %736, %cst_224 [0] : vector<9x32xf32> to vector<32xf32>
    %738 = vector.shape_cast %737 : vector<32xf32> to vector<1x32xf32>
    %cst_225 = arith.constant 9.000000e+00 : f32
    %739 = vector.broadcast %cst_225 : f32 to vector<1x32xf32>
    %740 = arith.divf %738, %739 : vector<1x32xf32>
    %cst_226 = arith.constant 9.99999996E-13 : f32
    %741 = vector.broadcast %cst_226 : f32 to vector<1x32xf32>
    %742 = arith.addf %740, %741 : vector<1x32xf32>
    %743 = math.rsqrt %742 : vector<1x32xf32>
    %744 = vector.broadcast %743 : vector<1x32xf32> to vector<9x32xf32>
    %745 = arith.mulf %735, %744 : vector<9x32xf32>
    %746 = vector.broadcast %88 : vector<1x32xf32> to vector<9x32xf32>
    %747 = arith.mulf %745, %746 : vector<9x32xf32>
    %748 = vector.broadcast %90 : vector<1x32xf32> to vector<9x32xf32>
    %749 = arith.addf %747, %748 : vector<9x32xf32>
    %cst_227 = arith.constant dense<0.000000e+00> : vector<9x64xf32>
    %750 = tpu.matmul %749, %80, %cst_227 {dimension_numbers = #tpu.dot_dimension_numbers<[1], [0], [0], [1], [0, 0, 1, 1], [], []>} : vector<9x32xf32>, vector<32x64xf32>, vector<9x64xf32> -> vector<9x64xf32>
    %751 = vector.broadcast %82 : vector<1x64xf32> to vector<9x64xf32>
    %752 = arith.addf %750, %751 : vector<9x64xf32>
    %cst_228 = arith.constant 5.000000e-01 : f32
    %753 = vector.broadcast %cst_228 : f32 to vector<9x64xf32>
    %754 = arith.mulf %753, %752 : vector<9x64xf32>
    %cst_229 = arith.constant 0.707106769 : f32
    %755 = vector.broadcast %cst_229 : f32 to vector<9x64xf32>
    %756 = arith.mulf %752, %755 : vector<9x64xf32>
    %757 = math.absf %756 : vector<9x64xf32>
    %cst_230 = arith.constant 0.327591091 : f32
    %758 = vector.broadcast %cst_230 : f32 to vector<9x64xf32>
    %759 = arith.mulf %758, %757 : vector<9x64xf32>
    %cst_231 = arith.constant 1.000000e+00 : f32
    %760 = vector.broadcast %cst_231 : f32 to vector<9x64xf32>
    %761 = arith.addf %760, %759 : vector<9x64xf32>
    %cst_232 = arith.constant 1.000000e+00 : f32
    %762 = vector.broadcast %cst_232 : f32 to vector<9x64xf32>
    %763 = arith.divf %762, %761 : vector<9x64xf32>
    %cst_233 = arith.constant 1.06140542 : f32
    %764 = vector.broadcast %cst_233 : f32 to vector<9x64xf32>
    %765 = arith.mulf %764, %763 : vector<9x64xf32>
    %cst_234 = arith.constant -1.45315206 : f32
    %766 = vector.broadcast %cst_234 : f32 to vector<9x64xf32>
    %767 = arith.addf %765, %766 : vector<9x64xf32>
    %768 = arith.mulf %767, %763 : vector<9x64xf32>
    %cst_235 = arith.constant 1.42141378 : f32
    %769 = vector.broadcast %cst_235 : f32 to vector<9x64xf32>
    %770 = arith.addf %768, %769 : vector<9x64xf32>
    %771 = arith.mulf %770, %763 : vector<9x64xf32>
    %cst_236 = arith.constant -0.284496725 : f32
    %772 = vector.broadcast %cst_236 : f32 to vector<9x64xf32>
    %773 = arith.addf %771, %772 : vector<9x64xf32>
    %774 = arith.mulf %773, %763 : vector<9x64xf32>
    %cst_237 = arith.constant 0.254829586 : f32
    %775 = vector.broadcast %cst_237 : f32 to vector<9x64xf32>
    %776 = arith.addf %774, %775 : vector<9x64xf32>
    %777 = arith.mulf %776, %763 : vector<9x64xf32>
    %cst_238 = arith.constant 0.000000e+00 : f32
    %778 = vector.broadcast %cst_238 : f32 to vector<9x64xf32>
    %779 = arith.subf %778, %757 : vector<9x64xf32>
    %780 = arith.mulf %779, %757 : vector<9x64xf32>
    %781 = math.exp %780 : vector<9x64xf32>
    %782 = arith.mulf %777, %781 : vector<9x64xf32>
    %cst_239 = arith.constant 1.000000e+00 : f32
    %783 = vector.broadcast %cst_239 : f32 to vector<9x64xf32>
    %784 = arith.subf %783, %782 : vector<9x64xf32>
    %cst_240 = arith.constant 0.000000e+00 : f32
    %785 = vector.broadcast %cst_240 : f32 to vector<9x64xf32>
    %786 = arith.cmpf oge, %756, %785 : vector<9x64xf32>
    %cst_241 = arith.constant 0.000000e+00 : f32
    %787 = vector.broadcast %cst_241 : f32 to vector<9x64xf32>
    %788 = arith.subf %787, %784 : vector<9x64xf32>
    %789 = arith.select %786, %784, %788 : vector<9x64xi1>, vector<9x64xf32>
    %cst_242 = arith.constant 1.000000e+00 : f32
    %790 = vector.broadcast %cst_242 : f32 to vector<9x64xf32>
    %791 = arith.addf %790, %789 : vector<9x64xf32>
    %792 = arith.mulf %754, %791 : vector<9x64xf32>
    %cst_243 = arith.constant dense<0.000000e+00> : vector<9x32xf32>
    %793 = tpu.matmul %792, %84, %cst_243 {dimension_numbers = #tpu.dot_dimension_numbers<[1], [0], [0], [1], [0, 0, 1, 1], [], []>} : vector<9x64xf32>, vector<64x32xf32>, vector<9x32xf32> -> vector<9x32xf32>
    %794 = vector.broadcast %86 : vector<1x32xf32> to vector<9x32xf32>
    %795 = arith.addf %793, %794 : vector<9x32xf32>
    %796 = arith.addf %795, %749 : vector<9x32xf32>
    %cst_244 = arith.constant dense<0.000000e+00> : vector<32xf32>
    %797 = vector.multi_reduction <add>, %796, %cst_244 [0] : vector<9x32xf32> to vector<32xf32>
    %798 = vector.shape_cast %797 : vector<32xf32> to vector<1x32xf32>
    %cst_245 = arith.constant 9.000000e+00 : f32
    %799 = vector.broadcast %cst_245 : f32 to vector<1x32xf32>
    %800 = arith.divf %798, %799 : vector<1x32xf32>
    %801 = vector.broadcast %800 : vector<1x32xf32> to vector<9x32xf32>
    %802 = arith.subf %796, %801 : vector<9x32xf32>
    %803 = arith.mulf %802, %802 : vector<9x32xf32>
    %cst_246 = arith.constant dense<0.000000e+00> : vector<32xf32>
    %804 = vector.multi_reduction <add>, %803, %cst_246 [0] : vector<9x32xf32> to vector<32xf32>
    %805 = vector.shape_cast %804 : vector<32xf32> to vector<1x32xf32>
    %cst_247 = arith.constant 9.000000e+00 : f32
    %806 = vector.broadcast %cst_247 : f32 to vector<1x32xf32>
    %807 = arith.divf %805, %806 : vector<1x32xf32>
    %cst_248 = arith.constant 9.99999996E-13 : f32
    %808 = vector.broadcast %cst_248 : f32 to vector<1x32xf32>
    %809 = arith.addf %807, %808 : vector<1x32xf32>
    %810 = math.rsqrt %809 : vector<1x32xf32>
    %811 = vector.broadcast %810 : vector<1x32xf32> to vector<9x32xf32>
    %812 = arith.mulf %802, %811 : vector<9x32xf32>
    %813 = vector.broadcast %92 : vector<1x32xf32> to vector<9x32xf32>
    %814 = arith.mulf %812, %813 : vector<9x32xf32>
    %815 = vector.broadcast %94 : vector<1x32xf32> to vector<9x32xf32>
    %816 = arith.addf %814, %815 : vector<9x32xf32>
    %c1_249 = arith.constant 1 : index
    %c0_250 = arith.constant 0 : index
    %c0_251 = arith.constant 0 : index
    %817 = vector.load %arg8[%c1_249, %c0_250, %c0_251] : memref<2x32x32xf32, #tpu.memory_space<vmem>>, vector<1x32x32xf32>
    %818 = vector.shape_cast %817 : vector<1x32x32xf32> to vector<32x32xf32>
    %c1_252 = arith.constant 1 : index
    %c0_253 = arith.constant 0 : index
    %c0_254 = arith.constant 0 : index
    %819 = vector.load %arg9[%c1_252, %c0_253, %c0_254] : memref<2x1x32xf32, #tpu.memory_space<vmem>>, vector<1x1x32xf32>
    %820 = vector.shape_cast %819 : vector<1x1x32xf32> to vector<1x32xf32>
    %c1_255 = arith.constant 1 : index
    %c0_256 = arith.constant 0 : index
    %c0_257 = arith.constant 0 : index
    %821 = vector.load %arg10[%c1_255, %c0_256, %c0_257] : memref<2x32x32xf32, #tpu.memory_space<vmem>>, vector<1x32x32xf32>
    %822 = vector.shape_cast %821 : vector<1x32x32xf32> to vector<32x32xf32>
    %c1_258 = arith.constant 1 : index
    %c0_259 = arith.constant 0 : index
    %c0_260 = arith.constant 0 : index
    %823 = vector.load %arg11[%c1_258, %c0_259, %c0_260] : memref<2x1x32xf32, #tpu.memory_space<vmem>>, vector<1x1x32xf32>
    %824 = vector.shape_cast %823 : vector<1x1x32xf32> to vector<1x32xf32>
    %c1_261 = arith.constant 1 : index
    %c0_262 = arith.constant 0 : index
    %c0_263 = arith.constant 0 : index
    %825 = vector.load %arg12[%c1_261, %c0_262, %c0_263] : memref<2x32x32xf32, #tpu.memory_space<vmem>>, vector<1x32x32xf32>
    %826 = vector.shape_cast %825 : vector<1x32x32xf32> to vector<32x32xf32>
    %c1_264 = arith.constant 1 : index
    %c0_265 = arith.constant 0 : index
    %c0_266 = arith.constant 0 : index
    %827 = vector.load %arg13[%c1_264, %c0_265, %c0_266] : memref<2x1x32xf32, #tpu.memory_space<vmem>>, vector<1x1x32xf32>
    %828 = vector.shape_cast %827 : vector<1x1x32xf32> to vector<1x32xf32>
    %c1_267 = arith.constant 1 : index
    %c0_268 = arith.constant 0 : index
    %c0_269 = arith.constant 0 : index
    %829 = vector.load %arg14[%c1_267, %c0_268, %c0_269] : memref<2x32x32xf32, #tpu.memory_space<vmem>>, vector<1x32x32xf32>
    %830 = vector.shape_cast %829 : vector<1x32x32xf32> to vector<32x32xf32>
    %c1_270 = arith.constant 1 : index
    %c0_271 = arith.constant 0 : index
    %c0_272 = arith.constant 0 : index
    %831 = vector.load %arg15[%c1_270, %c0_271, %c0_272] : memref<2x1x32xf32, #tpu.memory_space<vmem>>, vector<1x1x32xf32>
    %832 = vector.shape_cast %831 : vector<1x1x32xf32> to vector<1x32xf32>
    %c1_273 = arith.constant 1 : index
    %c0_274 = arith.constant 0 : index
    %c0_275 = arith.constant 0 : index
    %833 = vector.load %arg18[%c1_273, %c0_274, %c0_275] : memref<2x32x64xf32, #tpu.memory_space<vmem>>, vector<1x32x64xf32>
    %834 = vector.shape_cast %833 : vector<1x32x64xf32> to vector<32x64xf32>
    %c1_276 = arith.constant 1 : index
    %c0_277 = arith.constant 0 : index
    %c0_278 = arith.constant 0 : index
    %835 = vector.load %arg19[%c1_276, %c0_277, %c0_278] : memref<2x1x64xf32, #tpu.memory_space<vmem>>, vector<1x1x64xf32>
    %836 = vector.shape_cast %835 : vector<1x1x64xf32> to vector<1x64xf32>
    %c1_279 = arith.constant 1 : index
    %c0_280 = arith.constant 0 : index
    %c0_281 = arith.constant 0 : index
    %837 = vector.load %arg20[%c1_279, %c0_280, %c0_281] : memref<2x64x32xf32, #tpu.memory_space<vmem>>, vector<1x64x32xf32>
    %838 = vector.shape_cast %837 : vector<1x64x32xf32> to vector<64x32xf32>
    %c1_282 = arith.constant 1 : index
    %c0_283 = arith.constant 0 : index
    %c0_284 = arith.constant 0 : index
    %839 = vector.load %arg21[%c1_282, %c0_283, %c0_284] : memref<2x1x32xf32, #tpu.memory_space<vmem>>, vector<1x1x32xf32>
    %840 = vector.shape_cast %839 : vector<1x1x32xf32> to vector<1x32xf32>
    %c1_285 = arith.constant 1 : index
    %c0_286 = arith.constant 0 : index
    %c0_287 = arith.constant 0 : index
    %841 = vector.load %arg16[%c1_285, %c0_286, %c0_287] : memref<2x1x32xf32, #tpu.memory_space<vmem>>, vector<1x1x32xf32>
    %842 = vector.shape_cast %841 : vector<1x1x32xf32> to vector<1x32xf32>
    %c1_288 = arith.constant 1 : index
    %c0_289 = arith.constant 0 : index
    %c0_290 = arith.constant 0 : index
    %843 = vector.load %arg17[%c1_288, %c0_289, %c0_290] : memref<2x1x32xf32, #tpu.memory_space<vmem>>, vector<1x1x32xf32>
    %844 = vector.shape_cast %843 : vector<1x1x32xf32> to vector<1x32xf32>
    %c1_291 = arith.constant 1 : index
    %c0_292 = arith.constant 0 : index
    %c0_293 = arith.constant 0 : index
    %845 = vector.load %arg22[%c1_291, %c0_292, %c0_293] : memref<2x1x32xf32, #tpu.memory_space<vmem>>, vector<1x1x32xf32>
    %846 = vector.shape_cast %845 : vector<1x1x32xf32> to vector<1x32xf32>
    %c1_294 = arith.constant 1 : index
    %c0_295 = arith.constant 0 : index
    %c0_296 = arith.constant 0 : index
    %847 = vector.load %arg23[%c1_294, %c0_295, %c0_296] : memref<2x1x32xf32, #tpu.memory_space<vmem>>, vector<1x1x32xf32>
    %848 = vector.shape_cast %847 : vector<1x1x32xf32> to vector<1x32xf32>
    %cst_297 = arith.constant dense<0.000000e+00> : vector<9x32xf32>
    %849 = tpu.matmul %455, %818, %cst_297 {dimension_numbers = #tpu.dot_dimension_numbers<[1], [0], [0], [1], [0, 0, 1, 1], [], []>} : vector<9x32xf32>, vector<32x32xf32>, vector<9x32xf32> -> vector<9x32xf32>
    %850 = vector.broadcast %820 : vector<1x32xf32> to vector<9x32xf32>
    %851 = arith.addf %849, %850 : vector<9x32xf32>
    %cst_298 = arith.constant dense<0.000000e+00> : vector<9x32xf32>
    %852 = tpu.matmul %455, %822, %cst_298 {dimension_numbers = #tpu.dot_dimension_numbers<[1], [0], [0], [1], [0, 0, 1, 1], [], []>} : vector<9x32xf32>, vector<32x32xf32>, vector<9x32xf32> -> vector<9x32xf32>
    %853 = vector.broadcast %824 : vector<1x32xf32> to vector<9x32xf32>
    %854 = arith.addf %852, %853 : vector<9x32xf32>
    %cst_299 = arith.constant dense<0.000000e+00> : vector<9x32xf32>
    %855 = tpu.matmul %455, %826, %cst_299 {dimension_numbers = #tpu.dot_dimension_numbers<[1], [0], [0], [1], [0, 0, 1, 1], [], []>} : vector<9x32xf32>, vector<32x32xf32>, vector<9x32xf32> -> vector<9x32xf32>
    %856 = vector.broadcast %828 : vector<1x32xf32> to vector<9x32xf32>
    %857 = arith.addf %855, %856 : vector<9x32xf32>
    %858 = vector.extract_strided_slice %851 {offsets = [0, 0], sizes = [9, 8], strides = [1, 1]} : vector<9x32xf32> to vector<9x8xf32>
    %cst_300 = arith.constant 0.353553385 : f32
    %859 = vector.broadcast %cst_300 : f32 to vector<9x8xf32>
    %860 = arith.mulf %858, %859 : vector<9x8xf32>
    %861 = vector.extract_strided_slice %854 {offsets = [0, 0], sizes = [9, 8], strides = [1, 1]} : vector<9x32xf32> to vector<9x8xf32>
    %862 = vector.extract_strided_slice %857 {offsets = [0, 0], sizes = [9, 8], strides = [1, 1]} : vector<9x32xf32> to vector<9x8xf32>
    %863 = tpu.transpose %861, [1, 0] : vector<9x8xf32> -> vector<8x9xf32>
    %cst_301 = arith.constant dense<0.000000e+00> : vector<9x9xf32>
    %864 = tpu.matmul %860, %863, %cst_301 {dimension_numbers = #tpu.dot_dimension_numbers<[1], [0], [0], [1], [0, 0, 1, 1], [], []>} : vector<9x8xf32>, vector<8x9xf32>, vector<9x9xf32> -> vector<9x9xf32>
    %cst_302 = arith.constant dense<0.000000e+00> : vector<9x5xf32>
    %865 = tpu.matmul %860, %0, %cst_302 {dimension_numbers = #tpu.dot_dimension_numbers<[1], [0], [0], [1], [0, 0, 1, 1], [], []>} : vector<9x8xf32>, vector<8x5xf32>, vector<9x5xf32> -> vector<9x5xf32>
    %866 = vector.extract_strided_slice %865 {offsets = [0, 1], sizes = [9, 1], strides = [1, 1]} : vector<9x5xf32> to vector<9x1xf32>
    %867 = vector.broadcast %866 : vector<9x1xf32> to vector<9x9xf32>
    %868 = arith.mulf %867, %2 : vector<9x9xf32>
    %869 = arith.addf %864, %868 : vector<9x9xf32>
    %870 = vector.extract_strided_slice %865 {offsets = [0, 2], sizes = [9, 1], strides = [1, 1]} : vector<9x5xf32> to vector<9x1xf32>
    %871 = vector.broadcast %870 : vector<9x1xf32> to vector<9x9xf32>
    %872 = arith.mulf %871, %4 : vector<9x9xf32>
    %873 = arith.addf %869, %872 : vector<9x9xf32>
    %874 = vector.extract_strided_slice %865 {offsets = [0, 3], sizes = [9, 1], strides = [1, 1]} : vector<9x5xf32> to vector<9x1xf32>
    %875 = vector.broadcast %874 : vector<9x1xf32> to vector<9x9xf32>
    %876 = arith.mulf %875, %6 : vector<9x9xf32>
    %877 = arith.addf %873, %876 : vector<9x9xf32>
    %878 = vector.extract_strided_slice %865 {offsets = [0, 4], sizes = [9, 1], strides = [1, 1]} : vector<9x5xf32> to vector<9x1xf32>
    %879 = vector.broadcast %878 : vector<9x1xf32> to vector<9x9xf32>
    %880 = arith.mulf %879, %8 : vector<9x9xf32>
    %881 = arith.addf %877, %880 : vector<9x9xf32>
    %882 = arith.addf %881, %14 : vector<9x9xf32>
    %cst_303 = arith.constant dense<0xFF800000> : vector<9xf32>
    %883 = vector.multi_reduction <maximumf>, %882, %cst_303 [1] : vector<9x9xf32> to vector<9xf32>
    %884 = vector.shape_cast %883 : vector<9xf32> to vector<9x1xf32>
    %885 = vector.broadcast %884 : vector<9x1xf32> to vector<9x9xf32>
    %886 = arith.subf %882, %885 : vector<9x9xf32>
    %887 = math.exp %886 : vector<9x9xf32>
    %cst_304 = arith.constant dense<0.000000e+00> : vector<9xf32>
    %888 = vector.multi_reduction <add>, %887, %cst_304 [1] : vector<9x9xf32> to vector<9xf32>
    %889 = vector.shape_cast %888 : vector<9xf32> to vector<9x1xf32>
    %890 = tpu.reciprocal %889 {approx = true} : vector<9x1xf32> -> vector<9x1xf32>
    %891 = vector.broadcast %890 : vector<9x1xf32> to vector<9x9xf32>
    %892 = arith.mulf %887, %891 : vector<9x9xf32>
    %cst_305 = arith.constant dense<0.000000e+00> : vector<9x8xf32>
    %893 = tpu.matmul %892, %862, %cst_305 {dimension_numbers = #tpu.dot_dimension_numbers<[1], [0], [0], [1], [0, 0, 1, 1], [], []>} : vector<9x9xf32>, vector<9x8xf32>, vector<9x8xf32> -> vector<9x8xf32>
    %894 = arith.mulf %892, %2 : vector<9x9xf32>
    %cst_306 = arith.constant dense<0.000000e+00> : vector<9xf32>
    %895 = vector.multi_reduction <add>, %894, %cst_306 [1] : vector<9x9xf32> to vector<9xf32>
    %896 = vector.shape_cast %895 : vector<9xf32> to vector<9x1xf32>
    %897 = vector.broadcast %896 : vector<9x1xf32> to vector<9x8xf32>
    %898 = vector.broadcast %9 : vector<1x8xf32> to vector<9x8xf32>
    %899 = arith.mulf %897, %898 : vector<9x8xf32>
    %900 = arith.addf %893, %899 : vector<9x8xf32>
    %901 = arith.mulf %892, %4 : vector<9x9xf32>
    %cst_307 = arith.constant dense<0.000000e+00> : vector<9xf32>
    %902 = vector.multi_reduction <add>, %901, %cst_307 [1] : vector<9x9xf32> to vector<9xf32>
    %903 = vector.shape_cast %902 : vector<9xf32> to vector<9x1xf32>
    %904 = vector.broadcast %903 : vector<9x1xf32> to vector<9x8xf32>
    %905 = vector.broadcast %10 : vector<1x8xf32> to vector<9x8xf32>
    %906 = arith.mulf %904, %905 : vector<9x8xf32>
    %907 = arith.addf %900, %906 : vector<9x8xf32>
    %908 = arith.mulf %892, %6 : vector<9x9xf32>
    %cst_308 = arith.constant dense<0.000000e+00> : vector<9xf32>
    %909 = vector.multi_reduction <add>, %908, %cst_308 [1] : vector<9x9xf32> to vector<9xf32>
    %910 = vector.shape_cast %909 : vector<9xf32> to vector<9x1xf32>
    %911 = vector.broadcast %910 : vector<9x1xf32> to vector<9x8xf32>
    %912 = vector.broadcast %11 : vector<1x8xf32> to vector<9x8xf32>
    %913 = arith.mulf %911, %912 : vector<9x8xf32>
    %914 = arith.addf %907, %913 : vector<9x8xf32>
    %915 = arith.mulf %892, %8 : vector<9x9xf32>
    %cst_309 = arith.constant dense<0.000000e+00> : vector<9xf32>
    %916 = vector.multi_reduction <add>, %915, %cst_309 [1] : vector<9x9xf32> to vector<9xf32>
    %917 = vector.shape_cast %916 : vector<9xf32> to vector<9x1xf32>
    %918 = vector.broadcast %917 : vector<9x1xf32> to vector<9x8xf32>
    %919 = vector.broadcast %12 : vector<1x8xf32> to vector<9x8xf32>
    %920 = arith.mulf %918, %919 : vector<9x8xf32>
    %921 = arith.addf %914, %920 : vector<9x8xf32>
    %c0_310 = arith.constant 0 : index
    %c0_311 = arith.constant 0 : index
    %922 = vector.load %arg31[%c0_310, %c0_311] : memref<9x32xf32, #tpu.memory_space<vmem>>, vector<9x8xf32>
    tpu.vector_store %arg31[%c0_310, %c0_311], %921 {strides = array<i32>} : memref<9x32xf32, #tpu.memory_space<vmem>>, vector<9x8xf32>,
    %923 = vector.extract_strided_slice %851 {offsets = [0, 8], sizes = [9, 8], strides = [1, 1]} : vector<9x32xf32> to vector<9x8xf32>
    %cst_312 = arith.constant 0.353553385 : f32
    %924 = vector.broadcast %cst_312 : f32 to vector<9x8xf32>
    %925 = arith.mulf %923, %924 : vector<9x8xf32>
    %926 = vector.extract_strided_slice %854 {offsets = [0, 8], sizes = [9, 8], strides = [1, 1]} : vector<9x32xf32> to vector<9x8xf32>
    %927 = vector.extract_strided_slice %857 {offsets = [0, 8], sizes = [9, 8], strides = [1, 1]} : vector<9x32xf32> to vector<9x8xf32>
    %928 = tpu.transpose %926, [1, 0] : vector<9x8xf32> -> vector<8x9xf32>
    %cst_313 = arith.constant dense<0.000000e+00> : vector<9x9xf32>
    %929 = tpu.matmul %925, %928, %cst_313 {dimension_numbers = #tpu.dot_dimension_numbers<[1], [0], [0], [1], [0, 0, 1, 1], [], []>} : vector<9x8xf32>, vector<8x9xf32>, vector<9x9xf32> -> vector<9x9xf32>
    %cst_314 = arith.constant dense<0.000000e+00> : vector<9x5xf32>
    %930 = tpu.matmul %925, %0, %cst_314 {dimension_numbers = #tpu.dot_dimension_numbers<[1], [0], [0], [1], [0, 0, 1, 1], [], []>} : vector<9x8xf32>, vector<8x5xf32>, vector<9x5xf32> -> vector<9x5xf32>
    %931 = vector.extract_strided_slice %930 {offsets = [0, 1], sizes = [9, 1], strides = [1, 1]} : vector<9x5xf32> to vector<9x1xf32>
    %932 = vector.broadcast %931 : vector<9x1xf32> to vector<9x9xf32>
    %933 = arith.mulf %932, %2 : vector<9x9xf32>
    %934 = arith.addf %929, %933 : vector<9x9xf32>
    %935 = vector.extract_strided_slice %930 {offsets = [0, 2], sizes = [9, 1], strides = [1, 1]} : vector<9x5xf32> to vector<9x1xf32>
    %936 = vector.broadcast %935 : vector<9x1xf32> to vector<9x9xf32>
    %937 = arith.mulf %936, %4 : vector<9x9xf32>
    %938 = arith.addf %934, %937 : vector<9x9xf32>
    %939 = vector.extract_strided_slice %930 {offsets = [0, 3], sizes = [9, 1], strides = [1, 1]} : vector<9x5xf32> to vector<9x1xf32>
    %940 = vector.broadcast %939 : vector<9x1xf32> to vector<9x9xf32>
    %941 = arith.mulf %940, %6 : vector<9x9xf32>
    %942 = arith.addf %938, %941 : vector<9x9xf32>
    %943 = vector.extract_strided_slice %930 {offsets = [0, 4], sizes = [9, 1], strides = [1, 1]} : vector<9x5xf32> to vector<9x1xf32>
    %944 = vector.broadcast %943 : vector<9x1xf32> to vector<9x9xf32>
    %945 = arith.mulf %944, %8 : vector<9x9xf32>
    %946 = arith.addf %942, %945 : vector<9x9xf32>
    %947 = arith.addf %946, %14 : vector<9x9xf32>
    %cst_315 = arith.constant dense<0xFF800000> : vector<9xf32>
    %948 = vector.multi_reduction <maximumf>, %947, %cst_315 [1] : vector<9x9xf32> to vector<9xf32>
    %949 = vector.shape_cast %948 : vector<9xf32> to vector<9x1xf32>
    %950 = vector.broadcast %949 : vector<9x1xf32> to vector<9x9xf32>
    %951 = arith.subf %947, %950 : vector<9x9xf32>
    %952 = math.exp %951 : vector<9x9xf32>
    %cst_316 = arith.constant dense<0.000000e+00> : vector<9xf32>
    %953 = vector.multi_reduction <add>, %952, %cst_316 [1] : vector<9x9xf32> to vector<9xf32>
    %954 = vector.shape_cast %953 : vector<9xf32> to vector<9x1xf32>
    %955 = tpu.reciprocal %954 {approx = true} : vector<9x1xf32> -> vector<9x1xf32>
    %956 = vector.broadcast %955 : vector<9x1xf32> to vector<9x9xf32>
    %957 = arith.mulf %952, %956 : vector<9x9xf32>
    %cst_317 = arith.constant dense<0.000000e+00> : vector<9x8xf32>
    %958 = tpu.matmul %957, %927, %cst_317 {dimension_numbers = #tpu.dot_dimension_numbers<[1], [0], [0], [1], [0, 0, 1, 1], [], []>} : vector<9x9xf32>, vector<9x8xf32>, vector<9x8xf32> -> vector<9x8xf32>
    %959 = arith.mulf %957, %2 : vector<9x9xf32>
    %cst_318 = arith.constant dense<0.000000e+00> : vector<9xf32>
    %960 = vector.multi_reduction <add>, %959, %cst_318 [1] : vector<9x9xf32> to vector<9xf32>
    %961 = vector.shape_cast %960 : vector<9xf32> to vector<9x1xf32>
    %962 = vector.broadcast %961 : vector<9x1xf32> to vector<9x8xf32>
    %963 = vector.broadcast %9 : vector<1x8xf32> to vector<9x8xf32>
    %964 = arith.mulf %962, %963 : vector<9x8xf32>
    %965 = arith.addf %958, %964 : vector<9x8xf32>
    %966 = arith.mulf %957, %4 : vector<9x9xf32>
    %cst_319 = arith.constant dense<0.000000e+00> : vector<9xf32>
    %967 = vector.multi_reduction <add>, %966, %cst_319 [1] : vector<9x9xf32> to vector<9xf32>
    %968 = vector.shape_cast %967 : vector<9xf32> to vector<9x1xf32>
    %969 = vector.broadcast %968 : vector<9x1xf32> to vector<9x8xf32>
    %970 = vector.broadcast %10 : vector<1x8xf32> to vector<9x8xf32>
    %971 = arith.mulf %969, %970 : vector<9x8xf32>
    %972 = arith.addf %965, %971 : vector<9x8xf32>
    %973 = arith.mulf %957, %6 : vector<9x9xf32>
    %cst_320 = arith.constant dense<0.000000e+00> : vector<9xf32>
    %974 = vector.multi_reduction <add>, %973, %cst_320 [1] : vector<9x9xf32> to vector<9xf32>
    %975 = vector.shape_cast %974 : vector<9xf32> to vector<9x1xf32>
    %976 = vector.broadcast %975 : vector<9x1xf32> to vector<9x8xf32>
    %977 = vector.broadcast %11 : vector<1x8xf32> to vector<9x8xf32>
    %978 = arith.mulf %976, %977 : vector<9x8xf32>
    %979 = arith.addf %972, %978 : vector<9x8xf32>
    %980 = arith.mulf %957, %8 : vector<9x9xf32>
    %cst_321 = arith.constant dense<0.000000e+00> : vector<9xf32>
    %981 = vector.multi_reduction <add>, %980, %cst_321 [1] : vector<9x9xf32> to vector<9xf32>
    %982 = vector.shape_cast %981 : vector<9xf32> to vector<9x1xf32>
    %983 = vector.broadcast %982 : vector<9x1xf32> to vector<9x8xf32>
    %984 = vector.broadcast %12 : vector<1x8xf32> to vector<9x8xf32>
    %985 = arith.mulf %983, %984 : vector<9x8xf32>
    %986 = arith.addf %979, %985 : vector<9x8xf32>
    %c0_322 = arith.constant 0 : index
    %c8_323 = arith.constant 8 : index
    %987 = vector.load %arg31[%c0_322, %c8_323] : memref<9x32xf32, #tpu.memory_space<vmem>>, vector<9x8xf32>
    tpu.vector_store %arg31[%c0_322, %c8_323], %986 {strides = array<i32>} : memref<9x32xf32, #tpu.memory_space<vmem>>, vector<9x8xf32>,
    %988 = vector.extract_strided_slice %851 {offsets = [0, 16], sizes = [9, 8], strides = [1, 1]} : vector<9x32xf32> to vector<9x8xf32>
    %cst_324 = arith.constant 0.353553385 : f32
    %989 = vector.broadcast %cst_324 : f32 to vector<9x8xf32>
    %990 = arith.mulf %988, %989 : vector<9x8xf32>
    %991 = vector.extract_strided_slice %854 {offsets = [0, 16], sizes = [9, 8], strides = [1, 1]} : vector<9x32xf32> to vector<9x8xf32>
    %992 = vector.extract_strided_slice %857 {offsets = [0, 16], sizes = [9, 8], strides = [1, 1]} : vector<9x32xf32> to vector<9x8xf32>
    %993 = tpu.transpose %991, [1, 0] : vector<9x8xf32> -> vector<8x9xf32>
    %cst_325 = arith.constant dense<0.000000e+00> : vector<9x9xf32>
    %994 = tpu.matmul %990, %993, %cst_325 {dimension_numbers = #tpu.dot_dimension_numbers<[1], [0], [0], [1], [0, 0, 1, 1], [], []>} : vector<9x8xf32>, vector<8x9xf32>, vector<9x9xf32> -> vector<9x9xf32>
    %cst_326 = arith.constant dense<0.000000e+00> : vector<9x5xf32>
    %995 = tpu.matmul %990, %0, %cst_326 {dimension_numbers = #tpu.dot_dimension_numbers<[1], [0], [0], [1], [0, 0, 1, 1], [], []>} : vector<9x8xf32>, vector<8x5xf32>, vector<9x5xf32> -> vector<9x5xf32>
    %996 = vector.extract_strided_slice %995 {offsets = [0, 1], sizes = [9, 1], strides = [1, 1]} : vector<9x5xf32> to vector<9x1xf32>
    %997 = vector.broadcast %996 : vector<9x1xf32> to vector<9x9xf32>
    %998 = arith.mulf %997, %2 : vector<9x9xf32>
    %999 = arith.addf %994, %998 : vector<9x9xf32>
    %1000 = vector.extract_strided_slice %995 {offsets = [0, 2], sizes = [9, 1], strides = [1, 1]} : vector<9x5xf32> to vector<9x1xf32>
    %1001 = vector.broadcast %1000 : vector<9x1xf32> to vector<9x9xf32>
    %1002 = arith.mulf %1001, %4 : vector<9x9xf32>
    %1003 = arith.addf %999, %1002 : vector<9x9xf32>
    %1004 = vector.extract_strided_slice %995 {offsets = [0, 3], sizes = [9, 1], strides = [1, 1]} : vector<9x5xf32> to vector<9x1xf32>
    %1005 = vector.broadcast %1004 : vector<9x1xf32> to vector<9x9xf32>
    %1006 = arith.mulf %1005, %6 : vector<9x9xf32>
    %1007 = arith.addf %1003, %1006 : vector<9x9xf32>
    %1008 = vector.extract_strided_slice %995 {offsets = [0, 4], sizes = [9, 1], strides = [1, 1]} : vector<9x5xf32> to vector<9x1xf32>
    %1009 = vector.broadcast %1008 : vector<9x1xf32> to vector<9x9xf32>
    %1010 = arith.mulf %1009, %8 : vector<9x9xf32>
    %1011 = arith.addf %1007, %1010 : vector<9x9xf32>
    %1012 = arith.addf %1011, %14 : vector<9x9xf32>
    %cst_327 = arith.constant dense<0xFF800000> : vector<9xf32>
    %1013 = vector.multi_reduction <maximumf>, %1012, %cst_327 [1] : vector<9x9xf32> to vector<9xf32>
    %1014 = vector.shape_cast %1013 : vector<9xf32> to vector<9x1xf32>
    %1015 = vector.broadcast %1014 : vector<9x1xf32> to vector<9x9xf32>
    %1016 = arith.subf %1012, %1015 : vector<9x9xf32>
    %1017 = math.exp %1016 : vector<9x9xf32>
    %cst_328 = arith.constant dense<0.000000e+00> : vector<9xf32>
    %1018 = vector.multi_reduction <add>, %1017, %cst_328 [1] : vector<9x9xf32> to vector<9xf32>
    %1019 = vector.shape_cast %1018 : vector<9xf32> to vector<9x1xf32>
    %1020 = tpu.reciprocal %1019 {approx = true} : vector<9x1xf32> -> vector<9x1xf32>
    %1021 = vector.broadcast %1020 : vector<9x1xf32> to vector<9x9xf32>
    %1022 = arith.mulf %1017, %1021 : vector<9x9xf32>
    %cst_329 = arith.constant dense<0.000000e+00> : vector<9x8xf32>
    %1023 = tpu.matmul %1022, %992, %cst_329 {dimension_numbers = #tpu.dot_dimension_numbers<[1], [0], [0], [1], [0, 0, 1, 1], [], []>} : vector<9x9xf32>, vector<9x8xf32>, vector<9x8xf32> -> vector<9x8xf32>
    %1024 = arith.mulf %1022, %2 : vector<9x9xf32>
    %cst_330 = arith.constant dense<0.000000e+00> : vector<9xf32>
    %1025 = vector.multi_reduction <add>, %1024, %cst_330 [1] : vector<9x9xf32> to vector<9xf32>
    %1026 = vector.shape_cast %1025 : vector<9xf32> to vector<9x1xf32>
    %1027 = vector.broadcast %1026 : vector<9x1xf32> to vector<9x8xf32>
    %1028 = vector.broadcast %9 : vector<1x8xf32> to vector<9x8xf32>
    %1029 = arith.mulf %1027, %1028 : vector<9x8xf32>
    %1030 = arith.addf %1023, %1029 : vector<9x8xf32>
    %1031 = arith.mulf %1022, %4 : vector<9x9xf32>
    %cst_331 = arith.constant dense<0.000000e+00> : vector<9xf32>
    %1032 = vector.multi_reduction <add>, %1031, %cst_331 [1] : vector<9x9xf32> to vector<9xf32>
    %1033 = vector.shape_cast %1032 : vector<9xf32> to vector<9x1xf32>
    %1034 = vector.broadcast %1033 : vector<9x1xf32> to vector<9x8xf32>
    %1035 = vector.broadcast %10 : vector<1x8xf32> to vector<9x8xf32>
    %1036 = arith.mulf %1034, %1035 : vector<9x8xf32>
    %1037 = arith.addf %1030, %1036 : vector<9x8xf32>
    %1038 = arith.mulf %1022, %6 : vector<9x9xf32>
    %cst_332 = arith.constant dense<0.000000e+00> : vector<9xf32>
    %1039 = vector.multi_reduction <add>, %1038, %cst_332 [1] : vector<9x9xf32> to vector<9xf32>
    %1040 = vector.shape_cast %1039 : vector<9xf32> to vector<9x1xf32>
    %1041 = vector.broadcast %1040 : vector<9x1xf32> to vector<9x8xf32>
    %1042 = vector.broadcast %11 : vector<1x8xf32> to vector<9x8xf32>
    %1043 = arith.mulf %1041, %1042 : vector<9x8xf32>
    %1044 = arith.addf %1037, %1043 : vector<9x8xf32>
    %1045 = arith.mulf %1022, %8 : vector<9x9xf32>
    %cst_333 = arith.constant dense<0.000000e+00> : vector<9xf32>
    %1046 = vector.multi_reduction <add>, %1045, %cst_333 [1] : vector<9x9xf32> to vector<9xf32>
    %1047 = vector.shape_cast %1046 : vector<9xf32> to vector<9x1xf32>
    %1048 = vector.broadcast %1047 : vector<9x1xf32> to vector<9x8xf32>
    %1049 = vector.broadcast %12 : vector<1x8xf32> to vector<9x8xf32>
    %1050 = arith.mulf %1048, %1049 : vector<9x8xf32>
    %1051 = arith.addf %1044, %1050 : vector<9x8xf32>
    %c0_334 = arith.constant 0 : index
    %c16_335 = arith.constant 16 : index
    %1052 = vector.load %arg31[%c0_334, %c16_335] : memref<9x32xf32, #tpu.memory_space<vmem>>, vector<9x8xf32>
    tpu.vector_store %arg31[%c0_334, %c16_335], %1051 {strides = array<i32>} : memref<9x32xf32, #tpu.memory_space<vmem>>, vector<9x8xf32>,
    %1053 = vector.extract_strided_slice %851 {offsets = [0, 24], sizes = [9, 8], strides = [1, 1]} : vector<9x32xf32> to vector<9x8xf32>
    %cst_336 = arith.constant 0.353553385 : f32
    %1054 = vector.broadcast %cst_336 : f32 to vector<9x8xf32>
    %1055 = arith.mulf %1053, %1054 : vector<9x8xf32>
    %1056 = vector.extract_strided_slice %854 {offsets = [0, 24], sizes = [9, 8], strides = [1, 1]} : vector<9x32xf32> to vector<9x8xf32>
    %1057 = vector.extract_strided_slice %857 {offsets = [0, 24], sizes = [9, 8], strides = [1, 1]} : vector<9x32xf32> to vector<9x8xf32>
    %1058 = tpu.transpose %1056, [1, 0] : vector<9x8xf32> -> vector<8x9xf32>
    %cst_337 = arith.constant dense<0.000000e+00> : vector<9x9xf32>
    %1059 = tpu.matmul %1055, %1058, %cst_337 {dimension_numbers = #tpu.dot_dimension_numbers<[1], [0], [0], [1], [0, 0, 1, 1], [], []>} : vector<9x8xf32>, vector<8x9xf32>, vector<9x9xf32> -> vector<9x9xf32>
    %cst_338 = arith.constant dense<0.000000e+00> : vector<9x5xf32>
    %1060 = tpu.matmul %1055, %0, %cst_338 {dimension_numbers = #tpu.dot_dimension_numbers<[1], [0], [0], [1], [0, 0, 1, 1], [], []>} : vector<9x8xf32>, vector<8x5xf32>, vector<9x5xf32> -> vector<9x5xf32>
    %1061 = vector.extract_strided_slice %1060 {offsets = [0, 1], sizes = [9, 1], strides = [1, 1]} : vector<9x5xf32> to vector<9x1xf32>
    %1062 = vector.broadcast %1061 : vector<9x1xf32> to vector<9x9xf32>
    %1063 = arith.mulf %1062, %2 : vector<9x9xf32>
    %1064 = arith.addf %1059, %1063 : vector<9x9xf32>
    %1065 = vector.extract_strided_slice %1060 {offsets = [0, 2], sizes = [9, 1], strides = [1, 1]} : vector<9x5xf32> to vector<9x1xf32>
    %1066 = vector.broadcast %1065 : vector<9x1xf32> to vector<9x9xf32>
    %1067 = arith.mulf %1066, %4 : vector<9x9xf32>
    %1068 = arith.addf %1064, %1067 : vector<9x9xf32>
    %1069 = vector.extract_strided_slice %1060 {offsets = [0, 3], sizes = [9, 1], strides = [1, 1]} : vector<9x5xf32> to vector<9x1xf32>
    %1070 = vector.broadcast %1069 : vector<9x1xf32> to vector<9x9xf32>
    %1071 = arith.mulf %1070, %6 : vector<9x9xf32>
    %1072 = arith.addf %1068, %1071 : vector<9x9xf32>
    %1073 = vector.extract_strided_slice %1060 {offsets = [0, 4], sizes = [9, 1], strides = [1, 1]} : vector<9x5xf32> to vector<9x1xf32>
    %1074 = vector.broadcast %1073 : vector<9x1xf32> to vector<9x9xf32>
    %1075 = arith.mulf %1074, %8 : vector<9x9xf32>
    %1076 = arith.addf %1072, %1075 : vector<9x9xf32>
    %1077 = arith.addf %1076, %14 : vector<9x9xf32>
    %cst_339 = arith.constant dense<0xFF800000> : vector<9xf32>
    %1078 = vector.multi_reduction <maximumf>, %1077, %cst_339 [1] : vector<9x9xf32> to vector<9xf32>
    %1079 = vector.shape_cast %1078 : vector<9xf32> to vector<9x1xf32>
    %1080 = vector.broadcast %1079 : vector<9x1xf32> to vector<9x9xf32>
    %1081 = arith.subf %1077, %1080 : vector<9x9xf32>
    %1082 = math.exp %1081 : vector<9x9xf32>
    %cst_340 = arith.constant dense<0.000000e+00> : vector<9xf32>
    %1083 = vector.multi_reduction <add>, %1082, %cst_340 [1] : vector<9x9xf32> to vector<9xf32>
    %1084 = vector.shape_cast %1083 : vector<9xf32> to vector<9x1xf32>
    %1085 = tpu.reciprocal %1084 {approx = true} : vector<9x1xf32> -> vector<9x1xf32>
    %1086 = vector.broadcast %1085 : vector<9x1xf32> to vector<9x9xf32>
    %1087 = arith.mulf %1082, %1086 : vector<9x9xf32>
    %cst_341 = arith.constant dense<0.000000e+00> : vector<9x8xf32>
    %1088 = tpu.matmul %1087, %1057, %cst_341 {dimension_numbers = #tpu.dot_dimension_numbers<[1], [0], [0], [1], [0, 0, 1, 1], [], []>} : vector<9x9xf32>, vector<9x8xf32>, vector<9x8xf32> -> vector<9x8xf32>
    %1089 = arith.mulf %1087, %2 : vector<9x9xf32>
    %cst_342 = arith.constant dense<0.000000e+00> : vector<9xf32>
    %1090 = vector.multi_reduction <add>, %1089, %cst_342 [1] : vector<9x9xf32> to vector<9xf32>
    %1091 = vector.shape_cast %1090 : vector<9xf32> to vector<9x1xf32>
    %1092 = vector.broadcast %1091 : vector<9x1xf32> to vector<9x8xf32>
    %1093 = vector.broadcast %9 : vector<1x8xf32> to vector<9x8xf32>
    %1094 = arith.mulf %1092, %1093 : vector<9x8xf32>
    %1095 = arith.addf %1088, %1094 : vector<9x8xf32>
    %1096 = arith.mulf %1087, %4 : vector<9x9xf32>
    %cst_343 = arith.constant dense<0.000000e+00> : vector<9xf32>
    %1097 = vector.multi_reduction <add>, %1096, %cst_343 [1] : vector<9x9xf32> to vector<9xf32>
    %1098 = vector.shape_cast %1097 : vector<9xf32> to vector<9x1xf32>
    %1099 = vector.broadcast %1098 : vector<9x1xf32> to vector<9x8xf32>
    %1100 = vector.broadcast %10 : vector<1x8xf32> to vector<9x8xf32>
    %1101 = arith.mulf %1099, %1100 : vector<9x8xf32>
    %1102 = arith.addf %1095, %1101 : vector<9x8xf32>
    %1103 = arith.mulf %1087, %6 : vector<9x9xf32>
    %cst_344 = arith.constant dense<0.000000e+00> : vector<9xf32>
    %1104 = vector.multi_reduction <add>, %1103, %cst_344 [1] : vector<9x9xf32> to vector<9xf32>
    %1105 = vector.shape_cast %1104 : vector<9xf32> to vector<9x1xf32>
    %1106 = vector.broadcast %1105 : vector<9x1xf32> to vector<9x8xf32>
    %1107 = vector.broadcast %11 : vector<1x8xf32> to vector<9x8xf32>
    %1108 = arith.mulf %1106, %1107 : vector<9x8xf32>
    %1109 = arith.addf %1102, %1108 : vector<9x8xf32>
    %1110 = arith.mulf %1087, %8 : vector<9x9xf32>
    %cst_345 = arith.constant dense<0.000000e+00> : vector<9xf32>
    %1111 = vector.multi_reduction <add>, %1110, %cst_345 [1] : vector<9x9xf32> to vector<9xf32>
    %1112 = vector.shape_cast %1111 : vector<9xf32> to vector<9x1xf32>
    %1113 = vector.broadcast %1112 : vector<9x1xf32> to vector<9x8xf32>
    %1114 = vector.broadcast %12 : vector<1x8xf32> to vector<9x8xf32>
    %1115 = arith.mulf %1113, %1114 : vector<9x8xf32>
    %1116 = arith.addf %1109, %1115 : vector<9x8xf32>
    %c0_346 = arith.constant 0 : index
    %c24_347 = arith.constant 24 : index
    %1117 = vector.load %arg31[%c0_346, %c24_347] : memref<9x32xf32, #tpu.memory_space<vmem>>, vector<9x8xf32>
    tpu.vector_store %arg31[%c0_346, %c24_347], %1116 {strides = array<i32>} : memref<9x32xf32, #tpu.memory_space<vmem>>, vector<9x8xf32>,
    %c0_348 = arith.constant 0 : index
    %c0_349 = arith.constant 0 : index
    %1118 = vector.load %arg31[%c0_348, %c0_349] : memref<9x32xf32, #tpu.memory_space<vmem>>, vector<9x32xf32>
    %cst_350 = arith.constant dense<0.000000e+00> : vector<9x32xf32>
    %1119 = tpu.matmul %1118, %830, %cst_350 {dimension_numbers = #tpu.dot_dimension_numbers<[1], [0], [0], [1], [0, 0, 1, 1], [], []>} : vector<9x32xf32>, vector<32x32xf32>, vector<9x32xf32> -> vector<9x32xf32>
    %1120 = vector.broadcast %832 : vector<1x32xf32> to vector<9x32xf32>
    %1121 = arith.addf %1119, %1120 : vector<9x32xf32>
    %1122 = arith.addf %1121, %455 : vector<9x32xf32>
    %cst_351 = arith.constant dense<0.000000e+00> : vector<32xf32>
    %1123 = vector.multi_reduction <add>, %1122, %cst_351 [0] : vector<9x32xf32> to vector<32xf32>
    %1124 = vector.shape_cast %1123 : vector<32xf32> to vector<1x32xf32>
    %cst_352 = arith.constant 9.000000e+00 : f32
    %1125 = vector.broadcast %cst_352 : f32 to vector<1x32xf32>
    %1126 = arith.divf %1124, %1125 : vector<1x32xf32>
    %1127 = vector.broadcast %1126 : vector<1x32xf32> to vector<9x32xf32>
    %1128 = arith.subf %1122, %1127 : vector<9x32xf32>
    %1129 = arith.mulf %1128, %1128 : vector<9x32xf32>
    %cst_353 = arith.constant dense<0.000000e+00> : vector<32xf32>
    %1130 = vector.multi_reduction <add>, %1129, %cst_353 [0] : vector<9x32xf32> to vector<32xf32>
    %1131 = vector.shape_cast %1130 : vector<32xf32> to vector<1x32xf32>
    %cst_354 = arith.constant 9.000000e+00 : f32
    %1132 = vector.broadcast %cst_354 : f32 to vector<1x32xf32>
    %1133 = arith.divf %1131, %1132 : vector<1x32xf32>
    %cst_355 = arith.constant 9.99999996E-13 : f32
    %1134 = vector.broadcast %cst_355 : f32 to vector<1x32xf32>
    %1135 = arith.addf %1133, %1134 : vector<1x32xf32>
    %1136 = math.rsqrt %1135 : vector<1x32xf32>
    %1137 = vector.broadcast %1136 : vector<1x32xf32> to vector<9x32xf32>
    %1138 = arith.mulf %1128, %1137 : vector<9x32xf32>
    %1139 = vector.broadcast %842 : vector<1x32xf32> to vector<9x32xf32>
    %1140 = arith.mulf %1138, %1139 : vector<9x32xf32>
    %1141 = vector.broadcast %844 : vector<1x32xf32> to vector<9x32xf32>
    %1142 = arith.addf %1140, %1141 : vector<9x32xf32>
    %cst_356 = arith.constant dense<0.000000e+00> : vector<9x64xf32>
    %1143 = tpu.matmul %1142, %834, %cst_356 {dimension_numbers = #tpu.dot_dimension_numbers<[1], [0], [0], [1], [0, 0, 1, 1], [], []>} : vector<9x32xf32>, vector<32x64xf32>, vector<9x64xf32> -> vector<9x64xf32>
    %1144 = vector.broadcast %836 : vector<1x64xf32> to vector<9x64xf32>
    %1145 = arith.addf %1143, %1144 : vector<9x64xf32>
    %cst_357 = arith.constant 5.000000e-01 : f32
    %1146 = vector.broadcast %cst_357 : f32 to vector<9x64xf32>
    %1147 = arith.mulf %1146, %1145 : vector<9x64xf32>
    %cst_358 = arith.constant 0.707106769 : f32
    %1148 = vector.broadcast %cst_358 : f32 to vector<9x64xf32>
    %1149 = arith.mulf %1145, %1148 : vector<9x64xf32>
    %1150 = math.absf %1149 : vector<9x64xf32>
    %cst_359 = arith.constant 0.327591091 : f32
    %1151 = vector.broadcast %cst_359 : f32 to vector<9x64xf32>
    %1152 = arith.mulf %1151, %1150 : vector<9x64xf32>
    %cst_360 = arith.constant 1.000000e+00 : f32
    %1153 = vector.broadcast %cst_360 : f32 to vector<9x64xf32>
    %1154 = arith.addf %1153, %1152 : vector<9x64xf32>
    %cst_361 = arith.constant 1.000000e+00 : f32
    %1155 = vector.broadcast %cst_361 : f32 to vector<9x64xf32>
    %1156 = arith.divf %1155, %1154 : vector<9x64xf32>
    %cst_362 = arith.constant 1.06140542 : f32
    %1157 = vector.broadcast %cst_362 : f32 to vector<9x64xf32>
    %1158 = arith.mulf %1157, %1156 : vector<9x64xf32>
    %cst_363 = arith.constant -1.45315206 : f32
    %1159 = vector.broadcast %cst_363 : f32 to vector<9x64xf32>
    %1160 = arith.addf %1158, %1159 : vector<9x64xf32>
    %1161 = arith.mulf %1160, %1156 : vector<9x64xf32>
    %cst_364 = arith.constant 1.42141378 : f32
    %1162 = vector.broadcast %cst_364 : f32 to vector<9x64xf32>
    %1163 = arith.addf %1161, %1162 : vector<9x64xf32>
    %1164 = arith.mulf %1163, %1156 : vector<9x64xf32>
    %cst_365 = arith.constant -0.284496725 : f32
    %1165 = vector.broadcast %cst_365 : f32 to vector<9x64xf32>
    %1166 = arith.addf %1164, %1165 : vector<9x64xf32>
    %1167 = arith.mulf %1166, %1156 : vector<9x64xf32>
    %cst_366 = arith.constant 0.254829586 : f32
    %1168 = vector.broadcast %cst_366 : f32 to vector<9x64xf32>
    %1169 = arith.addf %1167, %1168 : vector<9x64xf32>
    %1170 = arith.mulf %1169, %1156 : vector<9x64xf32>
    %cst_367 = arith.constant 0.000000e+00 : f32
    %1171 = vector.broadcast %cst_367 : f32 to vector<9x64xf32>
    %1172 = arith.subf %1171, %1150 : vector<9x64xf32>
    %1173 = arith.mulf %1172, %1150 : vector<9x64xf32>
    %1174 = math.exp %1173 : vector<9x64xf32>
    %1175 = arith.mulf %1170, %1174 : vector<9x64xf32>
    %cst_368 = arith.constant 1.000000e+00 : f32
    %1176 = vector.broadcast %cst_368 : f32 to vector<9x64xf32>
    %1177 = arith.subf %1176, %1175 : vector<9x64xf32>
    %cst_369 = arith.constant 0.000000e+00 : f32
    %1178 = vector.broadcast %cst_369 : f32 to vector<9x64xf32>
    %1179 = arith.cmpf oge, %1149, %1178 : vector<9x64xf32>
    %cst_370 = arith.constant 0.000000e+00 : f32
    %1180 = vector.broadcast %cst_370 : f32 to vector<9x64xf32>
    %1181 = arith.subf %1180, %1177 : vector<9x64xf32>
    %1182 = arith.select %1179, %1177, %1181 : vector<9x64xi1>, vector<9x64xf32>
    %cst_371 = arith.constant 1.000000e+00 : f32
    %1183 = vector.broadcast %cst_371 : f32 to vector<9x64xf32>
    %1184 = arith.addf %1183, %1182 : vector<9x64xf32>
    %1185 = arith.mulf %1147, %1184 : vector<9x64xf32>
    %cst_372 = arith.constant dense<0.000000e+00> : vector<9x32xf32>
    %1186 = tpu.matmul %1185, %838, %cst_372 {dimension_numbers = #tpu.dot_dimension_numbers<[1], [0], [0], [1], [0, 0, 1, 1], [], []>} : vector<9x64xf32>, vector<64x32xf32>, vector<9x32xf32> -> vector<9x32xf32>
    %1187 = vector.broadcast %840 : vector<1x32xf32> to vector<9x32xf32>
    %1188 = arith.addf %1186, %1187 : vector<9x32xf32>
    %1189 = arith.addf %1188, %1142 : vector<9x32xf32>
    %cst_373 = arith.constant dense<0.000000e+00> : vector<32xf32>
    %1190 = vector.multi_reduction <add>, %1189, %cst_373 [0] : vector<9x32xf32> to vector<32xf32>
    %1191 = vector.shape_cast %1190 : vector<32xf32> to vector<1x32xf32>
    %cst_374 = arith.constant 9.000000e+00 : f32
    %1192 = vector.broadcast %cst_374 : f32 to vector<1x32xf32>
    %1193 = arith.divf %1191, %1192 : vector<1x32xf32>
    %1194 = vector.broadcast %1193 : vector<1x32xf32> to vector<9x32xf32>
    %1195 = arith.subf %1189, %1194 : vector<9x32xf32>
    %1196 = arith.mulf %1195, %1195 : vector<9x32xf32>
    %cst_375 = arith.constant dense<0.000000e+00> : vector<32xf32>
    %1197 = vector.multi_reduction <add>, %1196, %cst_375 [0] : vector<9x32xf32> to vector<32xf32>
    %1198 = vector.shape_cast %1197 : vector<32xf32> to vector<1x32xf32>
    %cst_376 = arith.constant 9.000000e+00 : f32
    %1199 = vector.broadcast %cst_376 : f32 to vector<1x32xf32>
    %1200 = arith.divf %1198, %1199 : vector<1x32xf32>
    %cst_377 = arith.constant 9.99999996E-13 : f32
    %1201 = vector.broadcast %cst_377 : f32 to vector<1x32xf32>
    %1202 = arith.addf %1200, %1201 : vector<1x32xf32>
    %1203 = math.rsqrt %1202 : vector<1x32xf32>
    %1204 = vector.broadcast %1203 : vector<1x32xf32> to vector<9x32xf32>
    %1205 = arith.mulf %1195, %1204 : vector<9x32xf32>
    %1206 = vector.broadcast %846 : vector<1x32xf32> to vector<9x32xf32>
    %1207 = arith.mulf %1205, %1206 : vector<9x32xf32>
    %1208 = vector.broadcast %848 : vector<1x32xf32> to vector<9x32xf32>
    %1209 = arith.addf %1207, %1208 : vector<9x32xf32>
    %cst_378 = arith.constant dense<0.000000e+00> : vector<9x32xf32>
    %1210 = tpu.matmul %816, %818, %cst_378 {dimension_numbers = #tpu.dot_dimension_numbers<[1], [0], [0], [1], [0, 0, 1, 1], [], []>} : vector<9x32xf32>, vector<32x32xf32>, vector<9x32xf32> -> vector<9x32xf32>
    %1211 = vector.broadcast %820 : vector<1x32xf32> to vector<9x32xf32>
    %1212 = arith.addf %1210, %1211 : vector<9x32xf32>
    %cst_379 = arith.constant dense<0.000000e+00> : vector<9x32xf32>
    %1213 = tpu.matmul %816, %822, %cst_379 {dimension_numbers = #tpu.dot_dimension_numbers<[1], [0], [0], [1], [0, 0, 1, 1], [], []>} : vector<9x32xf32>, vector<32x32xf32>, vector<9x32xf32> -> vector<9x32xf32>
    %1214 = vector.broadcast %824 : vector<1x32xf32> to vector<9x32xf32>
    %1215 = arith.addf %1213, %1214 : vector<9x32xf32>
    %cst_380 = arith.constant dense<0.000000e+00> : vector<9x32xf32>
    %1216 = tpu.matmul %816, %826, %cst_380 {dimension_numbers = #tpu.dot_dimension_numbers<[1], [0], [0], [1], [0, 0, 1, 1], [], []>} : vector<9x32xf32>, vector<32x32xf32>, vector<9x32xf32> -> vector<9x32xf32>
    %1217 = vector.broadcast %828 : vector<1x32xf32> to vector<9x32xf32>
    %1218 = arith.addf %1216, %1217 : vector<9x32xf32>
    %1219 = vector.extract_strided_slice %1212 {offsets = [0, 0], sizes = [9, 8], strides = [1, 1]} : vector<9x32xf32> to vector<9x8xf32>
    %cst_381 = arith.constant 0.353553385 : f32
    %1220 = vector.broadcast %cst_381 : f32 to vector<9x8xf32>
    %1221 = arith.mulf %1219, %1220 : vector<9x8xf32>
    %1222 = vector.extract_strided_slice %1215 {offsets = [0, 0], sizes = [9, 8], strides = [1, 1]} : vector<9x32xf32> to vector<9x8xf32>
    %1223 = vector.extract_strided_slice %1218 {offsets = [0, 0], sizes = [9, 8], strides = [1, 1]} : vector<9x32xf32> to vector<9x8xf32>
    %1224 = tpu.transpose %1222, [1, 0] : vector<9x8xf32> -> vector<8x9xf32>
    %cst_382 = arith.constant dense<0.000000e+00> : vector<9x9xf32>
    %1225 = tpu.matmul %1221, %1224, %cst_382 {dimension_numbers = #tpu.dot_dimension_numbers<[1], [0], [0], [1], [0, 0, 1, 1], [], []>} : vector<9x8xf32>, vector<8x9xf32>, vector<9x9xf32> -> vector<9x9xf32>
    %cst_383 = arith.constant dense<0.000000e+00> : vector<9x5xf32>
    %1226 = tpu.matmul %1221, %0, %cst_383 {dimension_numbers = #tpu.dot_dimension_numbers<[1], [0], [0], [1], [0, 0, 1, 1], [], []>} : vector<9x8xf32>, vector<8x5xf32>, vector<9x5xf32> -> vector<9x5xf32>
    %1227 = vector.extract_strided_slice %1226 {offsets = [0, 1], sizes = [9, 1], strides = [1, 1]} : vector<9x5xf32> to vector<9x1xf32>
    %1228 = vector.broadcast %1227 : vector<9x1xf32> to vector<9x9xf32>
    %1229 = arith.mulf %1228, %2 : vector<9x9xf32>
    %1230 = arith.addf %1225, %1229 : vector<9x9xf32>
    %1231 = vector.extract_strided_slice %1226 {offsets = [0, 2], sizes = [9, 1], strides = [1, 1]} : vector<9x5xf32> to vector<9x1xf32>
    %1232 = vector.broadcast %1231 : vector<9x1xf32> to vector<9x9xf32>
    %1233 = arith.mulf %1232, %4 : vector<9x9xf32>
    %1234 = arith.addf %1230, %1233 : vector<9x9xf32>
    %1235 = vector.extract_strided_slice %1226 {offsets = [0, 3], sizes = [9, 1], strides = [1, 1]} : vector<9x5xf32> to vector<9x1xf32>
    %1236 = vector.broadcast %1235 : vector<9x1xf32> to vector<9x9xf32>
    %1237 = arith.mulf %1236, %6 : vector<9x9xf32>
    %1238 = arith.addf %1234, %1237 : vector<9x9xf32>
    %1239 = vector.extract_strided_slice %1226 {offsets = [0, 4], sizes = [9, 1], strides = [1, 1]} : vector<9x5xf32> to vector<9x1xf32>
    %1240 = vector.broadcast %1239 : vector<9x1xf32> to vector<9x9xf32>
    %1241 = arith.mulf %1240, %8 : vector<9x9xf32>
    %1242 = arith.addf %1238, %1241 : vector<9x9xf32>
    %1243 = arith.addf %1242, %16 : vector<9x9xf32>
    %cst_384 = arith.constant dense<0xFF800000> : vector<9xf32>
    %1244 = vector.multi_reduction <maximumf>, %1243, %cst_384 [1] : vector<9x9xf32> to vector<9xf32>
    %1245 = vector.shape_cast %1244 : vector<9xf32> to vector<9x1xf32>
    %1246 = vector.broadcast %1245 : vector<9x1xf32> to vector<9x9xf32>
    %1247 = arith.subf %1243, %1246 : vector<9x9xf32>
    %1248 = math.exp %1247 : vector<9x9xf32>
    %cst_385 = arith.constant dense<0.000000e+00> : vector<9xf32>
    %1249 = vector.multi_reduction <add>, %1248, %cst_385 [1] : vector<9x9xf32> to vector<9xf32>
    %1250 = vector.shape_cast %1249 : vector<9xf32> to vector<9x1xf32>
    %1251 = tpu.reciprocal %1250 {approx = true} : vector<9x1xf32> -> vector<9x1xf32>
    %1252 = vector.broadcast %1251 : vector<9x1xf32> to vector<9x9xf32>
    %1253 = arith.mulf %1248, %1252 : vector<9x9xf32>
    %cst_386 = arith.constant dense<0.000000e+00> : vector<9x8xf32>
    %1254 = tpu.matmul %1253, %1223, %cst_386 {dimension_numbers = #tpu.dot_dimension_numbers<[1], [0], [0], [1], [0, 0, 1, 1], [], []>} : vector<9x9xf32>, vector<9x8xf32>, vector<9x8xf32> -> vector<9x8xf32>
    %1255 = arith.mulf %1253, %2 : vector<9x9xf32>
    %cst_387 = arith.constant dense<0.000000e+00> : vector<9xf32>
    %1256 = vector.multi_reduction <add>, %1255, %cst_387 [1] : vector<9x9xf32> to vector<9xf32>
    %1257 = vector.shape_cast %1256 : vector<9xf32> to vector<9x1xf32>
    %1258 = vector.broadcast %1257 : vector<9x1xf32> to vector<9x8xf32>
    %1259 = vector.broadcast %9 : vector<1x8xf32> to vector<9x8xf32>
    %1260 = arith.mulf %1258, %1259 : vector<9x8xf32>
    %1261 = arith.addf %1254, %1260 : vector<9x8xf32>
    %1262 = arith.mulf %1253, %4 : vector<9x9xf32>
    %cst_388 = arith.constant dense<0.000000e+00> : vector<9xf32>
    %1263 = vector.multi_reduction <add>, %1262, %cst_388 [1] : vector<9x9xf32> to vector<9xf32>
    %1264 = vector.shape_cast %1263 : vector<9xf32> to vector<9x1xf32>
    %1265 = vector.broadcast %1264 : vector<9x1xf32> to vector<9x8xf32>
    %1266 = vector.broadcast %10 : vector<1x8xf32> to vector<9x8xf32>
    %1267 = arith.mulf %1265, %1266 : vector<9x8xf32>
    %1268 = arith.addf %1261, %1267 : vector<9x8xf32>
    %1269 = arith.mulf %1253, %6 : vector<9x9xf32>
    %cst_389 = arith.constant dense<0.000000e+00> : vector<9xf32>
    %1270 = vector.multi_reduction <add>, %1269, %cst_389 [1] : vector<9x9xf32> to vector<9xf32>
    %1271 = vector.shape_cast %1270 : vector<9xf32> to vector<9x1xf32>
    %1272 = vector.broadcast %1271 : vector<9x1xf32> to vector<9x8xf32>
    %1273 = vector.broadcast %11 : vector<1x8xf32> to vector<9x8xf32>
    %1274 = arith.mulf %1272, %1273 : vector<9x8xf32>
    %1275 = arith.addf %1268, %1274 : vector<9x8xf32>
    %1276 = arith.mulf %1253, %8 : vector<9x9xf32>
    %cst_390 = arith.constant dense<0.000000e+00> : vector<9xf32>
    %1277 = vector.multi_reduction <add>, %1276, %cst_390 [1] : vector<9x9xf32> to vector<9xf32>
    %1278 = vector.shape_cast %1277 : vector<9xf32> to vector<9x1xf32>
    %1279 = vector.broadcast %1278 : vector<9x1xf32> to vector<9x8xf32>
    %1280 = vector.broadcast %12 : vector<1x8xf32> to vector<9x8xf32>
    %1281 = arith.mulf %1279, %1280 : vector<9x8xf32>
    %1282 = arith.addf %1275, %1281 : vector<9x8xf32>
    %c0_391 = arith.constant 0 : index
    %c0_392 = arith.constant 0 : index
    %1283 = vector.load %arg31[%c0_391, %c0_392] : memref<9x32xf32, #tpu.memory_space<vmem>>, vector<9x8xf32>
    tpu.vector_store %arg31[%c0_391, %c0_392], %1282 {strides = array<i32>} : memref<9x32xf32, #tpu.memory_space<vmem>>, vector<9x8xf32>,
    %1284 = vector.extract_strided_slice %1212 {offsets = [0, 8], sizes = [9, 8], strides = [1, 1]} : vector<9x32xf32> to vector<9x8xf32>
    %cst_393 = arith.constant 0.353553385 : f32
    %1285 = vector.broadcast %cst_393 : f32 to vector<9x8xf32>
    %1286 = arith.mulf %1284, %1285 : vector<9x8xf32>
    %1287 = vector.extract_strided_slice %1215 {offsets = [0, 8], sizes = [9, 8], strides = [1, 1]} : vector<9x32xf32> to vector<9x8xf32>
    %1288 = vector.extract_strided_slice %1218 {offsets = [0, 8], sizes = [9, 8], strides = [1, 1]} : vector<9x32xf32> to vector<9x8xf32>
    %1289 = tpu.transpose %1287, [1, 0] : vector<9x8xf32> -> vector<8x9xf32>
    %cst_394 = arith.constant dense<0.000000e+00> : vector<9x9xf32>
    %1290 = tpu.matmul %1286, %1289, %cst_394 {dimension_numbers = #tpu.dot_dimension_numbers<[1], [0], [0], [1], [0, 0, 1, 1], [], []>} : vector<9x8xf32>, vector<8x9xf32>, vector<9x9xf32> -> vector<9x9xf32>
    %cst_395 = arith.constant dense<0.000000e+00> : vector<9x5xf32>
    %1291 = tpu.matmul %1286, %0, %cst_395 {dimension_numbers = #tpu.dot_dimension_numbers<[1], [0], [0], [1], [0, 0, 1, 1], [], []>} : vector<9x8xf32>, vector<8x5xf32>, vector<9x5xf32> -> vector<9x5xf32>
    %1292 = vector.extract_strided_slice %1291 {offsets = [0, 1], sizes = [9, 1], strides = [1, 1]} : vector<9x5xf32> to vector<9x1xf32>
    %1293 = vector.broadcast %1292 : vector<9x1xf32> to vector<9x9xf32>
    %1294 = arith.mulf %1293, %2 : vector<9x9xf32>
    %1295 = arith.addf %1290, %1294 : vector<9x9xf32>
    %1296 = vector.extract_strided_slice %1291 {offsets = [0, 2], sizes = [9, 1], strides = [1, 1]} : vector<9x5xf32> to vector<9x1xf32>
    %1297 = vector.broadcast %1296 : vector<9x1xf32> to vector<9x9xf32>
    %1298 = arith.mulf %1297, %4 : vector<9x9xf32>
    %1299 = arith.addf %1295, %1298 : vector<9x9xf32>
    %1300 = vector.extract_strided_slice %1291 {offsets = [0, 3], sizes = [9, 1], strides = [1, 1]} : vector<9x5xf32> to vector<9x1xf32>
    %1301 = vector.broadcast %1300 : vector<9x1xf32> to vector<9x9xf32>
    %1302 = arith.mulf %1301, %6 : vector<9x9xf32>
    %1303 = arith.addf %1299, %1302 : vector<9x9xf32>
    %1304 = vector.extract_strided_slice %1291 {offsets = [0, 4], sizes = [9, 1], strides = [1, 1]} : vector<9x5xf32> to vector<9x1xf32>
    %1305 = vector.broadcast %1304 : vector<9x1xf32> to vector<9x9xf32>
    %1306 = arith.mulf %1305, %8 : vector<9x9xf32>
    %1307 = arith.addf %1303, %1306 : vector<9x9xf32>
    %1308 = arith.addf %1307, %16 : vector<9x9xf32>
    %cst_396 = arith.constant dense<0xFF800000> : vector<9xf32>
    %1309 = vector.multi_reduction <maximumf>, %1308, %cst_396 [1] : vector<9x9xf32> to vector<9xf32>
    %1310 = vector.shape_cast %1309 : vector<9xf32> to vector<9x1xf32>
    %1311 = vector.broadcast %1310 : vector<9x1xf32> to vector<9x9xf32>
    %1312 = arith.subf %1308, %1311 : vector<9x9xf32>
    %1313 = math.exp %1312 : vector<9x9xf32>
    %cst_397 = arith.constant dense<0.000000e+00> : vector<9xf32>
    %1314 = vector.multi_reduction <add>, %1313, %cst_397 [1] : vector<9x9xf32> to vector<9xf32>
    %1315 = vector.shape_cast %1314 : vector<9xf32> to vector<9x1xf32>
    %1316 = tpu.reciprocal %1315 {approx = true} : vector<9x1xf32> -> vector<9x1xf32>
    %1317 = vector.broadcast %1316 : vector<9x1xf32> to vector<9x9xf32>
    %1318 = arith.mulf %1313, %1317 : vector<9x9xf32>
    %cst_398 = arith.constant dense<0.000000e+00> : vector<9x8xf32>
    %1319 = tpu.matmul %1318, %1288, %cst_398 {dimension_numbers = #tpu.dot_dimension_numbers<[1], [0], [0], [1], [0, 0, 1, 1], [], []>} : vector<9x9xf32>, vector<9x8xf32>, vector<9x8xf32> -> vector<9x8xf32>
    %1320 = arith.mulf %1318, %2 : vector<9x9xf32>
    %cst_399 = arith.constant dense<0.000000e+00> : vector<9xf32>
    %1321 = vector.multi_reduction <add>, %1320, %cst_399 [1] : vector<9x9xf32> to vector<9xf32>
    %1322 = vector.shape_cast %1321 : vector<9xf32> to vector<9x1xf32>
    %1323 = vector.broadcast %1322 : vector<9x1xf32> to vector<9x8xf32>
    %1324 = vector.broadcast %9 : vector<1x8xf32> to vector<9x8xf32>
    %1325 = arith.mulf %1323, %1324 : vector<9x8xf32>
    %1326 = arith.addf %1319, %1325 : vector<9x8xf32>
    %1327 = arith.mulf %1318, %4 : vector<9x9xf32>
    %cst_400 = arith.constant dense<0.000000e+00> : vector<9xf32>
    %1328 = vector.multi_reduction <add>, %1327, %cst_400 [1] : vector<9x9xf32> to vector<9xf32>
    %1329 = vector.shape_cast %1328 : vector<9xf32> to vector<9x1xf32>
    %1330 = vector.broadcast %1329 : vector<9x1xf32> to vector<9x8xf32>
    %1331 = vector.broadcast %10 : vector<1x8xf32> to vector<9x8xf32>
    %1332 = arith.mulf %1330, %1331 : vector<9x8xf32>
    %1333 = arith.addf %1326, %1332 : vector<9x8xf32>
    %1334 = arith.mulf %1318, %6 : vector<9x9xf32>
    %cst_401 = arith.constant dense<0.000000e+00> : vector<9xf32>
    %1335 = vector.multi_reduction <add>, %1334, %cst_401 [1] : vector<9x9xf32> to vector<9xf32>
    %1336 = vector.shape_cast %1335 : vector<9xf32> to vector<9x1xf32>
    %1337 = vector.broadcast %1336 : vector<9x1xf32> to vector<9x8xf32>
    %1338 = vector.broadcast %11 : vector<1x8xf32> to vector<9x8xf32>
    %1339 = arith.mulf %1337, %1338 : vector<9x8xf32>
    %1340 = arith.addf %1333, %1339 : vector<9x8xf32>
    %1341 = arith.mulf %1318, %8 : vector<9x9xf32>
    %cst_402 = arith.constant dense<0.000000e+00> : vector<9xf32>
    %1342 = vector.multi_reduction <add>, %1341, %cst_402 [1] : vector<9x9xf32> to vector<9xf32>
    %1343 = vector.shape_cast %1342 : vector<9xf32> to vector<9x1xf32>
    %1344 = vector.broadcast %1343 : vector<9x1xf32> to vector<9x8xf32>
    %1345 = vector.broadcast %12 : vector<1x8xf32> to vector<9x8xf32>
    %1346 = arith.mulf %1344, %1345 : vector<9x8xf32>
    %1347 = arith.addf %1340, %1346 : vector<9x8xf32>
    %c0_403 = arith.constant 0 : index
    %c8_404 = arith.constant 8 : index
    %1348 = vector.load %arg31[%c0_403, %c8_404] : memref<9x32xf32, #tpu.memory_space<vmem>>, vector<9x8xf32>
    tpu.vector_store %arg31[%c0_403, %c8_404], %1347 {strides = array<i32>} : memref<9x32xf32, #tpu.memory_space<vmem>>, vector<9x8xf32>,
    %1349 = vector.extract_strided_slice %1212 {offsets = [0, 16], sizes = [9, 8], strides = [1, 1]} : vector<9x32xf32> to vector<9x8xf32>
    %cst_405 = arith.constant 0.353553385 : f32
    %1350 = vector.broadcast %cst_405 : f32 to vector<9x8xf32>
    %1351 = arith.mulf %1349, %1350 : vector<9x8xf32>
    %1352 = vector.extract_strided_slice %1215 {offsets = [0, 16], sizes = [9, 8], strides = [1, 1]} : vector<9x32xf32> to vector<9x8xf32>
    %1353 = vector.extract_strided_slice %1218 {offsets = [0, 16], sizes = [9, 8], strides = [1, 1]} : vector<9x32xf32> to vector<9x8xf32>
    %1354 = tpu.transpose %1352, [1, 0] : vector<9x8xf32> -> vector<8x9xf32>
    %cst_406 = arith.constant dense<0.000000e+00> : vector<9x9xf32>
    %1355 = tpu.matmul %1351, %1354, %cst_406 {dimension_numbers = #tpu.dot_dimension_numbers<[1], [0], [0], [1], [0, 0, 1, 1], [], []>} : vector<9x8xf32>, vector<8x9xf32>, vector<9x9xf32> -> vector<9x9xf32>
    %cst_407 = arith.constant dense<0.000000e+00> : vector<9x5xf32>
    %1356 = tpu.matmul %1351, %0, %cst_407 {dimension_numbers = #tpu.dot_dimension_numbers<[1], [0], [0], [1], [0, 0, 1, 1], [], []>} : vector<9x8xf32>, vector<8x5xf32>, vector<9x5xf32> -> vector<9x5xf32>
    %1357 = vector.extract_strided_slice %1356 {offsets = [0, 1], sizes = [9, 1], strides = [1, 1]} : vector<9x5xf32> to vector<9x1xf32>
    %1358 = vector.broadcast %1357 : vector<9x1xf32> to vector<9x9xf32>
    %1359 = arith.mulf %1358, %2 : vector<9x9xf32>
    %1360 = arith.addf %1355, %1359 : vector<9x9xf32>
    %1361 = vector.extract_strided_slice %1356 {offsets = [0, 2], sizes = [9, 1], strides = [1, 1]} : vector<9x5xf32> to vector<9x1xf32>
    %1362 = vector.broadcast %1361 : vector<9x1xf32> to vector<9x9xf32>
    %1363 = arith.mulf %1362, %4 : vector<9x9xf32>
    %1364 = arith.addf %1360, %1363 : vector<9x9xf32>
    %1365 = vector.extract_strided_slice %1356 {offsets = [0, 3], sizes = [9, 1], strides = [1, 1]} : vector<9x5xf32> to vector<9x1xf32>
    %1366 = vector.broadcast %1365 : vector<9x1xf32> to vector<9x9xf32>
    %1367 = arith.mulf %1366, %6 : vector<9x9xf32>
    %1368 = arith.addf %1364, %1367 : vector<9x9xf32>
    %1369 = vector.extract_strided_slice %1356 {offsets = [0, 4], sizes = [9, 1], strides = [1, 1]} : vector<9x5xf32> to vector<9x1xf32>
    %1370 = vector.broadcast %1369 : vector<9x1xf32> to vector<9x9xf32>
    %1371 = arith.mulf %1370, %8 : vector<9x9xf32>
    %1372 = arith.addf %1368, %1371 : vector<9x9xf32>
    %1373 = arith.addf %1372, %16 : vector<9x9xf32>
    %cst_408 = arith.constant dense<0xFF800000> : vector<9xf32>
    %1374 = vector.multi_reduction <maximumf>, %1373, %cst_408 [1] : vector<9x9xf32> to vector<9xf32>
    %1375 = vector.shape_cast %1374 : vector<9xf32> to vector<9x1xf32>
    %1376 = vector.broadcast %1375 : vector<9x1xf32> to vector<9x9xf32>
    %1377 = arith.subf %1373, %1376 : vector<9x9xf32>
    %1378 = math.exp %1377 : vector<9x9xf32>
    %cst_409 = arith.constant dense<0.000000e+00> : vector<9xf32>
    %1379 = vector.multi_reduction <add>, %1378, %cst_409 [1] : vector<9x9xf32> to vector<9xf32>
    %1380 = vector.shape_cast %1379 : vector<9xf32> to vector<9x1xf32>
    %1381 = tpu.reciprocal %1380 {approx = true} : vector<9x1xf32> -> vector<9x1xf32>
    %1382 = vector.broadcast %1381 : vector<9x1xf32> to vector<9x9xf32>
    %1383 = arith.mulf %1378, %1382 : vector<9x9xf32>
    %cst_410 = arith.constant dense<0.000000e+00> : vector<9x8xf32>
    %1384 = tpu.matmul %1383, %1353, %cst_410 {dimension_numbers = #tpu.dot_dimension_numbers<[1], [0], [0], [1], [0, 0, 1, 1], [], []>} : vector<9x9xf32>, vector<9x8xf32>, vector<9x8xf32> -> vector<9x8xf32>
    %1385 = arith.mulf %1383, %2 : vector<9x9xf32>
    %cst_411 = arith.constant dense<0.000000e+00> : vector<9xf32>
    %1386 = vector.multi_reduction <add>, %1385, %cst_411 [1] : vector<9x9xf32> to vector<9xf32>
    %1387 = vector.shape_cast %1386 : vector<9xf32> to vector<9x1xf32>
    %1388 = vector.broadcast %1387 : vector<9x1xf32> to vector<9x8xf32>
    %1389 = vector.broadcast %9 : vector<1x8xf32> to vector<9x8xf32>
    %1390 = arith.mulf %1388, %1389 : vector<9x8xf32>
    %1391 = arith.addf %1384, %1390 : vector<9x8xf32>
    %1392 = arith.mulf %1383, %4 : vector<9x9xf32>
    %cst_412 = arith.constant dense<0.000000e+00> : vector<9xf32>
    %1393 = vector.multi_reduction <add>, %1392, %cst_412 [1] : vector<9x9xf32> to vector<9xf32>
    %1394 = vector.shape_cast %1393 : vector<9xf32> to vector<9x1xf32>
    %1395 = vector.broadcast %1394 : vector<9x1xf32> to vector<9x8xf32>
    %1396 = vector.broadcast %10 : vector<1x8xf32> to vector<9x8xf32>
    %1397 = arith.mulf %1395, %1396 : vector<9x8xf32>
    %1398 = arith.addf %1391, %1397 : vector<9x8xf32>
    %1399 = arith.mulf %1383, %6 : vector<9x9xf32>
    %cst_413 = arith.constant dense<0.000000e+00> : vector<9xf32>
    %1400 = vector.multi_reduction <add>, %1399, %cst_413 [1] : vector<9x9xf32> to vector<9xf32>
    %1401 = vector.shape_cast %1400 : vector<9xf32> to vector<9x1xf32>
    %1402 = vector.broadcast %1401 : vector<9x1xf32> to vector<9x8xf32>
    %1403 = vector.broadcast %11 : vector<1x8xf32> to vector<9x8xf32>
    %1404 = arith.mulf %1402, %1403 : vector<9x8xf32>
    %1405 = arith.addf %1398, %1404 : vector<9x8xf32>
    %1406 = arith.mulf %1383, %8 : vector<9x9xf32>
    %cst_414 = arith.constant dense<0.000000e+00> : vector<9xf32>
    %1407 = vector.multi_reduction <add>, %1406, %cst_414 [1] : vector<9x9xf32> to vector<9xf32>
    %1408 = vector.shape_cast %1407 : vector<9xf32> to vector<9x1xf32>
    %1409 = vector.broadcast %1408 : vector<9x1xf32> to vector<9x8xf32>
    %1410 = vector.broadcast %12 : vector<1x8xf32> to vector<9x8xf32>
    %1411 = arith.mulf %1409, %1410 : vector<9x8xf32>
    %1412 = arith.addf %1405, %1411 : vector<9x8xf32>
    %c0_415 = arith.constant 0 : index
    %c16_416 = arith.constant 16 : index
    %1413 = vector.load %arg31[%c0_415, %c16_416] : memref<9x32xf32, #tpu.memory_space<vmem>>, vector<9x8xf32>
    tpu.vector_store %arg31[%c0_415, %c16_416], %1412 {strides = array<i32>} : memref<9x32xf32, #tpu.memory_space<vmem>>, vector<9x8xf32>,
    %1414 = vector.extract_strided_slice %1212 {offsets = [0, 24], sizes = [9, 8], strides = [1, 1]} : vector<9x32xf32> to vector<9x8xf32>
    %cst_417 = arith.constant 0.353553385 : f32
    %1415 = vector.broadcast %cst_417 : f32 to vector<9x8xf32>
    %1416 = arith.mulf %1414, %1415 : vector<9x8xf32>
    %1417 = vector.extract_strided_slice %1215 {offsets = [0, 24], sizes = [9, 8], strides = [1, 1]} : vector<9x32xf32> to vector<9x8xf32>
    %1418 = vector.extract_strided_slice %1218 {offsets = [0, 24], sizes = [9, 8], strides = [1, 1]} : vector<9x32xf32> to vector<9x8xf32>
    %1419 = tpu.transpose %1417, [1, 0] : vector<9x8xf32> -> vector<8x9xf32>
    %cst_418 = arith.constant dense<0.000000e+00> : vector<9x9xf32>
    %1420 = tpu.matmul %1416, %1419, %cst_418 {dimension_numbers = #tpu.dot_dimension_numbers<[1], [0], [0], [1], [0, 0, 1, 1], [], []>} : vector<9x8xf32>, vector<8x9xf32>, vector<9x9xf32> -> vector<9x9xf32>
    %cst_419 = arith.constant dense<0.000000e+00> : vector<9x5xf32>
    %1421 = tpu.matmul %1416, %0, %cst_419 {dimension_numbers = #tpu.dot_dimension_numbers<[1], [0], [0], [1], [0, 0, 1, 1], [], []>} : vector<9x8xf32>, vector<8x5xf32>, vector<9x5xf32> -> vector<9x5xf32>
    %1422 = vector.extract_strided_slice %1421 {offsets = [0, 1], sizes = [9, 1], strides = [1, 1]} : vector<9x5xf32> to vector<9x1xf32>
    %1423 = vector.broadcast %1422 : vector<9x1xf32> to vector<9x9xf32>
    %1424 = arith.mulf %1423, %2 : vector<9x9xf32>
    %1425 = arith.addf %1420, %1424 : vector<9x9xf32>
    %1426 = vector.extract_strided_slice %1421 {offsets = [0, 2], sizes = [9, 1], strides = [1, 1]} : vector<9x5xf32> to vector<9x1xf32>
    %1427 = vector.broadcast %1426 : vector<9x1xf32> to vector<9x9xf32>
    %1428 = arith.mulf %1427, %4 : vector<9x9xf32>
    %1429 = arith.addf %1425, %1428 : vector<9x9xf32>
    %1430 = vector.extract_strided_slice %1421 {offsets = [0, 3], sizes = [9, 1], strides = [1, 1]} : vector<9x5xf32> to vector<9x1xf32>
    %1431 = vector.broadcast %1430 : vector<9x1xf32> to vector<9x9xf32>
    %1432 = arith.mulf %1431, %6 : vector<9x9xf32>
    %1433 = arith.addf %1429, %1432 : vector<9x9xf32>
    %1434 = vector.extract_strided_slice %1421 {offsets = [0, 4], sizes = [9, 1], strides = [1, 1]} : vector<9x5xf32> to vector<9x1xf32>
    %1435 = vector.broadcast %1434 : vector<9x1xf32> to vector<9x9xf32>
    %1436 = arith.mulf %1435, %8 : vector<9x9xf32>
    %1437 = arith.addf %1433, %1436 : vector<9x9xf32>
    %1438 = arith.addf %1437, %16 : vector<9x9xf32>
    %cst_420 = arith.constant dense<0xFF800000> : vector<9xf32>
    %1439 = vector.multi_reduction <maximumf>, %1438, %cst_420 [1] : vector<9x9xf32> to vector<9xf32>
    %1440 = vector.shape_cast %1439 : vector<9xf32> to vector<9x1xf32>
    %1441 = vector.broadcast %1440 : vector<9x1xf32> to vector<9x9xf32>
    %1442 = arith.subf %1438, %1441 : vector<9x9xf32>
    %1443 = math.exp %1442 : vector<9x9xf32>
    %cst_421 = arith.constant dense<0.000000e+00> : vector<9xf32>
    %1444 = vector.multi_reduction <add>, %1443, %cst_421 [1] : vector<9x9xf32> to vector<9xf32>
    %1445 = vector.shape_cast %1444 : vector<9xf32> to vector<9x1xf32>
    %1446 = tpu.reciprocal %1445 {approx = true} : vector<9x1xf32> -> vector<9x1xf32>
    %1447 = vector.broadcast %1446 : vector<9x1xf32> to vector<9x9xf32>
    %1448 = arith.mulf %1443, %1447 : vector<9x9xf32>
    %cst_422 = arith.constant dense<0.000000e+00> : vector<9x8xf32>
    %1449 = tpu.matmul %1448, %1418, %cst_422 {dimension_numbers = #tpu.dot_dimension_numbers<[1], [0], [0], [1], [0, 0, 1, 1], [], []>} : vector<9x9xf32>, vector<9x8xf32>, vector<9x8xf32> -> vector<9x8xf32>
    %1450 = arith.mulf %1448, %2 : vector<9x9xf32>
    %cst_423 = arith.constant dense<0.000000e+00> : vector<9xf32>
    %1451 = vector.multi_reduction <add>, %1450, %cst_423 [1] : vector<9x9xf32> to vector<9xf32>
    %1452 = vector.shape_cast %1451 : vector<9xf32> to vector<9x1xf32>
    %1453 = vector.broadcast %1452 : vector<9x1xf32> to vector<9x8xf32>
    %1454 = vector.broadcast %9 : vector<1x8xf32> to vector<9x8xf32>
    %1455 = arith.mulf %1453, %1454 : vector<9x8xf32>
    %1456 = arith.addf %1449, %1455 : vector<9x8xf32>
    %1457 = arith.mulf %1448, %4 : vector<9x9xf32>
    %cst_424 = arith.constant dense<0.000000e+00> : vector<9xf32>
    %1458 = vector.multi_reduction <add>, %1457, %cst_424 [1] : vector<9x9xf32> to vector<9xf32>
    %1459 = vector.shape_cast %1458 : vector<9xf32> to vector<9x1xf32>
    %1460 = vector.broadcast %1459 : vector<9x1xf32> to vector<9x8xf32>
    %1461 = vector.broadcast %10 : vector<1x8xf32> to vector<9x8xf32>
    %1462 = arith.mulf %1460, %1461 : vector<9x8xf32>
    %1463 = arith.addf %1456, %1462 : vector<9x8xf32>
    %1464 = arith.mulf %1448, %6 : vector<9x9xf32>
    %cst_425 = arith.constant dense<0.000000e+00> : vector<9xf32>
    %1465 = vector.multi_reduction <add>, %1464, %cst_425 [1] : vector<9x9xf32> to vector<9xf32>
    %1466 = vector.shape_cast %1465 : vector<9xf32> to vector<9x1xf32>
    %1467 = vector.broadcast %1466 : vector<9x1xf32> to vector<9x8xf32>
    %1468 = vector.broadcast %11 : vector<1x8xf32> to vector<9x8xf32>
    %1469 = arith.mulf %1467, %1468 : vector<9x8xf32>
    %1470 = arith.addf %1463, %1469 : vector<9x8xf32>
    %1471 = arith.mulf %1448, %8 : vector<9x9xf32>
    %cst_426 = arith.constant dense<0.000000e+00> : vector<9xf32>
    %1472 = vector.multi_reduction <add>, %1471, %cst_426 [1] : vector<9x9xf32> to vector<9xf32>
    %1473 = vector.shape_cast %1472 : vector<9xf32> to vector<9x1xf32>
    %1474 = vector.broadcast %1473 : vector<9x1xf32> to vector<9x8xf32>
    %1475 = vector.broadcast %12 : vector<1x8xf32> to vector<9x8xf32>
    %1476 = arith.mulf %1474, %1475 : vector<9x8xf32>
    %1477 = arith.addf %1470, %1476 : vector<9x8xf32>
    %c0_427 = arith.constant 0 : index
    %c24_428 = arith.constant 24 : index
    %1478 = vector.load %arg31[%c0_427, %c24_428] : memref<9x32xf32, #tpu.memory_space<vmem>>, vector<9x8xf32>
    tpu.vector_store %arg31[%c0_427, %c24_428], %1477 {strides = array<i32>} : memref<9x32xf32, #tpu.memory_space<vmem>>, vector<9x8xf32>,
    %c0_429 = arith.constant 0 : index
    %c0_430 = arith.constant 0 : index
    %1479 = vector.load %arg31[%c0_429, %c0_430] : memref<9x32xf32, #tpu.memory_space<vmem>>, vector<9x32xf32>
    %cst_431 = arith.constant dense<0.000000e+00> : vector<9x32xf32>
    %1480 = tpu.matmul %1479, %830, %cst_431 {dimension_numbers = #tpu.dot_dimension_numbers<[1], [0], [0], [1], [0, 0, 1, 1], [], []>} : vector<9x32xf32>, vector<32x32xf32>, vector<9x32xf32> -> vector<9x32xf32>
    %1481 = vector.broadcast %832 : vector<1x32xf32> to vector<9x32xf32>
    %1482 = arith.addf %1480, %1481 : vector<9x32xf32>
    %1483 = arith.addf %1482, %816 : vector<9x32xf32>
    %cst_432 = arith.constant dense<0.000000e+00> : vector<32xf32>
    %1484 = vector.multi_reduction <add>, %1483, %cst_432 [0] : vector<9x32xf32> to vector<32xf32>
    %1485 = vector.shape_cast %1484 : vector<32xf32> to vector<1x32xf32>
    %cst_433 = arith.constant 9.000000e+00 : f32
    %1486 = vector.broadcast %cst_433 : f32 to vector<1x32xf32>
    %1487 = arith.divf %1485, %1486 : vector<1x32xf32>
    %1488 = vector.broadcast %1487 : vector<1x32xf32> to vector<9x32xf32>
    %1489 = arith.subf %1483, %1488 : vector<9x32xf32>
    %1490 = arith.mulf %1489, %1489 : vector<9x32xf32>
    %cst_434 = arith.constant dense<0.000000e+00> : vector<32xf32>
    %1491 = vector.multi_reduction <add>, %1490, %cst_434 [0] : vector<9x32xf32> to vector<32xf32>
    %1492 = vector.shape_cast %1491 : vector<32xf32> to vector<1x32xf32>
    %cst_435 = arith.constant 9.000000e+00 : f32
    %1493 = vector.broadcast %cst_435 : f32 to vector<1x32xf32>
    %1494 = arith.divf %1492, %1493 : vector<1x32xf32>
    %cst_436 = arith.constant 9.99999996E-13 : f32
    %1495 = vector.broadcast %cst_436 : f32 to vector<1x32xf32>
    %1496 = arith.addf %1494, %1495 : vector<1x32xf32>
    %1497 = math.rsqrt %1496 : vector<1x32xf32>
    %1498 = vector.broadcast %1497 : vector<1x32xf32> to vector<9x32xf32>
    %1499 = arith.mulf %1489, %1498 : vector<9x32xf32>
    %1500 = vector.broadcast %842 : vector<1x32xf32> to vector<9x32xf32>
    %1501 = arith.mulf %1499, %1500 : vector<9x32xf32>
    %1502 = vector.broadcast %844 : vector<1x32xf32> to vector<9x32xf32>
    %1503 = arith.addf %1501, %1502 : vector<9x32xf32>
    %cst_437 = arith.constant dense<0.000000e+00> : vector<9x64xf32>
    %1504 = tpu.matmul %1503, %834, %cst_437 {dimension_numbers = #tpu.dot_dimension_numbers<[1], [0], [0], [1], [0, 0, 1, 1], [], []>} : vector<9x32xf32>, vector<32x64xf32>, vector<9x64xf32> -> vector<9x64xf32>
    %1505 = vector.broadcast %836 : vector<1x64xf32> to vector<9x64xf32>
    %1506 = arith.addf %1504, %1505 : vector<9x64xf32>
    %cst_438 = arith.constant 5.000000e-01 : f32
    %1507 = vector.broadcast %cst_438 : f32 to vector<9x64xf32>
    %1508 = arith.mulf %1507, %1506 : vector<9x64xf32>
    %cst_439 = arith.constant 0.707106769 : f32
    %1509 = vector.broadcast %cst_439 : f32 to vector<9x64xf32>
    %1510 = arith.mulf %1506, %1509 : vector<9x64xf32>
    %1511 = math.absf %1510 : vector<9x64xf32>
    %cst_440 = arith.constant 0.327591091 : f32
    %1512 = vector.broadcast %cst_440 : f32 to vector<9x64xf32>
    %1513 = arith.mulf %1512, %1511 : vector<9x64xf32>
    %cst_441 = arith.constant 1.000000e+00 : f32
    %1514 = vector.broadcast %cst_441 : f32 to vector<9x64xf32>
    %1515 = arith.addf %1514, %1513 : vector<9x64xf32>
    %cst_442 = arith.constant 1.000000e+00 : f32
    %1516 = vector.broadcast %cst_442 : f32 to vector<9x64xf32>
    %1517 = arith.divf %1516, %1515 : vector<9x64xf32>
    %cst_443 = arith.constant 1.06140542 : f32
    %1518 = vector.broadcast %cst_443 : f32 to vector<9x64xf32>
    %1519 = arith.mulf %1518, %1517 : vector<9x64xf32>
    %cst_444 = arith.constant -1.45315206 : f32
    %1520 = vector.broadcast %cst_444 : f32 to vector<9x64xf32>
    %1521 = arith.addf %1519, %1520 : vector<9x64xf32>
    %1522 = arith.mulf %1521, %1517 : vector<9x64xf32>
    %cst_445 = arith.constant 1.42141378 : f32
    %1523 = vector.broadcast %cst_445 : f32 to vector<9x64xf32>
    %1524 = arith.addf %1522, %1523 : vector<9x64xf32>
    %1525 = arith.mulf %1524, %1517 : vector<9x64xf32>
    %cst_446 = arith.constant -0.284496725 : f32
    %1526 = vector.broadcast %cst_446 : f32 to vector<9x64xf32>
    %1527 = arith.addf %1525, %1526 : vector<9x64xf32>
    %1528 = arith.mulf %1527, %1517 : vector<9x64xf32>
    %cst_447 = arith.constant 0.254829586 : f32
    %1529 = vector.broadcast %cst_447 : f32 to vector<9x64xf32>
    %1530 = arith.addf %1528, %1529 : vector<9x64xf32>
    %1531 = arith.mulf %1530, %1517 : vector<9x64xf32>
    %cst_448 = arith.constant 0.000000e+00 : f32
    %1532 = vector.broadcast %cst_448 : f32 to vector<9x64xf32>
    %1533 = arith.subf %1532, %1511 : vector<9x64xf32>
    %1534 = arith.mulf %1533, %1511 : vector<9x64xf32>
    %1535 = math.exp %1534 : vector<9x64xf32>
    %1536 = arith.mulf %1531, %1535 : vector<9x64xf32>
    %cst_449 = arith.constant 1.000000e+00 : f32
    %1537 = vector.broadcast %cst_449 : f32 to vector<9x64xf32>
    %1538 = arith.subf %1537, %1536 : vector<9x64xf32>
    %cst_450 = arith.constant 0.000000e+00 : f32
    %1539 = vector.broadcast %cst_450 : f32 to vector<9x64xf32>
    %1540 = arith.cmpf oge, %1510, %1539 : vector<9x64xf32>
    %cst_451 = arith.constant 0.000000e+00 : f32
    %1541 = vector.broadcast %cst_451 : f32 to vector<9x64xf32>
    %1542 = arith.subf %1541, %1538 : vector<9x64xf32>
    %1543 = arith.select %1540, %1538, %1542 : vector<9x64xi1>, vector<9x64xf32>
    %cst_452 = arith.constant 1.000000e+00 : f32
    %1544 = vector.broadcast %cst_452 : f32 to vector<9x64xf32>
    %1545 = arith.addf %1544, %1543 : vector<9x64xf32>
    %1546 = arith.mulf %1508, %1545 : vector<9x64xf32>
    %cst_453 = arith.constant dense<0.000000e+00> : vector<9x32xf32>
    %1547 = tpu.matmul %1546, %838, %cst_453 {dimension_numbers = #tpu.dot_dimension_numbers<[1], [0], [0], [1], [0, 0, 1, 1], [], []>} : vector<9x64xf32>, vector<64x32xf32>, vector<9x32xf32> -> vector<9x32xf32>
    %1548 = vector.broadcast %840 : vector<1x32xf32> to vector<9x32xf32>
    %1549 = arith.addf %1547, %1548 : vector<9x32xf32>
    %1550 = arith.addf %1549, %1503 : vector<9x32xf32>
    %cst_454 = arith.constant dense<0.000000e+00> : vector<32xf32>
    %1551 = vector.multi_reduction <add>, %1550, %cst_454 [0] : vector<9x32xf32> to vector<32xf32>
    %1552 = vector.shape_cast %1551 : vector<32xf32> to vector<1x32xf32>
    %cst_455 = arith.constant 9.000000e+00 : f32
    %1553 = vector.broadcast %cst_455 : f32 to vector<1x32xf32>
    %1554 = arith.divf %1552, %1553 : vector<1x32xf32>
    %1555 = vector.broadcast %1554 : vector<1x32xf32> to vector<9x32xf32>
    %1556 = arith.subf %1550, %1555 : vector<9x32xf32>
    %1557 = arith.mulf %1556, %1556 : vector<9x32xf32>
    %cst_456 = arith.constant dense<0.000000e+00> : vector<32xf32>
    %1558 = vector.multi_reduction <add>, %1557, %cst_456 [0] : vector<9x32xf32> to vector<32xf32>
    %1559 = vector.shape_cast %1558 : vector<32xf32> to vector<1x32xf32>
    %cst_457 = arith.constant 9.000000e+00 : f32
    %1560 = vector.broadcast %cst_457 : f32 to vector<1x32xf32>
    %1561 = arith.divf %1559, %1560 : vector<1x32xf32>
    %cst_458 = arith.constant 9.99999996E-13 : f32
    %1562 = vector.broadcast %cst_458 : f32 to vector<1x32xf32>
    %1563 = arith.addf %1561, %1562 : vector<1x32xf32>
    %1564 = math.rsqrt %1563 : vector<1x32xf32>
    %1565 = vector.broadcast %1564 : vector<1x32xf32> to vector<9x32xf32>
    %1566 = arith.mulf %1556, %1565 : vector<9x32xf32>
    %1567 = vector.broadcast %846 : vector<1x32xf32> to vector<9x32xf32>
    %1568 = arith.mulf %1566, %1567 : vector<9x32xf32>
    %1569 = vector.broadcast %848 : vector<1x32xf32> to vector<9x32xf32>
    %1570 = arith.addf %1568, %1569 : vector<9x32xf32>
    %c0_459 = arith.constant 0 : index
    %c0_460 = arith.constant 0 : index
    %1571 = vector.load %arg3[%c0_459, %c0_460] : memref<2x9xf32, #tpu.memory_space<vmem>>, vector<1x9xf32>
    %cst_461 = arith.constant dense<0.000000e+00> : vector<1x32xf32>
    %1572 = tpu.matmul %1571, %1209, %cst_461 {dimension_numbers = #tpu.dot_dimension_numbers<[1], [0], [0], [1], [0, 0, 1, 1], [], []>} : vector<1x9xf32>, vector<9x32xf32>, vector<1x32xf32> -> vector<1x32xf32>
    %c0_462 = arith.constant 0 : index
    %c0_463 = arith.constant 0 : index
    %1573 = vector.load %arg32[%c0_462, %c0_463] : memref<2x32xf32, #tpu.memory_space<vmem>>, vector<1x32xf32>
    tpu.vector_store %arg32[%c0_462, %c0_463], %1572 {strides = array<i32>} : memref<2x32xf32, #tpu.memory_space<vmem>>, vector<1x32xf32>,
    %c1_464 = arith.constant 1 : index
    %c0_465 = arith.constant 0 : index
    %1574 = vector.load %arg3[%c1_464, %c0_465] : memref<2x9xf32, #tpu.memory_space<vmem>>, vector<1x9xf32>
    %cst_466 = arith.constant dense<0.000000e+00> : vector<1x32xf32>
    %1575 = tpu.matmul %1574, %1570, %cst_466 {dimension_numbers = #tpu.dot_dimension_numbers<[1], [0], [0], [1], [0, 0, 1, 1], [], []>} : vector<1x9xf32>, vector<9x32xf32>, vector<1x32xf32> -> vector<1x32xf32>
    %c1_467 = arith.constant 1 : index
    %c0_468 = arith.constant 0 : index
    %1576 = vector.load %arg32[%c1_467, %c0_468] : memref<2x32xf32, #tpu.memory_space<vmem>>, vector<1x32xf32>
    tpu.vector_store %arg32[%c1_467, %c0_468], %1575 {strides = array<i32>} : memref<2x32xf32, #tpu.memory_space<vmem>>, vector<1x32xf32>,
    %c0_469 = arith.constant 0 : index
    %c0_470 = arith.constant 0 : index
    %1577 = vector.load %arg32[%c0_469, %c0_470] : memref<2x32xf32, #tpu.memory_space<vmem>>, vector<2x32xf32>
    %c0_471 = arith.constant 0 : index
    %c0_472 = arith.constant 0 : index
    %1578 = vector.load %arg24[%c0_471, %c0_472] : memref<32x32xf32, #tpu.memory_space<vmem>>, vector<32x32xf32>
    %cst_473 = arith.constant dense<0.000000e+00> : vector<2x32xf32>
    %1579 = tpu.matmul %1577, %1578, %cst_473 {dimension_numbers = #tpu.dot_dimension_numbers<[1], [0], [0], [1], [0, 0, 1, 1], [], []>} : vector<2x32xf32>, vector<32x32xf32>, vector<2x32xf32> -> vector<2x32xf32>
    %c0_474 = arith.constant 0 : index
    %c0_475 = arith.constant 0 : index
    %1580 = vector.load %arg25[%c0_474, %c0_475] : memref<1x32xf32, #tpu.memory_space<vmem>>, vector<1x32xf32>
    %1581 = vector.broadcast %1580 : vector<1x32xf32> to vector<2x32xf32>
    %1582 = arith.addf %1579, %1581 : vector<2x32xf32>
    %cst_476 = arith.constant 5.000000e-01 : f32
    %1583 = vector.broadcast %cst_476 : f32 to vector<2x32xf32>
    %1584 = arith.mulf %1583, %1582 : vector<2x32xf32>
    %cst_477 = arith.constant 0.707106769 : f32
    %1585 = vector.broadcast %cst_477 : f32 to vector<2x32xf32>
    %1586 = arith.mulf %1582, %1585 : vector<2x32xf32>
    %1587 = math.absf %1586 : vector<2x32xf32>
    %cst_478 = arith.constant 0.327591091 : f32
    %1588 = vector.broadcast %cst_478 : f32 to vector<2x32xf32>
    %1589 = arith.mulf %1588, %1587 : vector<2x32xf32>
    %cst_479 = arith.constant 1.000000e+00 : f32
    %1590 = vector.broadcast %cst_479 : f32 to vector<2x32xf32>
    %1591 = arith.addf %1590, %1589 : vector<2x32xf32>
    %cst_480 = arith.constant 1.000000e+00 : f32
    %1592 = vector.broadcast %cst_480 : f32 to vector<2x32xf32>
    %1593 = arith.divf %1592, %1591 : vector<2x32xf32>
    %cst_481 = arith.constant 1.06140542 : f32
    %1594 = vector.broadcast %cst_481 : f32 to vector<2x32xf32>
    %1595 = arith.mulf %1594, %1593 : vector<2x32xf32>
    %cst_482 = arith.constant -1.45315206 : f32
    %1596 = vector.broadcast %cst_482 : f32 to vector<2x32xf32>
    %1597 = arith.addf %1595, %1596 : vector<2x32xf32>
    %1598 = arith.mulf %1597, %1593 : vector<2x32xf32>
    %cst_483 = arith.constant 1.42141378 : f32
    %1599 = vector.broadcast %cst_483 : f32 to vector<2x32xf32>
    %1600 = arith.addf %1598, %1599 : vector<2x32xf32>
    %1601 = arith.mulf %1600, %1593 : vector<2x32xf32>
    %cst_484 = arith.constant -0.284496725 : f32
    %1602 = vector.broadcast %cst_484 : f32 to vector<2x32xf32>
    %1603 = arith.addf %1601, %1602 : vector<2x32xf32>
    %1604 = arith.mulf %1603, %1593 : vector<2x32xf32>
    %cst_485 = arith.constant 0.254829586 : f32
    %1605 = vector.broadcast %cst_485 : f32 to vector<2x32xf32>
    %1606 = arith.addf %1604, %1605 : vector<2x32xf32>
    %1607 = arith.mulf %1606, %1593 : vector<2x32xf32>
    %cst_486 = arith.constant 0.000000e+00 : f32
    %1608 = vector.broadcast %cst_486 : f32 to vector<2x32xf32>
    %1609 = arith.subf %1608, %1587 : vector<2x32xf32>
    %1610 = arith.mulf %1609, %1587 : vector<2x32xf32>
    %1611 = math.exp %1610 : vector<2x32xf32>
    %1612 = arith.mulf %1607, %1611 : vector<2x32xf32>
    %cst_487 = arith.constant 1.000000e+00 : f32
    %1613 = vector.broadcast %cst_487 : f32 to vector<2x32xf32>
    %1614 = arith.subf %1613, %1612 : vector<2x32xf32>
    %cst_488 = arith.constant 0.000000e+00 : f32
    %1615 = vector.broadcast %cst_488 : f32 to vector<2x32xf32>
    %1616 = arith.cmpf oge, %1586, %1615 : vector<2x32xf32>
    %cst_489 = arith.constant 0.000000e+00 : f32
    %1617 = vector.broadcast %cst_489 : f32 to vector<2x32xf32>
    %1618 = arith.subf %1617, %1614 : vector<2x32xf32>
    %1619 = arith.select %1616, %1614, %1618 : vector<2x32xi1>, vector<2x32xf32>
    %cst_490 = arith.constant 1.000000e+00 : f32
    %1620 = vector.broadcast %cst_490 : f32 to vector<2x32xf32>
    %1621 = arith.addf %1620, %1619 : vector<2x32xf32>
    %1622 = arith.mulf %1584, %1621 : vector<2x32xf32>
    %cst_491 = arith.constant dense<0.000000e+00> : vector<32xf32>
    %1623 = vector.multi_reduction <add>, %1622, %cst_491 [0] : vector<2x32xf32> to vector<32xf32>
    %1624 = vector.shape_cast %1623 : vector<32xf32> to vector<1x32xf32>
    %cst_492 = arith.constant 2.000000e+00 : f32
    %1625 = vector.broadcast %cst_492 : f32 to vector<1x32xf32>
    %1626 = arith.divf %1624, %1625 : vector<1x32xf32>
    %1627 = vector.broadcast %1626 : vector<1x32xf32> to vector<2x32xf32>
    %1628 = arith.subf %1622, %1627 : vector<2x32xf32>
    %1629 = arith.mulf %1628, %1628 : vector<2x32xf32>
    %cst_493 = arith.constant dense<0.000000e+00> : vector<32xf32>
    %1630 = vector.multi_reduction <add>, %1629, %cst_493 [0] : vector<2x32xf32> to vector<32xf32>
    %1631 = vector.shape_cast %1630 : vector<32xf32> to vector<1x32xf32>
    %cst_494 = arith.constant 2.000000e+00 : f32
    %1632 = vector.broadcast %cst_494 : f32 to vector<1x32xf32>
    %1633 = arith.divf %1631, %1632 : vector<1x32xf32>
    %cst_495 = arith.constant 9.99999996E-13 : f32
    %1634 = vector.broadcast %cst_495 : f32 to vector<1x32xf32>
    %1635 = arith.addf %1633, %1634 : vector<1x32xf32>
    %1636 = math.rsqrt %1635 : vector<1x32xf32>
    %1637 = vector.broadcast %1636 : vector<1x32xf32> to vector<2x32xf32>
    %1638 = arith.mulf %1628, %1637 : vector<2x32xf32>
    %c0_496 = arith.constant 0 : index
    %c0_497 = arith.constant 0 : index
    %1639 = vector.load %arg26[%c0_496, %c0_497] : memref<1x32xf32, #tpu.memory_space<vmem>>, vector<1x32xf32>
    %1640 = vector.broadcast %1639 : vector<1x32xf32> to vector<2x32xf32>
    %1641 = arith.mulf %1638, %1640 : vector<2x32xf32>
    %c0_498 = arith.constant 0 : index
    %c0_499 = arith.constant 0 : index
    %1642 = vector.load %arg27[%c0_498, %c0_499] : memref<1x32xf32, #tpu.memory_space<vmem>>, vector<1x32xf32>
    %1643 = vector.broadcast %1642 : vector<1x32xf32> to vector<2x32xf32>
    %1644 = arith.addf %1641, %1643 : vector<2x32xf32>
    %c0_500 = arith.constant 0 : index
    %c0_501 = arith.constant 0 : index
    %1645 = vector.load %arg28[%c0_500, %c0_501] : memref<32x40xf32, #tpu.memory_space<vmem>>, vector<32x40xf32>
    %cst_502 = arith.constant dense<0.000000e+00> : vector<2x40xf32>
    %1646 = tpu.matmul %1644, %1645, %cst_502 {dimension_numbers = #tpu.dot_dimension_numbers<[1], [0], [0], [1], [0, 0, 1, 1], [], []>} : vector<2x32xf32>, vector<32x40xf32>, vector<2x40xf32> -> vector<2x40xf32>
    %c0_503 = arith.constant 0 : index
    %c0_504 = arith.constant 0 : index
    %1647 = vector.load %arg29[%c0_503, %c0_504] : memref<1x40xf32, #tpu.memory_space<vmem>>, vector<1x40xf32>
    %1648 = vector.broadcast %1647 : vector<1x40xf32> to vector<2x40xf32>
    %1649 = arith.addf %1646, %1648 : vector<2x40xf32>
    %c0_505 = arith.constant 0 : index
    %c0_506 = arith.constant 0 : index
    %1650 = vector.load %arg30[%c0_505, %c0_506] : memref<2x40xf32, #tpu.memory_space<vmem>>, vector<2x40xf32>
    tpu.vector_store %arg30[%c0_505, %c0_506], %1649 {strides = array<i32>} : memref<2x40xf32, #tpu.memory_space<vmem>>, vector<2x40xf32>,
    return
  }
}

</mosaic_0001>

<bundles_post_ra>
// kernel: run.1
= control target key start
LH: loop header
LB: loop body
LE: loop exit
PB: predicated region body
PF: predicated region fallthrough
CT: control target
= control target key end

     0   :  { %s6336_s6 = smov 1   ;;  %s6337_s10 = smov 2   ;;  %s8777_s0 = inlined_call_operand.smem [shape: u32[31], index: -1, kind: input, shape index: {}] }
   0x1   :  { %s6389_s5 = sld [smem:[%s8777_s0]]   ;;  %s6338_s14 = smov 3  }
   0x2   :  { %s6394_s9 = sld [smem:[%s8777_s0 + %s6336_s6]]   ;;  %s6339_s18 = smov 4  }
   0x3   :  { %s6399_s13 = sld [smem:[%s8777_s0 + %s6337_s10]]   ;;  %s6340_s22 = smov 5  }
   0x4   :  { %s6404_s17 = sld [smem:[%s8777_s0 + %s6338_s14]]   ;;  %s6341_s26 = smov 6  }
   0x5   :  { %s6409_s21 = sld [smem:[%s8777_s0 + %s6339_s18]]   ;;  %s6342_s30 = smov 7  }
   0x6   :  { %s6414_s25 = sld [smem:[%s8777_s0 + %s6340_s22]]   ;;  %s6343_s4 = smov 8  }
   0x7   :  { %s6419_s29 = sld [smem:[%s8777_s0 + %s6341_s26]]   ;;  %s6344_s10 = smov 9  }
   0x8   :  { %s6424_s3 = sld [smem:[%s8777_s0 + %s6342_s30]]   ;;  %s6345_s15 = smov 10  }
   0x9   :  { %s6429_s8 = sld [smem:[%s8777_s0 + %s6343_s4]]   ;;  %s6346_s20 = smov 11  }
   0xa   :  { %8791 = sst [smem:[#allocation10_spill]] %s6404_s17  ;;  %s6347_s26 = smov 12  }
   0xb   :  { %s6434_s14 = sld [smem:[%s8777_s0 + %s6344_s10]]   ;;  %s6348_s1 = smov 13  }
   0xc   :  { %8792 = sst [smem:[#allocation11_spill]] %s6414_s25  ;;  %s6349_s7 = smov 14  }
   0xd   :  { %s6439_s19 = sld [smem:[%s8777_s0 + %s6345_s15]]   ;;  %s6350_s15 = smov 15  }
   0xe   :  { %s6444_s24 = sld [smem:[%s8777_s0 + %s6346_s20]]   ;;  %s6351_s22 = smov 16  }
   0xf   :  { %s6449_s30 = sld [smem:[%s8777_s0 + %s6347_s26]]   ;;  %s6352_s28 = smov 17  }
  0x10   :  { %s6454_s6 = sld [smem:[%s8777_s0 + %s6348_s1]]  }
  0x11   :  { %s6459_s12 = sld [smem:[%s8777_s0 + %s6349_s7]]   ;;  %s6353_s7 = smov 18  }
  0x12   :  { %s6464_s20 = sld [smem:[%s8777_s0 + %s6350_s15]]   ;;  %s6354_s15 = smov 19  }
  0x13   :  { %s6469_s27 = sld [smem:[%s8777_s0 + %s6351_s22]]   ;;  %s6355_s22 = smov 20  }
  0x14   :  { %s6474_s4 = sld [smem:[%s8777_s0 + %s6352_s28]]   ;;  %s6356_s28 = smov 21  }
  0x15   :  { %s6479_s17 = sld [smem:[%s8777_s0 + %s6353_s7]]   ;;  %s6357_s7 = smov 22  }
  0x16   :  { %s6499_s25 = sld [smem:[%s8777_s0 + %s6357_s7]]   ;;  %s6361_s7 = smov 26  }
  0x18   :  { %8793 = sst [smem:[#allocation12_spill]] %s6464_s20 }
  0x19   :  { %8794 = sst [smem:[#allocation13_spill]] %s6469_s27 }
  0x1a   :  { %8795 = sst [smem:[#allocation14_spill]] %s6474_s4 }
  0x1b   :  { %s6484_s20 = sld [smem:[%s8777_s0 + %s6354_s15]]   ;;  %s6358_s15 = smov 23  }
  0x1c   :  { %s6489_s27 = sld [smem:[%s8777_s0 + %s6355_s22]]   ;;  %s6359_s22 = smov 24  }
  0x1d   :  { %s6494_s4 = sld [smem:[%s8777_s0 + %s6356_s28]]   ;;  %s6360_s28 = smov 25  }
  0x1e   :  { %8799 = sst [smem:[#allocation18_spill]] %s6499_s25 }
  0x1f   :  { %s6519_s25 = sld [smem:[%s8777_s0 + %s6361_s7]]   ;;  %s6365_s7 = smov 30  }
  0x21   :  { %8796 = sst [smem:[#allocation15_spill]] %s6484_s20 }
  0x22   :  { %8797 = sst [smem:[#allocation16_spill]] %s6489_s27 }
  0x23   :  { %8798 = sst [smem:[#allocation17_spill]] %s6494_s4 }
  0x24   :  { %s6504_s20 = sld [smem:[%s8777_s0 + %s6358_s15]]   ;;  %s6362_s15 = smov 27  }
  0x25   :  { %s6509_s27 = sld [smem:[%s8777_s0 + %s6359_s22]]   ;;  %s6363_s22 = smov 28  }
  0x26   :  { %s6514_s4 = sld [smem:[%s8777_s0 + %s6360_s28]]   ;;  %s6364_s28 = smov 29  }
  0x27   :  { %8803 = sst [smem:[#allocation22_spill]] %s6519_s25 }
  0x28   :  { %s6539_s25 = sld [smem:[%s8777_s0 + %s6365_s7]]  }
  0x2a   :  { %8800 = sst [smem:[#allocation19_spill]] %s6504_s20 }
  0x2b   :  { %8801 = sst [smem:[#allocation20_spill]] %s6509_s27 }
  0x2c   :  { %8802 = sst [smem:[#allocation21_spill]] %s6514_s4 }
  0x2d   :  { %s6524_s20 = sld [smem:[%s8777_s0 + %s6362_s15]]  }
  0x2e   :  { %s6529_s27 = sld [smem:[%s8777_s0 + %s6363_s22]]  }
  0x2f   :  { %s6534_s4 = sld [smem:[%s8777_s0 + %s6364_s28]]  }
  0x30   :  { %66 = vsyncpa [#allocation5], 0  ;;  %s100_s15 = sshll.u32 %s6459_s12, 4  ;;  %s101_s15 = int_to_ptr.hbm [resolvable:$true] %s100_s15 }
  0x31   :  { %67 = vsyncpa [#allocation7], 0  ;;  %s6366_s16 = smov [#allocation4]   ;;  %s119_s22 = sshll.u32 %s6479_s17, 4  ;;  %s120_s22 = int_to_ptr.hbm [resolvable:$true] %s119_s22 }
  0x32   :  { %s102_s18 = sshll.u32 %s6366_s16, 4  ;;  %s6284_s23 = sshra.s32 %s101_s15, 4  ;;  %s103_s18 = int_to_ptr.vmem [resolvable:$true] %s102_s18  ;;  %s6285_s23 = int_to_ptr.hbm [resolvable:$true] %s6284_s23 }
  0x33   :  { %s6286_s26 = scalar_lea.hbm %s6285_s23, 64  ;;  %s6288_s28 = scalar_lea.hbm %s6459_s12, 64 }
  0x34   :  { %p6287_p0 = scmp.ne.s32.totalorder %s6285_s23, %s6286_s26  ;;  %p6289_p1 = scmp.lt.s32.totalorder %s6285_s23, %s6459_s12 }
  0x35   :  { %p6290_p2 = scmp.lt.s32.totalorder %s6288_s28, %s6286_s26 }
  0x37   :  { %p6291_p3 = por %p6290_p2, %p6289_p1 }
  0x39   :  { %p6292_p4 = pnand %p6291_p3, %p6287_p0 }
  0x3b   :  { %6295 = shalt.err (!%p6292_p4)
}
  0x3c   :  { %s6367_s0 = smov 128   ;;  %s6368_s1 = smov 8  }
  0x3d   :  { %108 = dma.hbm_to_vmem [thread:$0]  %s101_s15, 1024, %s103_s18, [#allocation5], %s6367_s0, %s6367_s0, %s6368_s1  }
  0x3e   :  { %s6369_s2 = smov [#allocation6]   ;;  %s6308_s10 = sshra.s32 %s120_s22, 4  ;;  %s6309_s10 = int_to_ptr.hbm [resolvable:$true] %s6308_s10 }
  0x3f   :  { %s121_s7 = sshll.u32 %s6369_s2, 4  ;;  %s6310_s11 = scalar_lea.hbm %s6309_s10, 64  ;;  %s122_s7 = int_to_ptr.vmem [resolvable:$true] %s121_s7 }
  0x40   :  { %p6311_p5 = scmp.ne.s32.totalorder %s6309_s10, %s6310_s11  ;;  %s6312_s16 = scalar_lea.hbm %s6479_s17, 64 }
  0x41   :  { %p6313_p6 = scmp.lt.s32.totalorder %s6309_s10, %s6479_s17  ;;  %p6314_p7 = scmp.lt.s32.totalorder %s6312_s16, %s6310_s11 }
  0x43   :  { %p6315_p8 = por %p6314_p7, %p6313_p6 }
  0x45   :  { %p6316_p9 = pnand %p6315_p8, %p6311_p5 }
  0x47   :  { %6319 = shalt.err (!%p6316_p9)
}
  0x48   :  { %127 = dma.hbm_to_vmem [thread:$0]  %s120_s22, 1024, %s122_s7, [#allocation7], %s6367_s0, %s6367_s0, %s6368_s1  }
  0x49   :  { %6332 = dma.done.wait [#allocation5], 1024  }
  0x4a   :  { %6333 = vsyncadd [#allocation5], 4294966272 }
  0x4b   :  { %6334 = dma.done.wait [#allocation7], 1024  }
  0x4c   :  { %6335 = vsyncadd [#allocation7], 4294966272  ;;  %v6370_v0 = vmov 9.0   ;;  %v287_v2 = vld [vmem:[%s6429_s8 + $0x18] sm:$0xff]  ;;  %v286_v4 = vld [vmem:[%s6429_s8 + $0x10] sm:$0xff]  ;;  %vm184_vm0 = vcmask 261120  }
  0x4d   :  { %5999 = vrcp.f32 %v6370_v0  ;;  %v292_v3 = vld [vmem:[%s6439_s19 + $0x18] sm:$0xff]  ;;  %343 = vmatpush.msra.mxu0 %v287_v2  ;;  %v291_v5 = vld [vmem:[%s6439_s19 + $0x10] sm:$0xff]  ;;  %v285_v6 = vld [vmem:[%s6429_s8 + $0x8] sm:$0xff]  ;;  %vm186_vm1 = vcmask 253952   ;;  %vm408_vm6 = vcmask 64512   ;;  %s6371_s17 = smov 120  }
  0x4e   :  { %369 = vmatpush.msra.mxu1 %v292_v3  ;;  %v290_v7 = vld [vmem:[%s6439_s19 + $0x8] sm:$0xff]  ;;  %v284_v9 = vld [vmem:[%s6429_s8] sm:$0xff]  ;;  %v297_v59 = vld [vmem:[%s6449_s30 + $0x18] sm:$0xff]  ;;  %vm517_vm7 = vcmask 72704   ;;  %vm521_vm8 = vcmask 65536   ;;  %vm558_vm9 = vcmask 1040384  }
  0x4f   :  { %v289_v10 = vld [vmem:[%s6439_s19] sm:$0xff]  ;;  %344 = vmatpush.msra.mxu0 %v286_v4  ;;  %v183_v12 = vld [vmem:[%s6389_s5 + $0x8] sm:$0x1]  ;;  %v296_v60 = vld [vmem:[%s6449_s30 + $0x10] sm:$0xff]  ;;  %395 = vmatpush.msra.mxu2 %v297_v59  ;;  %s6376_s12 = smov 112   ;;  %s6377_s15 = smov 104  }
  0x50   :  { %370 = vmatpush.msra.mxu1 %v291_v5  ;;  %v182_v11 = vld [vmem:[%s6389_s5] sm:$0xff]  ;;  %v187_v15 = vsel %vm186_vm1, %v183_v12, 0.0  ;;  %v295_v61 = vld [vmem:[%s6449_s30 + $0x8] sm:$0xff]  ;;  %s8804_s18 = sld [smem:[#allocation11_spill]]  ;;  %vm625_vm10 = vcmask 57344   ;;  %s6378_s22 = smov 24  }
  0x51   :  { %v185_v14 = vsel %vm184_vm0, %v182_v11, 0.0  ;;  %345 = vmatpush.msra.mxu0 %v285_v6  ;;  %v5969_v48 = vld [vmem:[%s6419_s29] ss:$0 sm:$0xff]  ;;  %396 = vmatpush.msra.mxu2 %v296_v60  ;;  %vm852_vm11 = vcmask 130112   ;;  %s6379_s23 = smov 16   ;;  %vm854_vm12 = vcmask 122944  }
  0x52   :  { %371 = vmatpush.msra.mxu1 %v290_v7  ;;  %v188_v16 = vadd.f32 %v187_v15, %v185_v14  ;;  %v5970_v51 = vld [vmem:[%s6424_s3] ss:$0 sm:$0xff]  ;;  %vm1080_vm13 = vcmask 195712   ;;  %vm1308_vm14 = vcmask 261312   ;;  %vm8790_vm15 = vcmask 188544   ;;  %s8808_s26 = sld [smem:[#allocation15_spill]] }
  0x53   :  { %v6000_v1 = vpop.eup %5999  ;;  %346 = vmatpush.msra.mxu0 %v284_v9  ;;  %v6582_v57 = vld [vmem:[%s6409_s21] sm:$0xff]  ;;  %397 = vmatpush.msra.mxu2 %v295_v61  ;;  %s8809_s28 = sld [smem:[#allocation16_spill]] }
  0x54   :  { %v196_v8 = vmul.f32 9.0, %v6000_v1  ;;  %372 = vmatpush.msra.mxu1 %v289_v10  ;;  %v189_v17 = vrot.slane %v188_v16, 4  ;;  %vm200_vm2 = vweird.f32 %v6000_v1  ;;  %430 = vmatpush.msra.mxu3 %v6582_v57  ;;  %v5971_v58 = vld [vmem:[%s6434_s14] ss:$0 sm:$0xff]  ;;  %v6372_v10 = vmov 2   ;;  %s8810_s0 = sld [smem:[#allocation17_spill]] }
  0x55   :  { %v5972_v2 = vld [vmem:[%s6444_s24] ss:$0 sm:$0xff]  ;;  %5867 = vset.pattern.permute.xlu0 %v6372_v10  ;;  %s8811_s2 = sld [smem:[#allocation18_spill]] }
  0x56   :  { %v197_v13 = vsub.f32 1.0, %v196_v8  ;;  %v190_v19 = vadd.f32 %v189_v17, %v188_v16  ;;  %650 = vmatpush.msrb.mxu1 %v6582_v57  ;;  %v294_v9 = vld [vmem:[%s6449_s30] sm:$0xff]  ;;  %s8812_s7 = sld [smem:[#allocation19_spill]] }
  0x57   :  { %398 = vmatpush.msra.mxu2 %v294_v9 }
  0x58   :  { %v198_v18 = vmul.f32 %v6000_v1, %v197_v13  ;;  %v191_v20 = vrot.slane %v190_v19, 2 }
  0x5a   :  { %v199_v21 = vadd.f32 %v6000_v1, %v198_v18  ;;  %v192_v22 = vadd.f32 %v191_v20, %v190_v19  ;;  %v6374_v18 = vmov 3   ;;  %v6375_v19 = vmov 4  }
  0x5c   :  { %v193_v23 = vrot.slane %v192_v22, 1  ;;  %v6561_v24 = vsel %vm200_vm2, %v6000_v1, %v199_v21  ;;  %vm8789_vm2 = vcmask 254144  }
  0x5e   :  { %v194_v25 = vadd.f32 %v193_v23, %v192_v22  ;;  %v6645_v23 = vld [vmem:[%s6399_s13 + $0x10] sm:$0xff] }
  0x60   :  { %v202_v26 = vmul.f32 %v6561_v24, %v194_v25 }
  0x62   :  { %v203_v27 = vsub.f32 %v182_v11, %v202_v26  ;;  %v204_v28 = vsub.f32 %v183_v12, %v202_v26  ;;  %v6373_v11 = vmov 1   ;;  %v6648_v26 = vld [vmem:[%s6399_s13 + $0x20] sm:$0xff] }
  0x63   :  { %5866 = vset.pattern.permute.xlu2 %v6373_v11  ;;  %5870 = vset.pattern.permute.xlu1 %v6373_v11 }
  0x64   :  { %v205_v29 = vmul.f32 %v203_v27, %v203_v27  ;;  %v206_v30 = vmul.f32 %v204_v28, %v204_v28 }
  0x66   :  { %v207_v31 = vsel %vm184_vm0, %v205_v29, 0.0  ;;  %v208_v32 = vsel %vm186_vm1, %v206_v30, 0.0 }
  0x67   :  { %v209_v33 = vadd.f32 %v208_v32, %v207_v31 }
  0x69   :  { %v210_v34 = vrot.slane %v209_v33, 4 }
  0x6b   :  { %v211_v35 = vadd.f32 %v210_v34, %v209_v33  ;;  %v6654_v33 = vld [vmem:[%s6399_s13 + $0x30] sm:$0xff] }
  0x6d   :  { %v212_v36 = vrot.slane %v211_v35, 2 }
  0x6f   :  { %v213_v37 = vadd.f32 %v212_v36, %v211_v35  ;;  %v6658_v36 = vld [vmem:[%s6399_s13 + $0x18] sm:$0x1] }
  0x71   :  { %v214_v38 = vrot.slane %v213_v37, 1 }
  0x73   :  { %v215_v39 = vadd.f32 %v214_v38, %v213_v37  ;;  %v6661_v37 = vld [vmem:[%s6399_s13 + $0x40] sm:$0xff] }
  0x75   :  { %v216_v40 = vmul.f32 %v215_v39, %v6561_v24 }
  0x77   :  { %v217_v41 = vadd.f32 1e-12, %v216_v40  ;;  %v6664_v40 = vld [vmem:[%s6399_s13 + $0x28] sm:$0x1] }
  0x79   :  { %6001 = vrsqrt.f32 %v217_v41  ;;  %vm224_vm3 = vweird.f32 %v217_v41 }
  0x7f   :  { %v6002_v42 = vpop.eup %6001 }
  0x80   :  { %v219_v43 = vmul.f32 %v6002_v42, %v217_v41  ;;  %vm225_vm4 = vweird.f32 %v6002_v42 }
  0x81   :  { %vm226_vm5 = vmor %vm224_vm3, %vm225_vm4 }
  0x82   :  { %v220_v44 = vmul.f32 %v6002_v42, %v219_v43 }
  0x84   :  { %v221_v45 = vmul.f32 0.5, %v220_v44 }
  0x86   :  { %v222_v46 = vsub.f32 1.5, %v221_v45 }
  0x88   :  { %v223_v47 = vmul.f32 %v6002_v42, %v222_v46 }
  0x8a   :  { %v227_v49 = vsel %vm226_vm5, %v6002_v42, %v223_v47 }
  0x8b   :  { %v228_v50 = vmul.f32 %v227_v49, %v203_v27  ;;  %v229_v53 = vmul.f32 %v227_v49, %v204_v28  ;;  %v6673_v49 = vld [vmem:[%s6399_s13 + $0x38] sm:$0x1] }
  0x8d   :  { %v233_v52 = vmul.f32 %v5969_v48, %v228_v50  ;;  %v234_v55 = vmul.f32 %v5969_v48, %v229_v53  ;;  %v6670_v48 = vld [vmem:[%s6394_s9] sm:$0xff] }
  0x8f   :  { %v6569_v54 = vadd.f32 %v5970_v51, %v233_v52  ;;  %v6575_v56 = vadd.f32 %v5970_v51, %v234_v55  ;;  %v6680_v55 = vld [vmem:[%s6399_s13 + $0x48] sm:$0x1] }
  0x91   :  { %5593 = vmatmul.msk.f32.vlgmr.msra.gmra.mxu0 %vm184_vm0, %v6569_v54  ;;  %5595 = vmatmul.msk.f32.vlgmr.msra.gmra.mxu1 %vm184_vm0, %v6569_v54 }
  0x92   :  { %5597 = vmatmul.msk.f32.vlgmr.msra.gmra.mxu2 %vm184_vm0, %v6569_v54 }
  0x99   :  { %5594 = vmatmul.msk.f32.gmra.mxu0 %vm184_vm0, %v6575_v56  ;;  %5596 = vmatmul.msk.f32.gmra.mxu1 %vm184_vm0, %v6575_v56 }
  0x9a   :  { %5598 = vmatmul.msk.f32.gmra.mxu2 %vm184_vm0, %v6575_v56 }
 0x10e   :  { %v348_v62 = vpop.f32.mrf.mxu0  ;;  %v374_v63 = vpop.f32.mrf.mxu1 }
 0x10f   :  { %v349_v0 = vadd.f32 %v5971_v58, %v348_v62  ;;  %v6599_v7 = vadd.f32 %v5972_v2, %v374_v63  ;;  %v6686_v63 = vld [vmem:[%s6394_s9 + $0x8] sm:$0x1] }
 0x111   :  { %v6590_v1 = vmul.f32 0.35355338, %v349_v0 }
 0x113   :  { %627 = vrot.lane.b32.xlu0 %v6590_v1, %s6371_s17  ;;  %5599 = vmatmul.msk.f32.vlgmr.msra.gmra.mxu3 %vm408_vm6, %v6590_v1 }
 0x115   :  { %v400_v0 = vpop.f32.mrf.mxu2 }
 0x116   :  { %v351_v3 = vpop.f32.mrf.mxu0  ;;  %v377_v4 = vpop.f32.mrf.mxu1 }
 0x117   :  { %v352_v5 = vadd.f32 %v5971_v58, %v351_v3  ;;  %v6597_v6 = vadd.f32 %v5972_v2, %v377_v4  ;;  %v5973_v4 = vld [vmem:[%s6454_s6] ss:$0 sm:$0xff] }
 0x119   :  { %v6601_v8 = vmul.f32 0.35355338, %v352_v5  ;;  %672 = vrot.lane.b32.xlu1 %v6597_v6, %s6371_s17  ;;  %5601 = vmatpush.xpose.msk.msrb.mxu3 %vm408_vm6, %v6597_v6 }
 0x11b   :  { %629 = vrot.lane.b32.xlu0 %v6601_v8, %s6371_s17  ;;  %5600 = vmatmul.msk.f32.gmra.mxu3 %vm408_vm6, %v6601_v8 }
 0x11d   :  { %5602 = vmatpush.xpose.msk.msrb.mxu3 %vm408_vm6, %v6599_v7  ;;  %v403_v5 = vpop.f32.mrf.mxu2 }
 0x11e   :  { %v6691_v9 = vadd.f32 %v5973_v4, %v403_v5 }
 0x120   :  { %5605 = vmatpush.msk.msrb.mxu0 %vm558_vm9, %v6691_v9 }
 0x121   :  { %670 = vrot.lane.b32.xlu1 %v6599_v7, %s6371_s17 }
 0x123   :  { %5603 = vmatmul.msk.f32.vlgmr.msrb.gmra.mxu3 %vm408_vm6, %v6590_v1 }
 0x12b   :  { %5604 = vmatmul.msk.f32.gmra.mxu3 %vm408_vm6, %v6601_v8 }
 0x185   :  { %v628_v12 = vpop.permute.xlu0 %627 }
 0x186   :  { %5608 = vmatmul.msk.f32.vlgmr.msrb.gmra.mxu1 %vm408_vm6, %v628_v12 }
 0x18b   :  { %v673_v13 = vpop.permute.xlu1 %672 }
 0x18c   :  { %5610 = vmatpush.xpose.msk.msrb.mxu2 %vm408_vm6, %v673_v13 }
 0x18d   :  { %v630_v14 = vpop.permute.xlu0 %629 }
 0x18e   :  { %5609 = vmatmul.msk.f32.gmra.mxu1 %vm408_vm6, %v630_v14 }
 0x193   :  { %v671_v15 = vpop.permute.xlu1 %670 }
 0x194   :  { %5611 = vmatpush.xpose.msk.msrb.mxu2 %vm408_vm6, %v671_v15 }
 0x196   :  { %v432_v16 = vpop.f32.mrf.mxu3 }
 0x197   :  { %5612 = vmatmul.msk.f32.vlgmr.msrb.gmra.mxu2 %vm408_vm6, %v628_v12  ;;  %480 = vperm.xlu0 %5867, %v432_v16   ;;  %v6693_v12 = vadd.f32 %v5973_v4, %v400_v0 }
 0x198   :  { %440 = vperm.xlu2 %5866, %v432_v16  }
 0x199   :  { %577 = vmatpush.msrb.mxu0 %v6693_v12 }
 0x19b   :  { %879 = vmatpush.msra.mxu0 %v6582_v57 }
 0x19e   :  { %v435_v17 = vpop.f32.mrf.mxu3 }
 0x19f   :  { %5613 = vmatmul.msk.f32.gmra.mxu2 %vm408_vm6, %v630_v14  ;;  %445 = vperm.xlu1 %5870, %v435_v17  }
 0x1a0   :  { %5868 = vset.pattern.permute.xlu2 %v6374_v18  ;;  %5872 = vset.pattern.permute.xlu0 %v6374_v18 }
 0x1a1   :  { %492 = vperm.xlu2 %5868, %v432_v16   ;;  %496 = vperm.xlu0 %5872, %v435_v17  }
 0x1a6   :  { %v473_v31 = vpop.f32.mrf.mxu3 }
 0x1a7   :  { %5871 = vset.pattern.permute.xlu1 %v6372_v10 }
 0x1a8   :  { %484 = vperm.xlu1 %5871, %v435_v17  }
 0x1a9   :  { %5869 = vset.pattern.permute.xlu2 %v6375_v19  ;;  %5875 = vset.pattern.permute.xlu0 %v6375_v19 }
 0x1aa   :  { %504 = vperm.xlu2 %5869, %v432_v16  }
 0x1ae   :  { %v476_v45 = vpop.f32.mrf.mxu3 }
 0x1b2   :  { %508 = vperm.xlu2 %5869, %v435_v17  }
 0x1ba   :  { %5873 = vset.pattern.permute.xlu2 %v6373_v11 }
 0x1f2   :  { %v441_v22 = vpop.permute.xlu2 %440 }
 0x1f3   :  { %v448_v28 = vmul.f32 %v6645_v23, %v441_v22 }
 0x1f5   :  { %v474_v32 = vadd.f32 %v473_v31, %v448_v28 }
 0x1fb   :  { %v493_v25 = vpop.permute.xlu2 %492 }
 0x1fc   :  { %v499_v35 = vmul.f32 %v6654_v33, %v493_v25 }
 0x203   :  { %v652_v20 = vpop.f32.mrf.mxu1 }
 0x204   :  { %660 = vperm.xlu2 %5873, %v652_v20   ;;  %726 = vperm.xlu0 %5875, %v652_v20   ;;  %v505_v38 = vpop.permute.xlu2 %504 }
 0x205   :  { %702 = vperm.xlu1 %5871, %v652_v20   ;;  %v511_v43 = vmul.f32 %v6661_v37, %v505_v38 }
 0x209   :  { %v481_v27 = vpop.permute.xlu0 %480 }
 0x20a   :  { %v487_v30 = vmul.f32 %v6648_v26, %v481_v27 }
 0x20b   :  { %v655_v21 = vpop.f32.mrf.mxu1 }
 0x20c   :  { %665 = vperm.xlu2 %5873, %v655_v21   ;;  %5879 = vset.pattern.permute.xlu0 %v6372_v10  ;;  %v489_v34 = vadd.f32 %v487_v30, %v474_v32  ;;  %v509_v58 = vpop.permute.xlu2 %508 }
 0x20d   :  { %5874 = vset.pattern.permute.xlu1 %v6374_v18  ;;  %v512_v61 = vmul.f32 %v6680_v55, %v509_v58 }
 0x20e   :  { %714 = vperm.xlu1 %5874, %v652_v20   ;;  %v501_v39 = vadd.f32 %v499_v35, %v489_v34 }
 0x210   :  { %v513_v46 = vadd.f32 %v511_v43, %v501_v39 }
 0x211   :  { %v446_v29 = vpop.permute.xlu1 %445 }
 0x212   :  { %v449_v42 = vmul.f32 %v6658_v36, %v446_v29  ;;  %v6676_v52 = vadd.f32 %v513_v46, %v6670_v48 }
 0x213   :  { %v497_v50 = vpop.permute.xlu0 %496 }
 0x214   :  { %5876 = vset.pattern.permute.xlu2 %v6372_v10  ;;  %v477_v47 = vadd.f32 %v476_v45, %v449_v42  ;;  %v500_v53 = vmul.f32 %v6673_v49, %v497_v50  ;;  %v518_v60 = vsel %vm517_vm7, %v6676_v52, -inf }
 0x215   :  { %706 = vperm.xlu2 %5876, %v655_v21  }
 0x216   :  { %718 = vperm.xlu1 %5874, %v655_v21  }
 0x21a   :  { %v485_v41 = vpop.permute.xlu1 %484  ;;  %v695_v17 = vpop.f32.mrf.mxu2 }
 0x21b   :  { %v488_v44 = vmul.f32 %v6664_v40, %v485_v41 }
 0x21d   :  { %5880 = vset.pattern.permute.xlu2 %v6374_v18  ;;  %v490_v51 = vadd.f32 %v488_v44, %v477_v47 }
 0x21e   :  { %5877 = vset.pattern.permute.xlu1 %v6375_v19 }
 0x21f   :  { %730 = vperm.xlu1 %5877, %v655_v21   ;;  %v502_v59 = vadd.f32 %v500_v53, %v490_v51 }
 0x221   :  { %v514_v62 = vadd.f32 %v512_v61, %v502_v59 }
 0x222   :  { %v698_v42 = vpop.f32.mrf.mxu2 }
 0x223   :  { %v516_v2 = vadd.f32 %v514_v62, %v6686_v63 }
 0x225   :  { %v522_v3 = vsel %vm521_vm8, %v516_v2, -inf }
 0x227   :  { %5878 = vset.pattern.permute.xlu1 %v6373_v11 }
 0x23e   :  { %519 = vmax.xlane.f32.xlu2 %v518_v60 }
 0x249   :  { %523 = vmax.xlane.f32.xlu1 %v522_v3 }
 0x25e   :  { %v661_v13 = vpop.permute.xlu2 %660 }
 0x25f   :  { %v668_v15 = vmul.f32 %v6645_v23, %v661_v13 }
 0x261   :  { %v696_v20 = vadd.f32 %v695_v17, %v668_v15 }
 0x262   :  { %772 = vrot.lane.b32.xlu1 %v6693_v12, %s6371_s17 }
 0x266   :  { %v666_v21 = vpop.permute.xlu2 %665 }
 0x267   :  { %v669_v39 = vmul.f32 %v6658_v36, %v666_v21 }
 0x269   :  { %v699_v43 = vadd.f32 %v698_v42, %v669_v39 }
 0x26f   :  { %v707_v35 = vpop.permute.xlu2 %706 }
 0x270   :  { %v710_v41 = vmul.f32 %v6664_v40, %v707_v35 }
 0x272   :  { %v712_v45 = vadd.f32 %v710_v41, %v699_v43 }
 0x276   :  { %v727_v22 = vpop.permute.xlu0 %726 }
 0x277   :  { %v703_v14 = vpop.permute.xlu1 %702  ;;  %v733_v29 = vmul.f32 %v6661_v37, %v727_v22 }
 0x278   :  { %v709_v16 = vmul.f32 %v6648_v26, %v703_v14 }
 0x27a   :  { %v711_v27 = vadd.f32 %v709_v16, %v696_v20 }
 0x280   :  { %v715_v25 = vpop.permute.xlu1 %714 }
 0x281   :  { %v721_v28 = vmul.f32 %v6654_v33, %v715_v25 }
 0x283   :  { %v723_v30 = vadd.f32 %v721_v28, %v711_v27 }
 0x285   :  { %v735_v31 = vadd.f32 %v733_v29, %v723_v30 }
 0x287   :  { %v737_v32 = vadd.f32 %v735_v31, %v6670_v48 }
 0x288   :  { %v719_v34 = vpop.permute.xlu1 %718 }
 0x289   :  { %v739_v38 = vsel %vm517_vm7, %v737_v32, -inf  ;;  %v722_v44 = vmul.f32 %v6673_v49, %v719_v34 }
 0x28a   :  { %740 = vmax.xlane.f32.xlu0 %v739_v38 }
 0x28b   :  { %v724_v47 = vadd.f32 %v722_v44, %v712_v45 }
 0x291   :  { %v731_v46 = vpop.permute.xlu1 %730 }
 0x292   :  { %v734_v50 = vmul.f32 %v6680_v55, %v731_v46 }
 0x294   :  { %v736_v51 = vadd.f32 %v734_v50, %v724_v47 }
 0x296   :  { %v738_v53 = vadd.f32 %v736_v51, %v6686_v63 }
 0x298   :  { %v742_v58 = vsel %vm521_vm8, %v738_v53, -inf }
 0x299   :  { %743 = vmax.xlane.f32.xlu2 %v742_v58 }
 0x29e   :  { %856 = vrot.lane.b32.xlu0 %v6590_v1, %s6376_s12 }
 0x2b1   :  { %774 = vrot.lane.b32.xlu2 %v6691_v9, %s6371_s17  ;;  %v520_v62 = vpop.xlane.xlu2 %519 }
 0x2b2   :  { %v525_v3 = vsub.f32 %v6676_v52, %v520_v62 }
 0x2b4   :  { %v527_v5 = vmul.f32 1.442695, %v525_v3 }
 0x2bc   :  { %v524_v59 = vpop.xlane.xlu1 %523 }
 0x2bd   :  { %v526_v60 = vsub.f32 %v516_v2, %v524_v59 }
 0x2bf   :  { %v529_v61 = vmul.f32 1.442695, %v526_v60 }
 0x2c1   :  { %6003 = vpow2.f32 %v529_v61 }
 0x2c2   :  { %6005 = vpow2.f32 %v527_v5 }
 0x2c7   :  { %v6004_v0 = vpop.eup %6003 }
 0x2c8   :  { %v534_v4 = vsel %vm521_vm8, %v6004_v0, 0.0  ;;  %v6006_v13 = vpop.eup %6005 }
 0x2c9   :  { %535 = vadd.xlane.f32.xlu1 %v534_v4  ;;  %v531_v14 = vsel %vm517_vm7, %v6006_v13, 0.0 }
 0x2da   :  { %532 = vadd.xlane.f32.xlu2 %v531_v14 }
 0x2e2   :  { %858 = vrot.lane.b32.xlu1 %v6601_v8, %s6376_s12 }
 0x2ea   :  { %899 = vrot.lane.b32.xlu1 %v6599_v7, %s6376_s12 }
 0x2f2   :  { %1084 = vrot.lane.b32.xlu2 %v6590_v1, %s6377_s15  ;;  %v773_v1 = vpop.permute.xlu1 %772 }
 0x2fa   :  { %901 = vrot.lane.b32.xlu2 %v6597_v6, %s6376_s12 }
 0x2fd   :  { %v741_v52 = vpop.xlane.xlu0 %740 }
 0x2fe   :  { %v745_v2 = vsub.f32 %v737_v32, %v741_v52 }
 0x300   :  { %v747_v15 = vmul.f32 1.442695, %v745_v2 }
 0x302   :  { %6007 = vpow2.f32 %v747_v15  ;;  %1127 = vrot.lane.b32.xlu2 %v6599_v7, %s6377_s15 }
 0x308   :  { %v6008_v16 = vpop.eup %6007 }
 0x309   :  { %v751_v17 = vsel %vm517_vm7, %v6008_v16, 0.0 }
 0x30a   :  { %752 = vadd.xlane.f32.xlu0 %v751_v17 }
 0x30c   :  { %v744_v20 = vpop.xlane.xlu2 %743 }
 0x30d   :  { %v746_v21 = vsub.f32 %v738_v53, %v744_v20 }
 0x30f   :  { %v749_v22 = vmul.f32 1.442695, %v746_v21 }
 0x311   :  { %6009 = vpow2.f32 %v749_v22 }
 0x314   :  { %v775_v25 = vpop.permute.xlu2 %774 }
 0x315   :  { %5614 = vmatpush.msk.msra.mxu3 %vm558_vm9, %v775_v25 }
 0x317   :  { %v6010_v27 = vpop.eup %6009  ;;  %800 = vmatpush.msra.mxu3 %v773_v1 }
 0x318   :  { %v754_v28 = vsel %vm521_vm8, %v6010_v27, 0.0 }
 0x319   :  { %1107 = vmatpush.msrb.mxu3 %v6582_v57  ;;  %755 = vadd.xlane.f32.xlu0 %v754_v28 }
 0x32d   :  { %1086 = vrot.lane.b32.xlu0 %v6601_v8, %s6377_s15  ;;  %v857_v8 = vpop.permute.xlu0 %856 }
 0x335   :  { %1129 = vrot.lane.b32.xlu0 %v6597_v6, %s6377_s15 }
 0x33c   :  { %v536_v29 = vpop.xlane.xlu1 %535 }
 0x34d   :  { %v533_v7 = vpop.xlane.xlu2 %532 }
 0x34e   :  { %6011 = vrcp.f32 %v533_v7 }
 0x34f   :  { %6013 = vrcp.f32 %v536_v29 }
 0x354   :  { %v6012_v30 = vpop.eup %6011  ;;  %v859_v34 = vpop.permute.xlu1 %858 }
 0x355   :  { %v6738_v31 = vmul.f32 %v6012_v30, %v6006_v13  ;;  %v1085_v32 = vpop.permute.xlu2 %1084  ;;  %v6014_v57 = vpop.eup %6013 }
 0x356   :  { %v6742_v35 = vmul.f32 %v6014_v57, %v6004_v0 }
 0x357   :  { %5606 = vmatmul.msk.f32.vlgmr.msrb.gmra.mxu0 %vm517_vm7, %v6738_v31 }
 0x35c   :  { %v900_v6 = vpop.permute.xlu1 %899 }
 0x35d   :  { %v902_v38 = vpop.permute.xlu2 %901 }
 0x35e   :  { %5619 = vmatpush.xpose.msk.msra.mxu1 %vm408_vm6, %v902_v38 }
 0x35f   :  { %5607 = vmatmul.msk.f32.gmra.mxu0 %vm517_vm7, %v6742_v35 }
 0x362   :  { %5620 = vmatpush.xpose.msk.msra.mxu1 %vm408_vm6, %v900_v6 }
 0x365   :  { %5621 = vmatmul.msk.f32.vlgmr.msra.gmra.mxu1 %vm408_vm6, %v857_v8  ;;  %v1128_v50 = vpop.permute.xlu2 %1127 }
 0x367   :  { %5617 = vmatmul.msk.f32.vlgmr.msra.gmra.mxu0 %vm408_vm6, %v857_v8 }
 0x36d   :  { %5622 = vmatmul.msk.f32.gmra.mxu1 %vm408_vm6, %v859_v34 }
 0x36f   :  { %5618 = vmatmul.msk.f32.gmra.mxu0 %vm408_vm6, %v859_v34 }
 0x37d   :  { %v753_v39 = vpop.xlane.xlu0 %752 }
 0x37e   :  { %6015 = vrcp.f32 %v753_v39 }
 0x384   :  { %v6016_v41 = vpop.eup %6015 }
 0x385   :  { %v6752_v42 = vmul.f32 %v6016_v41, %v6008_v16 }
 0x387   :  { %5615 = vmatmul.msk.f32.vlgmr.msra.gmra.mxu3 %vm517_vm7, %v6752_v42 }
 0x38c   :  { %v756_v43 = vpop.xlane.xlu0 %755 }
 0x38d   :  { %6017 = vrcp.f32 %v756_v43 }
 0x393   :  { %v6018_v44 = vpop.eup %6017 }
 0x394   :  { %v6756_v45 = vmul.f32 %v6018_v44, %v6010_v27 }
 0x396   :  { %5616 = vmatmul.msk.f32.gmra.mxu3 %vm517_vm7, %v6756_v45 }
 0x39e   :  { %5626 = vmatmul.msk.f32.vlgmr.msrb.gmra.mxu3 %vm408_vm6, %v1085_v32 }
 0x39f   :  { %v1087_v46 = vpop.permute.xlu0 %1086 }
 0x3a6   :  { %5627 = vmatmul.msk.f32.gmra.mxu3 %vm408_vm6, %v1087_v46 }
 0x3a7   :  { %v1130_v47 = vpop.permute.xlu0 %1129 }
 0x3a8   :  { %5628 = vmatpush.xpose.msk.msrb.mxu0 %vm408_vm6, %v1130_v47 }
 0x3ac   :  { %5629 = vmatpush.xpose.msk.msrb.mxu0 %vm408_vm6, %v1128_v50 }
 0x3af   :  { %5630 = vmatmul.msk.f32.vlgmr.msrb.gmra.mxu0 %vm408_vm6, %v1085_v32 }
 0x3b7   :  { %5631 = vmatmul.msk.f32.gmra.mxu0 %vm408_vm6, %v1087_v46 }
 0x3d4   :  { %v6766_v51 = vpop.f32.mrf.mxu0 }
 0x3dc   :  { %v6768_v53 = vpop.f32.mrf.mxu0 }
 0x3e2   :  { %v924_v13 = vpop.f32.mrf.mxu1 }
 0x3e4   :  { %v881_v58 = vpop.f32.mrf.mxu0 }
 0x3e5   :  { %943 = vperm.xlu2 %5880, %v881_v58   ;;  %931 = vperm.xlu0 %5879, %v881_v58  }
 0x3e6   :  { %889 = vperm.xlu1 %5878, %v881_v58  }
 0x3ea   :  { %v927_v29 = vpop.f32.mrf.mxu1 }
 0x3ec   :  { %v884_v59 = vpop.f32.mrf.mxu0 }
 0x3ed   :  { %5883 = vset.pattern.permute.xlu2 %v6372_v10  ;;  %5884 = vset.pattern.permute.xlu0 %v6374_v18 }
 0x3ee   :  { %5881 = vset.pattern.permute.xlu1 %v6375_v19  ;;  %947 = vperm.xlu0 %5884, %v884_v59  }
 0x3ef   :  { %955 = vperm.xlu1 %5881, %v881_v58   ;;  %935 = vperm.xlu2 %5883, %v884_v59  }
 0x3f6   :  { %5887 = vset.pattern.permute.xlu0 %v6372_v10 }
 0x3f7   :  { %5882 = vset.pattern.permute.xlu1 %v6373_v11  ;;  %5886 = vset.pattern.permute.xlu2 %v6373_v11 }
 0x3f8   :  { %894 = vperm.xlu1 %5882, %v884_v59  }
 0x400   :  { %5885 = vset.pattern.permute.xlu1 %v6375_v19 }
 0x401   :  { %959 = vperm.xlu1 %5885, %v884_v59  }
 0x409   :  { %5888 = vset.pattern.permute.xlu1 %v6374_v18 }
 0x40a   :  { %v6778_v60 = vpop.f32.mrf.mxu3 }
 0x419   :  { %v6780_v61 = vpop.f32.mrf.mxu3 }
 0x421   :  { %v1109_v62 = vpop.f32.mrf.mxu3 }
 0x422   :  { %1171 = vperm.xlu1 %5888, %v1109_v62   ;;  %1159 = vperm.xlu0 %5887, %v1109_v62  }
 0x423   :  { %1117 = vperm.xlu2 %5886, %v1109_v62  }
 0x429   :  { %v1112_v0 = vpop.f32.mrf.mxu3 }
 0x42a   :  { %5891 = vset.pattern.permute.xlu1 %v6372_v10  ;;  %5892 = vset.pattern.permute.xlu0 %v6374_v18 }
 0x42b   :  { %5889 = vset.pattern.permute.xlu2 %v6375_v19  ;;  %1175 = vperm.xlu0 %5892, %v1112_v0  }
 0x42c   :  { %1183 = vperm.xlu2 %5889, %v1109_v62   ;;  %1163 = vperm.xlu1 %5891, %v1112_v0   ;;  %v1152_v58 = vpop.f32.mrf.mxu0 }
 0x433   :  { %5897 = vset.pattern.permute.xlu0 %v6375_v19 }
 0x434   :  { %5890 = vset.pattern.permute.xlu2 %v6373_v11  ;;  %5894 = vset.pattern.permute.xlu1 %v6373_v11 }
 0x435   :  { %1122 = vperm.xlu2 %5890, %v1112_v0  }
 0x43d   :  { %5893 = vset.pattern.permute.xlu2 %v6375_v19 }
 0x43e   :  { %1187 = vperm.xlu2 %5893, %v1112_v0  }
 0x43f   :  { %v944_v2 = vpop.permute.xlu2 %943 }
 0x440   :  { %v950_v16 = vmul.f32 %v6654_v33, %v944_v2 }
 0x446   :  { %5895 = vset.pattern.permute.xlu2 %v6372_v10 }
 0x449   :  { %v936_v28 = vpop.permute.xlu2 %935 }
 0x44a   :  { %v939_v32 = vmul.f32 %v6664_v40, %v936_v28 }
 0x457   :  { %v932_v4 = vpop.permute.xlu0 %931 }
 0x458   :  { %v890_v3 = vpop.permute.xlu1 %889  ;;  %v938_v52 = vmul.f32 %v6648_v26, %v932_v4 }
 0x459   :  { %v897_v5 = vmul.f32 %v6645_v23, %v890_v3 }
 0x45b   :  { %v925_v14 = vadd.f32 %v924_v13, %v897_v5 }
 0x45d   :  { %v940_v15 = vadd.f32 %v938_v52, %v925_v14 }
 0x45f   :  { %v952_v20 = vadd.f32 %v950_v16, %v940_v15  ;;  %v1155_v16 = vpop.f32.mrf.mxu0 }
 0x460   :  { %v948_v34 = vpop.permute.xlu0 %947 }
 0x461   :  { %v956_v17 = vpop.permute.xlu1 %955  ;;  %v951_v38 = vmul.f32 %v6673_v49, %v948_v34 }
 0x462   :  { %v962_v21 = vmul.f32 %v6661_v37, %v956_v17 }
 0x464   :  { %v964_v22 = vadd.f32 %v962_v21, %v952_v20 }
 0x466   :  { %v966_v25 = vadd.f32 %v964_v22, %v6670_v48 }
 0x468   :  { %v968_v1 = vsel %vm517_vm7, %v966_v25, -inf }
 0x469   :  { %969 = vmax.xlane.f32.xlu1 %v968_v1 }
 0x46a   :  { %v895_v27 = vpop.permute.xlu1 %894 }
 0x46b   :  { %v898_v7 = vmul.f32 %v6658_v36, %v895_v27 }
 0x46d   :  { %v928_v30 = vadd.f32 %v927_v29, %v898_v7 }
 0x46f   :  { %v941_v57 = vadd.f32 %v939_v32, %v928_v30 }
 0x471   :  { %v953_v8 = vadd.f32 %v951_v38, %v941_v57 }
 0x473   :  { %v960_v6 = vpop.permute.xlu1 %959 }
 0x474   :  { %v963_v39 = vmul.f32 %v6680_v55, %v960_v6 }
 0x476   :  { %v965_v41 = vadd.f32 %v963_v39, %v953_v8 }
 0x478   :  { %v967_v43 = vadd.f32 %v965_v41, %v6686_v63 }
 0x47a   :  { %v971_v44 = vsel %vm521_vm8, %v967_v43, -inf }
 0x47b   :  { %972 = vmax.xlane.f32.xlu2 %v971_v44 }
 0x47d   :  { %v1118_v46 = vpop.permute.xlu2 %1117 }
 0x47e   :  { %v1125_v50 = vmul.f32 %v6645_v23, %v1118_v46 }
 0x480   :  { %v1153_v0 = vadd.f32 %v1152_v58, %v1125_v50 }
 0x486   :  { %v1184_v47 = vpop.permute.xlu2 %1183 }
 0x487   :  { %v1190_v14 = vmul.f32 %v6661_v37, %v1184_v47 }
 0x48f   :  { %v1123_v4 = vpop.permute.xlu2 %1122 }
 0x490   :  { %v1126_v2 = vmul.f32 %v6658_v36, %v1123_v4 }
 0x492   :  { %v1156_v22 = vadd.f32 %v1155_v16, %v1126_v2  ;;  %v820_v2 = vmul.f32 %v6654_v33, %v6752_v42  ;;  %v541_v16 = vmul.f32 %v6645_v23, %v6738_v31 }
 0x493   :  { %1002 = vrot.lane.b32.xlu2 %v6691_v9, %s6376_s12 }
 0x494   :  { %v1172_v59 = vpop.permute.xlu1 %1171  ;;  %v1160_v62 = vpop.permute.xlu0 %1159 }
 0x495   :  { %v1166_v3 = vmul.f32 %v6648_v26, %v1160_v62  ;;  %v1178_v5 = vmul.f32 %v6654_v33, %v1172_v59 }
 0x497   :  { %v1168_v13 = vadd.f32 %v1166_v3, %v1153_v0 }
 0x498   :  { %v1188_v28 = vpop.permute.xlu2 %1187 }
 0x499   :  { %v1180_v52 = vadd.f32 %v1178_v5, %v1168_v13  ;;  %v1191_v30 = vmul.f32 %v6680_v55, %v1188_v28  ;;  %v599_v28 = vmul.f32 %v6673_v49, %v6742_v35 }
 0x49b   :  { %v1192_v15 = vadd.f32 %v1190_v14, %v1180_v52  ;;  %v808_v14 = vmul.f32 %v6648_v26, %v6752_v42 }
 0x49d   :  { %v1194_v17 = vadd.f32 %v1192_v15, %v6670_v48  ;;  %v1176_v20 = vpop.permute.xlu0 %1175  ;;  %v810_v52 = vsel %vm517_vm7, %v808_v14, 0.0  ;;  %v822_v15 = vsel %vm517_vm7, %v820_v2, 0.0  ;;  %v6190_v14 = vld [vmem:[%s6429_s8 + $0x10] sm:$0xff] }
 0x49e   :  { %v1164_v21 = vpop.permute.xlu1 %1163  ;;  %v1179_v7 = vmul.f32 %v6673_v49, %v1176_v20  ;;  %v543_v20 = vsel %vm517_vm7, %v541_v16, 0.0 }
 0x49f   :  { %v1167_v1 = vmul.f32 %v6664_v40, %v1164_v21  ;;  %v1196_v27 = vsel %vm517_vm7, %v1194_v17, -inf }
 0x4a0   :  { %1197 = vmax.xlane.f32.xlu0 %v1196_v27 }
 0x4a1   :  { %v1169_v29 = vadd.f32 %v1167_v1, %v1156_v22  ;;  %v611_v22 = vmul.f32 %v6661_v37, %v6738_v31 }
 0x4a3   :  { %v1181_v32 = vadd.f32 %v1179_v7, %v1169_v29  ;;  %v613_v1 = vsel %vm517_vm7, %v611_v22, 0.0  ;;  %v809_v7 = vmul.f32 %v6664_v40, %v6756_v45  ;;  %v603_v29 = vsel %vm521_vm8, %v599_v28, 0.0 }
 0x4a5   :  { %v1193_v34 = vadd.f32 %v1191_v30, %v1181_v32  ;;  %v813_v30 = vsel %vm521_vm8, %v809_v7, 0.0  ;;  %v612_v32 = vmul.f32 %v6680_v55, %v6742_v35 }
 0x4a7   :  { %v1195_v57 = vadd.f32 %v1193_v34, %v6686_v63  ;;  %v821_v34 = vmul.f32 %v6673_v49, %v6756_v45 }
 0x4a9   :  { %v1199_v48 = vsel %vm521_vm8, %v1195_v57, -inf }
 0x4aa   :  { %1200 = vmax.xlane.f32.xlu1 %v1199_v48  ;;  %v825_v48 = vsel %vm521_vm8, %v821_v34, 0.0 }
 0x4dc   :  { %v970_v38 = vpop.xlane.xlu1 %969 }
 0x4dd   :  { %v974_v6 = vsub.f32 %v966_v25, %v970_v38 }
 0x4df   :  { %v976_v8 = vmul.f32 1.442695, %v974_v6  ;;  %v833_v6 = vmul.f32 %v6680_v55, %v6756_v45 }
 0x4e1   :  { %6019 = vpow2.f32 %v976_v8  ;;  %v761_v8 = vmul.f32 %v6645_v23, %v6752_v42 }
 0x4e7   :  { %v6816_v39 = vpop.eup %6019 }
 0x4e8   :  { %v980_v41 = vsel %vm517_vm7, %v6816_v39, 0.0 }
 0x4e9   :  { %981 = vadd.xlane.f32.xlu0 %v980_v41  ;;  %v837_v41 = vsel %vm521_vm8, %v833_v6, 0.0 }
 0x4ee   :  { %v973_v44 = vpop.xlane.xlu2 %972 }
 0x4ef   :  { %v975_v46 = vsub.f32 %v967_v43, %v973_v44  ;;  %v763_v44 = vsel %vm517_vm7, %v761_v8, 0.0 }
 0x4f1   :  { %v978_v47 = vmul.f32 1.442695, %v975_v46 }
 0x4f3   :  { %6021 = vpow2.f32 %v978_v47 }
 0x4f6   :  { %v1003_v50 = vpop.permute.xlu2 %1002 }
 0x4f7   :  { %5623 = vmatpush.msk.msra.mxu2 %vm558_vm9, %v1003_v50  ;;  %v598_v50 = vmul.f32 %v6654_v33, %v6738_v31 }
 0x4f9   :  { %v6821_v63 = vpop.eup %6021 }
 0x4fa   :  { %v983_v25 = vsel %vm521_vm8, %v6821_v63, 0.0 }
 0x4fb   :  { %984 = vadd.xlane.f32.xlu0 %v983_v25 }
 0x50f   :  { %1230 = vrot.lane.b32.xlu0 %v6691_v9, %s6377_s15 }
 0x513   :  { %v1198_v58 = vpop.xlane.xlu0 %1197 }
 0x514   :  { %v1202_v59 = vsub.f32 %v1194_v17, %v1198_v58  ;;  %v832_v17 = vmul.f32 %v6661_v37, %v6752_v42  ;;  %v600_v58 = vsel %vm517_vm7, %v598_v50, 0.0 }
 0x516   :  { %v1204_v62 = vmul.f32 1.442695, %v1202_v59  ;;  %v834_v21 = vsel %vm517_vm7, %v832_v17, 0.0  ;;  %v586_v59 = vmul.f32 %v6664_v40, %v6742_v35 }
 0x517   :  { %1228 = vrot.lane.b32.xlu0 %v6693_v12, %s6377_s15 }
 0x518   :  { %6023 = vpow2.f32 %v1204_v62  ;;  %v542_v62 = vmul.f32 %v6658_v36, %v6742_v35  ;;  %v6192_v35 = vld [vmem:[%s6429_s8] sm:$0xff] }
 0x51d   :  { %v1201_v43 = vpop.xlane.xlu1 %1200 }
 0x51e   :  { %v6829_v0 = vpop.eup %6023  ;;  %v1203_v3 = vsub.f32 %v1195_v57, %v1201_v43  ;;  %v616_v57 = vsel %vm521_vm8, %v612_v32, 0.0  ;;  %v546_v43 = vsel %vm521_vm8, %v542_v62, 0.0 }
 0x51f   :  { %v1208_v4 = vsel %vm517_vm7, %v6829_v0, 0.0 }
 0x520   :  { %v1206_v5 = vmul.f32 1.442695, %v1203_v3  ;;  %1209 = vadd.xlane.f32.xlu1 %v1208_v4 }
 0x522   :  { %6025 = vpow2.f32 %v1206_v5 }
 0x528   :  { %v6833_v13 = vpop.eup %6025 }
 0x529   :  { %v1211_v9 = vsel %vm521_vm8, %v6833_v13, 0.0 }
 0x52a   :  { %1212 = vadd.xlane.f32.xlu2 %v1211_v9  ;;  %v6189_v9 = vld [vmem:[%s6429_s8 + $0x18] sm:$0xff] }
 0x532   :  { %811 = vadd.xlane.f32.xlu2 %v810_v52  ;;  %v6191_v52 = vld [vmem:[%s6429_s8 + $0x8] sm:$0xff] }
 0x539   :  { %1000 = vrot.lane.b32.xlu1 %v6693_v12, %s6376_s12  ;;  %v762_v12 = vmul.f32 %v6658_v36, %v6756_v45  ;;  %v585_v45 = vmul.f32 %v6648_v26, %v6738_v31  ;;  %v590_v31 = vsel %vm521_vm8, %v586_v59, 0.0 }
 0x53a   :  { %823 = vadd.xlane.f32.xlu2 %v822_v15 }
 0x53b   :  { %v766_v27 = vsel %vm521_vm8, %v762_v12, 0.0 }
 0x541   :  { %544 = vadd.xlane.f32.xlu0 %v543_v20 }
 0x542   :  { %835 = vadd.xlane.f32.xlu2 %v834_v21 }
 0x549   :  { %614 = vadd.xlane.f32.xlu0 %v613_v1 }
 0x54a   :  { %767 = vadd.xlane.f32.xlu2 %v766_v27 }
 0x551   :  { %604 = vadd.xlane.f32.xlu0 %v603_v29 }
 0x552   :  { %814 = vadd.xlane.f32.xlu2 %v813_v30 }
 0x559   :  { %617 = vadd.xlane.f32.xlu0 %v616_v57 }
 0x55a   :  { %826 = vadd.xlane.f32.xlu2 %v825_v48 }
 0x55c   :  { %v982_v38 = vpop.xlane.xlu0 %981 }
 0x55d   :  { %6027 = vrcp.f32 %v982_v38 }
 0x562   :  { %838 = vadd.xlane.f32.xlu2 %v837_v41 }
 0x563   :  { %v6028_v46 = vpop.eup %6027  ;;  %764 = vadd.xlane.f32.xlu1 %v763_v44 }
 0x564   :  { %v6876_v47 = vmul.f32 %v6028_v46, %v6816_v39  ;;  %v587_v39 = vsel %vm517_vm7, %v585_v45, 0.0 }
 0x566   :  { %v990_v25 = vmul.f32 %v6645_v23, %v6876_v47 }
 0x568   :  { %v992_v42 = vsel %vm517_vm7, %v990_v25, 0.0 }
 0x569   :  { %993 = vadd.xlane.f32.xlu0 %v992_v42 }
 0x56a   :  { %601 = vadd.xlane.f32.xlu2 %v600_v58  ;;  %v6932_v58 = vld [vmem:[%s8804_s18 + $0x2] ss:$0 sm:$0xff] }
 0x56b   :  { %588 = vadd.xlane.f32.xlu1 %v587_v39  ;;  %v6935_v39 = vld [vmem:[%s8804_s18 + $0x1] ss:$0 sm:$0xff] }
 0x56e   :  { %v985_v3 = vpop.xlane.xlu0 %984 }
 0x572   :  { %591 = vadd.xlane.f32.xlu2 %v590_v31 }
 0x573   :  { %547 = vadd.xlane.f32.xlu1 %v546_v43  ;;  %v6940_v43 = vld [vmem:[%s8804_s18 + $0x3] ss:$0 sm:$0xff] }
 0x581   :  { %v1231_v4 = vpop.permute.xlu0 %1230 }
 0x582   :  { %5632 = vmatpush.msk.msrb.mxu1 %vm558_vm9, %v1231_v4 }
 0x589   :  { %v1229_v5 = vpop.permute.xlu0 %1228 }
 0x58a   :  { %1256 = vmatpush.msrb.mxu1 %v1229_v5  ;;  %v6945_v5 = vld [vmem:[%s8804_s18 + $0x4] ss:$0 sm:$0xff] }
 0x58c   :  { %1607 = vmatpush.msra.mxu1 %v6189_v9 }
 0x58e   :  { %1608 = vmatpush.msra.mxu1 %v6190_v14 }
 0x590   :  { %1609 = vmatpush.msra.mxu1 %v6191_v52 }
 0x592   :  { %1610 = vmatpush.msra.mxu1 %v6192_v35 }
 0x593   :  { %v1210_v2 = vpop.xlane.xlu1 %1209 }
 0x594   :  { %6029 = vrcp.f32 %v1210_v2 }
 0x59a   :  { %v6030_v15 = vpop.eup %6029 }
 0x59b   :  { %v1216_v16 = vmul.f32 %v6030_v15, %v6829_v0 }
 0x59d   :  { %v1213_v17 = vpop.xlane.xlu2 %1212  ;;  %5633 = vmatmul.msk.f32.vlgmr.msrb.gmra.mxu1 %vm517_vm7, %v1216_v16  ;;  %v1218_v20 = vmul.f32 %v6645_v23, %v1216_v16  ;;  %v1264_v21 = vmul.f32 %v6648_v26, %v1216_v16  ;;  %v1276_v1 = vmul.f32 %v6654_v33, %v1216_v16  ;;  %v1288_v32 = vmul.f32 %v6661_v37, %v1216_v16 }
 0x59e   :  { %6031 = vrcp.f32 %v1213_v17 }
 0x59f   :  { %v1220_v22 = vsel %vm517_vm7, %v1218_v20, 0.0  ;;  %v1266_v12 = vsel %vm517_vm7, %v1264_v21, 0.0  ;;  %v1278_v7 = vsel %vm517_vm7, %v1276_v1, 0.0  ;;  %6033 = vrcp.f32 %v985_v3 }
 0x5a0   :  { %1221 = vadd.xlane.f32.xlu2 %v1220_v22  ;;  %1267 = vadd.xlane.f32.xlu0 %v1266_v12 }
 0x5a4   :  { %v6032_v27 = vpop.eup %6031 }
 0x5a5   :  { %v1217_v28 = vmul.f32 %v6032_v27, %v6833_v13  ;;  %v812_v0 = vpop.xlane.xlu2 %811  ;;  %v1290_v13 = vsel %vm517_vm7, %v1288_v32, 0.0  ;;  %v6034_v57 = vpop.eup %6033 }
 0x5a6   :  { %v6915_v48 = vmul.f32 %v6034_v57, %v6821_v63  ;;  %v816_v4 = vmul.f32 %v6932_v58, %v812_v0 }
 0x5a7   :  { %5634 = vmatmul.msk.f32.gmra.mxu1 %vm517_vm7, %v1217_v28  ;;  %v1289_v23 = vmul.f32 %v6680_v55, %v1217_v28  ;;  %v1219_v38 = vmul.f32 %v6658_v36, %v1217_v28  ;;  %v1265_v41 = vmul.f32 %v6664_v40, %v1217_v28  ;;  %v1277_v63 = vmul.f32 %v6673_v49, %v1217_v28 }
 0x5a8   :  { %1279 = vadd.xlane.f32.xlu0 %v1278_v7 }
 0x5a9   :  { %v1293_v29 = vsel %vm521_vm8, %v1289_v23, 0.0  ;;  %v1223_v8 = vsel %vm521_vm8, %v1219_v38, 0.0  ;;  %v1269_v46 = vsel %vm521_vm8, %v1265_v41, 0.0  ;;  %v1281_v25 = vsel %vm521_vm8, %v1277_v63, 0.0 }
 0x5aa   :  { %1294 = vadd.xlane.f32.xlu2 %v1293_v29 }
 0x5ab   :  { %v1001_v30 = vpop.permute.xlu1 %1000 }
 0x5ac   :  { %1028 = vmatpush.msra.mxu2 %v1001_v30 }
 0x5ad   :  { %v824_v34 = vpop.xlane.xlu2 %823  ;;  %5624 = vmatmul.msk.f32.vlgmr.msra.gmra.mxu2 %vm517_vm7, %v6876_v47 }
 0x5ae   :  { %v828_v14 = vmul.f32 %v6940_v43, %v824_v34 }
 0x5b0   :  { %1291 = vadd.xlane.f32.xlu0 %v1290_v13 }
 0x5b4   :  { %v545_v45 = vpop.xlane.xlu0 %544 }
 0x5b5   :  { %v836_v6 = vpop.xlane.xlu2 %835  ;;  %5625 = vmatmul.msk.f32.gmra.mxu2 %vm517_vm7, %v6915_v48  ;;  %v550_v52 = vmul.f32 %v6935_v39, %v545_v45  ;;  %v1060_v45 = vmul.f32 %v6661_v37, %v6876_v47 }
 0x5b6   :  { %v840_v2 = vmul.f32 %v6945_v5, %v836_v6 }
 0x5b7   :  { %v580_v20 = vadd.f32 %v6766_v51, %v550_v52 }
 0x5b8   :  { %1224 = vadd.xlane.f32.xlu0 %v1223_v8  ;;  %v1036_v8 = vmul.f32 %v6648_v26, %v6876_v47  ;;  %v1062_v26 = vsel %vm517_vm7, %v1060_v45, 0.0 }
 0x5ba   :  { %v1038_v41 = vsel %vm517_vm7, %v1036_v8, 0.0 }
 0x5bc   :  { %v615_v62 = vpop.xlane.xlu0 %614 }
 0x5bd   :  { %v6922_v44 = vpop.xlane.xlu2 %767 }
 0x5c0   :  { %1270 = vadd.xlane.f32.xlu0 %v1269_v46 }
 0x5c4   :  { %v605_v12 = vpop.xlane.xlu0 %604 }
 0x5c5   :  { %v6926_v50 = vpop.xlane.xlu2 %814  ;;  %v608_v34 = vmul.f32 %v6940_v43, %v605_v12 }
 0x5c8   :  { %1282 = vadd.xlane.f32.xlu0 %v1281_v25 }
 0x5cc   :  { %v618_v32 = vpop.xlane.xlu0 %617 }
 0x5cd   :  { %v6929_v42 = vpop.xlane.xlu2 %826  ;;  %v621_v57 = vmul.f32 %v6945_v5, %v618_v32 }
 0x5d5   :  { %v6937_v59 = vpop.xlane.xlu2 %838 }
 0x5d6   :  { %v765_v31 = vpop.xlane.xlu1 %764 }
 0x5d7   :  { %v769_v3 = vmul.f32 %v6935_v39, %v765_v31 }
 0x5d9   :  { %v803_v9 = vadd.f32 %v6778_v60, %v769_v3  ;;  %v620_v60 = vmul.f32 %v6945_v5, %v615_v62 }
 0x5db   :  { %v818_v35 = vadd.f32 %v816_v4, %v803_v9 }
 0x5dc   :  { %v6966_v46 = vpop.xlane.xlu0 %993 }
 0x5dd   :  { %v602_v15 = vpop.xlane.xlu2 %601  ;;  %v830_v16 = vadd.f32 %v828_v14, %v818_v35  ;;  %v998_v8 = vmul.f32 %v6935_v39, %v6966_v46 }
 0x5de   :  { %v589_v17 = vpop.xlane.xlu1 %588  ;;  %v607_v1 = vmul.f32 %v6940_v43, %v602_v15 }
 0x5df   :  { %v594_v21 = vmul.f32 %v6932_v58, %v589_v17  ;;  %v842_v22 = vadd.f32 %v840_v2, %v830_v16  ;;  %v1037_v17 = vmul.f32 %v6664_v40, %v6915_v48 }
 0x5e1   :  { %v596_v27 = vadd.f32 %v594_v21, %v580_v20  ;;  %846 = vrot.lane.b32.xlu1 %v842_v22, %s6368_s1  ;;  %v1041_v20 = vsel %vm521_vm8, %v1037_v17, 0.0  ;;  %v1061_v22 = vmul.f32 %v6680_v55, %v6915_v48  ;;  %v841_v55 = vmul.f32 %v6945_v5, %v6937_v59 }
 0x5e3   :  { %v609_v28 = vadd.f32 %v607_v1, %v596_v27  ;;  %v1065_v12 = vsel %vm521_vm8, %v1061_v22, 0.0  ;;  %v770_v27 = vmul.f32 %v6935_v39, %v6922_v44  ;;  %v6196_v22 = vld [vmem:[%s6439_s19] sm:$0xff] }
 0x5e5   :  { %v622_v0 = vadd.f32 %v620_v60, %v609_v28  ;;  %v592_v7 = vpop.xlane.xlu2 %591  ;;  %v817_v60 = vmul.f32 %v6932_v58, %v6926_v50  ;;  %v806_v28 = vadd.f32 %v6780_v61, %v770_v27 }
 0x5e6   :  { %v548_v23 = vpop.xlane.xlu1 %547  ;;  %v595_v51 = vmul.f32 %v6932_v58, %v592_v7 }
 0x5e7   :  { %624 = vst.msk [vmem:[#allocation2] sm:$0xff] %vm408_vm6, %v622_v0  ;;  %v551_v29 = vmul.f32 %v6935_v39, %v548_v23  ;;  %v819_v0 = vadd.f32 %v817_v60, %v806_v28 }
 0x5e9   :  { %v583_v30 = vadd.f32 %v6768_v53, %v551_v29  ;;  %v1048_v53 = vmul.f32 %v6654_v33, %v6876_v47  ;;  %v991_v33 = vmul.f32 %v6658_v36, %v6915_v48  ;;  %v1049_v36 = vmul.f32 %v6673_v49, %v6915_v48 }
 0x5ea   :  { %v829_v49 = vmul.f32 %v6940_v43, %v6929_v42 }
 0x5eb   :  { %v597_v13 = vadd.f32 %v595_v51, %v583_v30  ;;  %v1050_v63 = vsel %vm517_vm7, %v1048_v53, 0.0  ;;  %v995_v2 = vsel %vm521_vm8, %v991_v33, 0.0  ;;  %v1053_v21 = vsel %vm521_vm8, %v1049_v36, 0.0  ;;  %v6194_v36 = vld [vmem:[%s6439_s19 + $0x10] sm:$0xff] }
 0x5ec   :  { %v831_v29 = vadd.f32 %v829_v49, %v819_v0 }
 0x5ed   :  { %v610_v38 = vadd.f32 %v608_v34, %v597_v13 }
 0x5ee   :  { %v843_v30 = vadd.f32 %v841_v55, %v831_v29 }
 0x5ef   :  { %v623_v6 = vadd.f32 %v621_v57, %v610_v38 }
 0x5f1   :  { %626 = vst.msk [vmem:[#allocation2 + $0x8] sm:$0x1] %vm625_vm10, %v623_v6 }
 0x60b   :  { %1039 = vadd.xlane.f32.xlu1 %v1038_v41 }
 0x613   :  { %v1268_v25 = vpop.xlane.xlu0 %1267  ;;  %1051 = vadd.xlane.f32.xlu1 %v1050_v63  ;;  %v1222_v62 = vpop.xlane.xlu2 %1221 }
 0x614   :  { %v1226_v31 = vmul.f32 %v6935_v39, %v1222_v62  ;;  %v1272_v14 = vmul.f32 %v6932_v58, %v1268_v25 }
 0x61a   :  { %v1258_v3 = vpop.f32.mrf.mxu1 }
 0x61b   :  { %v1280_v4 = vpop.xlane.xlu0 %1279  ;;  %1063 = vadd.xlane.f32.xlu1 %v1062_v26  ;;  %v1259_v9 = vadd.f32 %v1258_v3, %v1226_v31 }
 0x61c   :  { %v1284_v35 = vmul.f32 %v6940_v43, %v1280_v4 }
 0x61d   :  { %v1274_v52 = vadd.f32 %v1272_v14, %v1259_v9  ;;  %v1295_v42 = vpop.xlane.xlu2 %1294 }
 0x61e   :  { %v1297_v34 = vmul.f32 %v6945_v5, %v1295_v42 }
 0x61f   :  { %v1286_v47 = vadd.f32 %v1284_v35, %v1274_v52 }
 0x623   :  { %v1292_v37 = vpop.xlane.xlu0 %1291  ;;  %996 = vadd.xlane.f32.xlu1 %v995_v2 }
 0x624   :  { %v1296_v15 = vmul.f32 %v6945_v5, %v1292_v37  ;;  %v1261_v51 = vpop.f32.mrf.mxu1 }
 0x626   :  { %v1298_v16 = vadd.f32 %v1296_v15, %v1286_v47 }
 0x628   :  { %1302 = vrot.lane.b32.xlu0 %v1298_v16, %s6378_s22 }
 0x62b   :  { %1042 = vadd.xlane.f32.xlu1 %v1041_v20  ;;  %v1225_v1 = vpop.xlane.xlu0 %1224  ;;  %v299_v20 = vld [vmem:[#allocation4] sm:$0xff] }
 0x62c   :  { %v1227_v48 = vmul.f32 %v6935_v39, %v1225_v1  ;;  %v5592_v1 = vld [vmem:[%s6389_s5 + $0x18] sm:$0x1] }
 0x62d   :  { %v244_v27 = vsel %vm186_vm1, %v5592_v1, 0.0 }
 0x62e   :  { %v1262_v44 = vadd.f32 %v1261_v51, %v1227_v48 }
 0x630   :  { %v1030_v6 = vpop.f32.mrf.mxu2 }
 0x631   :  { %v1031_v53 = vadd.f32 %v1030_v6, %v998_v8 }
 0x633   :  { %1054 = vadd.xlane.f32.xlu1 %v1053_v21  ;;  %v1271_v40 = vpop.xlane.xlu0 %1270  ;;  %v6195_v21 = vld [vmem:[%s6439_s19 + $0x8] sm:$0xff] }
 0x634   :  { %v1273_v23 = vmul.f32 %v6932_v58, %v1271_v40 }
 0x636   :  { %v1275_v32 = vadd.f32 %v1273_v23, %v1262_v44 }
 0x638   :  { %v1033_v33 = vpop.f32.mrf.mxu2 }
 0x63b   :  { %1066 = vadd.xlane.f32.xlu1 %v1065_v12  ;;  %v1283_v7 = vpop.xlane.xlu0 %1282  ;;  %v5591_v12 = vld [vmem:[%s6389_s5 + $0x10] sm:$0xff]  ;;  %s8805_s5 = sld [smem:[#allocation12_spill]] }
 0x63c   :  { %v1285_v50 = vmul.f32 %v6940_v43, %v1283_v7  ;;  %v243_v40 = vsel %vm184_vm0, %v5591_v12, 0.0 }
 0x63d   :  { %v245_v60 = vadd.f32 %v244_v27, %v243_v40  ;;  %v6199_v27 = vld [vmem:[%s6434_s14] ss:$0 sm:$0xff] }
 0x63e   :  { %v1287_v59 = vadd.f32 %v1285_v50, %v1275_v32 }
 0x63f   :  { %v246_v28 = vrot.slane %v245_v60, 4 }
 0x640   :  { %v1299_v13 = vadd.f32 %v1297_v34, %v1287_v59 }
 0x641   :  { %v247_v49 = vadd.f32 %v246_v28, %v245_v60 }
 0x643   :  { %v248_v0 = vrot.slane %v247_v49, 2 }
 0x645   :  { %v249_v7 = vadd.f32 %v248_v0, %v247_v49 }
 0x647   :  { %v250_v23 = vrot.slane %v249_v7, 1 }
 0x649   :  { %v251_v29 = vadd.f32 %v250_v23, %v249_v7 }
 0x64b   :  { %v252_v51 = vmul.f32 %v251_v29, %v6561_v24 }
 0x64d   :  { %v253_v50 = vsub.f32 %v5591_v12, %v252_v51 }
 0x653   :  { %v847_v61 = vpop.permute.xlu1 %846 }
 0x654   :  { %853 = vst.msk [vmem:[#allocation2] sm:$0xff] %vm852_vm11, %v847_v61  ;;  %848 = vrot.lane.b32.xlu1 %v843_v30, %s6368_s1  ;;  %v254_v30 = vsub.f32 %v5592_v1, %v252_v51  ;;  %v255_v61 = vmul.f32 %v253_v50, %v253_v50 }
 0x656   :  { %v256_v32 = vmul.f32 %v254_v30, %v254_v30  ;;  %v257_v42 = vsel %vm184_vm0, %v255_v61, 0.0 }
 0x658   :  { %v258_v59 = vsel %vm186_vm1, %v256_v32, 0.0  ;;  %v7064_v32 = vld [vmem:[#allocation6 + $0x18] sm:$0xff] }
 0x659   :  { %v259_v34 = vadd.f32 %v258_v59, %v257_v42  ;;  %1416 = vmatpush.msra.mxu3 %v7064_v32  ;;  %v7067_v59 = vld [vmem:[#allocation6 + $0x10] sm:$0xff] }
 0x65b   :  { %1417 = vmatpush.msra.mxu3 %v7067_v59 }
 0x65c   :  { %1304 = vrot.lane.b32.xlu1 %v1299_v13, %s6378_s22  ;;  %v260_v13 = vrot.slane %v259_v34, 4 }
 0x67e   :  { %v1040_v57 = vpop.xlane.xlu1 %1039 }
 0x67f   :  { %v1044_v41 = vmul.f32 %v6932_v58, %v1040_v57  ;;  %v261_v57 = vadd.f32 %v260_v13, %v259_v34  ;;  %v7070_v13 = vld [vmem:[#allocation6 + $0x8] sm:$0xff] }
 0x680   :  { %1418 = vmatpush.msra.mxu3 %v7070_v13 }
 0x681   :  { %v1046_v25 = vadd.f32 %v1044_v41, %v1031_v53 }
 0x686   :  { %v1052_v38 = vpop.xlane.xlu1 %1051 }
 0x687   :  { %v1056_v63 = vmul.f32 %v6940_v43, %v1052_v38  ;;  %v262_v38 = vrot.slane %v261_v57, 2 }
 0x689   :  { %v1058_v62 = vadd.f32 %v1056_v63, %v1046_v25  ;;  %v263_v6 = vadd.f32 %v262_v38, %v261_v57  ;;  %v7072_v57 = vld [vmem:[#allocation6] sm:$0xff] }
 0x68a   :  { %1419 = vmatpush.msra.mxu3 %v7072_v57 }
 0x68b   :  { %v264_v8 = vrot.slane %v263_v6, 1 }
 0x68d   :  { %v265_v41 = vadd.f32 %v264_v8, %v263_v6 }
 0x68e   :  { %v1064_v45 = vpop.xlane.xlu1 %1063 }
 0x68f   :  { %v1068_v31 = vmul.f32 %v6945_v5, %v1064_v45  ;;  %v266_v53 = vmul.f32 %v265_v41, %v6561_v24 }
 0x691   :  { %v1070_v3 = vadd.f32 %v1068_v31, %v1058_v62  ;;  %v267_v63 = vadd.f32 1e-12, %v266_v53  ;;  %v6200_v53 = vld [vmem:[%s6449_s30 + $0x18] sm:$0xff] }
 0x692   :  { %1653 = vmatpush.msrb.mxu3 %v6200_v53 }
 0x693   :  { %1074 = vrot.lane.b32.xlu2 %v1070_v3, %s6379_s23  ;;  %6035 = vrsqrt.f32 %v267_v63  ;;  %vm274_vm3 = vweird.f32 %v267_v63 }
 0x696   :  { %v997_v26 = vpop.xlane.xlu1 %996 }
 0x697   :  { %v999_v14 = vmul.f32 %v6935_v39, %v997_v26  ;;  %v301_v39 = vld [vmem:[#allocation4 + $0x10] sm:$0xff] }
 0x699   :  { %v1034_v52 = vadd.f32 %v1033_v33, %v999_v14  ;;  %v6036_v62 = vpop.eup %6035 }
 0x69a   :  { %v1303_v48 = vpop.permute.xlu0 %1302  ;;  %v269_v31 = vmul.f32 %v6036_v62, %v267_v63  ;;  %vm275_vm4 = vweird.f32 %v6036_v62 }
 0x69b   :  { %vm276_vm5 = vmor %vm274_vm3, %vm275_vm4 }
 0x69c   :  { %v270_v26 = vmul.f32 %v6036_v62, %v269_v31  ;;  %v6202_v31 = vld [vmem:[%s6449_s30 + $0x8] sm:$0xff] }
 0x69e   :  { %v1043_v4 = vpop.xlane.xlu1 %1042 }
 0x69f   :  { %v1045_v46 = vmul.f32 %v6932_v58, %v1043_v4  ;;  %v302_v58 = vld [vmem:[#allocation4 + $0x18] sm:$0xff]  ;;  %v271_v4 = vmul.f32 0.5, %v270_v26  ;;  %v6203_v26 = vld [vmem:[%s6449_s30] sm:$0xff] }
 0x6a0   :  { %1335 = vmatpush.msrb.mxu2 %v302_v58  ;;  %v5978_v58 = vld [vmem:[%s8805_s5] ss:$0 sm:$0xff] }
 0x6a1   :  { %v1047_v2 = vadd.f32 %v1045_v46, %v1034_v52  ;;  %v6197_v52 = vld [vmem:[%s6419_s29] ss:$0 sm:$0xff]  ;;  %s8806_s29 = sld [smem:[#allocation13_spill]] }
 0x6a2   :  { %1336 = vmatpush.msrb.mxu2 %v301_v39 }
 0x6a6   :  { %v1055_v9 = vpop.xlane.xlu1 %1054 }
 0x6a7   :  { %v1057_v35 = vmul.f32 %v6940_v43, %v1055_v9  ;;  %v300_v43 = vld [vmem:[#allocation4 + $0x8] sm:$0xff]  ;;  %v272_v9 = vsub.f32 1.5, %v271_v4 }
 0x6a8   :  { %1337 = vmatpush.msrb.mxu2 %v300_v43 }
 0x6a9   :  { %v1059_v47 = vadd.f32 %v1057_v35, %v1047_v2  ;;  %v273_v14 = vmul.f32 %v6036_v62, %v272_v9  ;;  %v6204_v9 = vld [vmem:[%s6444_s24] ss:$0 sm:$0xff] }
 0x6aa   :  { %1338 = vmatpush.msrb.mxu2 %v299_v20 }
 0x6ab   :  { %v277_v46 = vsel %vm276_vm5, %v6036_v62, %v273_v14 }
 0x6ac   :  { %v278_v33 = vmul.f32 %v277_v46, %v253_v50  ;;  %v279_v2 = vmul.f32 %v277_v46, %v254_v30 }
 0x6ae   :  { %v1067_v37 = vpop.xlane.xlu1 %1066  ;;  %v280_v35 = vmul.f32 %v6197_v52, %v278_v33 }
 0x6af   :  { %v1069_v15 = vmul.f32 %v6945_v5, %v1067_v37  ;;  %v6193_v5 = vld [vmem:[%s6439_s19 + $0x18] sm:$0xff]  ;;  %v6198_v37 = vld [vmem:[%s6424_s3] ss:$0 sm:$0xff]  ;;  %s8807_s3 = sld [smem:[#allocation14_spill]] }
 0x6b0   :  { %1630 = vmatpush.msra.mxu2 %v6193_v5 }
 0x6b1   :  { %v1071_v16 = vadd.f32 %v1069_v15, %v1059_v47  ;;  %v7039_v47 = vadd.f32 %v6198_v37, %v280_v35  ;;  %v281_v15 = vmul.f32 %v6197_v52, %v279_v2 }
 0x6b2   :  { %1631 = vmatpush.msra.mxu2 %v6194_v36 }
 0x6b3   :  { %1076 = vrot.lane.b32.xlu2 %v1071_v16, %s6379_s23  ;;  %5641 = vmatmul.msk.f32.vlgmr.msra.gmra.mxu1 %vm184_vm0, %v7039_v47  ;;  %v7045_v16 = vadd.f32 %v6198_v37, %v281_v15 }
 0x6b4   :  { %1632 = vmatpush.msra.mxu2 %v6195_v21 }
 0x6b6   :  { %1633 = vmatpush.msra.mxu2 %v6196_v22 }
 0x6bb   :  { %5642 = vmatmul.msk.f32.gmra.mxu1 %vm184_vm0, %v7045_v16 }
 0x6c6   :  { %v849_v17 = vpop.permute.xlu1 %848 }
 0x6c7   :  { %855 = vst.msk [vmem:[#allocation2 + $0x8] sm:$0x1] %vm854_vm12, %v849_v17 }
 0x6ce   :  { %v1305_v45 = vpop.permute.xlu1 %1304 }
 0x6ed   :  { %v1075_v55 = vpop.permute.xlu2 %1074 }
 0x6ee   :  { %1081 = vst.msk [vmem:[#allocation2] sm:$0xff] %vm1080_vm13, %v1075_v55 }
 0x6ef   :  { %1309 = vst.msk [vmem:[#allocation2] sm:$0xff] %vm1308_vm14, %v1303_v48 }
 0x6f6   :  { %v1312_v44 = vld [vmem:[#allocation2] sm:$0xff] }
 0x6f7   :  { %5635 = vmatmul.msk.f32.vlgmr.msrb.gmra.mxu2 %vm184_vm0, %v1312_v44 }
 0x70d   :  { %v1077_v25 = vpop.permute.xlu2 %1076 }
 0x70e   :  { %1083 = vst.msk [vmem:[#allocation2 + $0x8] sm:$0x1] %vm8790_vm15, %v1077_v25 }
 0x70f   :  { %1311 = vst.msk [vmem:[#allocation2 + $0x8] sm:$0x1] %vm8789_vm2, %v1305_v45  ;;  %v6201_v45 = vld [vmem:[%s6449_s30 + $0x10] sm:$0xff] }
 0x710   :  { %1654 = vmatpush.msrb.mxu3 %v6201_v45 }
 0x712   :  { %1655 = vmatpush.msrb.mxu3 %v6202_v31  ;;  %v7166_v31 = vld [vmem:[%s8809_s28 + $0x8] sm:$0xff] }
 0x714   :  { %1656 = vmatpush.msrb.mxu3 %v6203_v26 }
 0x716   :  { %v1313_v3 = vld [vmem:[#allocation2 + $0x8] sm:$0x1] }
 0x717   :  { %5636 = vmatmul.msk.f32.gmra.mxu2 %vm184_vm0, %v1313_v3 }
 0x71f   :  { %5643 = vmatmul.msk.f32.vlgmr.msra.gmra.mxu2 %vm184_vm0, %v7039_v47 }
 0x727   :  { %5644 = vmatmul.msk.f32.gmra.mxu2 %vm184_vm0, %v7045_v16 }
 0x730   :  { %v1612_v40 = vpop.f32.mrf.mxu1 }
 0x731   :  { %v1613_v60 = vadd.f32 %v6199_v27, %v1612_v40 }
 0x733   :  { %v7057_v49 = vmul.f32 0.35355338, %v1613_v60  ;;  %v5981_v60 = vld [vmem:[%s8808_s26] ss:$0 sm:$0xff] }
 0x735   :  { %1876 = vrot.lane.b32.xlu0 %v7057_v49, %s6371_s17 }
 0x738   :  { %v1615_v8 = vpop.f32.mrf.mxu1 }
 0x739   :  { %v1616_v41 = vadd.f32 %v6199_v27, %v1615_v8  ;;  %v7158_v8 = vld [vmem:[%s8809_s28 + $0x18] sm:$0xff] }
 0x73b   :  { %v7077_v25 = vmul.f32 0.35355338, %v1616_v41 }
 0x73d   :  { %1878 = vrot.lane.b32.xlu2 %v7077_v25, %s6371_s17 }
 0x77a   :  { %v1340_v17 = vpop.f32.mrf.mxu2 }
 0x77b   :  { %v1341_v39 = vadd.f32 %v5978_v58, %v1340_v17 }
 0x77d   :  { %v1346_v20 = vadd.f32 %v1341_v39, %v6569_v54 }
 0x77f   :  { %v1348_v21 = vsel %vm184_vm0, %v1346_v20, 0.0 }
 0x797   :  { %v7124_v27 = vpop.permute.xlu2 %1878 }
 0x79a   :  { %v1343_v43 = vpop.f32.mrf.mxu2 }
 0x79b   :  { %v1344_v5 = vadd.f32 %v5978_v58, %v1343_v43  ;;  %v5979_v58 = vld [vmem:[%s8806_s29] ss:$0 sm:$0xff] }
 0x79d   :  { %v1347_v36 = vadd.f32 %v1344_v5, %v6575_v56 }
 0x79f   :  { %v1349_v22 = vsel %vm186_vm1, %v1347_v36, 0.0 }
 0x7a0   :  { %v1350_v12 = vadd.f32 %v1349_v22, %v1348_v21  ;;  %v7107_v22 = vld [vmem:[%s6409_s21] sm:$0xff] }
 0x7a2   :  { %v1351_v1 = vrot.slane %v1350_v12, 4  ;;  %v1635_v4 = vpop.f32.mrf.mxu2 }
 0x7a3   :  { %v7086_v14 = vadd.f32 %v6204_v9, %v1635_v4 }
 0x7a4   :  { %v1352_v28 = vadd.f32 %v1351_v1, %v1350_v12 }
 0x7a5   :  { %1919 = vrot.lane.b32.xlu0 %v7086_v14, %s6371_s17 }
 0x7a6   :  { %v1353_v0 = vrot.slane %v1352_v28, 2 }
 0x7a7   :  { %v7120_v40 = vpop.permute.xlu0 %1876 }
 0x7a8   :  { %v1354_v54 = vadd.f32 %v1353_v0, %v1352_v28 }
 0x7aa   :  { %v1355_v55 = vrot.slane %v1354_v54, 1  ;;  %v1638_v52 = vpop.f32.mrf.mxu2 }
 0x7ab   :  { %v7090_v2 = vadd.f32 %v6204_v9, %v1638_v52 }
 0x7ac   :  { %v1356_v48 = vadd.f32 %v1355_v55, %v1354_v54 }
 0x7ad   :  { %5649 = vmatpush.xpose.msk.msrb.mxu1 %vm408_vm6, %v7090_v2  ;;  %1921 = vrot.lane.b32.xlu1 %v7090_v2, %s6371_s17 }
 0x7ae   :  { %v1357_v56 = vmul.f32 %v1356_v48, %v6561_v24 }
 0x7b0   :  { %v1358_v7 = vsub.f32 %v1346_v20, %v1357_v56  ;;  %v1359_v23 = vsub.f32 %v1347_v36, %v1357_v56  ;;  %v5980_v20 = vld [vmem:[%s8807_s3] ss:$0 sm:$0xff] }
 0x7b1   :  { %5650 = vmatpush.xpose.msk.msrb.mxu1 %vm408_vm6, %v7086_v14 }
 0x7b2   :  { %v1360_v29 = vmul.f32 %v1358_v7, %v1358_v7  ;;  %v1361_v51 = vmul.f32 %v1359_v23, %v1359_v23 }
 0x7b4   :  { %v1362_v44 = vsel %vm184_vm0, %v1360_v29, 0.0  ;;  %v1363_v50 = vsel %vm186_vm1, %v1361_v51, 0.0  ;;  %5651 = vmatmul.msk.f32.vlgmr.msrb.gmra.mxu1 %vm408_vm6, %v7057_v49  ;;  %v7138_v29 = vld [vmem:[%s8809_s28 + $0x38] sm:$0xff] }
 0x7b5   :  { %v1364_v30 = vadd.f32 %v1363_v50, %v1362_v44  ;;  %1525 = vmatpush.msra.mxu0 %v7138_v29  ;;  %v7145_v44 = vld [vmem:[%s8809_s28 + $0x30] sm:$0xff] }
 0x7b7   :  { %v1365_v61 = vrot.slane %v1364_v30, 4  ;;  %1526 = vmatpush.msra.mxu0 %v7145_v44 }
 0x7b9   :  { %v1366_v42 = vadd.f32 %v1365_v61, %v1364_v30  ;;  %v7150_v30 = vld [vmem:[%s8809_s28 + $0x28] sm:$0xff] }
 0x7ba   :  { %1527 = vmatpush.msra.mxu0 %v7150_v30 }
 0x7bb   :  { %v1367_v34 = vrot.slane %v1366_v42, 2 }
 0x7bc   :  { %5652 = vmatmul.msk.f32.gmra.mxu1 %vm408_vm6, %v7077_v25 }
 0x7bd   :  { %v1368_v38 = vadd.f32 %v1367_v34, %v1366_v42  ;;  %v7154_v34 = vld [vmem:[%s8809_s28 + $0x20] sm:$0xff] }
 0x7be   :  { %1528 = vmatpush.msra.mxu0 %v7154_v34 }
 0x7bf   :  { %v1369_v6 = vrot.slane %v1368_v38, 1 }
 0x7c0   :  { %1529 = vmatpush.msra.mxu0 %v7158_v8 }
 0x7c1   :  { %v1370_v63 = vadd.f32 %v1369_v6, %v1368_v38 }
 0x7c3   :  { %v1371_v62 = vmul.f32 %v1370_v63, %v6561_v24  ;;  %v7162_v63 = vld [vmem:[%s8809_s28 + $0x10] sm:$0xff] }
 0x7c4   :  { %1530 = vmatpush.msra.mxu0 %v7162_v63 }
 0x7c5   :  { %v1372_v3 = vadd.f32 1e-12, %v1371_v62 }
 0x7c6   :  { %1531 = vmatpush.msra.mxu0 %v7166_v31 }
 0x7c7   :  { %6037 = vrsqrt.f32 %v1372_v3  ;;  %vm1379_vm4 = vweird.f32 %v1372_v3 }
 0x7cd   :  { %v6038_v46 = vpop.eup %6037 }
 0x7ce   :  { %v1374_v33 = vmul.f32 %v6038_v46, %v1372_v3  ;;  %vm1380_vm3 = vweird.f32 %v6038_v46  ;;  %v7169_v3 = vld [vmem:[%s8809_s28] sm:$0xff] }
 0x7cf   :  { %vm1381_vm5 = vmor %vm1379_vm4, %vm1380_vm3  ;;  %1532 = vmatpush.msra.mxu0 %v7169_v3 }
 0x7d0   :  { %v1375_v35 = vmul.f32 %v6038_v46, %v1374_v33 }
 0x7d1   :  { %1687 = vmatpush.msrb.mxu0 %v7107_v22 }
 0x7d2   :  { %v1376_v37 = vmul.f32 0.5, %v1375_v35 }
 0x7d4   :  { %v1377_v15 = vsub.f32 1.5, %v1376_v37 }
 0x7d6   :  { %v1378_v17 = vmul.f32 %v6038_v46, %v1377_v15 }
 0x7d8   :  { %v1382_v39 = vsel %vm1381_vm5, %v6038_v46, %v1378_v17 }
 0x7d9   :  { %v1383_v43 = vmul.f32 %v1382_v39, %v1358_v7  ;;  %v1384_v36 = vmul.f32 %v1382_v39, %v1359_v23 }
 0x7db   :  { %v1388_v5 = vmul.f32 %v5979_v58, %v1383_v43  ;;  %v1389_v12 = vmul.f32 %v5979_v58, %v1384_v36 }
 0x7dd   :  { %v7102_v21 = vadd.f32 %v5980_v20, %v1388_v5  ;;  %v7112_v1 = vadd.f32 %v5980_v20, %v1389_v12 }
 0x7df   :  { %5637 = vmatmul.msk.f32.vlgmr.msra.gmra.mxu3 %vm184_vm0, %v7102_v21 }
 0x7e0   :  { %1899 = vmatpush.msra.mxu3 %v7107_v22 }
 0x7e7   :  { %5638 = vmatmul.msk.f32.gmra.mxu3 %vm184_vm0, %v7112_v1 }
 0x7ef   :  { %5645 = vmatmul.msk.f32.vlgmr.msrb.gmra.mxu3 %vm184_vm0, %v7039_v47 }
 0x7f7   :  { %5646 = vmatmul.msk.f32.gmra.mxu3 %vm184_vm0, %v7045_v16 }
 0x7ff   :  { %5656 = vmatmul.msk.f32.vlgmr.msra.gmra.mxu3 %vm408_vm6, %v7120_v40 }
 0x807   :  { %5657 = vmatmul.msk.f32.gmra.mxu3 %vm408_vm6, %v7124_v27 }
 0x862   :  { %v1421_v28 = vpop.f32.mrf.mxu3 }
 0x863   :  { %v7129_v0 = vadd.f32 %v5981_v60, %v1421_v28 }
 0x865   :  { %v7132_v54 = vmul.f32 0.70710677, %v7129_v0 }
 0x867   :  { %v1431_v55 = vand.u32 2147483647, %v7132_v54 }
 0x869   :  { %v1433_v48 = vmul.f32 0.3275911, %v1431_v55  ;;  %v1485_v52 = vsub.f32 0.0, %v1431_v55 }
 0x86a   :  { %v1424_v56 = vpop.f32.mrf.mxu3 }
 0x86b   :  { %v1435_v7 = vadd.f32 1.0, %v1433_v48  ;;  %v7135_v23 = vadd.f32 %v5981_v60, %v1424_v56  ;;  %v1487_v39 = vmul.f32 %v1485_v52, %v1431_v55 }
 0x86d   :  { %6039 = vrcp.f32 %v1435_v7  ;;  %v7141_v51 = vmul.f32 0.70710677, %v7135_v23  ;;  %v1448_v53 = vand.u32 2147483648, %v1435_v7  ;;  %v1446_v62 = vand.u32 2147483647, %v1435_v7 }
 0x86e   :  { %vm1442_vm4 = vweird.f32 %v1435_v7  ;;  %v1489_v28 = vmul.f32 1.442695, %v1487_v39 }
 0x86f   :  { %v1432_v50 = vand.u32 2147483647, %v7141_v51  ;;  %v1449_v4 = vor.u32 1.1754944e-38, %v1448_v53  ;;  %vm1447_vm2 = vcmp.eq.f32.partialorder %v1446_v62, 8.507059e+37 }
 0x871   :  { %v1434_v61 = vmul.f32 0.3275911, %v1432_v50 }
 0x873   :  { %v6040_v42 = vpop.eup %6039  ;;  %v1436_v6 = vadd.f32 1.0, %v1434_v61 }
 0x874   :  { %v1438_v38 = vmul.f32 %v6040_v42, %v1435_v7  ;;  %vm1443_vm3 = vweird.f32 %v6040_v42  ;;  %v1486_v7 = vsub.f32 0.0, %v1432_v50 }
 0x875   :  { %6041 = vrcp.f32 %v1436_v6  ;;  %vm1444_vm5 = vmor %vm1442_vm4, %vm1443_vm3  ;;  %v1463_v58 = vand.u32 2147483648, %v1436_v6  ;;  %v1461_v20 = vand.u32 2147483647, %v1436_v6  ;;  %vm1457_vm3 = vweird.f32 %v1436_v6 }
 0x876   :  { %v1439_v41 = vsub.f32 1.0, %v1438_v38  ;;  %6043 = vpow2.f32 %v1489_v28  ;;  %v1488_v53 = vmul.f32 %v1486_v7, %v1432_v50  ;;  %v6206_v50 = vld [vmem:[%s6454_s6] ss:$0 sm:$0xff]  ;;  %v1922_v7 = vpop.permute.xlu1 %1921 }
 0x877   :  { %v1464_v60 = vor.u32 1.1754944e-38, %v1463_v58 }
 0x878   :  { %v1440_v45 = vmul.f32 %v6040_v42, %v1439_v41 }
 0x87a   :  { %v1441_v26 = vadd.f32 %v6040_v42, %v1440_v45 }
 0x87b   :  { %v6042_v9 = vpop.eup %6041 }
 0x87c   :  { %v1445_v46 = vsel %vm1444_vm5, %v6040_v42, %v1441_v26  ;;  %v1453_v35 = vmul.f32 %v6042_v9, %v1436_v6  ;;  %vm1458_vm15 = vweird.f32 %v6042_v9  ;;  %v1658_v6 = vpop.f32.mrf.mxu3  ;;  %v6044_v52 = vpop.eup %6043  ;;  %vm1510_vm5 = vcmask 523264  }
 0x87d   :  { %v1450_v33 = vsel %vm1447_vm2, %v1449_v4, %v1445_v46  ;;  %vm1459_vm4 = vmor %vm1457_vm3, %vm1458_vm15  ;;  %vm1462_vm2 = vcmp.eq.f32.partialorder %v1461_v20, 8.507059e+37  ;;  %v1491_v46 = vmul.f32 1.442695, %v1488_v53  ;;  %vm1497_vm15 = vcmp.ge.f32.partialorder %v7132_v54, 0.0 }
 0x87e   :  { %v1467_v37 = vmul.f32 1.0614054, %v1450_v33  ;;  %v1454_v15 = vsub.f32 1.0, %v1453_v35  ;;  %v7176_v20 = vadd.f32 %v6206_v50, %v1658_v6  ;;  %vm1498_vm3 = vcmp.ge.f32.partialorder %v7141_v51, 0.0 }
 0x87f   :  { %6045 = vpow2.f32 %v1491_v46 }
 0x880   :  { %v1469_v17 = vadd.f32 -1.4531521, %v1467_v37  ;;  %v1455_v43 = vmul.f32 %v6042_v9, %v1454_v15 }
 0x882   :  { %v1471_v5 = vmul.f32 %v1469_v17, %v1450_v33  ;;  %v1456_v36 = vadd.f32 %v6042_v9, %v1455_v43 }
 0x884   :  { %v1473_v12 = vadd.f32 1.4214138, %v1471_v5  ;;  %v1460_v48 = vsel %vm1459_vm4, %v6042_v9, %v1456_v36  ;;  %v1661_v39 = vpop.f32.mrf.mxu3 }
 0x885   :  { %v1465_v61 = vsel %vm1462_vm2, %v1464_v60, %v1460_v48  ;;  %v7178_v5 = vadd.f32 %v6206_v50, %v1661_v39  ;;  %v6046_v28 = vpop.eup %6045  ;;  %v7228_v50 = vld [vmem:[%s6399_s13 + $0x40] sm:$0xff] }
 0x886   :  { %v1475_v56 = vmul.f32 %v1473_v12, %v1450_v33  ;;  %v1468_v42 = vmul.f32 1.0614054, %v1465_v61 }
 0x887   :  { %5653 = vmatpush.msk.msrb.mxu2 %vm558_vm9, %v7178_v5 }
 0x888   :  { %v1477_v38 = vadd.f32 -0.28449672, %v1475_v56  ;;  %v1470_v41 = vadd.f32 -1.4531521, %v1468_v42  ;;  %v1920_v42 = vpop.permute.xlu0 %1919 }
 0x889   :  { %1830 = vmatpush.msrb.mxu2 %v7176_v20 }
 0x88a   :  { %v1479_v55 = vmul.f32 %v1477_v38, %v1450_v33  ;;  %v1472_v45 = vmul.f32 %v1470_v41, %v1465_v61  ;;  %v1428_v41 = vmul.f32 0.5, %v7135_v23 }
 0x88b   :  { %2126 = vmatpush.msra.mxu2 %v7107_v22 }
 0x88c   :  { %v1481_v62 = vadd.f32 0.2548296, %v1479_v55  ;;  %v1474_v26 = vadd.f32 1.4214138, %v1472_v45 }
 0x88e   :  { %v1483_v4 = vmul.f32 %v1481_v62, %v1450_v33  ;;  %v1476_v35 = vmul.f32 %v1474_v26, %v1465_v61  ;;  %v1427_v33 = vmul.f32 0.5, %v7129_v0  ;;  %v7214_v26 = vld [vmem:[%s6399_s13 + $0x10] sm:$0xff] }
 0x890   :  { %v1493_v9 = vmul.f32 %v6044_v52, %v1483_v4  ;;  %v1478_v37 = vadd.f32 -0.28449672, %v1476_v35  ;;  %v7219_v52 = vld [vmem:[%s6399_s13 + $0x20] sm:$0xff] }
 0x892   :  { %v1495_v15 = vsub.f32 1.0, %v1493_v9  ;;  %v1480_v17 = vmul.f32 %v1478_v37, %v1465_v61 }
 0x894   :  { %v1499_v58 = vsub.f32 0.0, %v1495_v15  ;;  %v1482_v43 = vadd.f32 0.2548296, %v1480_v17  ;;  %v7223_v17 = vld [vmem:[%s6399_s13 + $0x30] sm:$0xff] }
 0x896   :  { %v1501_v36 = vsel %vm1497_vm15, %v1495_v15, %v1499_v58  ;;  %v1484_v60 = vmul.f32 %v1482_v43, %v1465_v61  ;;  %v1901_v61 = vpop.f32.mrf.mxu3 }
 0x897   :  { %v1503_v12 = vadd.f32 1.0, %v1501_v36  ;;  %1909 = vperm.xlu1 %5894, %v1901_v61   ;;  %1975 = vperm.xlu0 %5897, %v1901_v61  }
 0x898   :  { %v1494_v56 = vmul.f32 %v6046_v28, %v1484_v60  ;;  %1951 = vperm.xlu2 %5895, %v1901_v61  }
 0x899   :  { %v1505_v48 = vmul.f32 %v1503_v12, %v1427_v33  ;;  %v7232_v12 = vld [vmem:[%s6394_s9 + $0x10] sm:$0xff] }
 0x89a   :  { %v1496_v54 = vsub.f32 1.0, %v1494_v56 }
 0x89b   :  { %5639 = vmatmul.msk.f32.vlgmr.msra.gmra.mxu0 %vm1510_vm5, %v1505_v48 }
 0x89c   :  { %5658 = vmatpush.xpose.msk.msra.mxu0 %vm408_vm6, %v1922_v7  ;;  %v1500_v0 = vsub.f32 0.0, %v1496_v54 }
 0x89e   :  { %v1502_v38 = vsel %vm1498_vm3, %v1496_v54, %v1500_v0  ;;  %v1904_v45 = vpop.f32.mrf.mxu3  ;;  %vm8813_vm3 = vcmask 188544  }
 0x89f   :  { %v1504_v55 = vadd.f32 1.0, %v1502_v38  ;;  %1914 = vperm.xlu1 %5894, %v1904_v45   ;;  %5900 = vset.pattern.permute.xlu0 %v6372_v10 }
 0x8a0   :  { %5659 = vmatpush.xpose.msk.msra.mxu0 %vm408_vm6, %v1920_v42  ;;  %5896 = vset.pattern.permute.xlu2 %v6374_v18 }
 0x8a1   :  { %v1506_v53 = vmul.f32 %v1504_v55, %v1428_v41  ;;  %1963 = vperm.xlu2 %5896, %v1901_v61   ;;  %v7242_v55 = vld [vmem:[%s6399_s13 + $0x18] sm:$0x1] }
 0x8a3   :  { %5640 = vmatmul.msk.f32.gmra.mxu0 %vm1510_vm5, %v1506_v53 }
 0x8a7   :  { %5898 = vset.pattern.permute.xlu1 %v6372_v10 }
 0x8a8   :  { %1955 = vperm.xlu1 %5898, %v1904_v45  }
 0x8a9   :  { %1967 = vperm.xlu2 %5896, %v1904_v45  }
 0x8ab   :  { %5647 = vmatmul.msk.f32.vlgmr.msrb.gmra.mxu0 %vm408_vm6, %v7057_v49 }
 0x8b0   :  { %5901 = vset.pattern.permute.xlu1 %v6374_v18 }
 0x8b1   :  { %5899 = vset.pattern.permute.xlu2 %v6373_v11 }
 0x8b3   :  { %5648 = vmatmul.msk.f32.gmra.mxu0 %vm408_vm6, %v7077_v25 }
 0x8bb   :  { %5660 = vmatmul.msk.f32.vlgmr.msra.gmra.mxu0 %vm408_vm6, %v7120_v40 }
 0x8c3   :  { %5661 = vmatmul.msk.f32.gmra.mxu0 %vm408_vm6, %v7124_v27 }
 0x8f2   :  { %v1952_v40 = vpop.permute.xlu2 %1951 }
 0x8f3   :  { %v1958_v35 = vmul.f32 %v7219_v52, %v1952_v40 }
 0x8fb   :  { %v1964_v37 = vpop.permute.xlu2 %1963 }
 0x8fc   :  { %v1970_v58 = vmul.f32 %v7223_v17, %v1964_v37  ;;  %v7252_v37 = vld [vmem:[%s6399_s13 + $0x38] sm:$0x1] }
 0x903   :  { %v1968_v48 = vpop.permute.xlu2 %1967 }
 0x909   :  { %v1910_v27 = vpop.permute.xlu1 %1909  ;;  %v1976_v39 = vpop.permute.xlu0 %1975 }
 0x90a   :  { %v1917_v4 = vmul.f32 %v7214_v26, %v1910_v27  ;;  %v1982_v36 = vmul.f32 %v7228_v50, %v1976_v39 }
 0x911   :  { %v1915_v7 = vpop.permute.xlu1 %1914 }
 0x912   :  { %v1918_v53 = vmul.f32 %v7242_v55, %v1915_v7 }
 0x918   :  { %v7204_v23 = vpop.f32.mrf.mxu0 }
 0x91a   :  { %v1956_v0 = vpop.permute.xlu1 %1955 }
 0x920   :  { %v7206_v51 = vpop.f32.mrf.mxu0 }
 0x928   :  { %v1689_v62 = vpop.f32.mrf.mxu0 }
 0x929   :  { %1737 = vperm.xlu0 %5900, %v1689_v62   ;;  %1697 = vperm.xlu2 %5899, %v1689_v62  }
 0x92a   :  { %1749 = vperm.xlu1 %5901, %v1689_v62  }
 0x930   :  { %v1692_v6 = vpop.f32.mrf.mxu0 }
 0x931   :  { %5905 = vset.pattern.permute.xlu0 %v6374_v18  ;;  %1702 = vperm.xlu2 %5899, %v1692_v6  }
 0x932   :  { %5902 = vset.pattern.permute.xlu1 %v6375_v19  ;;  %1753 = vperm.xlu0 %5905, %v1692_v6  }
 0x933   :  { %1761 = vperm.xlu1 %5902, %v1689_v62   ;;  %v1730_v62 = vpop.f32.mrf.mxu1 }
 0x938   :  { %v1944_v46 = vpop.f32.mrf.mxu0 }
 0x939   :  { %5903 = vset.pattern.permute.xlu2 %v6372_v10  ;;  %v1945_v9 = vadd.f32 %v1944_v46, %v1917_v4  ;;  %v7247_v4 = vld [vmem:[%s6399_s13 + $0x28] sm:$0x1] }
 0x93a   :  { %1741 = vperm.xlu2 %5903, %v1692_v6   ;;  %5906 = vset.pattern.permute.xlu0 %v6373_v11  ;;  %v1959_v46 = vmul.f32 %v7247_v4, %v1956_v0  ;;  %v7259_v0 = vld [vmem:[%s6399_s13 + $0x48] sm:$0x1] }
 0x93b   :  { %1765 = vperm.xlu1 %5902, %v1692_v6   ;;  %v1960_v15 = vadd.f32 %v1958_v35, %v1945_v9 }
 0x93d   :  { %v1972_v43 = vadd.f32 %v1970_v58, %v1960_v15  ;;  %v1971_v15 = vmul.f32 %v7252_v37, %v1968_v48 }
 0x93f   :  { %v1984_v33 = vadd.f32 %v1982_v36, %v1972_v43 }
 0x940   :  { %v1947_v6 = vpop.f32.mrf.mxu0 }
 0x941   :  { %v1986_v60 = vadd.f32 %v7232_v12, %v1984_v33  ;;  %v1948_v27 = vadd.f32 %v1947_v6, %v1918_v53 }
 0x942   :  { %5904 = vset.pattern.permute.xlu2 %v6375_v19 }
 0x943   :  { %1979 = vperm.xlu2 %5904, %v1904_v45   ;;  %5907 = vset.pattern.permute.xlu1 %v6372_v10  ;;  %v1988_v28 = vsel %vm517_vm7, %v1986_v60, -inf  ;;  %v1961_v43 = vadd.f32 %v1959_v46, %v1948_v27  ;;  %v7266_v46 = vld [vmem:[%s6394_s9 + $0x18] sm:$0x1] }
 0x945   :  { %v1973_v53 = vadd.f32 %v1971_v15, %v1961_v43 }
 0x94b   :  { %5908 = vset.pattern.permute.xlu2 %v6374_v18 }
 0x95c   :  { %1989 = vmax.xlane.f32.xlu0 %v1988_v28 }
 0x970   :  { %2023 = vrot.lane.b32.xlu0 %v7178_v5, %s6371_s17 }
 0x978   :  { %2329 = vrot.lane.b32.xlu0 %v7057_v49, %s6377_s15 }
 0x983   :  { %v1698_v56 = vpop.permute.xlu2 %1697 }
 0x984   :  { %v1705_v38 = vmul.f32 %v7214_v26, %v1698_v56 }
 0x986   :  { %v1731_v40 = vadd.f32 %v1730_v62, %v1705_v38 }
 0x98b   :  { %v1703_v54 = vpop.permute.xlu2 %1702 }
 0x98c   :  { %v1706_v36 = vmul.f32 %v7242_v55, %v1703_v54 }
 0x994   :  { %v1742_v42 = vpop.permute.xlu2 %1741 }
 0x995   :  { %v1745_v7 = vmul.f32 %v7247_v4, %v1742_v42 }
 0x99b   :  { %v1738_v61 = vpop.permute.xlu0 %1737 }
 0x99c   :  { %v1750_v41 = vpop.permute.xlu1 %1749  ;;  %v1744_v45 = vmul.f32 %v7219_v52, %v1738_v61 }
 0x99d   :  { %v1756_v9 = vmul.f32 %v7223_v17, %v1750_v41  ;;  %v1980_v58 = vpop.permute.xlu2 %1979  ;;  %v1733_v41 = vpop.f32.mrf.mxu1 }
 0x99e   :  { %v1746_v35 = vadd.f32 %v1744_v45, %v1731_v40  ;;  %v1983_v61 = vmul.f32 %v7259_v0, %v1980_v58  ;;  %v1734_v48 = vadd.f32 %v1733_v41, %v1706_v36 }
 0x9a0   :  { %v1758_v33 = vadd.f32 %v1756_v9, %v1746_v35  ;;  %v1747_v54 = vadd.f32 %v1745_v7, %v1734_v48  ;;  %v1985_v6 = vadd.f32 %v1983_v61, %v1973_v53 }
 0x9a2   :  { %v1987_v58 = vadd.f32 %v7266_v46, %v1985_v6 }
 0x9a4   :  { %v1754_v56 = vpop.permute.xlu0 %1753  ;;  %v1991_v43 = vsel %vm521_vm8, %v1987_v58, -inf }
 0x9a5   :  { %v1762_v39 = vpop.permute.xlu1 %1761  ;;  %v1757_v45 = vmul.f32 %v7252_v37, %v1754_v56 }
 0x9a6   :  { %v1768_v28 = vmul.f32 %v7228_v50, %v1762_v39 }
 0x9a7   :  { %v1759_v42 = vadd.f32 %v1757_v45, %v1747_v54 }
 0x9a8   :  { %v1770_v38 = vadd.f32 %v1768_v28, %v1758_v33 }
 0x9aa   :  { %v1772_v62 = vadd.f32 %v7232_v12, %v1770_v38 }
 0x9ac   :  { %v1774_v40 = vsel %vm517_vm7, %v1772_v62, -inf }
 0x9ad   :  { %v1766_v27 = vpop.permute.xlu1 %1765  ;;  %1775 = vmax.xlane.f32.xlu1 %v1774_v40 }
 0x9ae   :  { %v1769_v35 = vmul.f32 %v7259_v0, %v1766_v27 }
 0x9b0   :  { %v1771_v9 = vadd.f32 %v1769_v35, %v1759_v42 }
 0x9b2   :  { %v1773_v15 = vadd.f32 %v7266_v46, %v1771_v9 }
 0x9b4   :  { %v1777_v39 = vsel %vm521_vm8, %v1773_v15, -inf }
 0x9b5   :  { %1778 = vmax.xlane.f32.xlu2 %v1777_v39  ;;  %1992 = vmax.xlane.f32.xlu1 %v1991_v43 }
 0x9ce   :  { %2021 = vrot.lane.b32.xlu1 %v7176_v20, %s6371_s17 }
 0x9cf   :  { %v1990_v36 = vpop.xlane.xlu0 %1989 }
 0x9d0   :  { %v1994_v33 = vsub.f32 %v1986_v60, %v1990_v36 }
 0x9d2   :  { %v1996_v28 = vmul.f32 1.442695, %v1994_v33 }
 0x9d4   :  { %6047 = vpow2.f32 %v1996_v28 }
 0x9da   :  { %v6048_v56 = vpop.eup %6047 }
 0x9db   :  { %v2000_v7 = vsel %vm517_vm7, %v6048_v56, 0.0 }
 0x9dc   :  { %2001 = vadd.xlane.f32.xlu2 %v2000_v7 }
 0x9e2   :  { %v2024_v61 = vpop.permute.xlu0 %2023 }
 0x9e3   :  { %5662 = vmatpush.msk.msra.mxu1 %vm558_vm9, %v2024_v61 }
 0xa20   :  { %v1776_v38 = vpop.xlane.xlu1 %1775 }
 0xa21   :  { %v1780_v41 = vsub.f32 %v1772_v62, %v1776_v38 }
 0xa23   :  { %v1782_v53 = vmul.f32 1.442695, %v1780_v41 }
 0xa25   :  { %6049 = vpow2.f32 %v1782_v53 }
 0xa28   :  { %v1993_v48 = vpop.xlane.xlu1 %1992  ;;  %v1779_v45 = vpop.xlane.xlu2 %1778 }
 0xa29   :  { %v1995_v54 = vsub.f32 %v1987_v58, %v1993_v48  ;;  %v1781_v6 = vsub.f32 %v1773_v15, %v1779_v45 }
 0xa2b   :  { %v6050_v40 = vpop.eup %6049  ;;  %v1998_v27 = vmul.f32 1.442695, %v1995_v54  ;;  %v1784_v60 = vmul.f32 1.442695, %v1781_v6 }
 0xa2c   :  { %v1786_v42 = vsel %vm517_vm7, %v6050_v40, 0.0 }
 0xa2d   :  { %6051 = vpow2.f32 %v1998_v27  ;;  %1787 = vadd.xlane.f32.xlu0 %v1786_v42 }
 0xa2e   :  { %6053 = vpow2.f32 %v1784_v60 }
 0xa33   :  { %v6052_v35 = vpop.eup %6051 }
 0xa34   :  { %v6054_v9 = vpop.eup %6053  ;;  %v2003_v39 = vsel %vm521_vm8, %v6052_v35, 0.0 }
 0xa35   :  { %2004 = vadd.xlane.f32.xlu2 %v2003_v39  ;;  %v1789_v62 = vsel %vm521_vm8, %v6054_v9, 0.0 }
 0xa36   :  { %1790 = vadd.xlane.f32.xlu1 %v1789_v62 }
 0xa40   :  { %v2022_v43 = vpop.permute.xlu1 %2021 }
 0xa41   :  { %2105 = vrot.lane.b32.xlu0 %v7077_v25, %s6376_s12  ;;  %2049 = vmatpush.msra.mxu1 %v2022_v43 }
 0xa43   :  { %2352 = vmatpush.msrb.mxu1 %v7107_v22 }
 0xa49   :  { %2372 = vrot.lane.b32.xlu0 %v7086_v14, %s6377_s15 }
 0xa4d   :  { %2103 = vrot.lane.b32.xlu2 %v7057_v49, %s6376_s12  ;;  %v2330_v49 = vpop.permute.xlu0 %2329 }
 0xa4f   :  { %2331 = vrot.lane.b32.xlu1 %v7077_v25, %s6377_s15  ;;  %v2002_v58 = vpop.xlane.xlu2 %2001 }
 0xa50   :  { %6055 = vrcp.f32 %v2002_v58 }
 0xa55   :  { %2374 = vrot.lane.b32.xlu2 %v7090_v2, %s6377_s15 }
 0xa56   :  { %v6056_v15 = vpop.eup %6055 }
 0xa57   :  { %v7291_v36 = vmul.f32 %v6056_v15, %v6048_v56  ;;  %2148 = vrot.lane.b32.xlu1 %v7090_v2, %s6376_s12 }
 0xa59   :  { %5663 = vmatmul.msk.f32.vlgmr.msra.gmra.mxu1 %vm517_vm7, %v7291_v36 }
 0xa5a   :  { %2647 = vmatpush.msra.mxu1 %v7064_v32 }
 0xa5c   :  { %2648 = vmatpush.msra.mxu1 %v7067_v59 }
 0xa5d   :  { %2146 = vrot.lane.b32.xlu2 %v7086_v14, %s6376_s12 }
 0xa5e   :  { %2649 = vmatpush.msra.mxu1 %v7070_v13 }
 0xa60   :  { %2650 = vmatpush.msra.mxu1 %v7072_v57 }
 0xaa0   :  { %v1788_v25 = vpop.xlane.xlu0 %1787 }
 0xaa1   :  { %6057 = vrcp.f32 %v1788_v25 }
 0xaa7   :  { %v6058_v33 = vpop.eup %6057 }
 0xaa8   :  { %v7303_v28 = vmul.f32 %v6058_v33, %v6050_v40  ;;  %v2005_v2 = vpop.xlane.xlu2 %2004 }
 0xaa9   :  { %v1791_v56 = vpop.xlane.xlu1 %1790  ;;  %6059 = vrcp.f32 %v2005_v2 }
 0xaaa   :  { %6061 = vrcp.f32 %v1791_v56  ;;  %5654 = vmatmul.msk.f32.vlgmr.msrb.gmra.mxu2 %vm517_vm7, %v7303_v28 }
 0xaaf   :  { %v6060_v32 = vpop.eup %6059 }
 0xab0   :  { %v6062_v59 = vpop.eup %6061  ;;  %v7307_v14 = vmul.f32 %v6060_v32, %v6052_v35  ;;  %v2104_v13 = vpop.permute.xlu2 %2103 }
 0xab1   :  { %v7309_v7 = vmul.f32 %v6062_v59, %v6054_v9 }
 0xab2   :  { %5664 = vmatmul.msk.f32.gmra.mxu1 %vm517_vm7, %v7307_v14 }
 0xab3   :  { %5655 = vmatmul.msk.f32.gmra.mxu2 %vm517_vm7, %v7309_v7  ;;  %v2106_v57 = vpop.permute.xlu0 %2105 }
 0xab8   :  { %v2375_v61 = vpop.permute.xlu2 %2374 }
 0xab9   :  { %5676 = vmatpush.xpose.msk.msrb.mxu2 %vm408_vm6, %v2375_v61 }
 0xaba   :  { %5674 = vmatmul.msk.f32.vlgmr.msrb.gmra.mxu1 %vm408_vm6, %v2330_v49 }
 0xabb   :  { %5665 = vmatmul.msk.f32.vlgmr.msra.gmra.mxu2 %vm408_vm6, %v2104_v13  ;;  %v2373_v38 = vpop.permute.xlu0 %2372 }
 0xabd   :  { %5677 = vmatpush.xpose.msk.msrb.mxu2 %vm408_vm6, %v2373_v38 }
 0xac1   :  { %2752 = vmatpush.msra.mxu2 %v7138_v29  ;;  %v2332_v41 = vpop.permute.xlu1 %2331  ;;  %v2147_v29 = vpop.permute.xlu2 %2146 }
 0xac2   :  { %5675 = vmatmul.msk.f32.gmra.mxu1 %vm408_vm6, %v2332_v41 }
 0xac3   :  { %2753 = vmatpush.msra.mxu2 %v7145_v44 }
 0xac4   :  { %5666 = vmatmul.msk.f32.gmra.mxu2 %vm408_vm6, %v2106_v57 }
 0xac5   :  { %2754 = vmatpush.msra.mxu2 %v7150_v30 }
 0xac7   :  { %2755 = vmatpush.msra.mxu2 %v7154_v34 }
 0xac9   :  { %2756 = vmatpush.msra.mxu2 %v7158_v8  ;;  %v2149_v53 = vpop.permute.xlu1 %2148 }
 0xaca   :  { %5667 = vmatpush.xpose.msk.msrb.mxu3 %vm408_vm6, %v2149_v53 }
 0xacb   :  { %2757 = vmatpush.msra.mxu2 %v7162_v63 }
 0xacc   :  { %5678 = vmatmul.msk.f32.vlgmr.msrb.gmra.mxu2 %vm408_vm6, %v2330_v49 }
 0xacd   :  { %2758 = vmatpush.msra.mxu2 %v7166_v31 }
 0xace   :  { %5668 = vmatpush.xpose.msk.msrb.mxu3 %vm408_vm6, %v2147_v29 }
 0xacf   :  { %2759 = vmatpush.msra.mxu2 %v7169_v3 }
 0xad1   :  { %2971 = vmatpush.msrb.mxu2 %v7107_v22  ;;  %5669 = vmatmul.msk.f32.vlgmr.msrb.gmra.mxu3 %vm408_vm6, %v2104_v13 }
 0xad4   :  { %5679 = vmatmul.msk.f32.gmra.mxu2 %vm408_vm6, %v2332_v41 }
 0xad6   :  { %v7336_v44 = vpop.f32.mrf.mxu1 }
 0xad9   :  { %5670 = vmatmul.msk.f32.gmra.mxu3 %vm408_vm6, %v2106_v57 }
 0xb2d   :  { %v7340_v34 = vpop.f32.mrf.mxu2 }
 0xb2f   :  { %v7338_v30 = vpop.f32.mrf.mxu1 }
 0xb36   :  { %v7342_v63 = vpop.f32.mrf.mxu2 }
 0xb37   :  { %v2354_v8 = vpop.f32.mrf.mxu1 }
 0xb38   :  { %2416 = vperm.xlu2 %5908, %v2354_v8   ;;  %2404 = vperm.xlu1 %5907, %v2354_v8  }
 0xb39   :  { %2362 = vperm.xlu0 %5906, %v2354_v8  }
 0xb3e   :  { %v2128_v31 = vpop.f32.mrf.mxu2 }
 0xb3f   :  { %v2357_v22 = vpop.f32.mrf.mxu1 }
 0xb40   :  { %5909 = vset.pattern.permute.xlu2 %v6375_v19  ;;  %5910 = vset.pattern.permute.xlu1 %v6373_v11 }
 0xb41   :  { %5912 = vset.pattern.permute.xlu0 %v6374_v18  ;;  %2428 = vperm.xlu2 %5909, %v2354_v8  }
 0xb42   :  { %2420 = vperm.xlu0 %5912, %v2357_v22   ;;  %2367 = vperm.xlu1 %5910, %v2357_v22  }
 0xb47   :  { %v2131_v3 = vpop.f32.mrf.mxu2 }
 0xb49   :  { %2432 = vperm.xlu2 %5909, %v2357_v22  }
 0xb4a   :  { %5914 = vset.pattern.permute.xlu0 %v6372_v10  ;;  %5911 = vset.pattern.permute.xlu1 %v6372_v10 }
 0xb4b   :  { %2408 = vperm.xlu1 %5911, %v2357_v22   ;;  %2178 = vperm.xlu0 %5914, %v2128_v31  }
 0xb4f   :  { %v2397_v27 = vpop.f32.mrf.mxu2 }
 0xb51   :  { %5915 = vset.pattern.permute.xlu2 %v6374_v18 }
 0xb52   :  { %2190 = vperm.xlu2 %5915, %v2128_v31  }
 0xb53   :  { %5913 = vset.pattern.permute.xlu1 %v6373_v11  ;;  %5919 = vset.pattern.permute.xlu0 %v6375_v19 }
 0xb54   :  { %2136 = vperm.xlu1 %5913, %v2128_v31   ;;  %2206 = vperm.xlu0 %5919, %v2131_v3  }
 0xb57   :  { %v2400_v56 = vpop.f32.mrf.mxu2 }
 0xb5a   :  { %5916 = vset.pattern.permute.xlu2 %v6375_v19 }
 0xb5b   :  { %2202 = vperm.xlu2 %5916, %v2128_v31  }
 0xb5c   :  { %2141 = vperm.xlu1 %5913, %v2131_v3  }
 0xb63   :  { %5918 = vset.pattern.permute.xlu2 %v6374_v18 }
 0xb64   :  { %5917 = vset.pattern.permute.xlu1 %v6372_v10  ;;  %2194 = vperm.xlu2 %5918, %v2131_v3  }
 0xb65   :  { %2182 = vperm.xlu1 %5917, %v2131_v3  }
 0xb6c   :  { %5921 = vset.pattern.permute.xlu2 %v6372_v10 }
 0xb6d   :  { %5920 = vset.pattern.permute.xlu1 %v6373_v11 }
 0xb92   :  { %v2417_v48 = vpop.permute.xlu2 %2416 }
 0xb93   :  { %v2423_v35 = vmul.f32 %v7223_v17, %v2417_v48  ;;  %v2171_v48 = vpop.f32.mrf.mxu3 }
 0xb9b   :  { %v2429_v6 = vpop.permute.xlu2 %2428 }
 0xb9c   :  { %v2435_v39 = vmul.f32 %v7228_v50, %v2429_v6 }
 0xba3   :  { %v2433_v15 = vpop.permute.xlu2 %2432 }
 0xba4   :  { %v2436_v41 = vmul.f32 %v7259_v0, %v2433_v15  ;;  %v2174_v15 = vpop.f32.mrf.mxu3 }
 0xbaa   :  { %v2405_v45 = vpop.permute.xlu1 %2404 }
 0xbab   :  { %v2363_v54 = vpop.permute.xlu0 %2362  ;;  %v2411_v60 = vmul.f32 %v7219_v52, %v2405_v45 }
 0xbac   :  { %v2370_v40 = vmul.f32 %v7214_v26, %v2363_v54  ;;  %v2191_v57 = vpop.permute.xlu2 %2190 }
 0xbae   :  { %v2398_v42 = vadd.f32 %v2397_v27, %v2370_v40  ;;  %v2197_v27 = vmul.f32 %v7223_v17, %v2191_v57 }
 0xbb0   :  { %v2413_v9 = vadd.f32 %v2411_v60, %v2398_v42 }
 0xbb2   :  { %v2425_v62 = vadd.f32 %v2423_v35, %v2413_v9 }
 0xbb4   :  { %v2368_v43 = vpop.permute.xlu1 %2367  ;;  %v2437_v58 = vadd.f32 %v2435_v39, %v2425_v62  ;;  %v2421_v2 = vpop.permute.xlu0 %2420 }
 0xbb5   :  { %v2371_v33 = vmul.f32 %v7242_v55, %v2368_v43  ;;  %v2424_v61 = vmul.f32 %v7252_v37, %v2421_v2  ;;  %v2203_v40 = vpop.permute.xlu2 %2202 }
 0xbb6   :  { %v2439_v49 = vadd.f32 %v7232_v12, %v2437_v58  ;;  %v2209_v42 = vmul.f32 %v7228_v50, %v2203_v40 }
 0xbb7   :  { %v2401_v59 = vadd.f32 %v2400_v56, %v2371_v33 }
 0xbb8   :  { %v2441_v25 = vsel %vm517_vm7, %v2439_v49, -inf }
 0xbb9   :  { %2442 = vmax.xlane.f32.xlu1 %v2441_v25 }
 0xbbd   :  { %v2409_v32 = vpop.permute.xlu1 %2408  ;;  %v2179_v8 = vpop.permute.xlu0 %2178 }
 0xbbe   :  { %v2412_v13 = vmul.f32 %v7247_v4, %v2409_v32  ;;  %v2185_v54 = vmul.f32 %v7219_v52, %v2179_v8  ;;  %v2195_v25 = vpop.permute.xlu2 %2194 }
 0xbc0   :  { %v2414_v38 = vadd.f32 %v2412_v13, %v2401_v59  ;;  %v2198_v59 = vmul.f32 %v7252_v37, %v2195_v25 }
 0xbc2   :  { %v2426_v53 = vadd.f32 %v2424_v61, %v2414_v38 }
 0xbc4   :  { %v2438_v29 = vadd.f32 %v2436_v41, %v2426_v53 }
 0xbc6   :  { %v2137_v22 = vpop.permute.xlu1 %2136  ;;  %v2440_v31 = vadd.f32 %v7266_v46, %v2438_v29  ;;  %v2207_v32 = vpop.permute.xlu0 %2206 }
 0xbc7   :  { %v2144_v3 = vmul.f32 %v7214_v26, %v2137_v22 }
 0xbc8   :  { %v2444_v45 = vsel %vm521_vm8, %v2440_v31, -inf }
 0xbc9   :  { %v2172_v6 = vadd.f32 %v2171_v48, %v2144_v3  ;;  %2445 = vmax.xlane.f32.xlu0 %v2444_v45 }
 0xbcb   :  { %v2187_v60 = vadd.f32 %v2185_v54, %v2172_v6 }
 0xbcd   :  { %v2199_v35 = vadd.f32 %v2197_v27, %v2187_v60  ;;  %v5982_v27 = vld [vmem:[%s8810_s0] ss:$0 sm:$0xff] }
 0xbce   :  { %v2142_v9 = vpop.permute.xlu1 %2141 }
 0xbcf   :  { %v2211_v39 = vadd.f32 %v2209_v42, %v2199_v35  ;;  %v2145_v58 = vmul.f32 %v7242_v55, %v2142_v9  ;;  %v1538_v42 = vadd.f32 %v5982_v27, %v7206_v51  ;;  %v1535_v9 = vadd.f32 %v5982_v27, %v7204_v23 }
 0xbd0   :  { %v2010_v27 = vmul.f32 %v7214_v26, %v7291_v36 }
 0xbd1   :  { %v2213_v62 = vadd.f32 %v7232_v12, %v2211_v39  ;;  %v2175_v2 = vadd.f32 %v2174_v15, %v2145_v58  ;;  %v2210_v12 = vmul.f32 %v7259_v0, %v2207_v32  ;;  %v1540_v39 = vadd.f32 %v1535_v9, %v7102_v21 }
 0xbd2   :  { %2475 = vrot.lane.b32.xlu1 %v7178_v5, %s6377_s15 }
 0xbd3   :  { %v2215_v43 = vsel %vm517_vm7, %v2213_v62, -inf  ;;  %v1542_v15 = vsel %vm184_vm0, %v1540_v39, 0.0 }
 0xbd4   :  { %2216 = vmax.xlane.f32.xlu2 %v2215_v43 }
 0xbd7   :  { %v2183_v33 = vpop.permute.xlu1 %2182 }
 0xbd8   :  { %v2186_v56 = vmul.f32 %v7247_v4, %v2183_v33 }
 0xbda   :  { %v2188_v13 = vadd.f32 %v2186_v56, %v2175_v2 }
 0xbdc   :  { %v2200_v57 = vadd.f32 %v2198_v59, %v2188_v13 }
 0xbde   :  { %v2212_v61 = vadd.f32 %v2210_v12, %v2200_v57  ;;  %v2057_v12 = vmul.f32 %v7219_v52, %v7291_v36 }
 0xbe0   :  { %v2214_v38 = vadd.f32 %v7266_v46, %v2212_v61  ;;  %v2059_v61 = vsel %vm517_vm7, %v2057_v12, 0.0  ;;  %v5690_v12 = vld [vmem:[%s6429_s8 + $0x28] sm:$0xff] }
 0xbe2   :  { %v2218_v41 = vsel %vm521_vm8, %v2214_v38, -inf }
 0xbe3   :  { %2219 = vmax.xlane.f32.xlu2 %v2218_v41 }
 0xbfb   :  { %2473 = vrot.lane.b32.xlu2 %v7176_v20, %s6377_s15 }
 0xc2c   :  { %v2443_v53 = vpop.xlane.xlu1 %2442 }
 0xc2d   :  { %v2447_v29 = vsub.f32 %v2439_v49, %v2443_v53 }
 0xc2f   :  { %v2449_v8 = vmul.f32 1.442695, %v2447_v29 }
 0xc31   :  { %6063 = vpow2.f32 %v2449_v8 }
 0xc37   :  { %v7385_v22 = vpop.eup %6063 }
 0xc38   :  { %v2453_v3 = vsel %vm517_vm7, %v7385_v22, 0.0 }
 0xc39   :  { %2454 = vadd.xlane.f32.xlu1 %v2453_v3  ;;  %v1797_v3 = vmul.f32 %v7242_v55, %v7309_v7 }
 0xc3c   :  { %v2446_v48 = vpop.xlane.xlu0 %2445 }
 0xc3d   :  { %v2448_v45 = vsub.f32 %v2440_v31, %v2446_v48  ;;  %v1541_v31 = vadd.f32 %v1538_v42, %v7112_v1 }
 0xc3f   :  { %v2451_v46 = vmul.f32 1.442695, %v2448_v45  ;;  %v1543_v58 = vsel %vm186_vm1, %v1541_v31, 0.0  ;;  %v1801_v45 = vsel %vm521_vm8, %v1797_v3, 0.0 }
 0xc40   :  { %v1544_v25 = vadd.f32 %v1543_v58, %v1542_v15  ;;  %v2069_v58 = vmul.f32 %v7223_v17, %v7291_v36 }
 0xc41   :  { %6065 = vpow2.f32 %v2451_v46 }
 0xc42   :  { %v1545_v2 = vrot.slane %v1544_v25, 4  ;;  %v2071_v15 = vsel %vm517_vm7, %v2069_v58, 0.0 }
 0xc44   :  { %v2476_v54 = vpop.permute.xlu1 %2475  ;;  %v1546_v56 = vadd.f32 %v1545_v2, %v1544_v25 }
 0xc45   :  { %5680 = vmatpush.msk.msra.mxu3 %vm558_vm9, %v2476_v54 }
 0xc46   :  { %v1547_v32 = vrot.slane %v1546_v56, 2 }
 0xc47   :  { %v7390_v6 = vpop.eup %6065  ;;  %v2217_v40 = vpop.xlane.xlu2 %2216 }
 0xc48   :  { %v2221_v49 = vsub.f32 %v2213_v62, %v2217_v40  ;;  %v2456_v60 = vsel %vm521_vm8, %v7390_v6, 0.0  ;;  %v1548_v13 = vadd.f32 %v1547_v32, %v1546_v56  ;;  %v2011_v56 = vmul.f32 %v7242_v55, %v7307_v14  ;;  %v5692_v32 = vld [vmem:[%s6429_s8 + $0x38] sm:$0xff] }
 0xc49   :  { %2457 = vadd.xlane.f32.xlu0 %v2456_v60  ;;  %v2012_v60 = vsel %vm517_vm7, %v2010_v27, 0.0 }
 0xc4a   :  { %v2223_v35 = vmul.f32 1.442695, %v2221_v49  ;;  %v1549_v57 = vrot.slane %v1548_v13, 1 }
 0xc4c   :  { %6067 = vpow2.f32 %v2223_v35  ;;  %v1796_v35 = vmul.f32 %v7214_v26, %v7303_v28 }
 0xc52   :  { %v7399_v43 = vpop.eup %6067 }
 0xc53   :  { %v2227_v62 = vsel %vm517_vm7, %v7399_v43, 0.0 }
 0xc54   :  { %2228 = vadd.xlane.f32.xlu2 %v2227_v62 }
 0xc56   :  { %v2220_v51 = vpop.xlane.xlu2 %2219 }
 0xc57   :  { %v2222_v33 = vsub.f32 %v2214_v38, %v2220_v51  ;;  %v1838_v38 = vmul.f32 %v7219_v52, %v7303_v28  ;;  %v2081_v51 = vmul.f32 %v7228_v50, %v7291_v36  ;;  %v5691_v36 = vld [vmem:[%s6429_s8 + $0x30] sm:$0xff] }
 0xc59   :  { %v2225_v23 = vmul.f32 1.442695, %v2222_v33  ;;  %v1840_v53 = vsel %vm517_vm7, %v1838_v38, 0.0  ;;  %v2083_v2 = vsel %vm517_vm7, %v2081_v51, 0.0 }
 0xc5b   :  { %6069 = vpow2.f32 %v2225_v23 }
 0xc5d   :  { %2249 = vrot.lane.b32.xlu0 %v7178_v5, %s6376_s12  ;;  %v1550_v5 = vadd.f32 %v1549_v57, %v1548_v13 }
 0xc5e   :  { %v2474_v21 = vpop.permute.xlu2 %2473 }
 0xc5f   :  { %2501 = vmatpush.msra.mxu3 %v2474_v21  ;;  %v1551_v41 = vmul.f32 %v1550_v5, %v6561_v24  ;;  %v2015_v21 = vsel %vm521_vm8, %v2011_v56, 0.0  ;;  %v5689_v5 = vld [vmem:[%s6429_s8 + $0x20] sm:$0xff] }
 0xc61   :  { %v7407_v1 = vpop.eup %6069  ;;  %v7420_v29 = vsub.f32 %v1540_v39, %v1551_v41  ;;  %v7422_v8 = vsub.f32 %v1541_v31, %v1551_v41  ;;  %v1798_v31 = vsel %vm517_vm7, %v1796_v35, 0.0  ;;  %2885 = vmatpush.msrb.mxu3 %v5692_v32  ;;  %v2070_v41 = vmul.f32 %v7252_v37, %v7307_v14 }
 0xc62   :  { %v2230_v59 = vsel %vm521_vm8, %v7407_v1, 0.0 }
 0xc63   :  { %2231 = vadd.xlane.f32.xlu1 %v2230_v59  ;;  %v1554_v48 = vmul.f32 %v7420_v29, %v7420_v29  ;;  %v2058_v59 = vmul.f32 %v7247_v4, %v7307_v14  ;;  %2886 = vmatpush.msrb.mxu3 %v5691_v36 }
 0xc65   :  { %v1556_v46 = vsel %vm184_vm0, %v1554_v48, 0.0  ;;  %2887 = vmatpush.msrb.mxu3 %v5690_v12 }
 0xc67   :  { %2888 = vmatpush.msrb.mxu3 %v5689_v5  ;;  %v6215_v5 = vld [vmem:[#allocation4 + $0x18] sm:$0xff] }
 0xc6b   :  { %2060 = vadd.xlane.f32.xlu1 %v2059_v61  ;;  %v2062_v61 = vsel %vm521_vm8, %v2058_v59, 0.0 }
 0xc6c   :  { %2247 = vrot.lane.b32.xlu2 %v7176_v20, %s6376_s12  ;;  %v1555_v20 = vmul.f32 %v7422_v8, %v7422_v8 }
 0xc6e   :  { %v1557_v54 = vsel %vm186_vm1, %v1555_v20, 0.0  ;;  %v2074_v20 = vsel %vm521_vm8, %v2070_v41, 0.0  ;;  %v6216_v41 = vld [vmem:[#allocation4 + $0x10] sm:$0xff] }
 0xc6f   :  { %v1558_v40 = vadd.f32 %v1557_v54, %v1556_v46 }
 0xc71   :  { %v1559_v49 = vrot.slane %v1558_v40, 4 }
 0xc73   :  { %1841 = vadd.xlane.f32.xlu1 %v1840_v53  ;;  %v1560_v42 = vadd.f32 %v1559_v49, %v1558_v40  ;;  %v2082_v40 = vmul.f32 %v7259_v0, %v7307_v14 }
 0xc75   :  { %v1561_v9 = vrot.slane %v1560_v42, 2 }
 0xc77   :  { %v1562_v39 = vadd.f32 %v1561_v9, %v1560_v42 }
 0xc79   :  { %v1563_v62 = vrot.slane %v1562_v39, 1 }
 0xc7b   :  { %1802 = vadd.xlane.f32.xlu1 %v1801_v45  ;;  %v1564_v25 = vadd.f32 %v1563_v62, %v1562_v39  ;;  %v5983_v39 = vld [vmem:[%s8811_s2] ss:$0 sm:$0xff] }
 0xc7d   :  { %v1565_v33 = vmul.f32 %v1564_v25, %v6561_v24 }
 0xc7f   :  { %v1566_v23 = vadd.f32 1e-12, %v1565_v33 }
 0xc81   :  { %6071 = vrsqrt.f32 %v1566_v23  ;;  %vm1573_vm2 = vweird.f32 %v1566_v23 }
 0xc87   :  { %2013 = vadd.xlane.f32.xlu0 %v2012_v60  ;;  %v6072_v13 = vpop.eup %6071  ;;  %v2086_v60 = vsel %vm521_vm8, %v2082_v40, 0.0  ;;  %v1839_v40 = vmul.f32 %v7247_v4, %v7309_v7 }
 0xc88   :  { %v1568_v38 = vmul.f32 %v6072_v13, %v1566_v23  ;;  %vm1574_vm4 = vweird.f32 %v6072_v13  ;;  %v5984_v23 = vld [vmem:[%s8812_s7] ss:$0 sm:$0xff] }
 0xc89   :  { %vm1575_vm15 = vmor %vm1573_vm2, %vm1574_vm4  ;;  %vm8814_vm4 = vcmask 254144  }
 0xc8a   :  { %v1569_v53 = vmul.f32 %v6072_v13, %v1568_v38 }
 0xc8c   :  { %v1570_v45 = vmul.f32 0.5, %v1569_v53 }
 0xc8e   :  { %v1571_v27 = vsub.f32 1.5, %v1570_v45 }
 0xc8f   :  { %1799 = vadd.xlane.f32.xlu0 %v1798_v31 }
 0xc90   :  { %v1572_v42 = vmul.f32 %v6072_v13, %v1571_v27 }
 0xc92   :  { %v1576_v9 = vsel %vm1575_vm15, %v6072_v13, %v1572_v42 }
 0xc93   :  { %v1577_v31 = vmul.f32 %v1576_v9, %v7420_v29  ;;  %v1578_v29 = vmul.f32 %v1576_v9, %v7422_v8 }
 0xc95   :  { %2072 = vadd.xlane.f32.xlu2 %v2071_v15  ;;  %v1582_v51 = vmul.f32 %v5983_v39, %v1577_v31  ;;  %v1583_v13 = vmul.f32 %v5983_v39, %v1578_v29 }
 0xc97   :  { %v7478_v56 = vadd.f32 %v5984_v23, %v1582_v51  ;;  %v7529_v51 = vld [vmem:[%s8804_s18 + $0x2] ss:$0 sm:$0xff] }
 0xc9d   :  { %2084 = vadd.xlane.f32.xlu2 %v2083_v2 }
 0xca5   :  { %2016 = vadd.xlane.f32.xlu2 %v2015_v21 }
 0xcac   :  { %v2455_v57 = vpop.xlane.xlu1 %2454 }
 0xcad   :  { %6073 = vrcp.f32 %v2455_v57  ;;  %2063 = vadd.xlane.f32.xlu2 %v2062_v61 }
 0xcb3   :  { %v6074_v3 = vpop.eup %6073 }
 0xcb4   :  { %v2461_v48 = vmul.f32 %v6074_v3, %v7385_v22  ;;  %v6217_v3 = vld [vmem:[#allocation4 + $0x8] sm:$0xff] }
 0xcb5   :  { %2075 = vadd.xlane.f32.xlu2 %v2074_v20 }
 0xcb6   :  { %5681 = vmatmul.msk.f32.vlgmr.msra.gmra.mxu3 %vm517_vm7, %v2461_v48  ;;  %v2463_v46 = vmul.f32 %v7214_v26, %v2461_v48  ;;  %v2509_v22 = vmul.f32 %v7219_v52, %v2461_v48  ;;  %v2521_v62 = vmul.f32 %v7223_v17, %v2461_v48 }
 0xcb8   :  { %v2465_v54 = vsel %vm517_vm7, %v2463_v46, 0.0  ;;  %v2511_v35 = vsel %vm517_vm7, %v2509_v22, 0.0  ;;  %v2523_v33 = vsel %vm517_vm7, %v2521_v62, 0.0 }
 0xcb9   :  { %2466 = vadd.xlane.f32.xlu0 %v2465_v54 }
 0xcbc   :  { %v2458_v49 = vpop.xlane.xlu0 %2457 }
 0xcbd   :  { %6075 = vrcp.f32 %v2458_v49  ;;  %2087 = vadd.xlane.f32.xlu2 %v2086_v60  ;;  %v1843_v49 = vsel %vm521_vm8, %v1839_v40, 0.0 }
 0xcc1   :  { %2512 = vadd.xlane.f32.xlu0 %v2511_v35  ;;  %v1851_v35 = vmul.f32 %v7252_v37, %v7309_v7 }
 0xcc3   :  { %v6076_v14 = vpop.eup %6075  ;;  %v1855_v9 = vsel %vm521_vm8, %v1851_v35, 0.0 }
 0xcc4   :  { %v2462_v58 = vmul.f32 %v6076_v14, %v7390_v6  ;;  %v2533_v6 = vmul.f32 %v7228_v50, %v2461_v48  ;;  %v6218_v48 = vld [vmem:[#allocation4] sm:$0xff]  ;;  %v1863_v14 = vmul.f32 %v7259_v0, %v7309_v7 }
 0xcc6   :  { %5682 = vmatmul.msk.f32.gmra.mxu3 %vm517_vm7, %v2462_v58  ;;  %v2534_v15 = vmul.f32 %v7259_v0, %v2462_v58  ;;  %v2535_v36 = vsel %vm517_vm7, %v2533_v6, 0.0  ;;  %v2464_v61 = vmul.f32 %v7242_v55, %v2462_v58  ;;  %v2510_v45 = vmul.f32 %v7247_v4, %v2462_v58 }
 0xcc7   :  { %v2229_v25 = vpop.xlane.xlu2 %2228  ;;  %v2522_v60 = vmul.f32 %v7252_v37, %v2462_v58  ;;  %v1867_v31 = vsel %vm521_vm8, %v1863_v14, 0.0  ;;  %v7524_v58 = vld [vmem:[%s8804_s18 + $0x1] ss:$0 sm:$0xff] }
 0xcc8   :  { %6077 = vrcp.f32 %v2229_v25  ;;  %v2538_v2 = vsel %vm521_vm8, %v2534_v15, 0.0  ;;  %v2468_v53 = vsel %vm521_vm8, %v2464_v61, 0.0  ;;  %v2514_v27 = vsel %vm521_vm8, %v2510_v45, 0.0  ;;  %v7566_v14 = vld [vmem:[%s6434_s14 + $0x1] ss:$0 sm:$0xff] }
 0xcc9   :  { %2524 = vadd.xlane.f32.xlu0 %v2523_v33  ;;  %2539 = vadd.xlane.f32.xlu2 %v2538_v2  ;;  %v2526_v22 = vsel %vm521_vm8, %v2522_v60, 0.0  ;;  %v7533_v2 = vld [vmem:[%s8804_s18 + $0x3] ss:$0 sm:$0xff] }
 0xcce   :  { %v6078_v21 = vpop.eup %6077  ;;  %5719 = vmatmul.msk.f32.vlgmr.msrb.gmra.mxu3 %vm184_vm0, %v7478_v56 }
 0xccf   :  { %v7484_v32 = vmul.f32 %v6078_v21, %v7399_v43  ;;  %v2250_v59 = vpop.permute.xlu0 %2249  ;;  %v2248_v12 = vpop.permute.xlu2 %2247  ;;  %v7493_v43 = vadd.f32 %v5984_v23, %v1583_v13  ;;  %v7537_v21 = vld [vmem:[%s8804_s18 + $0x4] ss:$0 sm:$0xff] }
 0xcd0   :  { %5671 = vmatpush.msk.msrb.mxu0 %vm558_vm9, %v2250_v59 }
 0xcd1   :  { %2536 = vadd.xlane.f32.xlu0 %v2535_v36  ;;  %v2237_v8 = vmul.f32 %v7214_v26, %v7484_v32  ;;  %v1850_v26 = vmul.f32 %v7223_v17, %v7303_v28 }
 0xcd2   :  { %2275 = vmatpush.msrb.mxu0 %v2248_v12 }
 0xcd3   :  { %5672 = vmatmul.msk.f32.vlgmr.msrb.gmra.mxu0 %vm517_vm7, %v7484_v32  ;;  %v2239_v57 = vsel %vm517_vm7, %v2237_v8, 0.0  ;;  %v1852_v20 = vsel %vm517_vm7, %v1850_v26, 0.0 }
 0xcd4   :  { %2240 = vadd.xlane.f32.xlu2 %v2239_v57  ;;  %2575 = vmatpush.msra.mxu0 %v6215_v5 }
 0xcd6   :  { %v2232_v38 = vpop.xlane.xlu1 %2231  ;;  %5720 = vmatmul.msk.f32.gmra.mxu3 %vm184_vm0, %v7493_v43  ;;  %2576 = vmatpush.msra.mxu0 %v6216_v41 }
 0xcd7   :  { %6079 = vrcp.f32 %v2232_v38  ;;  %v2283_v38 = vmul.f32 %v7219_v52, %v7484_v32 }
 0xcd8   :  { %2577 = vmatpush.msra.mxu0 %v6217_v3 }
 0xcd9   :  { %2469 = vadd.xlane.f32.xlu0 %v2468_v53  ;;  %v2285_v3 = vsel %vm517_vm7, %v2283_v38, 0.0 }
 0xcda   :  { %2578 = vmatpush.msra.mxu0 %v6218_v48 }
 0xcdc   :  { %1853 = vadd.xlane.f32.xlu2 %v1852_v20 }
 0xcdd   :  { %v6080_v46 = vpop.eup %6079 }
 0xcde   :  { %v7504_v54 = vmul.f32 %v6080_v46, %v7407_v1  ;;  %v1862_v1 = vmul.f32 %v7228_v50, %v7303_v28  ;;  %v2061_v15 = vpop.xlane.xlu1 %2060  ;;  %v2295_v46 = vmul.f32 %v7223_v17, %v7484_v32 }
 0xcdf   :  { %v2065_v33 = vmul.f32 %v7529_v51, %v2061_v15 }
 0xce0   :  { %5673 = vmatmul.msk.f32.gmra.mxu0 %vm517_vm7, %v7504_v54  ;;  %v1864_v42 = vsel %vm517_vm7, %v1862_v1, 0.0  ;;  %v2297_v60 = vsel %vm517_vm7, %v2295_v46, 0.0 }
 0xce1   :  { %2515 = vadd.xlane.f32.xlu0 %v2514_v27 }
 0xce4   :  { %1844 = vadd.xlane.f32.xlu2 %v1843_v49 }
 0xce9   :  { %2527 = vadd.xlane.f32.xlu0 %v2526_v22 }
 0xcf1   :  { %1865 = vadd.xlane.f32.xlu0 %v1864_v42  ;;  %v2307_v42 = vmul.f32 %v7228_v50, %v7484_v32  ;;  %v2284_v32 = vmul.f32 %v7247_v4, %v7504_v54 }
 0xcf3   :  { %v2309_v17 = vsel %vm517_vm7, %v2307_v42, 0.0 }
 0xcf9   :  { %1856 = vadd.xlane.f32.xlu0 %v1855_v9 }
 0xcfa   :  { %v2014_v39 = vpop.xlane.xlu0 %2013 }
 0xcfb   :  { %v2018_v28 = vmul.f32 %v7524_v58, %v2014_v39 }
 0xcfd   :  { %v2052_v25 = vadd.f32 %v7336_v44, %v2018_v28  ;;  %v2238_v28 = vmul.f32 %v7242_v55, %v7504_v54  ;;  %v2288_v55 = vsel %vm521_vm8, %v2284_v32, 0.0 }
 0xcff   :  { %v2067_v23 = vadd.f32 %v2065_v33, %v2052_v25  ;;  %v2242_v50 = vsel %vm521_vm8, %v2238_v28, 0.0 }
 0xd01   :  { %1868 = vadd.xlane.f32.xlu0 %v1867_v31 }
 0xd02   :  { %v1800_v13 = vpop.xlane.xlu0 %1799 }
 0xd03   :  { %v1804_v33 = vmul.f32 %v7524_v58, %v1800_v13 }
 0xd08   :  { %v2073_v62 = vpop.xlane.xlu2 %2072 }
 0xd09   :  { %v2077_v7 = vmul.f32 %v7533_v2, %v2073_v62 }
 0xd0b   :  { %v2079_v6 = vadd.f32 %v2077_v7, %v2067_v23  ;;  %v1842_v23 = vpop.xlane.xlu1 %1841 }
 0xd10   :  { %v2085_v29 = vpop.xlane.xlu2 %2084 }
 0xd11   :  { %v2089_v59 = vmul.f32 %v7537_v21, %v2085_v29 }
 0xd13   :  { %v2091_v36 = vadd.f32 %v2089_v59, %v2079_v6  ;;  %v1833_v6 = vadd.f32 %v7340_v34, %v1804_v33  ;;  %v1846_v59 = vmul.f32 %v7529_v51, %v1842_v23  ;;  %v1803_v34 = vpop.xlane.xlu1 %1802 }
 0xd15   :  { %2095 = vrot.lane.b32.xlu1 %v2091_v36, %s6368_s1 }
 0xd18   :  { %v7541_v44 = vpop.xlane.xlu2 %2016 }
 0xd20   :  { %v7543_v8 = vpop.xlane.xlu2 %2063 }
 0xd28   :  { %v7545_v61 = vpop.xlane.xlu2 %2075 }
 0xd2c   :  { %v2467_v12 = vpop.xlane.xlu0 %2466 }
 0xd2d   :  { %v2471_v41 = vmul.f32 %v7524_v58, %v2467_v12  ;;  %v2296_v12 = vmul.f32 %v7252_v37, %v7504_v54 }
 0xd2f   :  { %v2300_v38 = vsel %vm521_vm8, %v2296_v12, 0.0 }
 0xd30   :  { %v7555_v40 = vpop.xlane.xlu2 %2087 }
 0xd34   :  { %v2513_v57 = vpop.xlane.xlu0 %2512 }
 0xd35   :  { %v2517_v48 = vmul.f32 %v7529_v51, %v2513_v57  ;;  %v1848_v57 = vadd.f32 %v1846_v59, %v1833_v6 }
 0xd39   :  { %v2503_v5 = vpop.f32.mrf.mxu3 }
 0xd3a   :  { %v2504_v53 = vadd.f32 %v2503_v5, %v2471_v41 }
 0xd3c   :  { %v2525_v26 = vpop.xlane.xlu0 %2524  ;;  %v2519_v20 = vadd.f32 %v2517_v48, %v2504_v53  ;;  %v7562_v35 = vpop.xlane.xlu2 %2539  ;;  %v1805_v48 = vmul.f32 %v7524_v58, %v1803_v34 }
 0xd3d   :  { %v2529_v45 = vmul.f32 %v7533_v2, %v2525_v26  ;;  %v2308_v26 = vmul.f32 %v7259_v0, %v7504_v54  ;;  %v2019_v0 = vmul.f32 %v7524_v58, %v7541_v44  ;;  %v2066_v54 = vmul.f32 %v7529_v51, %v7543_v8 }
 0xd3f   :  { %2286 = vadd.xlane.f32.xlu1 %v2285_v3  ;;  %v2531_v52 = vadd.f32 %v2529_v45, %v2519_v20  ;;  %v2312_v37 = vsel %vm521_vm8, %v2308_v26, 0.0  ;;  %v1836_v45 = vadd.f32 %v7342_v63, %v1805_v48  ;;  %v2055_v42 = vadd.f32 %v7338_v30, %v2019_v0 }
 0xd40   :  { %v2078_v63 = vmul.f32 %v7533_v2, %v7545_v61  ;;  %v2542_v61 = vmul.f32 %v7537_v21, %v7562_v35 }
 0xd44   :  { %v2537_v27 = vpop.xlane.xlu0 %2536 }
 0xd45   :  { %v2541_v49 = vmul.f32 %v7537_v21, %v2537_v27 }
 0xd47   :  { %v2543_v22 = vadd.f32 %v2541_v49, %v2531_v52  ;;  %2298 = vadd.xlane.f32.xlu1 %v2297_v60  ;;  %v7571_v62 = vpop.xlane.xlu2 %2240 }
 0xd49   :  { %v2506_v1 = vpop.f32.mrf.mxu3  ;;  %2547 = vrot.lane.b32.xlu0 %v2543_v22, %s6378_s22 }
 0xd4c   :  { %v2470_v9 = vpop.xlane.xlu0 %2469 }
 0xd4f   :  { %2310 = vadd.xlane.f32.xlu1 %v2309_v17  ;;  %v1854_v29 = vpop.xlane.xlu2 %1853  ;;  %v2068_v17 = vadd.f32 %v2066_v54, %v2055_v42 }
 0xd50   :  { %v1858_v36 = vmul.f32 %v7533_v2, %v1854_v29 }
 0xd51   :  { %v2890_v31 = vpop.f32.mrf.mxu3  ;;  %v2080_v28 = vadd.f32 %v2078_v63, %v2068_v17  ;;  %v6223_v63 = vld [vmem:[%s8805_s5] ss:$0 sm:$0xff] }
 0xd52   :  { %v2891_v39 = vadd.f32 %v7566_v14, %v2890_v31  ;;  %v1860_v4 = vadd.f32 %v1858_v36, %v1848_v57  ;;  %v2090_v31 = vmul.f32 %v7537_v21, %v7555_v40 }
 0xd54   :  { %v7573_v15 = vmul.f32 0.35355338, %v2891_v39  ;;  %v2516_v25 = vpop.xlane.xlu0 %2515  ;;  %v2472_v39 = vmul.f32 %v7524_v58, %v2470_v9  ;;  %v2092_v32 = vadd.f32 %v2090_v31, %v2080_v28 }
 0xd56   :  { %3160 = vrot.lane.b32.xlu0 %v7573_v15, %s6371_s17  ;;  %v2507_v33 = vadd.f32 %v2506_v1, %v2472_v39  ;;  %v2245_v1 = vmul.f32 %v7524_v58, %v7571_v62 }
 0xd57   :  { %2243 = vadd.xlane.f32.xlu1 %v2242_v50  ;;  %v1845_v53 = vpop.xlane.xlu2 %1844  ;;  %v2518_v50 = vmul.f32 %v7529_v51, %v2516_v25  ;;  %v2277_v25 = vpop.f32.mrf.mxu0 }
 0xd58   :  { %v1847_v20 = vmul.f32 %v7529_v51, %v1845_v53 }
 0xd59   :  { %v2520_v8 = vadd.f32 %v2518_v50, %v2507_v33 }
 0xd5a   :  { %v1849_v27 = vadd.f32 %v1847_v20, %v1836_v45  ;;  %v2893_v45 = vpop.f32.mrf.mxu3 }
 0xd5c   :  { %v2528_v7 = vpop.xlane.xlu0 %2527 }
 0xd5d   :  { %v2530_v44 = vmul.f32 %v7533_v2, %v2528_v7 }
 0xd5f   :  { %2289 = vadd.xlane.f32.xlu1 %v2288_v55  ;;  %v2532_v30 = vadd.f32 %v2530_v44, %v2520_v8  ;;  %v2278_v55 = vadd.f32 %v2277_v25, %v2245_v1  ;;  %v5986_v44 = vld [vmem:[%s6444_s24 + $0x1] ss:$0 sm:$0xff] }
 0xd61   :  { %v2544_v40 = vadd.f32 %v2542_v61, %v2532_v30 }
 0xd64   :  { %v1866_v5 = vpop.xlane.xlu0 %1865 }
 0xd65   :  { %v1870_v13 = vmul.f32 %v7537_v21, %v1866_v5 }
 0xd67   :  { %v1872_v41 = vadd.f32 %v1870_v13, %v1860_v4  ;;  %2301 = vadd.xlane.f32.xlu1 %v2300_v38 }
 0xd69   :  { %1874 = vst.msk [vmem:[#allocation2] sm:$0xff] %vm408_vm6, %v1872_v41  ;;  %v2280_v41 = vpop.f32.mrf.mxu0 }
 0xd6c   :  { %v1857_v3 = vpop.xlane.xlu0 %1856 }
 0xd6d   :  { %v1859_v46 = vmul.f32 %v7533_v2, %v1857_v3 }
 0xd6f   :  { %2313 = vadd.xlane.f32.xlu1 %v2312_v37  ;;  %v1861_v49 = vadd.f32 %v1859_v46, %v1849_v27 }
 0xd74   :  { %v1869_v52 = vpop.xlane.xlu0 %1868 }
 0xd75   :  { %v1871_v60 = vmul.f32 %v7537_v21, %v1869_v52  ;;  %v5697_v52 = vld [vmem:[%s6439_s19 + $0x38] sm:$0xff] }
 0xd76   :  { %2911 = vmatpush.msrb.mxu0 %v5697_v52 }
 0xd77   :  { %v1873_v22 = vadd.f32 %v1871_v60, %v1861_v49  ;;  %v5695_v49 = vld [vmem:[%s6439_s19 + $0x28] sm:$0xff]  ;;  %v5694_v60 = vld [vmem:[%s6439_s19 + $0x20] sm:$0xff] }
 0xd79   :  { %1875 = vst.msk [vmem:[#allocation2 + $0x8] sm:$0x1] %vm625_vm10, %v1873_v22 }
 0xd87   :  { %v2096_v23 = vpop.permute.xlu1 %2095 }
 0xd88   :  { %2101 = vst.msk [vmem:[#allocation2] sm:$0xff] %vm852_vm11, %v2096_v23  ;;  %2097 = vrot.lane.b32.xlu1 %v2092_v32, %s6368_s1 }
 0xd90   :  { %2549 = vrot.lane.b32.xlu1 %v2544_v40, %s6378_s22 }
 0xdb2   :  { %v2287_v9 = vpop.xlane.xlu1 %2286 }
 0xdb3   :  { %v2291_v7 = vmul.f32 %v7529_v51, %v2287_v9 }
 0xdb5   :  { %v2293_v59 = vadd.f32 %v2291_v7, %v2278_v55 }
 0xdba   :  { %v2299_v29 = vpop.xlane.xlu1 %2298 }
 0xdbb   :  { %v2303_v6 = vmul.f32 %v7533_v2, %v2299_v29  ;;  %v2548_v27 = vpop.permute.xlu0 %2547 }
 0xdbd   :  { %v2305_v12 = vadd.f32 %v2303_v6, %v2293_v59 }
 0xdc2   :  { %v2311_v36 = vpop.xlane.xlu1 %2310 }
 0xdc3   :  { %v2315_v57 = vmul.f32 %v7537_v21, %v2311_v36 }
 0xdc5   :  { %v2317_v35 = vadd.f32 %v2315_v57, %v2305_v12 }
 0xdc7   :  { %2321 = vrot.lane.b32.xlu2 %v2317_v35, %s6379_s23 }
 0xdca   :  { %v2244_v5 = vpop.xlane.xlu1 %2243 }
 0xdcb   :  { %v2246_v38 = vmul.f32 %v7524_v58, %v2244_v5  ;;  %v2894_v58 = vadd.f32 %v7566_v14, %v2893_v45  ;;  %v5696_v14 = vld [vmem:[%s6439_s19 + $0x30] sm:$0xff] }
 0xdcc   :  { %2912 = vmatpush.msrb.mxu0 %v5696_v14  ;;  %v6224_v14 = vld [vmem:[%s8806_s29] ss:$0 sm:$0xff] }
 0xdcd   :  { %v2281_v34 = vadd.f32 %v2280_v41, %v2246_v38 }
 0xdce   :  { %2913 = vmatpush.msrb.mxu0 %v5695_v49 }
 0xdd0   :  { %2914 = vmatpush.msrb.mxu0 %v5694_v60 }
 0xdd2   :  { %v2290_v4 = vpop.xlane.xlu1 %2289 }
 0xdd3   :  { %v2292_v62 = vmul.f32 %v7529_v51, %v2290_v4  ;;  %v7628_v51 = vmul.f32 0.35355338, %v2894_v58 }
 0xdd5   :  { %v2294_v53 = vadd.f32 %v2292_v62, %v2281_v34 }
 0xdda   :  { %v2302_v13 = vpop.xlane.xlu1 %2301 }
 0xddb   :  { %v2304_v26 = vmul.f32 %v7533_v2, %v2302_v13 }
 0xddd   :  { %v2306_v48 = vadd.f32 %v2304_v26, %v2294_v53  ;;  %v5702_v53 = vld [vmem:[%s6449_s30 + $0x38] sm:$0xff] }
 0xdde   :  { %2937 = vmatpush.msrb.mxu1 %v5702_v53 }
 0xde2   :  { %v2314_v3 = vpop.xlane.xlu1 %2313 }
 0xde3   :  { %v2316_v37 = vmul.f32 %v7537_v21, %v2314_v3  ;;  %v5701_v3 = vld [vmem:[%s6449_s30 + $0x30] sm:$0xff] }
 0xde4   :  { %2938 = vmatpush.msrb.mxu1 %v5701_v3 }
 0xde5   :  { %v2318_v20 = vadd.f32 %v2316_v37, %v2306_v48  ;;  %v5700_v48 = vld [vmem:[%s6449_s30 + $0x28] sm:$0xff]  ;;  %v5699_v37 = vld [vmem:[%s6449_s30 + $0x20] sm:$0xff] }
 0xde6   :  { %2939 = vmatpush.msrb.mxu1 %v5700_v48 }
 0xde7   :  { %2323 = vrot.lane.b32.xlu2 %v2318_v20, %s6379_s23 }
 0xde8   :  { %2940 = vmatpush.msrb.mxu1 %v5699_v37 }
 0xdef   :  { %3162 = vrot.lane.b32.xlu2 %v7628_v51, %s6371_s17 }
 0xdfa   :  { %v2098_v2 = vpop.permute.xlu1 %2097 }
 0xdfb   :  { %2102 = vst.msk [vmem:[#allocation2 + $0x8] sm:$0x1] %vm854_vm12, %v2098_v2 }
 0xe02   :  { %v2550_v0 = vpop.permute.xlu1 %2549 }
 0xe21   :  { %v2322_v46 = vpop.permute.xlu2 %2321 }
 0xe22   :  { %2327 = vst.msk [vmem:[#allocation2] sm:$0xff] %vm1080_vm13, %v2322_v46 }
 0xe23   :  { %2553 = vst.msk [vmem:[#allocation2] sm:$0xff] %vm1308_vm14, %v2548_v27 }
 0xe2a   :  { %v2555_v21 = vld [vmem:[#allocation2] sm:$0xff] }
 0xe2b   :  { %5683 = vmatmul.msk.f32.vlgmr.msra.gmra.mxu0 %vm184_vm0, %v2555_v21 }
 0xe41   :  { %v2324_v22 = vpop.permute.xlu2 %2323 }
 0xe42   :  { %2328 = vst.msk [vmem:[#allocation2 + $0x8] sm:$0x1] %vm8813_vm3, %v2324_v22  ;;  %v6225_v22 = vld [vmem:[%s8807_s3] ss:$0 sm:$0xff] }
 0xe43   :  { %2554 = vst.msk [vmem:[#allocation2 + $0x8] sm:$0x1] %vm8814_vm4, %v2550_v0 }
 0xe4a   :  { %v2556_v54 = vld [vmem:[#allocation2 + $0x8] sm:$0x1] }
 0xe4b   :  { %5684 = vmatmul.msk.f32.gmra.mxu0 %vm184_vm0, %v2556_v54  ;;  %v7684_v54 = vld [vmem:[%s6409_s21] sm:$0xff] }
 0xe53   :  { %5721 = vmatmul.msk.f32.vlgmr.msrb.gmra.mxu0 %vm184_vm0, %v7478_v56 }
 0xe5b   :  { %5722 = vmatmul.msk.f32.gmra.mxu0 %vm184_vm0, %v7493_v43 }
 0xea8   :  { %v2580_v42 = vpop.f32.mrf.mxu0 }
 0xea9   :  { %v2581_v17 = vadd.f32 %v6223_v63, %v2580_v42 }
 0xeab   :  { %v2586_v39 = vadd.f32 %v2581_v17, %v7039_v47  ;;  %v7695_v17 = vpop.permute.xlu0 %3160 }
 0xead   :  { %v2588_v32 = vsel %vm184_vm0, %v2586_v39, 0.0 }
 0xec8   :  { %v2583_v31 = vpop.f32.mrf.mxu0 }
 0xec9   :  { %v2584_v28 = vadd.f32 %v6223_v63, %v2583_v31  ;;  %v7699_v31 = vpop.permute.xlu2 %3162 }
 0xecb   :  { %v2587_v50 = vadd.f32 %v2584_v28, %v7045_v16  ;;  %v6227_v28 = vld [vmem:[%s8808_s26] ss:$0 sm:$0xff] }
 0xecd   :  { %v2589_v33 = vsel %vm186_vm1, %v2587_v50, 0.0 }
 0xece   :  { %v2590_v23 = vadd.f32 %v2589_v33, %v2588_v32 }
 0xed0   :  { %v2591_v8 = vrot.slane %v2590_v23, 4  ;;  %v2916_v30 = vpop.f32.mrf.mxu0 }
 0xed1   :  { %v7653_v61 = vadd.f32 %v5986_v44, %v2916_v30 }
 0xed2   :  { %v2592_v40 = vadd.f32 %v2591_v8, %v2590_v23 }
 0xed3   :  { %3203 = vrot.lane.b32.xlu0 %v7653_v61, %s6371_s17 }
 0xed4   :  { %v2593_v9 = vrot.slane %v2592_v40, 2 }
 0xed6   :  { %v2594_v29 = vadd.f32 %v2593_v9, %v2592_v40 }
 0xed8   :  { %v2595_v47 = vrot.slane %v2594_v29, 1  ;;  %v2919_v25 = vpop.f32.mrf.mxu0 }
 0xed9   :  { %v7657_v1 = vadd.f32 %v5986_v44, %v2919_v25 }
 0xeda   :  { %v2596_v16 = vadd.f32 %v2595_v47, %v2594_v29 }
 0xedb   :  { %3205 = vrot.lane.b32.xlu1 %v7657_v1, %s6371_s17  ;;  %5727 = vmatpush.xpose.msk.msra.mxu3 %vm408_vm6, %v7657_v1 }
 0xedc   :  { %v2597_v7 = vmul.f32 %v2596_v16, %v6561_v24 }
 0xede   :  { %v2598_v55 = vsub.f32 %v2586_v39, %v2597_v7  ;;  %v2599_v6 = vsub.f32 %v2587_v50, %v2597_v7 }
 0xedf   :  { %5728 = vmatpush.xpose.msk.msra.mxu3 %vm408_vm6, %v7653_v61 }
 0xee0   :  { %v2600_v59 = vmul.f32 %v2598_v55, %v2598_v55  ;;  %v2601_v36 = vmul.f32 %v2599_v6, %v2599_v6 }
 0xee2   :  { %v2602_v12 = vsel %vm184_vm0, %v2600_v59, 0.0  ;;  %v2603_v57 = vsel %vm186_vm1, %v2601_v36, 0.0  ;;  %5729 = vmatmul.msk.f32.vlgmr.msra.gmra.mxu3 %vm408_vm6, %v7573_v15 }
 0xee3   :  { %v2604_v35 = vadd.f32 %v2603_v57, %v2602_v12  ;;  %v5987_v12 = vld [vmem:[%s6454_s6 + $0x1] ss:$0 sm:$0xff] }
 0xee5   :  { %v2605_v5 = vrot.slane %v2604_v35, 4 }
 0xee7   :  { %v2606_v4 = vadd.f32 %v2605_v5, %v2604_v35 }
 0xee9   :  { %v2607_v13 = vrot.slane %v2606_v4, 2 }
 0xeea   :  { %5730 = vmatmul.msk.f32.gmra.mxu3 %vm408_vm6, %v7628_v51 }
 0xeeb   :  { %v2608_v38 = vadd.f32 %v2607_v13, %v2606_v4 }
 0xeed   :  { %v2609_v62 = vrot.slane %v2608_v38, 1 }
 0xeef   :  { %v2610_v41 = vadd.f32 %v2609_v62, %v2608_v38 }
 0xef1   :  { %v2611_v34 = vmul.f32 %v2610_v41, %v6561_v24 }
 0xef3   :  { %v2612_v26 = vadd.f32 1e-12, %v2611_v34 }
 0xef5   :  { %6081 = vrsqrt.f32 %v2612_v26  ;;  %vm2619_vm15 = vweird.f32 %v2612_v26 }
 0xefb   :  { %v6082_v20 = vpop.eup %6081 }
 0xefc   :  { %v2614_v45 = vmul.f32 %v6082_v20, %v2612_v26  ;;  %vm2620_vm2 = vweird.f32 %v6082_v20 }
 0xefd   :  { %vm2621_vm3 = vmor %vm2619_vm15, %vm2620_vm2 }
 0xefe   :  { %v2615_v58 = vmul.f32 %v6082_v20, %v2614_v45 }
 0xf00   :  { %v2616_v2 = vmul.f32 0.5, %v2615_v58 }
 0xf02   :  { %v2617_v46 = vsub.f32 1.5, %v2616_v2 }
 0xf04   :  { %v2618_v27 = vmul.f32 %v6082_v20, %v2617_v46 }
 0xf06   :  { %v2622_v21 = vsel %vm2621_vm3, %v6082_v20, %v2618_v27 }
 0xf07   :  { %v2623_v52 = vmul.f32 %v2622_v21, %v2598_v55  ;;  %v2624_v60 = vmul.f32 %v2622_v21, %v2599_v6 }
 0xf09   :  { %v2625_v49 = vmul.f32 %v6224_v14, %v2623_v52  ;;  %v2626_v42 = vmul.f32 %v6224_v14, %v2624_v60 }
 0xf0b   :  { %v7679_v0 = vadd.f32 %v6225_v22, %v2625_v49  ;;  %v7687_v63 = vadd.f32 %v6225_v22, %v2626_v42 }
 0xf0d   :  { %5685 = vmatmul.msk.f32.vlgmr.msra.gmra.mxu1 %vm184_vm0, %v7679_v0 }
 0xf0e   :  { %3183 = vmatpush.msra.mxu1 %v7684_v54 }
 0xf15   :  { %5686 = vmatmul.msk.f32.gmra.mxu1 %vm184_vm0, %v7687_v63 }
 0xf1d   :  { %5723 = vmatmul.msk.f32.vlgmr.msrb.gmra.mxu1 %vm184_vm0, %v7478_v56 }
 0xf25   :  { %5724 = vmatmul.msk.f32.gmra.mxu1 %vm184_vm0, %v7493_v43 }
 0xf2d   :  { %5734 = vmatmul.msk.f32.vlgmr.msra.gmra.mxu1 %vm408_vm6, %v7695_v17 }
 0xf35   :  { %5735 = vmatmul.msk.f32.gmra.mxu1 %vm408_vm6, %v7699_v31 }
 0xf8a   :  { %v2652_v39 = vpop.f32.mrf.mxu1 }
 0xf8b   :  { %v7704_v50 = vadd.f32 %v6227_v28, %v2652_v39 }
 0xf8d   :  { %v7707_v32 = vmul.f32 0.70710677, %v7704_v50 }
 0xf8f   :  { %v2662_v33 = vand.u32 2147483647, %v7707_v32 }
 0xf91   :  { %v2664_v44 = vmul.f32 0.3275911, %v2662_v33  ;;  %v2716_v41 = vsub.f32 0.0, %v2662_v33 }
 0xf92   :  { %v2655_v23 = vpop.f32.mrf.mxu1 }
 0xf93   :  { %v2666_v8 = vadd.f32 1.0, %v2664_v44  ;;  %v7710_v30 = vadd.f32 %v6227_v28, %v2655_v23  ;;  %v2718_v20 = vmul.f32 %v2716_v41, %v2662_v33 }
 0xf95   :  { %6083 = vrcp.f32 %v2666_v8  ;;  %v7713_v40 = vmul.f32 0.70710677, %v7710_v30  ;;  %v2679_v6 = vand.u32 2147483648, %v2666_v8  ;;  %v2677_v36 = vand.u32 2147483647, %v2666_v8 }
 0xf96   :  { %vm2673_vm2 = vweird.f32 %v2666_v8  ;;  %v2720_v14 = vmul.f32 1.442695, %v2718_v20  ;;  %v2659_v20 = vmul.f32 0.5, %v7710_v30  ;;  %v6228_v30 = vld [vmem:[%s8810_s0] ss:$0 sm:$0xff] }
 0xf97   :  { %v2663_v9 = vand.u32 2147483647, %v7713_v40  ;;  %v2680_v5 = vor.u32 1.1754944e-38, %v2679_v6  ;;  %vm2678_vm3 = vcmp.eq.f32.partialorder %v2677_v36, 8.507059e+37 }
 0xf99   :  { %v2665_v29 = vmul.f32 0.3275911, %v2663_v9  ;;  %v2717_v22 = vsub.f32 0.0, %v2663_v9 }
 0xf9a   :  { %v2942_v47 = vpop.f32.mrf.mxu1 }
 0xf9b   :  { %v6084_v25 = vpop.eup %6083  ;;  %v2667_v7 = vadd.f32 1.0, %v2665_v29  ;;  %v7719_v26 = vadd.f32 %v5987_v12, %v2942_v47  ;;  %v2719_v23 = vmul.f32 %v2717_v22, %v2663_v9 }
 0xf9c   :  { %v2669_v16 = vmul.f32 %v6084_v25, %v2666_v8  ;;  %vm2674_vm4 = vweird.f32 %v6084_v25 }
 0xf9d   :  { %6085 = vrcp.f32 %v2667_v7  ;;  %vm2675_vm15 = vmor %vm2673_vm2, %vm2674_vm4  ;;  %v2694_v37 = vand.u32 2147483648, %v2667_v7  ;;  %v2692_v58 = vand.u32 2147483647, %v2667_v7  ;;  %vm2688_vm2 = vweird.f32 %v2667_v7 }
 0xf9e   :  { %v2670_v55 = vsub.f32 1.0, %v2669_v16  ;;  %6087 = vpow2.f32 %v2720_v14 }
 0xf9f   :  { %v2695_v52 = vor.u32 1.1754944e-38, %v2694_v37 }
 0xfa0   :  { %v2671_v59 = vmul.f32 %v6084_v25, %v2670_v55 }
 0xfa2   :  { %v2672_v57 = vadd.f32 %v6084_v25, %v2671_v59  ;;  %v2945_v35 = vpop.f32.mrf.mxu1 }
 0xfa3   :  { %v7717_v4 = vadd.f32 %v5987_v12, %v2945_v35  ;;  %v6086_v13 = vpop.eup %6085 }
 0xfa4   :  { %v2676_v38 = vsel %vm2675_vm15, %v6084_v25, %v2672_v57  ;;  %v2684_v34 = vmul.f32 %v6086_v13, %v2667_v7  ;;  %vm2689_vm4 = vweird.f32 %v6086_v13  ;;  %v2722_v7 = vmul.f32 1.442695, %v2719_v23  ;;  %v6088_v55 = vpop.eup %6087 }
 0xfa5   :  { %v2681_v62 = vsel %vm2678_vm3, %v2680_v5, %v2676_v38  ;;  %5731 = vmatpush.msk.msra.mxu0 %vm558_vm9, %v7717_v4  ;;  %vm2690_vm15 = vmor %vm2688_vm2, %vm2689_vm4  ;;  %vm2693_vm3 = vcmp.eq.f32.partialorder %v2692_v58, 8.507059e+37  ;;  %vm2728_vm4 = vcmp.ge.f32.partialorder %v7707_v32, 0.0  ;;  %vm2729_vm2 = vcmp.ge.f32.partialorder %v7713_v40, 0.0 }
 0xfa6   :  { %v2698_v53 = vmul.f32 1.0614054, %v2681_v62  ;;  %v2685_v3 = vsub.f32 1.0, %v2684_v34  ;;  %6089 = vpow2.f32 %v2722_v7 }
 0xfa7   :  { %3114 = vmatpush.msra.mxu0 %v7719_v26 }
 0xfa8   :  { %v2700_v48 = vadd.f32 -1.4531521, %v2698_v53  ;;  %v2686_v45 = vmul.f32 %v6086_v13, %v2685_v3  ;;  %v3206_v3 = vpop.permute.xlu1 %3205 }
 0xfa9   :  { %3410 = vmatpush.msrb.mxu0 %v7684_v54 }
 0xfaa   :  { %v2702_v2 = vmul.f32 %v2700_v48, %v2681_v62  ;;  %v3185_v46 = vpop.f32.mrf.mxu1  ;;  %v2687_v27 = vadd.f32 %v6086_v13, %v2686_v45 }
 0xfab   :  { %3259 = vperm.xlu0 %5919, %v3185_v46   ;;  %3235 = vperm.xlu2 %5921, %v3185_v46  }
 0xfac   :  { %v2704_v21 = vadd.f32 1.4214138, %v2702_v2  ;;  %3193 = vperm.xlu1 %5920, %v3185_v46   ;;  %v2691_v49 = vsel %vm2690_vm15, %v6086_v13, %v2687_v27  ;;  %v2658_v13 = vmul.f32 0.5, %v7704_v50  ;;  %v6090_v41 = vpop.eup %6089  ;;  %v3204_v50 = vpop.permute.xlu0 %3203 }
 0xfad   :  { %v2696_v42 = vsel %vm2693_vm3, %v2695_v52, %v2691_v49 }
 0xfae   :  { %v2706_v60 = vmul.f32 %v2704_v21, %v2681_v62  ;;  %v2699_v39 = vmul.f32 1.0614054, %v2696_v42 }
 0xfb0   :  { %v2708_v28 = vadd.f32 -0.28449672, %v2706_v60  ;;  %v2701_v33 = vadd.f32 -1.4531521, %v2699_v39 }
 0xfb2   :  { %v2710_v44 = vmul.f32 %v2708_v28, %v2681_v62  ;;  %v7725_v8 = vpop.f32.mrf.mxu1  ;;  %v2703_v29 = vmul.f32 %v2701_v33, %v2696_v42 }
 0xfb3   :  { %5922 = vset.pattern.permute.xlu2 %v6374_v18  ;;  %5925 = vset.pattern.permute.xlu0 %v6372_v10 }
 0xfb4   :  { %v2712_v47 = vadd.f32 0.2548296, %v2710_v44  ;;  %3198 = vperm.xlu1 %5920, %v7725_v8   ;;  %3247 = vperm.xlu2 %5922, %v3185_v46   ;;  %v2705_v25 = vadd.f32 1.4214138, %v2703_v29 }
 0xfb6   :  { %v2714_v16 = vmul.f32 %v2712_v47, %v2681_v62  ;;  %v2707_v6 = vmul.f32 %v2705_v25, %v2696_v42 }
 0xfb8   :  { %v2724_v59 = vmul.f32 %v6088_v55, %v2714_v16  ;;  %v2709_v36 = vadd.f32 -0.28449672, %v2707_v6 }
 0xfba   :  { %v2726_v12 = vsub.f32 1.0, %v2724_v59  ;;  %v2711_v9 = vmul.f32 %v2709_v36, %v2696_v42 }
 0xfbc   :  { %v2730_v57 = vsub.f32 0.0, %v2726_v12  ;;  %5923 = vset.pattern.permute.xlu1 %v6372_v10  ;;  %3251 = vperm.xlu2 %5922, %v7725_v8   ;;  %v2713_v35 = vadd.f32 0.2548296, %v2711_v9 }
 0xfbd   :  { %3239 = vperm.xlu1 %5923, %v7725_v8  }
 0xfbe   :  { %v2732_v5 = vsel %vm2728_vm4, %v2726_v12, %v2730_v57  ;;  %v2715_v62 = vmul.f32 %v2713_v35, %v2696_v42  ;;  %v7766_v35 = vld [vmem:[%s6399_s13 + $0x10] sm:$0xff] }
 0xfbf   :  { %v2734_v38 = vadd.f32 1.0, %v2732_v5 }
 0xfc0   :  { %v2725_v53 = vmul.f32 %v6090_v41, %v2715_v62  ;;  %v7770_v41 = vld [vmem:[%s6399_s13 + $0x20] sm:$0xff] }
 0xfc1   :  { %v2736_v34 = vmul.f32 %v2734_v38, %v2658_v13 }
 0xfc2   :  { %v2727_v48 = vsub.f32 1.0, %v2725_v53 }
 0xfc3   :  { %5687 = vmatmul.msk.f32.vlgmr.msra.gmra.mxu2 %vm1510_vm5, %v2736_v34 }
 0xfc4   :  { %5736 = vmatpush.xpose.msk.msra.mxu2 %vm408_vm6, %v3206_v3  ;;  %5924 = vset.pattern.permute.xlu2 %v6373_v11  ;;  %v2731_v32 = vsub.f32 0.0, %v2727_v48 }
 0xfc5   :  { %5926 = vset.pattern.permute.xlu1 %v6374_v18 }
 0xfc6   :  { %v2733_v37 = vsel %vm2729_vm2, %v2727_v48, %v2731_v32  ;;  %v7776_v32 = vld [vmem:[%s6399_s13 + $0x30] sm:$0xff]  ;;  %vm8815_vm2 = vcmask 188544  }
 0xfc7   :  { %v2735_v45 = vadd.f32 1.0, %v2733_v37 }
 0xfc8   :  { %5737 = vmatpush.xpose.msk.msra.mxu2 %vm408_vm6, %v3204_v50 }
 0xfc9   :  { %v2737_v58 = vmul.f32 %v2735_v45, %v2659_v20  ;;  %v7780_v45 = vld [vmem:[%s6399_s13 + $0x40] sm:$0xff] }
 0xfcb   :  { %5688 = vmatmul.msk.f32.gmra.mxu2 %vm1510_vm5, %v2737_v58 }
 0xfd3   :  { %5725 = vmatmul.msk.f32.vlgmr.msrb.gmra.mxu2 %vm408_vm6, %v7573_v15 }
 0xfdb   :  { %5726 = vmatmul.msk.f32.gmra.mxu2 %vm408_vm6, %v7628_v51 }
 0xfe3   :  { %5738 = vmatmul.msk.f32.vlgmr.msra.gmra.mxu2 %vm408_vm6, %v7695_v17 }
 0xfeb   :  { %5739 = vmatmul.msk.f32.gmra.mxu2 %vm408_vm6, %v7699_v31 }
0x1005   :  { %v3236_v59 = vpop.permute.xlu2 %3235 }
0x1006   :  { %v3242_v34 = vmul.f32 %v7770_v41, %v3236_v59 }
0x100e   :  { %v3248_v3 = vpop.permute.xlu2 %3247 }
0x100f   :  { %v3254_v50 = vmul.f32 %v7776_v32, %v3248_v3 }
0x101d   :  { %v3260_v37 = vpop.permute.xlu0 %3259 }
0x101e   :  { %v3194_v12 = vpop.permute.xlu1 %3193  ;;  %v3266_v58 = vmul.f32 %v7780_v45, %v3260_v37  ;;  %v7818_v37 = vld [vmem:[%s6399_s13 + $0x48] sm:$0x1] }
0x101f   :  { %v3201_v5 = vmul.f32 %v7766_v35, %v3194_v12  ;;  %v7806_v12 = vld [vmem:[%s6399_s13 + $0x28] sm:$0x1] }
0x1046   :  { %v2761_v40 = vpop.f32.mrf.mxu2 }
0x1047   :  { %v2762_v2 = vadd.f32 %v6228_v30, %v2761_v40 }
0x1049   :  { %v2767_v27 = vadd.f32 %v2762_v2, %v7679_v0 }
0x104b   :  { %v2769_v14 = vsel %vm184_vm0, %v2767_v27, 0.0 }
0x104e   :  { %v2764_v46 = vpop.f32.mrf.mxu2 }
0x104f   :  { %v2765_v21 = vadd.f32 %v6228_v30, %v2764_v46 }
0x1051   :  { %v2768_v52 = vadd.f32 %v2765_v21, %v7687_v63 }
0x1053   :  { %v2770_v49 = vsel %vm186_vm1, %v2768_v52, 0.0 }
0x1054   :  { %v2771_v60 = vadd.f32 %v2770_v49, %v2769_v14 }
0x1056   :  { %v2772_v22 = vrot.slane %v2771_v60, 4  ;;  %v2973_v42 = vpop.f32.mrf.mxu2 }
0x1057   :  { %3021 = vperm.xlu0 %5925, %v2973_v42   ;;  %2981 = vperm.xlu2 %5924, %v2973_v42  }
0x1058   :  { %v2773_v17 = vadd.f32 %v2772_v22, %v2771_v60  ;;  %3033 = vperm.xlu1 %5926, %v2973_v42  }
0x105a   :  { %v2774_v31 = vrot.slane %v2773_v17, 2 }
0x105c   :  { %v2775_v39 = vadd.f32 %v2774_v31, %v2773_v17  ;;  %v3252_v31 = vpop.permute.xlu2 %3251 }
0x105e   :  { %v2776_v28 = vrot.slane %v2775_v39, 1  ;;  %v2976_v33 = vpop.f32.mrf.mxu2 }
0x105f   :  { %5930 = vset.pattern.permute.xlu0 %v6374_v18  ;;  %2986 = vperm.xlu2 %5924, %v2976_v33  }
0x1060   :  { %v2777_v0 = vadd.f32 %v2776_v28, %v2775_v39  ;;  %5927 = vset.pattern.permute.xlu1 %v6375_v19  ;;  %3037 = vperm.xlu0 %5930, %v2976_v33   ;;  %v3199_v28 = vpop.permute.xlu1 %3198 }
0x1061   :  { %3045 = vperm.xlu1 %5927, %v2973_v42  }
0x1062   :  { %v2778_v63 = vmul.f32 %v2777_v0, %v6561_v24 }
0x1064   :  { %v2779_v44 = vsub.f32 %v2767_v27, %v2778_v63  ;;  %v2780_v23 = vsub.f32 %v2768_v52, %v2778_v63  ;;  %v7784_v27 = vld [vmem:[%s6394_s9] sm:$0xff] }
0x1066   :  { %v2781_v29 = vmul.f32 %v2779_v44, %v2779_v44  ;;  %v2782_v47 = vmul.f32 %v2780_v23, %v2780_v23  ;;  %v3228_v57 = vpop.f32.mrf.mxu2 }
0x1067   :  { %5928 = vset.pattern.permute.xlu2 %v6372_v10  ;;  %v3229_v62 = vadd.f32 %v3228_v57, %v3201_v5 }
0x1068   :  { %v2783_v25 = vsel %vm184_vm0, %v2781_v29, 0.0  ;;  %v2784_v16 = vsel %vm186_vm1, %v2782_v47, 0.0  ;;  %3025 = vperm.xlu2 %5928, %v2976_v33   ;;  %v3240_v0 = vpop.permute.xlu1 %3239 }
0x1069   :  { %v2785_v7 = vadd.f32 %v2784_v16, %v2783_v25  ;;  %3049 = vperm.xlu1 %5927, %v2976_v33   ;;  %v3244_v48 = vadd.f32 %v3242_v34, %v3229_v62  ;;  %v3014_v25 = vpop.f32.mrf.mxu3 }
0x106b   :  { %v2786_v55 = vrot.slane %v2785_v7, 4  ;;  %v3256_v20 = vadd.f32 %v3254_v50, %v3244_v48 }
0x106d   :  { %v2787_v6 = vadd.f32 %v2786_v55, %v2785_v7  ;;  %v3268_v30 = vadd.f32 %v3266_v58, %v3256_v20  ;;  %v7802_v7 = vld [vmem:[%s6399_s13 + $0x18] sm:$0x1] }
0x106e   :  { %v3231_v16 = vpop.f32.mrf.mxu2  ;;  %v3202_v55 = vmul.f32 %v7802_v7, %v3199_v28 }
0x106f   :  { %v2788_v36 = vrot.slane %v2787_v6, 2  ;;  %v7787_v21 = vadd.f32 %v7784_v27, %v3268_v30 }
0x1070   :  { %5929 = vset.pattern.permute.xlu2 %v6375_v19  ;;  %v3232_v59 = vadd.f32 %v3231_v16, %v3202_v55 }
0x1071   :  { %v2789_v9 = vadd.f32 %v2788_v36, %v2787_v6  ;;  %3263 = vperm.xlu2 %5929, %v7725_v8   ;;  %5932 = vset.pattern.permute.xlu1 %v6372_v10  ;;  %v3272_v49 = vsel %vm517_vm7, %v7787_v21, -inf }
0x1073   :  { %v2790_v13 = vrot.slane %v2789_v9, 1 }
0x1075   :  { %v2791_v38 = vadd.f32 %v2790_v13, %v2789_v9  ;;  %v3243_v9 = vmul.f32 %v7806_v12, %v3240_v0 }
0x1077   :  { %v2792_v53 = vmul.f32 %v2791_v38, %v6561_v24  ;;  %v3245_v38 = vadd.f32 %v3243_v9, %v3232_v59 }
0x1079   :  { %v2793_v8 = vadd.f32 1e-12, %v2792_v53  ;;  %5931 = vset.pattern.permute.xlu2 %v6373_v11 }
0x107b   :  { %6091 = vrsqrt.f32 %v2793_v8  ;;  %vm2800_vm3 = vweird.f32 %v2793_v8 }
0x1081   :  { %v6092_v40 = vpop.eup %6091 }
0x1082   :  { %v2795_v2 = vmul.f32 %v6092_v40, %v2793_v8  ;;  %vm2801_vm15 = vweird.f32 %v6092_v40  ;;  %v7813_v8 = vld [vmem:[%s6399_s13 + $0x38] sm:$0x1] }
0x1083   :  { %vm2802_vm4 = vmor %vm2800_vm3, %vm2801_vm15  ;;  %v3255_v48 = vmul.f32 %v7813_v8, %v3252_v31  ;;  %vm8816_vm15 = vcmask 254144  }
0x1084   :  { %v2796_v46 = vmul.f32 %v6092_v40, %v2795_v2 }
0x1085   :  { %v3257_v30 = vadd.f32 %v3255_v48, %v3245_v38 }
0x1086   :  { %v2797_v52 = vmul.f32 0.5, %v2796_v46 }
0x1088   :  { %v2798_v14 = vsub.f32 1.5, %v2797_v52 }
0x108a   :  { %v2799_v60 = vmul.f32 %v6092_v40, %v2798_v14  ;;  %3273 = vmax.xlane.f32.xlu0 %v3272_v49 }
0x108c   :  { %v2803_v22 = vsel %vm2802_vm4, %v6092_v40, %v2799_v60  ;;  %v3017_v40 = vpop.f32.mrf.mxu3 }
0x108d   :  { %v7791_v42 = vmul.f32 %v2803_v22, %v2779_v44  ;;  %v7793_v17 = vmul.f32 %v2803_v22, %v2780_v23 }
0x109e   :  { %3307 = vrot.lane.b32.xlu0 %v7717_v4, %s6371_s17 }
0x10a6   :  { %3613 = vrot.lane.b32.xlu0 %v7573_v15, %s6377_s15 }
0x10b1   :  { %v2982_v39 = vpop.permute.xlu2 %2981 }
0x10b2   :  { %v2989_v44 = vmul.f32 %v7766_v35, %v2982_v39 }
0x10b4   :  { %v3015_v6 = vadd.f32 %v3014_v25, %v2989_v44 }
0x10b9   :  { %v2987_v33 = vpop.permute.xlu2 %2986 }
0x10ba   :  { %v2990_v62 = vmul.f32 %v7802_v7, %v2987_v33  ;;  %v7826_v33 = vld [vmem:[%s6394_s9 + $0x8] sm:$0x1] }
0x10bc   :  { %v3018_v2 = vadd.f32 %v3017_v40, %v2990_v62 }
0x10c2   :  { %v3026_v63 = vpop.permute.xlu2 %3025 }
0x10c3   :  { %v3029_v50 = vmul.f32 %v7806_v12, %v3026_v63 }
0x10c5   :  { %v3031_v14 = vadd.f32 %v3029_v50, %v3018_v2 }
0x10c9   :  { %v3022_v29 = vpop.permute.xlu0 %3021 }
0x10ca   :  { %v3034_v47 = vpop.permute.xlu1 %3033  ;;  %v3028_v23 = vmul.f32 %v7770_v41, %v3022_v29 }
0x10cb   :  { %v3040_v57 = vmul.f32 %v7776_v32, %v3034_v47  ;;  %v3264_v5 = vpop.permute.xlu2 %3263 }
0x10cc   :  { %v3030_v36 = vadd.f32 %v3028_v23, %v3015_v6  ;;  %v3267_v20 = vmul.f32 %v7818_v37, %v3264_v5 }
0x10ce   :  { %v3042_v34 = vadd.f32 %v3040_v57, %v3030_v36  ;;  %v3269_v49 = vadd.f32 %v3267_v20, %v3257_v30 }
0x10d0   :  { %v3271_v0 = vadd.f32 %v7826_v33, %v3269_v49 }
0x10d2   :  { %v3038_v3 = vpop.permute.xlu0 %3037  ;;  %v3275_v44 = vsel %vm521_vm8, %v3271_v0, -inf }
0x10d3   :  { %v3046_v13 = vpop.permute.xlu1 %3045  ;;  %v3041_v46 = vmul.f32 %v7813_v8, %v3038_v3 }
0x10d4   :  { %v3052_v53 = vmul.f32 %v7780_v45, %v3046_v13 }
0x10d5   :  { %v3043_v31 = vadd.f32 %v3041_v46, %v3031_v14 }
0x10d6   :  { %v3054_v58 = vadd.f32 %v3052_v53, %v3042_v34 }
0x10d8   :  { %v3056_v52 = vadd.f32 %v7784_v27, %v3054_v58 }
0x10da   :  { %v3058_v60 = vsel %vm517_vm7, %v3056_v52, -inf }
0x10db   :  { %v3050_v22 = vpop.permute.xlu1 %3049  ;;  %3059 = vmax.xlane.f32.xlu1 %v3058_v60 }
0x10dc   :  { %v3053_v39 = vmul.f32 %v7818_v37, %v3050_v22 }
0x10de   :  { %v3055_v28 = vadd.f32 %v3053_v39, %v3043_v31 }
0x10e0   :  { %v3057_v63 = vadd.f32 %v7826_v33, %v3055_v28 }
0x10e2   :  { %v3061_v29 = vsel %vm521_vm8, %v3057_v63, -inf }
0x10e3   :  { %3062 = vmax.xlane.f32.xlu2 %v3061_v29  ;;  %3276 = vmax.xlane.f32.xlu1 %v3275_v44 }
0x10fc   :  { %3305 = vrot.lane.b32.xlu1 %v7719_v26, %s6371_s17 }
0x10fd   :  { %v3274_v47 = vpop.xlane.xlu0 %3273 }
0x10fe   :  { %v3278_v23 = vsub.f32 %v7787_v21, %v3274_v47 }
0x1100   :  { %v3280_v25 = vmul.f32 1.442695, %v3278_v23 }
0x1102   :  { %6093 = vpow2.f32 %v3280_v25 }
0x1108   :  { %v6094_v16 = vpop.eup %6093 }
0x1109   :  { %v3284_v55 = vsel %vm517_vm7, %v6094_v16, 0.0 }
0x110a   :  { %3285 = vadd.xlane.f32.xlu2 %v3284_v55 }
0x1110   :  { %v3308_v6 = vpop.permute.xlu0 %3307 }
0x1111   :  { %5740 = vmatpush.msk.msrb.mxu3 %vm558_vm9, %v3308_v6 }
0x114e   :  { %v3060_v59 = vpop.xlane.xlu1 %3059 }
0x114f   :  { %v3064_v36 = vsub.f32 %v3056_v52, %v3060_v59 }
0x1151   :  { %v3066_v9 = vmul.f32 1.442695, %v3064_v36 }
0x1153   :  { %6095 = vpow2.f32 %v3066_v9 }
0x1156   :  { %v3277_v57 = vpop.xlane.xlu1 %3276  ;;  %v3063_v5 = vpop.xlane.xlu2 %3062 }
0x1157   :  { %v3279_v13 = vsub.f32 %v3271_v0, %v3277_v57  ;;  %v3065_v38 = vsub.f32 %v3057_v63, %v3063_v5 }
0x1159   :  { %v6096_v62 = vpop.eup %6095  ;;  %v3282_v34 = vmul.f32 1.442695, %v3279_v13  ;;  %v3068_v21 = vmul.f32 1.442695, %v3065_v38 }
0x115a   :  { %v3070_v53 = vsel %vm517_vm7, %v6096_v62, 0.0 }
0x115b   :  { %6097 = vpow2.f32 %v3282_v34  ;;  %3071 = vadd.xlane.f32.xlu0 %v3070_v53 }
0x115c   :  { %6099 = vpow2.f32 %v3068_v21 }
0x1161   :  { %v6098_v3 = vpop.eup %6097 }
0x1162   :  { %v6100_v48 = vpop.eup %6099  ;;  %v3287_v50 = vsel %vm521_vm8, %v6098_v3, 0.0 }
0x1163   :  { %3288 = vadd.xlane.f32.xlu2 %v3287_v50  ;;  %v3073_v20 = vsel %vm521_vm8, %v6100_v48, 0.0 }
0x1164   :  { %3074 = vadd.xlane.f32.xlu1 %v3073_v20 }
0x116e   :  { %v3306_v58 = vpop.permute.xlu1 %3305 }
0x116f   :  { %3389 = vrot.lane.b32.xlu0 %v7628_v51, %s6376_s12  ;;  %3333 = vmatpush.msrb.mxu3 %v3306_v58 }
0x1171   :  { %3636 = vmatpush.msra.mxu3 %v7684_v54 }
0x1177   :  { %3430 = vrot.lane.b32.xlu0 %v7653_v61, %s6376_s12 }
0x117b   :  { %3387 = vrot.lane.b32.xlu2 %v7573_v15, %s6376_s12  ;;  %v3614_v15 = vpop.permute.xlu0 %3613 }
0x117d   :  { %3615 = vrot.lane.b32.xlu1 %v7628_v51, %s6377_s15  ;;  %v3286_v40 = vpop.xlane.xlu2 %3285 }
0x117e   :  { %6101 = vrcp.f32 %v3286_v40 }
0x1183   :  { %3432 = vrot.lane.b32.xlu2 %v7657_v1, %s6376_s12 }
0x1184   :  { %v6102_v30 = vpop.eup %6101 }
0x1185   :  { %v7851_v2 = vmul.f32 %v6102_v30, %v6094_v16  ;;  %3658 = vrot.lane.b32.xlu1 %v7657_v1, %s6377_s15 }
0x1187   :  { %5741 = vmatmul.msk.f32.vlgmr.msrb.gmra.mxu3 %vm517_vm7, %v7851_v2 }
0x118b   :  { %3656 = vrot.lane.b32.xlu2 %v7653_v61, %s6377_s15 }
0x11ce   :  { %v3072_v54 = vpop.xlane.xlu0 %3071 }
0x11cf   :  { %6103 = vrcp.f32 %v3072_v54 }
0x11d5   :  { %v6104_v51 = vpop.eup %6103 }
0x11d6   :  { %v7859_v46 = vmul.f32 %v6104_v51, %v6096_v62  ;;  %v3289_v52 = vpop.xlane.xlu2 %3288 }
0x11d7   :  { %v3075_v14 = vpop.xlane.xlu1 %3074  ;;  %6105 = vrcp.f32 %v3289_v52 }
0x11d8   :  { %6107 = vrcp.f32 %v3075_v14  ;;  %5732 = vmatmul.msk.f32.vlgmr.msra.gmra.mxu0 %vm517_vm7, %v7859_v46 }
0x11dd   :  { %v6106_v1 = vpop.eup %6105 }
0x11de   :  { %v6108_v49 = vpop.eup %6107  ;;  %v7863_v60 = vmul.f32 %v6106_v1, %v6098_v3  ;;  %v3388_v22 = vpop.permute.xlu2 %3387 }
0x11df   :  { %v7865_v31 = vmul.f32 %v6108_v49, %v6100_v48 }
0x11e0   :  { %5742 = vmatmul.msk.f32.gmra.mxu3 %vm517_vm7, %v7863_v60 }
0x11e1   :  { %5733 = vmatmul.msk.f32.gmra.mxu0 %vm517_vm7, %v7865_v31  ;;  %v3390_v61 = vpop.permute.xlu0 %3389 }
0x11e6   :  { %v3433_v39 = vpop.permute.xlu2 %3432 }
0x11e7   :  { %5745 = vmatpush.xpose.msk.msrb.mxu1 %vm408_vm6, %v3433_v39 }
0x11e8   :  { %5752 = vmatmul.msk.f32.vlgmr.msra.gmra.mxu3 %vm408_vm6, %v3614_v15 }
0x11e9   :  { %5743 = vmatmul.msk.f32.vlgmr.msrb.gmra.mxu0 %vm408_vm6, %v3388_v22  ;;  %v3431_v28 = vpop.permute.xlu0 %3430 }
0x11eb   :  { %5746 = vmatpush.xpose.msk.msrb.mxu1 %vm408_vm6, %v3431_v28 }
0x11ee   :  { %5747 = vmatmul.msk.f32.vlgmr.msrb.gmra.mxu1 %vm408_vm6, %v3388_v22  ;;  %v3657_v29 = vpop.permute.xlu2 %3656 }
0x11ef   :  { %v3616_v0 = vpop.permute.xlu1 %3615 }
0x11f0   :  { %5753 = vmatmul.msk.f32.gmra.mxu3 %vm408_vm6, %v3616_v0 }
0x11f1   :  { %5744 = vmatmul.msk.f32.gmra.mxu0 %vm408_vm6, %v3390_v61 }
0x11f6   :  { %5748 = vmatmul.msk.f32.gmra.mxu1 %vm408_vm6, %v3390_v61 }
0x11f7   :  { %v3659_v63 = vpop.permute.xlu1 %3658 }
0x11f8   :  { %5754 = vmatpush.xpose.msk.msra.mxu0 %vm408_vm6, %v3659_v63 }
0x11fc   :  { %5755 = vmatpush.xpose.msk.msra.mxu0 %vm408_vm6, %v3657_v29 }
0x11ff   :  { %5756 = vmatmul.msk.f32.vlgmr.msra.gmra.mxu0 %vm408_vm6, %v3614_v15 }
0x1207   :  { %5757 = vmatmul.msk.f32.gmra.mxu0 %vm408_vm6, %v3616_v0 }
0x120a   :  { %v7883_v44 = vpop.f32.mrf.mxu3 }
0x1255   :  { %v7885_v47 = vpop.f32.mrf.mxu0 }
0x125e   :  { %v7889_v25 = vpop.f32.mrf.mxu0 }
0x1263   :  { %v7887_v23 = vpop.f32.mrf.mxu3 }
0x1266   :  { %v3412_v55 = vpop.f32.mrf.mxu0 }
0x126b   :  { %v3638_v16 = vpop.f32.mrf.mxu3  ;;  %v3455_v22 = vpop.f32.mrf.mxu1 }
0x126c   :  { %3700 = vperm.xlu0 %5930, %v3638_v16   ;;  %3688 = vperm.xlu1 %5932, %v3638_v16  }
0x126d   :  { %3646 = vperm.xlu2 %5931, %v3638_v16  }
0x126e   :  { %v3415_v6 = vpop.f32.mrf.mxu0 }
0x1273   :  { %v3641_v59 = vpop.f32.mrf.mxu3 }
0x1274   :  { %5934 = vset.pattern.permute.xlu0 %v6373_v11  ;;  %3462 = vperm.xlu1 %5932, %v3412_v55  }
0x1275   :  { %5933 = vset.pattern.permute.xlu2 %v6375_v19  ;;  %3420 = vperm.xlu0 %5934, %v3412_v55  }
0x1276   :  { %3712 = vperm.xlu2 %5933, %v3638_v16  }
0x127c   :  { %5936 = vset.pattern.permute.xlu1 %v6375_v19  ;;  %v3681_v13 = vpop.f32.mrf.mxu0 }
0x127d   :  { %3486 = vperm.xlu1 %5936, %v3412_v55   ;;  %3425 = vperm.xlu0 %5934, %v3415_v6  }
0x127e   :  { %5935 = vset.pattern.permute.xlu2 %v6374_v18 }
0x127f   :  { %3474 = vperm.xlu2 %5935, %v3412_v55  }
0x1284   :  { %v3684_v61 = vpop.f32.mrf.mxu0 }
0x1285   :  { %5940 = vset.pattern.permute.xlu1 %v6374_v18  ;;  %5939 = vset.pattern.permute.xlu0 %v6372_v10 }
0x1286   :  { %3704 = vperm.xlu1 %5940, %v3641_v59   ;;  %3692 = vperm.xlu0 %5939, %v3641_v59  }
0x1287   :  { %5937 = vset.pattern.permute.xlu2 %v6372_v10 }
0x1288   :  { %3466 = vperm.xlu2 %5937, %v3415_v6  }
0x128e   :  { %3478 = vperm.xlu1 %5940, %v3415_v6   ;;  %5945 = vset.pattern.permute.xlu0 %v6374_v18 }
0x1290   :  { %5938 = vset.pattern.permute.xlu2 %v6373_v11 }
0x1291   :  { %3651 = vperm.xlu2 %5938, %v3641_v59  }
0x1296   :  { %5942 = vset.pattern.permute.xlu1 %v6375_v19 }
0x1297   :  { %3490 = vperm.xlu1 %5942, %v3415_v6  }
0x1299   :  { %5941 = vset.pattern.permute.xlu2 %v6375_v19 }
0x129a   :  { %3716 = vperm.xlu2 %5941, %v3641_v59  }
0x12a2   :  { %5943 = vset.pattern.permute.xlu2 %v6373_v11 }
0x12c7   :  { %v3647_v36 = vpop.permute.xlu2 %3646 }
0x12c8   :  { %v3654_v57 = vmul.f32 %v7766_v35, %v3647_v36 }
0x12ca   :  { %v3682_v34 = vadd.f32 %v3681_v13, %v3654_v57 }
0x12d0   :  { %v3713_v9 = vpop.permute.xlu2 %3712 }
0x12d1   :  { %v3719_v48 = vmul.f32 %v7780_v45, %v3713_v9 }
0x12d9   :  { %v3475_v5 = vpop.permute.xlu2 %3474 }
0x12da   :  { %v3481_v13 = vmul.f32 %v7776_v32, %v3475_v5 }
0x12de   :  { %v3701_v38 = vpop.permute.xlu0 %3700  ;;  %v3689_v62 = vpop.permute.xlu1 %3688 }
0x12df   :  { %v3695_v21 = vmul.f32 %v7770_v41, %v3689_v62  ;;  %v3707_v53 = vmul.f32 %v7776_v32, %v3701_v38 }
0x12e1   :  { %v3697_v3 = vadd.f32 %v3695_v21, %v3682_v34 }
0x12e2   :  { %v3467_v58 = vpop.permute.xlu2 %3466 }
0x12e3   :  { %v3709_v50 = vadd.f32 %v3707_v53, %v3697_v3 }
0x12e5   :  { %v3721_v20 = vadd.f32 %v3719_v48, %v3709_v50  ;;  %v3458_v48 = vpop.f32.mrf.mxu1 }
0x12e6   :  { %v3463_v40 = vpop.permute.xlu1 %3462 }
0x12e7   :  { %v3421_v30 = vpop.permute.xlu0 %3420  ;;  %v3723_v15 = vadd.f32 %v7784_v27, %v3721_v20  ;;  %v3469_v55 = vmul.f32 %v7770_v41, %v3463_v40 }
0x12e8   :  { %v3428_v1 = vmul.f32 %v7766_v35, %v3421_v30  ;;  %v3470_v30 = vmul.f32 %v7806_v12, %v3467_v58 }
0x12e9   :  { %v3725_v54 = vsel %vm517_vm7, %v3723_v15, -inf }
0x12ea   :  { %3726 = vmax.xlane.f32.xlu2 %v3725_v54  ;;  %v3456_v0 = vadd.f32 %v3455_v22, %v3428_v1 }
0x12eb   :  { %v3652_v14 = vpop.permute.xlu2 %3651 }
0x12ec   :  { %v3655_v49 = vmul.f32 %v7802_v7, %v3652_v14  ;;  %v3471_v36 = vadd.f32 %v3469_v55, %v3456_v0 }
0x12ee   :  { %v3685_v63 = vadd.f32 %v3684_v61, %v3655_v49  ;;  %v3483_v53 = vadd.f32 %v3481_v13, %v3471_v36 }
0x12ef   :  { %v3487_v51 = vpop.permute.xlu1 %3486  ;;  %v3426_v52 = vpop.permute.xlu0 %3425 }
0x12f0   :  { %v3493_v38 = vmul.f32 %v7780_v45, %v3487_v51  ;;  %v3429_v34 = vmul.f32 %v7802_v7, %v3426_v52 }
0x12f2   :  { %v3495_v50 = vadd.f32 %v3493_v38, %v3483_v53  ;;  %v3459_v40 = vadd.f32 %v3458_v48, %v3429_v34  ;;  %v3341_v38 = vmul.f32 %v7770_v41, %v7851_v2 }
0x12f4   :  { %v3717_v16 = vpop.permute.xlu2 %3716  ;;  %v3497_v5 = vadd.f32 %v7784_v27, %v3495_v50  ;;  %v3472_v51 = vadd.f32 %v3470_v30, %v3459_v40  ;;  %v3343_v34 = vsel %vm517_vm7, %v3341_v38, 0.0 }
0x12f5   :  { %v3720_v9 = vmul.f32 %v7818_v37, %v3717_v16 }
0x12f6   :  { %v3499_v49 = vsel %vm517_vm7, %v3497_v5, -inf }
0x12f8   :  { %v3705_v39 = vpop.permute.xlu1 %3704  ;;  %v3693_v28 = vpop.permute.xlu0 %3692 }
0x12f9   :  { %v3696_v29 = vmul.f32 %v7806_v12, %v3693_v28  ;;  %v3708_v6 = vmul.f32 %v7813_v8, %v3705_v39 }
0x12fb   :  { %v3698_v59 = vadd.f32 %v3696_v29, %v3685_v63 }
0x12fd   :  { %v3710_v57 = vadd.f32 %v3708_v6, %v3698_v59 }
0x12ff   :  { %v3722_v62 = vadd.f32 %v3720_v9, %v3710_v57 }
0x1300   :  { %v3479_v21 = vpop.permute.xlu1 %3478 }
0x1301   :  { %v3724_v3 = vadd.f32 %v7826_v33, %v3722_v62  ;;  %v3482_v54 = vmul.f32 %v7813_v8, %v3479_v21 }
0x1303   :  { %v3728_v20 = vsel %vm521_vm8, %v3724_v3, -inf  ;;  %v3484_v1 = vadd.f32 %v3482_v54, %v3472_v51  ;;  %v3081_v54 = vmul.f32 %v7802_v7, %v7865_v31  ;;  %v3365_v51 = vmul.f32 %v7780_v45, %v7851_v2 }
0x1304   :  { %3729 = vmax.xlane.f32.xlu1 %v3728_v20  ;;  %v3122_v20 = vmul.f32 %v7770_v41, %v7859_v46 }
0x1306   :  { %v3124_v30 = vsel %vm517_vm7, %v3122_v20, 0.0 }
0x1309   :  { %v3491_v14 = vpop.permute.xlu1 %3490 }
0x130a   :  { %v3494_v52 = vmul.f32 %v7818_v37, %v3491_v14  ;;  %v3367_v14 = vsel %vm517_vm7, %v3365_v51, 0.0 }
0x130c   :  { %v3496_v22 = vadd.f32 %v3494_v52, %v3484_v1  ;;  %3500 = vmax.xlane.f32.xlu1 %v3499_v49  ;;  %v3295_v1 = vmul.f32 %v7802_v7, %v7863_v60  ;;  %v3342_v49 = vmul.f32 %v7806_v12, %v7863_v60 }
0x130e   :  { %v3498_v61 = vadd.f32 %v7826_v33, %v3496_v22  ;;  %v3299_v52 = vsel %vm521_vm8, %v3295_v1, 0.0  ;;  %v3346_v22 = vsel %vm521_vm8, %v3342_v49, 0.0 }
0x1310   :  { %v3502_v39 = vsel %vm521_vm8, %v3498_v61, -inf }
0x1311   :  { %3503 = vmax.xlane.f32.xlu0 %v3502_v39  ;;  %v3366_v39 = vmul.f32 %v7818_v37, %v7863_v60 }
0x1325   :  { %3533 = vrot.lane.b32.xlu0 %v7717_v4, %s6376_s12  ;;  %3531 = vrot.lane.b32.xlu1 %v7719_v26, %s6376_s12 }
0x135d   :  { %v3727_v27 = vpop.xlane.xlu2 %3726 }
0x135e   :  { %v3731_v58 = vsub.f32 %v3723_v15, %v3727_v27  ;;  %v3370_v27 = vsel %vm521_vm8, %v3366_v39, 0.0 }
0x1360   :  { %v3733_v28 = vmul.f32 1.442695, %v3731_v58  ;;  %v3294_v58 = vmul.f32 %v7766_v35, %v7851_v2 }
0x1362   :  { %6109 = vpow2.f32 %v3733_v28  ;;  %v3134_v28 = vmul.f32 %v7776_v32, %v7859_v46 }
0x1368   :  { %v7931_v0 = vpop.eup %6109 }
0x1369   :  { %v3737_v63 = vsel %vm517_vm7, %v7931_v0, 0.0 }
0x136a   :  { %3738 = vadd.xlane.f32.xlu1 %v3737_v63  ;;  %v3296_v63 = vsel %vm517_vm7, %v3294_v58, 0.0  ;;  %v6240_v58 = vld [vmem:[%s6429_s8 + $0x30] sm:$0xff] }
0x1377   :  { %v3730_v33 = vpop.xlane.xlu1 %3729 }
0x1378   :  { %v3732_v29 = vsub.f32 %v3724_v3, %v3730_v33  ;;  %v3136_v33 = vsel %vm517_vm7, %v3134_v28, 0.0  ;;  %v3135_v28 = vmul.f32 %v7813_v8, %v7865_v31 }
0x137a   :  { %v3735_v16 = vmul.f32 1.442695, %v3732_v29  ;;  %v3080_v29 = vmul.f32 %v7766_v35, %v7859_v46 }
0x137c   :  { %6111 = vpow2.f32 %v3735_v16 }
0x137f   :  { %v3501_v55 = vpop.xlane.xlu1 %3500 }
0x1380   :  { %v3505_v6 = vsub.f32 %v3497_v5, %v3501_v55  ;;  %v3085_v5 = vsel %vm521_vm8, %v3081_v54, 0.0 }
0x1382   :  { %v7935_v59 = vpop.eup %6111  ;;  %v3507_v36 = vmul.f32 1.442695, %v3505_v6 }
0x1383   :  { %3757 = vrot.lane.b32.xlu1 %v7719_v26, %s6377_s15  ;;  %v3740_v15 = vsel %vm521_vm8, %v7935_v59, 0.0  ;;  %v3353_v26 = vmul.f32 %v7776_v32, %v7851_v2  ;;  %v3146_v2 = vmul.f32 %v7780_v45, %v7859_v46 }
0x1384   :  { %6113 = vpow2.f32 %v3507_v36  ;;  %v3504_v9 = vpop.xlane.xlu0 %3503  ;;  %3741 = vadd.xlane.f32.xlu0 %v3740_v15 }
0x1385   :  { %v3506_v57 = vsub.f32 %v3498_v61, %v3504_v9  ;;  %v3355_v3 = vsel %vm517_vm7, %v3353_v26, 0.0  ;;  %v3354_v61 = vmul.f32 %v7813_v8, %v7863_v60  ;;  %v3082_v60 = vsel %vm517_vm7, %v3080_v29, 0.0 }
0x1386   :  { %v3148_v6 = vsel %vm517_vm7, %v3146_v2, 0.0  ;;  %v3139_v29 = vsel %vm521_vm8, %v3135_v28, 0.0 }
0x1387   :  { %v3509_v13 = vmul.f32 1.442695, %v3506_v57 }
0x1389   :  { %6115 = vpow2.f32 %v3509_v13 }
0x138a   :  { %v7943_v62 = vpop.eup %6113 }
0x138b   :  { %v3511_v21 = vsel %vm517_vm7, %v7943_v62, 0.0 }
0x138c   :  { %3344 = vadd.xlane.f32.xlu0 %v3343_v34  ;;  %3512 = vadd.xlane.f32.xlu2 %v3511_v21 }
0x138f   :  { %v7950_v53 = vpop.eup %6115 }
0x1390   :  { %v3514_v48 = vsel %vm521_vm8, %v7950_v53, 0.0 }
0x1394   :  { %3356 = vadd.xlane.f32.xlu0 %v3355_v3  ;;  %3515 = vadd.xlane.f32.xlu2 %v3514_v48 }
0x1397   :  { %v3534_v50 = vpop.permute.xlu0 %3533  ;;  %v3532_v40 = vpop.permute.xlu1 %3531 }
0x1398   :  { %5749 = vmatpush.msk.msrb.mxu2 %vm558_vm9, %v3534_v50 }
0x139a   :  { %3559 = vmatpush.msrb.mxu2 %v3532_v40 }
0x139c   :  { %3125 = vadd.xlane.f32.xlu0 %v3124_v30 }
0x13a4   :  { %3086 = vadd.xlane.f32.xlu0 %v3085_v5 }
0x13ac   :  { %3759 = vrot.lane.b32.xlu2 %v7717_v4, %s6377_s15  ;;  %v3358_v4 = vsel %vm521_vm8, %v3354_v61, 0.0  ;;  %v3123_v61 = vmul.f32 %v7806_v12, %v7865_v31 }
0x13ad   :  { %3368 = vadd.xlane.f32.xlu1 %v3367_v14 }
0x13b5   :  { %3300 = vadd.xlane.f32.xlu1 %v3299_v52 }
0x13bd   :  { %3347 = vadd.xlane.f32.xlu1 %v3346_v22 }
0x13c5   :  { %3359 = vadd.xlane.f32.xlu1 %v3358_v4 }
0x13cd   :  { %3371 = vadd.xlane.f32.xlu1 %v3370_v27  ;;  %v6239_v27 = vld [vmem:[%s6429_s8 + $0x38] sm:$0xff] }
0x13d5   :  { %3297 = vadd.xlane.f32.xlu2 %v3296_v63  ;;  %3137 = vadd.xlane.f32.xlu1 %v3136_v33  ;;  %v6241_v63 = vld [vmem:[%s6429_s8 + $0x28] sm:$0xff]  ;;  %v6242_v33 = vld [vmem:[%s6429_s8 + $0x20] sm:$0xff]  ;;  %s8822_s8 = sld [smem:[#allocation22_spill]] }
0x13dd   :  { %3083 = vadd.xlane.f32.xlu2 %v3082_v60  ;;  %v3739_v16 = vpop.xlane.xlu1 %3738  ;;  %v6243_v60 = vld [vmem:[%s8811_s2] ss:$0 sm:$0xff] }
0x13de   :  { %6117 = vrcp.f32 %v3739_v16  ;;  %v2806_v16 = vmul.f32 %v6243_v60, %v7791_v42  ;;  %v3147_v42 = vmul.f32 %v7818_v37, %v7865_v31 }
0x13e4   :  { %v6118_v55 = vpop.eup %6117 }
0x13e5   :  { %v3745_v36 = vmul.f32 %v6118_v55, %v7931_v0  ;;  %3149 = vadd.xlane.f32.xlu2 %v3148_v6  ;;  %v6244_v6 = vld [vmem:[%s8812_s7] ss:$0 sm:$0xff] }
0x13e7   :  { %v3747_v15 = vmul.f32 %v7766_v35, %v3745_v36  ;;  %v3793_v9 = vmul.f32 %v7770_v41, %v3745_v36  ;;  %v3805_v38 = vmul.f32 %v7776_v32, %v3745_v36  ;;  %v3817_v0 = vmul.f32 %v7780_v45, %v3745_v36 }
0x13e9   :  { %v3749_v57 = vsel %vm517_vm7, %v3747_v15, 0.0  ;;  %v3795_v13 = vsel %vm517_vm7, %v3793_v9, 0.0  ;;  %v3807_v46 = vsel %vm517_vm7, %v3805_v38, 0.0  ;;  %v3819_v21 = vsel %vm517_vm7, %v3817_v0, 0.0  ;;  %v8054_v38 = vld [vmem:[%s8804_s18 + $0x1] ss:$0 sm:$0xff] }
0x13ea   :  { %3750 = vadd.xlane.f32.xlu0 %v3749_v57  ;;  %v2807_v9 = vmul.f32 %v6243_v60, %v7793_v17  ;;  %v8059_v0 = vld [vmem:[%s8804_s18 + $0x2] ss:$0 sm:$0xff] }
0x13ed   :  { %3796 = vadd.xlane.f32.xlu2 %v3795_v13  ;;  %v8048_v13 = vadd.f32 %v6244_v6, %v2807_v9 }
0x13f5   :  { %3808 = vadd.xlane.f32.xlu2 %v3807_v46  ;;  %v3758_v4 = vpop.permute.xlu1 %3757 }
0x13f7   :  { %v3742_v34 = vpop.xlane.xlu0 %3741 }
0x13f8   :  { %6119 = vrcp.f32 %v3742_v34 }
0x13fd   :  { %3820 = vadd.xlane.f32.xlu2 %v3819_v21 }
0x13fe   :  { %v6120_v26 = vpop.eup %6119 }
0x13ff   :  { %v3746_v3 = vmul.f32 %v6120_v26, %v7935_v59  ;;  %v3513_v48 = vpop.xlane.xlu2 %3512 }
0x1400   :  { %6121 = vrcp.f32 %v3513_v48 }
0x1401   :  { %v3818_v50 = vmul.f32 %v7818_v37, %v3746_v3  ;;  %v3748_v20 = vmul.f32 %v7802_v7, %v3746_v3  ;;  %v3794_v59 = vmul.f32 %v7806_v12, %v3746_v3 }
0x1403   :  { %v3822_v40 = vsel %vm521_vm8, %v3818_v50, 0.0  ;;  %v3752_v30 = vsel %vm521_vm8, %v3748_v20, 0.0  ;;  %v3798_v52 = vsel %vm521_vm8, %v3794_v59, 0.0  ;;  %v3345_v20 = vpop.xlane.xlu0 %3344 }
0x1404   :  { %3823 = vadd.xlane.f32.xlu1 %v3822_v40 }
0x1405   :  { %3753 = vadd.xlane.f32.xlu2 %v3752_v30  ;;  %v8067_v30 = vld [vmem:[%s8804_s18 + $0x4] ss:$0 sm:$0xff] }
0x1406   :  { %v6122_v54 = vpop.eup %6121 }
0x1407   :  { %v8006_v5 = vmul.f32 %v6122_v54, %v7943_v62  ;;  %v3516_v51 = vpop.xlane.xlu2 %3515 }
0x1408   :  { %6123 = vrcp.f32 %v3516_v51 }
0x1409   :  { %5750 = vmatmul.msk.f32.vlgmr.msrb.gmra.mxu2 %vm517_vm7, %v8006_v5  ;;  %v3521_v14 = vmul.f32 %v7766_v35, %v8006_v5  ;;  %v3806_v35 = vmul.f32 %v7813_v8, %v3746_v3  ;;  %v3567_v55 = vmul.f32 %v7770_v41, %v8006_v5  ;;  %v3151_v41 = vsel %vm521_vm8, %v3147_v42, 0.0 }
0x140b   :  { %v3523_v1 = vsel %vm517_vm7, %v3521_v14, 0.0  ;;  %v3810_v39 = vsel %vm521_vm8, %v3806_v35, 0.0  ;;  %v3569_v15 = vsel %vm517_vm7, %v3567_v55, 0.0 }
0x140c   :  { %3524 = vadd.xlane.f32.xlu1 %v3523_v1  ;;  %v3349_v1 = vmul.f32 %v8059_v0, %v3345_v20 }
0x140d   :  { %3799 = vadd.xlane.f32.xlu2 %v3798_v52 }
0x140e   :  { %v6124_v49 = vpop.eup %6123 }
0x140f   :  { %v8016_v62 = vmul.f32 %v6124_v49, %v7950_v53  ;;  %v3760_v22 = vpop.permute.xlu2 %3759  ;;  %v3127_v53 = vsel %vm521_vm8, %v3123_v61, 0.0 }
0x1410   :  { %5758 = vmatpush.msk.msra.mxu1 %vm558_vm9, %v3760_v22 }
0x1411   :  { %5751 = vmatmul.msk.f32.gmra.mxu2 %vm517_vm7, %v8016_v62 }
0x1412   :  { %3785 = vmatpush.msra.mxu1 %v3758_v4 }
0x1413   :  { %5759 = vmatmul.msk.f32.vlgmr.msra.gmra.mxu1 %vm517_vm7, %v3745_v36  ;;  %v8040_v36 = vadd.f32 %v6244_v6, %v2806_v16 }
0x1414   :  { %3128 = vadd.xlane.f32.xlu1 %v3127_v53  ;;  %4133 = vmatpush.msrb.mxu1 %v6239_v27 }
0x1415   :  { %3811 = vadd.xlane.f32.xlu2 %v3810_v39 }
0x1416   :  { %4134 = vmatpush.msrb.mxu1 %v6240_v58 }
0x1418   :  { %4135 = vmatpush.msrb.mxu1 %v6241_v63 }
0x141a   :  { %4136 = vmatpush.msrb.mxu1 %v6242_v33 }
0x141b   :  { %5760 = vmatmul.msk.f32.gmra.mxu1 %vm517_vm7, %v3746_v3  ;;  %v8063_v3 = vld [vmem:[%s8804_s18 + $0x3] ss:$0 sm:$0xff] }
0x141d   :  { %3140 = vadd.xlane.f32.xlu2 %v3139_v29 }
0x1420   :  { %v3369_v2 = vpop.xlane.xlu1 %3368 }
0x1421   :  { %v3373_v61 = vmul.f32 %v8067_v30, %v3369_v2 }
0x1423   :  { %5767 = vmatmul.msk.f32.vlgmr.msrb.gmra.mxu1 %vm184_vm0, %v8040_v36 }
0x1425   :  { %3570 = vadd.xlane.f32.xlu2 %v3569_v15 }
0x1428   :  { %v3301_v57 = vpop.xlane.xlu1 %3300 }
0x1429   :  { %v3303_v46 = vmul.f32 %v8054_v38, %v3301_v57 }
0x142b   :  { %5768 = vmatmul.msk.f32.gmra.mxu1 %vm184_vm0, %v8048_v13  ;;  %v3339_v34 = vadd.f32 %v7887_v23, %v3303_v46  ;;  %v3357_v23 = vpop.xlane.xlu0 %3356 }
0x142c   :  { %v3361_v49 = vmul.f32 %v8063_v3, %v3357_v23 }
0x142d   :  { %3152 = vadd.xlane.f32.xlu2 %v3151_v41  ;;  %v3591_v41 = vmul.f32 %v7780_v45, %v8006_v5  ;;  %v3568_v45 = vmul.f32 %v7806_v12, %v8016_v62  ;;  %v3580_v12 = vmul.f32 %v7813_v8, %v8016_v62  ;;  %v3592_v8 = vmul.f32 %v7818_v37, %v8016_v62 }
0x1430   :  { %v3348_v17 = vpop.xlane.xlu1 %3347 }
0x1431   :  { %v3350_v31 = vmul.f32 %v8059_v0, %v3348_v17 }
0x1433   :  { %v3352_v21 = vadd.f32 %v3350_v31, %v3339_v34  ;;  %v3126_v4 = vpop.xlane.xlu0 %3125  ;;  %v3593_v34 = vsel %vm517_vm7, %v3591_v41, 0.0 }
0x1434   :  { %v3130_v58 = vmul.f32 %v8059_v0, %v3126_v4 }
0x1438   :  { %v3360_v26 = vpop.xlane.xlu1 %3359 }
0x1439   :  { %v3362_v48 = vmul.f32 %v8063_v3, %v3360_v26 }
0x143b   :  { %v3364_v50 = vadd.f32 %v3362_v48, %v3352_v21  ;;  %v3087_v46 = vpop.xlane.xlu0 %3086  ;;  %v3522_v21 = vmul.f32 %v7802_v7, %v8016_v62  ;;  %v3572_v7 = vsel %vm521_vm8, %v3568_v45, 0.0 }
0x143c   :  { %v3089_v4 = vmul.f32 %v8054_v38, %v3087_v46 }
0x143d   :  { %v3526_v48 = vsel %vm521_vm8, %v3522_v21, 0.0 }
0x1440   :  { %v3372_v40 = vpop.xlane.xlu1 %3371 }
0x1441   :  { %v3374_v54 = vmul.f32 %v8067_v30, %v3372_v40 }
0x1443   :  { %v8070_v51 = vadd.f32 %v3374_v54, %v3364_v50 }
0x1448   :  { %v3298_v59 = vpop.xlane.xlu2 %3297  ;;  %v3138_v63 = vpop.xlane.xlu1 %3137 }
0x1449   :  { %v3302_v14 = vmul.f32 %v8054_v38, %v3298_v59 }
0x144b   :  { %v3336_v52 = vadd.f32 %v7883_v44, %v3302_v14  ;;  %v3142_v44 = vmul.f32 %v8063_v3, %v3138_v63  ;;  %v3120_v63 = vadd.f32 %v7889_v25, %v3089_v4  ;;  %v2832_v4 = vld [vmem:[#allocation4 + $0x20] sm:$0xff] }
0x144d   :  { %v3351_v22 = vadd.f32 %v3349_v1, %v3336_v52 }
0x144f   :  { %v3363_v35 = vadd.f32 %v3361_v49, %v3351_v22 }
0x1450   :  { %v3084_v53 = vpop.xlane.xlu2 %3083 }
0x1451   :  { %v3088_v39 = vmul.f32 %v8054_v38, %v3084_v53  ;;  %v3375_v27 = vadd.f32 %v3373_v61, %v3363_v35 }
0x1453   :  { %v3117_v28 = vadd.f32 %v7885_v47, %v3088_v39  ;;  %3379 = vrot.lane.b32.xlu0 %v3375_v27, %s6368_s1  ;;  %v3579_v47 = vmul.f32 %v7776_v32, %v8006_v5 }
0x1455   :  { %v3132_v33 = vadd.f32 %v3130_v58, %v3117_v28  ;;  %v3581_v57 = vsel %vm517_vm7, %v3579_v47, 0.0  ;;  %v3584_v28 = vsel %vm521_vm8, %v3580_v12, 0.0 }
0x1457   :  { %v3144_v60 = vadd.f32 %v3142_v44, %v3132_v33 }
0x1458   :  { %v3150_v29 = vpop.xlane.xlu2 %3149 }
0x1459   :  { %v3154_v16 = vmul.f32 %v8067_v30, %v3150_v29 }
0x145b   :  { %v3156_v2 = vadd.f32 %v3154_v16, %v3144_v60 }
0x145d   :  { %3158 = vst.msk [vmem:[#allocation2] sm:$0xff] %vm408_vm6, %v3156_v2  ;;  %v3751_v26 = vpop.xlane.xlu0 %3750 }
0x145e   :  { %v3755_v50 = vmul.f32 %v8054_v38, %v3751_v26  ;;  %v6249_v26 = vld [vmem:[%s6434_s14 + $0x1] ss:$0 sm:$0xff] }
0x1460   :  { %v3797_v55 = vpop.xlane.xlu2 %3796 }
0x1461   :  { %v3801_v5 = vmul.f32 %v8059_v0, %v3797_v55  ;;  %v3596_v55 = vsel %vm521_vm8, %v3592_v8, 0.0 }
0x1468   :  { %v3809_v6 = vpop.xlane.xlu2 %3808 }
0x1469   :  { %v3813_v23 = vmul.f32 %v8063_v3, %v3809_v6 }
0x1470   :  { %v3821_v15 = vpop.xlane.xlu2 %3820 }
0x1471   :  { %v3825_v14 = vmul.f32 %v8067_v30, %v3821_v15 }
0x1477   :  { %v3824_v17 = vpop.xlane.xlu1 %3823 }
0x1478   :  { %v3754_v9 = vpop.xlane.xlu2 %3753  ;;  %v3826_v46 = vmul.f32 %v8067_v30, %v3824_v17 }
0x1479   :  { %v3756_v25 = vmul.f32 %v8054_v38, %v3754_v9 }
0x147d   :  { %3582 = vadd.xlane.f32.xlu0 %v3581_v57 }
0x147f   :  { %v3525_v32 = vpop.xlane.xlu1 %3524 }
0x1480   :  { %v3800_v42 = vpop.xlane.xlu2 %3799  ;;  %v3529_v49 = vmul.f32 %v8054_v38, %v3525_v32 }
0x1481   :  { %v3802_v47 = vmul.f32 %v8059_v0, %v3800_v42 }
0x1485   :  { %3594 = vadd.xlane.f32.xlu0 %v3593_v34 }
0x1487   :  { %v3129_v61 = vpop.xlane.xlu1 %3128 }
0x1488   :  { %v3812_v31 = vpop.xlane.xlu2 %3811  ;;  %v3131_v27 = vmul.f32 %v8059_v0, %v3129_v61 }
0x1489   :  { %v3814_v37 = vmul.f32 %v8063_v3, %v3812_v31 }
0x148a   :  { %v3133_v44 = vadd.f32 %v3131_v27, %v3120_v63  ;;  %v6252_v27 = vld [vmem:[%s6439_s19 + $0x28] sm:$0xff] }
0x148c   :  { %v3561_v52 = vpop.f32.mrf.mxu2 }
0x148d   :  { %3527 = vadd.xlane.f32.xlu0 %v3526_v48  ;;  %v3562_v53 = vadd.f32 %v3561_v52, %v3529_v49 }
0x1490   :  { %v3787_v20 = vpop.f32.mrf.mxu1  ;;  %v3141_v40 = vpop.xlane.xlu2 %3140 }
0x1491   :  { %v3788_v54 = vadd.f32 %v3787_v20, %v3755_v50  ;;  %v3143_v33 = vmul.f32 %v8063_v3, %v3141_v40 }
0x1493   :  { %v3803_v59 = vadd.f32 %v3801_v5, %v3788_v54  ;;  %v3145_v60 = vadd.f32 %v3143_v33, %v3133_v44 }
0x1495   :  { %v3815_v1 = vadd.f32 %v3813_v23, %v3803_v59  ;;  %3573 = vadd.xlane.f32.xlu0 %v3572_v7  ;;  %v3564_v59 = vpop.f32.mrf.mxu2 }
0x1497   :  { %v3827_v22 = vadd.f32 %v3825_v14, %v3815_v1 }
0x1498   :  { %v3571_v35 = vpop.xlane.xlu2 %3570  ;;  %v3790_v6 = vpop.f32.mrf.mxu1 }
0x1499   :  { %v3575_v39 = vmul.f32 %v8059_v0, %v3571_v35  ;;  %3831 = vrot.lane.b32.xlu2 %v3827_v22, %s6378_s22  ;;  %v3791_v15 = vadd.f32 %v3790_v6, %v3756_v25 }
0x149b   :  { %v3577_v58 = vadd.f32 %v3575_v39, %v3562_v53  ;;  %v3804_v41 = vadd.f32 %v3802_v47, %v3791_v15  ;;  %v6250_v53 = vld [vmem:[%s6439_s19 + $0x38] sm:$0xff]  ;;  %v6251_v39 = vld [vmem:[%s6439_s19 + $0x30] sm:$0xff] }
0x149d   :  { %3585 = vadd.xlane.f32.xlu0 %v3584_v28  ;;  %v3816_v62 = vadd.f32 %v3814_v37, %v3804_v41 }
0x149f   :  { %v3828_v34 = vadd.f32 %v3826_v46, %v3816_v62  ;;  %v6254_v46 = vld [vmem:[%s6444_s24 + $0x1] ss:$0 sm:$0xff] }
0x14a0   :  { %v3153_v29 = vpop.xlane.xlu2 %3152  ;;  %v4138_v57 = vpop.f32.mrf.mxu1 }
0x14a1   :  { %v3155_v16 = vmul.f32 %v8067_v30, %v3153_v29  ;;  %v4139_v35 = vadd.f32 %v6249_v26, %v4138_v57 }
0x14a3   :  { %v3157_v2 = vadd.f32 %v3155_v16, %v3145_v60  ;;  %v8136_v12 = vmul.f32 0.35355338, %v4139_v35  ;;  %v5988_v16 = vld [vmem:[%s8805_s5 + $0x1] ss:$0 sm:$0xff] }
0x14a5   :  { %3159 = vst.msk [vmem:[#allocation2 + $0x8] sm:$0x1] %vm625_vm10, %v3157_v2  ;;  %3597 = vadd.xlane.f32.xlu0 %v3596_v55 }
0x14a8   :  { %v4141_v21 = vpop.f32.mrf.mxu1 }
0x14a9   :  { %v4142_v48 = vadd.f32 %v6249_v26, %v4141_v21 }
0x14ab   :  { %v8124_v42 = vmul.f32 0.35355338, %v4142_v48 }
0x14b9   :  { %3381 = vrot.lane.b32.xlu0 %v8070_v51, %s6368_s1 }
0x14c1   :  { %3833 = vrot.lane.b32.xlu0 %v3828_v34, %s6378_s22 }
0x14c5   :  { %v3380_v9 = vpop.permute.xlu0 %3379 }
0x14c6   :  { %3385 = vst.msk [vmem:[#allocation2] sm:$0xff] %vm852_vm11, %v3380_v9 }
0x14c9   :  { %4404 = vrot.lane.b32.xlu0 %v8124_v42, %s6371_s17 }
0x14f0   :  { %v3583_v31 = vpop.xlane.xlu0 %3582 }
0x14f1   :  { %v3587_v51 = vmul.f32 %v8063_v3, %v3583_v31 }
0x14f3   :  { %v3589_v50 = vadd.f32 %v3587_v51, %v3577_v58  ;;  %v6253_v58 = vld [vmem:[%s6439_s19 + $0x20] sm:$0xff]  ;;  %v3832_v63 = vpop.permute.xlu2 %3831 }
0x14f8   :  { %v3595_v32 = vpop.xlane.xlu0 %3594 }
0x14f9   :  { %v3599_v17 = vmul.f32 %v8067_v30, %v3595_v32 }
0x14fb   :  { %v3601_v20 = vadd.f32 %v3599_v17, %v3589_v50 }
0x14fd   :  { %3605 = vrot.lane.b32.xlu1 %v3601_v20, %s6379_s23 }
0x1500   :  { %v3528_v40 = vpop.xlane.xlu0 %3527 }
0x1501   :  { %v3530_v54 = vmul.f32 %v8054_v38, %v3528_v40 }
0x1503   :  { %v3565_v7 = vadd.f32 %v3564_v59, %v3530_v54 }
0x1508   :  { %v3574_v45 = vpop.xlane.xlu0 %3573 }
0x1509   :  { %v3576_v23 = vmul.f32 %v8059_v0, %v3574_v45  ;;  %v2835_v0 = vld [vmem:[#allocation4 + $0x38] sm:$0xff] }
0x150a   :  { %3862 = vmatpush.msra.mxu2 %v2835_v0 }
0x150b   :  { %v3578_v1 = vadd.f32 %v3576_v23, %v3565_v7  ;;  %v8178_v23 = vld [vmem:[#allocation6 + $0x38] sm:$0xff]  ;;  %v8181_v7 = vld [vmem:[#allocation6 + $0x30] sm:$0xff] }
0x150c   :  { %3943 = vmatpush.msrb.mxu3 %v8178_v23 }
0x150e   :  { %3944 = vmatpush.msrb.mxu3 %v8181_v7 }
0x1510   :  { %v3586_v5 = vpop.xlane.xlu0 %3585 }
0x1511   :  { %v3588_v14 = vmul.f32 %v8063_v3, %v3586_v5  ;;  %v2834_v3 = vld [vmem:[#allocation4 + $0x30] sm:$0xff] }
0x1512   :  { %3863 = vmatpush.msra.mxu2 %v2834_v3  ;;  %v6257_v3 = vld [vmem:[%s6449_s30 + $0x28] sm:$0xff] }
0x1513   :  { %v3590_v49 = vadd.f32 %v3588_v14, %v3578_v1  ;;  %v8186_v1 = vld [vmem:[#allocation6 + $0x28] sm:$0xff] }
0x1514   :  { %3945 = vmatpush.msrb.mxu3 %v8186_v1 }
0x1518   :  { %v3598_v52 = vpop.xlane.xlu0 %3597 }
0x1519   :  { %v3600_v22 = vmul.f32 %v8067_v30, %v3598_v52  ;;  %v2833_v30 = vld [vmem:[#allocation4 + $0x28] sm:$0xff] }
0x151a   :  { %3864 = vmatpush.msra.mxu2 %v2833_v30 }
0x151b   :  { %v3602_v61 = vadd.f32 %v3600_v22, %v3590_v49  ;;  %v8189_v49 = vld [vmem:[#allocation6 + $0x20] sm:$0xff] }
0x151c   :  { %3865 = vmatpush.msra.mxu2 %v2832_v4  ;;  %3946 = vmatpush.msrb.mxu3 %v8189_v49  ;;  %v6258_v4 = vld [vmem:[%s6449_s30 + $0x20] sm:$0xff] }
0x151d   :  { %3607 = vrot.lane.b32.xlu1 %v3602_v61, %s6379_s23  ;;  %v6255_v61 = vld [vmem:[%s6449_s30 + $0x38] sm:$0xff] }
0x151e   :  { %4156 = vmatpush.msrb.mxu2 %v6250_v53  ;;  %4179 = vmatpush.msra.mxu3 %v6255_v61 }
0x1520   :  { %4157 = vmatpush.msrb.mxu2 %v6251_v39 }
0x1522   :  { %4158 = vmatpush.msrb.mxu2 %v6252_v27 }
0x1524   :  { %4159 = vmatpush.msrb.mxu2 %v6253_v58 }
0x1525   :  { %4402 = vrot.lane.b32.xlu1 %v8136_v12, %s6371_s17 }
0x152b   :  { %v3382_v38 = vpop.permute.xlu0 %3381 }
0x152c   :  { %3386 = vst.msk [vmem:[#allocation2 + $0x8] sm:$0x1] %vm854_vm12, %v3382_v38  ;;  %v6256_v38 = vld [vmem:[%s6449_s30 + $0x30] sm:$0xff] }
0x152d   :  { %4180 = vmatpush.msra.mxu3 %v6256_v38  ;;  %v8264_v38 = vld [vmem:[%s8809_s28 + $0x48] sm:$0xff] }
0x152f   :  { %4181 = vmatpush.msra.mxu3 %v6257_v3 }
0x1531   :  { %4182 = vmatpush.msra.mxu3 %v6258_v4 }
0x1533   :  { %v3834_v29 = vpop.permute.xlu0 %3833 }
0x156f   :  { %v3606_v28 = vpop.permute.xlu1 %3605 }
0x1570   :  { %3611 = vst.msk [vmem:[#allocation2] sm:$0xff] %vm1080_vm13, %v3606_v28 }
0x1571   :  { %3837 = vst.msk [vmem:[#allocation2] sm:$0xff] %vm1308_vm14, %v3832_v63 }
0x1578   :  { %v3839_v33 = vld [vmem:[#allocation2] sm:$0xff] }
0x1579   :  { %5761 = vmatmul.msk.f32.vlgmr.msra.gmra.mxu2 %vm184_vm0, %v3839_v33  ;;  %v5989_v33 = vld [vmem:[%s8806_s29 + $0x1] ss:$0 sm:$0xff] }
0x158f   :  { %v3608_v44 = vpop.permute.xlu1 %3607 }
0x1590   :  { %3612 = vst.msk [vmem:[#allocation2 + $0x8] sm:$0x1] %vm8815_vm2, %v3608_v44 }
0x1591   :  { %3838 = vst.msk [vmem:[#allocation2 + $0x8] sm:$0x1] %vm8816_vm15, %v3834_v29 }
0x1598   :  { %v3840_v8 = vld [vmem:[#allocation2 + $0x8] sm:$0x1] }
0x1599   :  { %5762 = vmatmul.msk.f32.gmra.mxu2 %vm184_vm0, %v3840_v8  ;;  %v5990_v8 = vld [vmem:[%s8807_s3 + $0x1] ss:$0 sm:$0xff] }
0x15a1   :  { %5769 = vmatmul.msk.f32.vlgmr.msrb.gmra.mxu2 %vm184_vm0, %v8040_v36 }
0x15a9   :  { %5770 = vmatmul.msk.f32.gmra.mxu2 %vm184_vm0, %v8048_v13 }
0x15fc   :  { %v3867_v60 = vpop.f32.mrf.mxu2 }
0x15fd   :  { %v3868_v2 = vadd.f32 %v5988_v16, %v3867_v60 }
0x15ff   :  { %v3873_v6 = vadd.f32 %v3868_v2, %v7478_v56 }
0x1601   :  { %v3875_v47 = vsel %vm184_vm0, %v3873_v6, 0.0 }
0x161c   :  { %v3870_v55 = vpop.f32.mrf.mxu2 }
0x161d   :  { %v3871_v25 = vadd.f32 %v5988_v16, %v3870_v55  ;;  %v8204_v55 = vld [vmem:[%s6409_s21] sm:$0xff]  ;;  %s8821_s21 = sld [smem:[#allocation21_spill]] }
0x161f   :  { %v3874_v15 = vadd.f32 %v3871_v25, %v7493_v43 }
0x1621   :  { %v3876_v57 = vsel %vm186_vm1, %v3874_v15, 0.0 }
0x1622   :  { %v3877_v41 = vadd.f32 %v3876_v57, %v3875_v47  ;;  %v8219_v47 = vpop.permute.xlu0 %4404  ;;  %v5991_v57 = vld [vmem:[%s8808_s26 + $0x1] ss:$0 sm:$0xff] }
0x1624   :  { %v3878_v37 = vrot.slane %v3877_v41, 4  ;;  %v4161_v62 = vpop.f32.mrf.mxu2 }
0x1625   :  { %v8161_v34 = vadd.f32 %v6254_v46, %v4161_v62 }
0x1626   :  { %v3879_v21 = vadd.f32 %v3878_v37, %v3877_v41 }
0x1627   :  { %4445 = vrot.lane.b32.xlu1 %v8161_v34, %s6371_s17 }
0x1628   :  { %v3880_v26 = vrot.slane %v3879_v21, 2 }
0x162a   :  { %v3881_v48 = vadd.f32 %v3880_v26, %v3879_v21 }
0x162c   :  { %v3882_v56 = vrot.slane %v3881_v48, 1  ;;  %v4164_v9 = vpop.f32.mrf.mxu2 }
0x162d   :  { %v8165_v31 = vadd.f32 %v6254_v46, %v4164_v9  ;;  %v8233_v9 = vld [vmem:[%s8809_s28 + $0x78] sm:$0xff] }
0x162e   :  { %v3883_v43 = vadd.f32 %v3882_v56, %v3881_v48  ;;  %4051 = vmatpush.msrb.mxu0 %v8233_v9 }
0x162f   :  { %4447 = vrot.lane.b32.xlu2 %v8165_v31, %s6371_s17  ;;  %5775 = vmatpush.xpose.msk.msra.mxu1 %vm408_vm6, %v8165_v31 }
0x1630   :  { %v3884_v51 = vmul.f32 %v3883_v43, %v6561_v24 }
0x1632   :  { %v3885_v32 = vsub.f32 %v3873_v6, %v3884_v51  ;;  %v3886_v50 = vsub.f32 %v3874_v15, %v3884_v51  ;;  %v8215_v15 = vpop.permute.xlu1 %4402  ;;  %v8240_v51 = vld [vmem:[%s8809_s28 + $0x70] sm:$0xff] }
0x1633   :  { %5776 = vmatpush.xpose.msk.msra.mxu1 %vm408_vm6, %v8161_v34  ;;  %4052 = vmatpush.msrb.mxu0 %v8240_v51 }
0x1634   :  { %v3887_v17 = vmul.f32 %v3885_v32, %v3885_v32  ;;  %v3888_v20 = vmul.f32 %v3886_v50, %v3886_v50 }
0x1636   :  { %v3889_v40 = vsel %vm184_vm0, %v3887_v17, 0.0  ;;  %v3890_v45 = vsel %vm186_vm1, %v3888_v20, 0.0  ;;  %5777 = vmatmul.msk.f32.vlgmr.msra.gmra.mxu1 %vm408_vm6, %v8136_v12 }
0x1637   :  { %v3891_v5 = vadd.f32 %v3890_v45, %v3889_v40  ;;  %v8252_v40 = vld [vmem:[%s8809_s28 + $0x60] sm:$0xff] }
0x1639   :  { %v3892_v54 = vrot.slane %v3891_v5, 4 }
0x163b   :  { %v3893_v59 = vadd.f32 %v3892_v54, %v3891_v5 }
0x163d   :  { %v3894_v14 = vrot.slane %v3893_v59, 2 }
0x163e   :  { %5778 = vmatmul.msk.f32.gmra.mxu1 %vm408_vm6, %v8124_v42 }
0x163f   :  { %v3895_v52 = vadd.f32 %v3894_v14, %v3893_v59  ;;  %v8256_v59 = vld [vmem:[%s8809_s28 + $0x58] sm:$0xff] }
0x1641   :  { %v3896_v22 = vrot.slane %v3895_v52, 1 }
0x1643   :  { %v3897_v35 = vadd.f32 %v3896_v22, %v3895_v52  ;;  %v8260_v52 = vld [vmem:[%s8809_s28 + $0x50] sm:$0xff] }
0x1645   :  { %v3898_v0 = vmul.f32 %v3897_v35, %v6561_v24 }
0x1647   :  { %v3899_v30 = vadd.f32 1e-12, %v3898_v0 }
0x1649   :  { %6125 = vrsqrt.f32 %v3899_v30  ;;  %vm3906_vm4 = vweird.f32 %v3899_v30 }
0x164f   :  { %v6126_v53 = vpop.eup %6125 }
0x1650   :  { %v3901_v39 = vmul.f32 %v6126_v53, %v3899_v30  ;;  %vm3907_vm3 = vweird.f32 %v6126_v53  ;;  %v8268_v30 = vld [vmem:[%s8809_s28 + $0x40] sm:$0xff] }
0x1651   :  { %vm3908_vm2 = vmor %vm3906_vm4, %vm3907_vm3 }
0x1652   :  { %v3902_v27 = vmul.f32 %v6126_v53, %v3901_v39 }
0x1654   :  { %v3903_v58 = vmul.f32 0.5, %v3902_v27 }
0x1656   :  { %v3904_v28 = vsub.f32 1.5, %v3903_v58 }
0x1658   :  { %v3905_v63 = vmul.f32 %v6126_v53, %v3904_v28 }
0x165a   :  { %v3909_v44 = vsel %vm3908_vm2, %v6126_v53, %v3905_v63  ;;  %v6260_v53 = vld [vmem:[%s6454_s6 + $0x1] ss:$0 sm:$0xff] }
0x165b   :  { %v3910_v29 = vmul.f32 %v3909_v44, %v3885_v32  ;;  %v3911_v16 = vmul.f32 %v3909_v44, %v3886_v50  ;;  %v8247_v50 = vld [vmem:[%s8809_s28 + $0x68] sm:$0xff] }
0x165c   :  { %4053 = vmatpush.msrb.mxu0 %v8247_v50 }
0x165d   :  { %v3915_v60 = vmul.f32 %v5989_v33, %v3910_v29  ;;  %v3916_v6 = vmul.f32 %v5989_v33, %v3911_v16 }
0x165e   :  { %4054 = vmatpush.msrb.mxu0 %v8252_v40 }
0x165f   :  { %v8199_v2 = vadd.f32 %v5990_v8, %v3915_v60  ;;  %v8207_v25 = vadd.f32 %v5990_v8, %v3916_v6 }
0x1660   :  { %4055 = vmatpush.msrb.mxu0 %v8256_v59 }
0x1661   :  { %5763 = vmatmul.msk.f32.vlgmr.msrb.gmra.mxu3 %vm184_vm0, %v8199_v2 }
0x1662   :  { %4425 = vmatpush.msrb.mxu3 %v8204_v55  ;;  %4056 = vmatpush.msrb.mxu0 %v8260_v52 }
0x1664   :  { %4057 = vmatpush.msrb.mxu0 %v8264_v38 }
0x1666   :  { %4058 = vmatpush.msrb.mxu0 %v8268_v30 }
0x1668   :  { %4213 = vmatpush.msra.mxu0 %v8204_v55 }
0x1669   :  { %5764 = vmatmul.msk.f32.gmra.mxu3 %vm184_vm0, %v8207_v25 }
0x1671   :  { %5771 = vmatmul.msk.f32.vlgmr.msra.gmra.mxu3 %vm184_vm0, %v8040_v36 }
0x1679   :  { %5772 = vmatmul.msk.f32.gmra.mxu3 %vm184_vm0, %v8048_v13 }
0x1681   :  { %5782 = vmatmul.msk.f32.vlgmr.msrb.gmra.mxu3 %vm408_vm6, %v8215_v15 }
0x1689   :  { %5783 = vmatmul.msk.f32.gmra.mxu3 %vm408_vm6, %v8219_v47 }
0x16e4   :  { %v3948_v41 = vpop.f32.mrf.mxu3 }
0x16e5   :  { %v8224_v37 = vadd.f32 %v5991_v57, %v3948_v41 }
0x16e7   :  { %v8227_v62 = vmul.f32 0.70710677, %v8224_v37 }
0x16e9   :  { %v3958_v46 = vand.u32 2147483647, %v8227_v62 }
0x16eb   :  { %v3960_v21 = vmul.f32 0.3275911, %v3958_v46  ;;  %v4012_v63 = vsub.f32 0.0, %v3958_v46 }
0x16ec   :  { %v3951_v26 = vpop.f32.mrf.mxu3 }
0x16ed   :  { %v3962_v48 = vadd.f32 1.0, %v3960_v21  ;;  %v8230_v56 = vadd.f32 %v5991_v57, %v3951_v26  ;;  %v4014_v6 = vmul.f32 %v4012_v63, %v3958_v46 }
0x16ef   :  { %6127 = vrcp.f32 %v3962_v48  ;;  %v8237_v43 = vmul.f32 0.70710677, %v8230_v56  ;;  %v3975_v22 = vand.u32 2147483648, %v3962_v48  ;;  %v3973_v35 = vand.u32 2147483647, %v3962_v48 }
0x16f0   :  { %vm3969_vm3 = vweird.f32 %v3962_v48 }
0x16f1   :  { %v8244_v32 = vand.u32 2147483647, %v8237_v43  ;;  %v3976_v4 = vor.u32 1.1754944e-38, %v3975_v22  ;;  %vm3974_vm2 = vcmp.eq.f32.partialorder %v3973_v35, 8.507059e+37 }
0x16f3   :  { %v3961_v17 = vmul.f32 0.3275911, %v8244_v32  ;;  %v4013_v46 = vsub.f32 0.0, %v8244_v32 }
0x16f4   :  { %v4184_v20 = vpop.f32.mrf.mxu3 }
0x16f5   :  { %v6128_v45 = vpop.eup %6127  ;;  %v3963_v54 = vadd.f32 1.0, %v3961_v17  ;;  %v8275_v44 = vadd.f32 %v6260_v53, %v4184_v20 }
0x16f6   :  { %v3965_v5 = vmul.f32 %v6128_v45, %v3962_v48  ;;  %vm3970_vm15 = vweird.f32 %v6128_v45 }
0x16f7   :  { %6129 = vrcp.f32 %v3963_v54  ;;  %vm3971_vm4 = vmor %vm3969_vm3, %vm3970_vm15  ;;  %v3990_v16 = vand.u32 2147483648, %v3963_v54  ;;  %v3988_v41 = vand.u32 2147483647, %v3963_v54  ;;  %vm3984_vm3 = vweird.f32 %v3963_v54 }
0x16f8   :  { %v3966_v14 = vsub.f32 1.0, %v3965_v5 }
0x16f9   :  { %v3991_v20 = vor.u32 1.1754944e-38, %v3990_v16 }
0x16fa   :  { %v3967_v61 = vmul.f32 %v6128_v45, %v3966_v14 }
0x16fc   :  { %v3968_v0 = vadd.f32 %v6128_v45, %v3967_v61  ;;  %v4187_v3 = vpop.f32.mrf.mxu3 }
0x16fd   :  { %v8271_v39 = vadd.f32 %v6260_v53, %v4187_v3  ;;  %v6130_v27 = vpop.eup %6129 }
0x16fe   :  { %v3972_v58 = vsel %vm3971_vm4, %v6128_v45, %v3968_v0  ;;  %v3980_v33 = vmul.f32 %v6130_v27, %v3963_v54  ;;  %vm3985_vm15 = vweird.f32 %v6130_v27  ;;  %v4016_v45 = vmul.f32 1.442695, %v4014_v6 }
0x16ff   :  { %v3977_v28 = vsel %vm3974_vm2, %v3976_v4, %v3972_v58  ;;  %5779 = vmatpush.msk.msra.mxu2 %vm558_vm9, %v8271_v39  ;;  %vm3986_vm4 = vmor %vm3984_vm3, %vm3985_vm15  ;;  %vm3989_vm2 = vcmp.eq.f32.partialorder %v3988_v41, 8.507059e+37  ;;  %v4015_v54 = vmul.f32 %v4013_v46, %v8244_v32  ;;  %vm4024_vm15 = vcmp.ge.f32.partialorder %v8227_v62, 0.0  ;;  %v4446_v62 = vpop.permute.xlu1 %4445 }
0x1700   :  { %v3994_v29 = vmul.f32 1.0614054, %v3977_v28  ;;  %v3981_v8 = vsub.f32 1.0, %v3980_v33  ;;  %6131 = vpow2.f32 %v4016_v45  ;;  %vm4025_vm3 = vcmp.ge.f32.partialorder %v8237_v43, 0.0 }
0x1701   :  { %4356 = vmatpush.msra.mxu2 %v8275_v44  ;;  %v4018_v33 = vmul.f32 1.442695, %v4015_v54 }
0x1702   :  { %v3996_v60 = vadd.f32 -1.4531521, %v3994_v29  ;;  %v3982_v57 = vmul.f32 %v6130_v27, %v3981_v8 }
0x1703   :  { %4652 = vmatpush.msrb.mxu2 %v8204_v55  ;;  %6133 = vpow2.f32 %v4018_v33 }
0x1704   :  { %v3998_v21 = vmul.f32 %v3996_v60, %v3977_v28  ;;  %v4427_v26 = vpop.f32.mrf.mxu3  ;;  %v3983_v48 = vadd.f32 %v6130_v27, %v3982_v57 }
0x1705   :  { %4501 = vperm.xlu1 %5942, %v4427_v26   ;;  %4489 = vperm.xlu0 %5945, %v4427_v26  }
0x1706   :  { %v4000_v17 = vadd.f32 1.4214138, %v3998_v21  ;;  %4435 = vperm.xlu2 %5943, %v4427_v26   ;;  %v3987_v5 = vsel %vm3986_vm4, %v6130_v27, %v3983_v48  ;;  %v6132_v29 = vpop.eup %6131 }
0x1707   :  { %v3992_v22 = vsel %vm3989_vm2, %v3991_v20, %v3987_v5  ;;  %v4448_v5 = vpop.permute.xlu2 %4447 }
0x1708   :  { %v4002_v14 = vmul.f32 %v4000_v17, %v3977_v28  ;;  %v3995_v61 = vmul.f32 1.0614054, %v3992_v22 }
0x1709   :  { %v6134_v17 = vpop.eup %6133 }
0x170a   :  { %v4004_v35 = vadd.f32 -0.28449672, %v4002_v14  ;;  %v3997_v0 = vadd.f32 -1.4531521, %v3995_v61 }
0x170c   :  { %v4006_v3 = vmul.f32 %v4004_v35, %v3977_v28  ;;  %v8283_v4 = vpop.f32.mrf.mxu3  ;;  %v3999_v53 = vmul.f32 %v3997_v0, %v3992_v22 }
0x170d   :  { %5946 = vset.pattern.permute.xlu1 %v6373_v11  ;;  %5947 = vset.pattern.permute.xlu0 %v6373_v11 }
0x170e   :  { %v4008_v27 = vadd.f32 0.2548296, %v4006_v3  ;;  %5944 = vset.pattern.permute.xlu2 %v6372_v10  ;;  %4440 = vperm.xlu1 %5946, %v8283_v4   ;;  %v4001_v58 = vadd.f32 1.4214138, %v3999_v53 }
0x170f   :  { %4477 = vperm.xlu2 %5944, %v4427_v26   ;;  %v3954_v26 = vmul.f32 0.5, %v8224_v37  ;;  %v3955_v37 = vmul.f32 0.5, %v8230_v56  ;;  %v5992_v56 = vld [vmem:[%s8810_s0 + $0x1] ss:$0 sm:$0xff] }
0x1710   :  { %v4010_v63 = vmul.f32 %v4008_v27, %v3977_v28  ;;  %v4003_v8 = vmul.f32 %v4001_v58, %v3992_v22 }
0x1712   :  { %v4020_v60 = vmul.f32 %v6132_v29, %v4010_v63  ;;  %v4005_v32 = vadd.f32 -0.28449672, %v4003_v8 }
0x1714   :  { %v4022_v16 = vsub.f32 1.0, %v4020_v60  ;;  %v4007_v6 = vmul.f32 %v4005_v32, %v3992_v22 }
0x1716   :  { %v4026_v57 = vsub.f32 0.0, %v4022_v16  ;;  %5948 = vset.pattern.permute.xlu1 %v6372_v10  ;;  %v4009_v41 = vadd.f32 0.2548296, %v4007_v6 }
0x1717   :  { %4481 = vperm.xlu2 %5944, %v8283_v4  }
0x1718   :  { %v4028_v21 = vsel %vm4024_vm15, %v4022_v16, %v4026_v57  ;;  %v4011_v48 = vmul.f32 %v4009_v41, %v3992_v22 }
0x1719   :  { %v4030_v28 = vadd.f32 1.0, %v4028_v21 }
0x171a   :  { %v4021_v45 = vmul.f32 %v6134_v17, %v4011_v48 }
0x171b   :  { %v4032_v20 = vmul.f32 %v4030_v28, %v3954_v26 }
0x171c   :  { %v4023_v14 = vsub.f32 1.0, %v4021_v45 }
0x171d   :  { %5765 = vmatmul.msk.f32.vlgmr.msrb.gmra.mxu0 %vm1510_vm5, %v4032_v20 }
0x171e   :  { %5784 = vmatpush.xpose.msk.msrb.mxu0 %vm408_vm6, %v4448_v5  ;;  %v4027_v46 = vsub.f32 0.0, %v4023_v14 }
0x171f   :  { %5950 = vset.pattern.permute.xlu2 %v6375_v19 }
0x1720   :  { %v4029_v61 = vsel %vm4025_vm3, %v4023_v14, %v4027_v46 }
0x1721   :  { %v4031_v22 = vadd.f32 1.0, %v4029_v61 }
0x1722   :  { %5785 = vmatpush.xpose.msk.msrb.mxu0 %vm408_vm6, %v4446_v62 }
0x1723   :  { %v4033_v35 = vmul.f32 %v4031_v22, %v3955_v37 }
0x1725   :  { %5766 = vmatmul.msk.f32.gmra.mxu0 %vm1510_vm5, %v4033_v35 }
0x172d   :  { %5773 = vmatmul.msk.f32.vlgmr.msra.gmra.mxu0 %vm408_vm6, %v8136_v12 }
0x1735   :  { %5774 = vmatmul.msk.f32.gmra.mxu0 %vm408_vm6, %v8124_v42 }
0x173d   :  { %5786 = vmatmul.msk.f32.vlgmr.msrb.gmra.mxu0 %vm408_vm6, %v8215_v15 }
0x1745   :  { %5787 = vmatmul.msk.f32.gmra.mxu0 %vm408_vm6, %v8219_v47 }
0x1760   :  { %v4436_v37 = vpop.permute.xlu2 %4435 }
0x179a   :  { %v4060_v43 = vpop.f32.mrf.mxu0 }
0x179b   :  { %v4061_v0 = vadd.f32 %v5992_v56, %v4060_v43  ;;  %v8328_v43 = vld [vmem:[%s6399_s13 + $0x10] sm:$0xff] }
0x179d   :  { %v4066_v54 = vadd.f32 %v4061_v0, %v8199_v2 }
0x179f   :  { %v4068_v58 = vsel %vm184_vm0, %v4066_v54, 0.0 }
0x17a2   :  { %v4063_v3 = vpop.f32.mrf.mxu0 }
0x17a3   :  { %v4064_v53 = vadd.f32 %v5992_v56, %v4063_v3  ;;  %v4443_v56 = vmul.f32 %v8328_v43, %v4436_v37  ;;  %v4478_v3 = vpop.permute.xlu2 %4477 }
0x17a5   :  { %v4067_v27 = vadd.f32 %v4064_v53, %v8207_v25 }
0x17a7   :  { %v4069_v63 = vsel %vm186_vm1, %v4067_v27, 0.0 }
0x17a8   :  { %v4070_v33 = vadd.f32 %v4069_v63, %v4068_v58 }
0x17aa   :  { %v4071_v29 = vrot.slane %v4070_v33, 4  ;;  %v4215_v8 = vpop.f32.mrf.mxu0 }
0x17ab   :  { %4287 = vperm.xlu2 %5950, %v4215_v8   ;;  %4263 = vperm.xlu1 %5948, %v4215_v8  }
0x17ac   :  { %v4072_v15 = vadd.f32 %v4071_v29, %v4070_v33  ;;  %4223 = vperm.xlu0 %5947, %v4215_v8   ;;  %v4490_v33 = vpop.permute.xlu0 %4489 }
0x17ae   :  { %v4073_v47 = vrot.slane %v4072_v15, 2 }
0x17b0   :  { %v4074_v60 = vadd.f32 %v4073_v47, %v4072_v15  ;;  %v8336_v15 = vld [vmem:[%s6399_s13 + $0x30] sm:$0xff] }
0x17b1   :  { %v4496_v47 = vmul.f32 %v8336_v15, %v4490_v33 }
0x17b2   :  { %v4075_v32 = vrot.slane %v4074_v60, 1  ;;  %v4218_v16 = vpop.f32.mrf.mxu0 }
0x17b3   :  { %5951 = vset.pattern.permute.xlu2 %v6373_v11  ;;  %5949 = vset.pattern.permute.xlu1 %v6374_v18 }
0x17b4   :  { %v4076_v2 = vadd.f32 %v4075_v32, %v4074_v60  ;;  %5953 = vset.pattern.permute.xlu0 %v6372_v10  ;;  %4275 = vperm.xlu1 %5949, %v4215_v8   ;;  %v4502_v32 = vpop.permute.xlu1 %4501 }
0x17b5   :  { %4267 = vperm.xlu0 %5953, %v4218_v16   ;;  %4228 = vperm.xlu2 %5951, %v4218_v16  }
0x17b6   :  { %v4077_v25 = vmul.f32 %v4076_v2, %v6561_v24 }
0x17b8   :  { %v4078_v6 = vsub.f32 %v4066_v54, %v4077_v25  ;;  %v4079_v57 = vsub.f32 %v4067_v27, %v4077_v25  ;;  %v8332_v27 = vld [vmem:[%s6399_s13 + $0x20] sm:$0xff] }
0x17b9   :  { %v4484_v58 = vmul.f32 %v8332_v27, %v4478_v3  ;;  %v8358_v3 = vld [vmem:[%s6399_s13 + $0x18] sm:$0x1] }
0x17ba   :  { %v4080_v41 = vmul.f32 %v4078_v6, %v4078_v6  ;;  %v4081_v21 = vmul.f32 %v4079_v57, %v4079_v57  ;;  %v4470_v35 = vpop.f32.mrf.mxu0 }
0x17bb   :  { %v4471_v53 = vadd.f32 %v4470_v35, %v4443_v56 }
0x17bc   :  { %v4082_v26 = vsel %vm184_vm0, %v4080_v41, 0.0  ;;  %v4083_v28 = vsel %vm186_vm1, %v4081_v21, 0.0  ;;  %4279 = vperm.xlu1 %5949, %v4218_v16   ;;  %v8344_v41 = vld [vmem:[%s6399_s13 + $0x40] sm:$0xff] }
0x17bd   :  { %v4084_v48 = vadd.f32 %v4083_v28, %v4082_v26  ;;  %5954 = vset.pattern.permute.xlu0 %v6375_v19  ;;  %5952 = vset.pattern.permute.xlu2 %v6374_v18  ;;  %v4486_v8 = vadd.f32 %v4484_v58, %v4471_v53  ;;  %v4508_v21 = vmul.f32 %v8344_v41, %v4502_v32  ;;  %v8348_v28 = vld [vmem:[%s6394_s9 + $0x10] sm:$0xff] }
0x17be   :  { %4505 = vperm.xlu0 %5954, %v8283_v4   ;;  %4493 = vperm.xlu2 %5952, %v8283_v4  }
0x17bf   :  { %v4085_v17 = vrot.slane %v4084_v48, 4  ;;  %v4498_v25 = vadd.f32 %v4496_v47, %v4486_v8  ;;  %v8363_v8 = vld [vmem:[%s6399_s13 + $0x28] sm:$0x1] }
0x17c1   :  { %v4086_v20 = vadd.f32 %v4085_v17, %v4084_v48  ;;  %v4510_v26 = vadd.f32 %v4508_v21, %v4498_v25 }
0x17c3   :  { %v4087_v45 = vrot.slane %v4086_v20, 2  ;;  %v4512_v48 = vadd.f32 %v8348_v28, %v4510_v26 }
0x17c4   :  { %5955 = vset.pattern.permute.xlu1 %v6375_v19 }
0x17c5   :  { %v4088_v5 = vadd.f32 %v4087_v45, %v4086_v20  ;;  %4291 = vperm.xlu1 %5955, %v4218_v16   ;;  %v4514_v17 = vsel %vm517_vm7, %v4512_v48, -inf }
0x17c6   :  { %5956 = vset.pattern.permute.xlu0 %v6373_v11 }
0x17c7   :  { %v4089_v14 = vrot.slane %v4088_v5, 1 }
0x17c9   :  { %v4090_v46 = vadd.f32 %v4089_v14, %v4088_v5 }
0x17cb   :  { %v4091_v62 = vmul.f32 %v4090_v46, %v6561_v24 }
0x17cd   :  { %v4092_v61 = vadd.f32 1e-12, %v4091_v62  ;;  %5957 = vset.pattern.permute.xlu1 %v6372_v10  ;;  %v4256_v62 = vpop.f32.mrf.mxu1 }
0x17cf   :  { %6135 = vrsqrt.f32 %v4092_v61  ;;  %vm4099_vm2 = vweird.f32 %v4092_v61 }
0x17d5   :  { %v6136_v4 = vpop.eup %6135 }
0x17d6   :  { %v4094_v22 = vmul.f32 %v6136_v4, %v4092_v61  ;;  %vm4100_vm4 = vweird.f32 %v6136_v4 }
0x17d7   :  { %vm4101_vm15 = vmor %vm4099_vm2, %vm4100_vm4 }
0x17d8   :  { %v4095_v0 = vmul.f32 %v6136_v4, %v4094_v22 }
0x17da   :  { %v4096_v54 = vmul.f32 0.5, %v4095_v0  ;;  %v4473_v0 = vpop.f32.mrf.mxu0 }
0x17dc   :  { %v4097_v63 = vsub.f32 1.5, %v4096_v54 }
0x17de   :  { %v4098_v29 = vmul.f32 %v6136_v4, %v4097_v63 }
0x17e0   :  { %v4102_v60 = vsel %vm4101_vm15, %v6136_v4, %v4098_v29 }
0x17e1   :  { %v8339_v16 = vmul.f32 %v4102_v60, %v4079_v57  ;;  %v8341_v2 = vmul.f32 %v4102_v60, %v4078_v6  ;;  %v4482_v57 = vpop.permute.xlu2 %4481  ;;  %v4441_v6 = vpop.permute.xlu1 %4440  ;;  %v8367_v60 = vld [vmem:[%s6399_s13 + $0x38] sm:$0x1] }
0x17e2   :  { %v4444_v54 = vmul.f32 %v8358_v3, %v4441_v6  ;;  %v4485_v47 = vmul.f32 %v8363_v8, %v4482_v57 }
0x17e4   :  { %v4474_v33 = vadd.f32 %v4473_v0, %v4444_v54 }
0x17e6   :  { %v4487_v26 = vadd.f32 %v4485_v47, %v4474_v33 }
0x17ef   :  { %4515 = vmax.xlane.f32.xlu1 %v4514_v17 }
0x1805   :  { %v4288_v20 = vpop.permute.xlu2 %4287 }
0x1806   :  { %v4294_v53 = vmul.f32 %v8344_v41, %v4288_v20 }
0x1808   :  { %4547 = vrot.lane.b32.xlu1 %v8275_v44, %s6371_s17 }
0x180f   :  { %v4229_v46 = vpop.permute.xlu2 %4228 }
0x1810   :  { %v4232_v6 = vmul.f32 %v8358_v3, %v4229_v46 }
0x1818   :  { %v4494_v63 = vpop.permute.xlu2 %4493 }
0x1819   :  { %v4497_v32 = vmul.f32 %v8367_v60, %v4494_v63 }
0x181d   :  { %v4264_v45 = vpop.permute.xlu1 %4263 }
0x181e   :  { %v4224_v5 = vpop.permute.xlu0 %4223  ;;  %v4270_v37 = vmul.f32 %v8332_v27, %v4264_v45  ;;  %v4499_v45 = vadd.f32 %v4497_v32, %v4487_v26 }
0x181f   :  { %v4231_v14 = vmul.f32 %v8328_v43, %v4224_v5  ;;  %v8374_v5 = vld [vmem:[%s6399_s13 + $0x48] sm:$0x1]  ;;  %s8820_s13 = sld [smem:[#allocation20_spill]] }
0x1821   :  { %v4257_v61 = vadd.f32 %v4256_v62, %v4231_v14  ;;  %v4259_v62 = vpop.f32.mrf.mxu1 }
0x1823   :  { %v4272_v22 = vadd.f32 %v4270_v37, %v4257_v61  ;;  %v4260_v37 = vadd.f32 %v4259_v62, %v4232_v6 }
0x1826   :  { %v4276_v4 = vpop.permute.xlu1 %4275 }
0x1827   :  { %v4282_v35 = vmul.f32 %v8336_v15, %v4276_v4  ;;  %v4268_v56 = vpop.permute.xlu0 %4267 }
0x1828   :  { %v4271_v14 = vmul.f32 %v8363_v8, %v4268_v56 }
0x1829   :  { %v4284_v58 = vadd.f32 %v4282_v35, %v4272_v22  ;;  %v8380_v22 = vld [vmem:[%s6394_s9 + $0x18] sm:$0x1]  ;;  %s8819_s9 = sld [smem:[#allocation10_spill]] }
0x182a   :  { %v4273_v0 = vadd.f32 %v4271_v14, %v4260_v37 }
0x182b   :  { %v4296_v29 = vadd.f32 %v4294_v53, %v4284_v58 }
0x182d   :  { %v4298_v25 = vadd.f32 %v8348_v28, %v4296_v29 }
0x182e   :  { %v4280_v21 = vpop.permute.xlu1 %4279 }
0x182f   :  { %v4300_v17 = vsel %vm517_vm7, %v4298_v25, -inf  ;;  %v4283_v4 = vmul.f32 %v8367_v60, %v4280_v21 }
0x1830   :  { %v4506_v20 = vpop.permute.xlu0 %4505  ;;  %4301 = vmax.xlane.f32.xlu2 %v4300_v17 }
0x1831   :  { %v4509_v57 = vmul.f32 %v8374_v5, %v4506_v20  ;;  %v4285_v53 = vadd.f32 %v4283_v4, %v4273_v0 }
0x1833   :  { %v4511_v61 = vadd.f32 %v4509_v57, %v4499_v45 }
0x1835   :  { %v4513_v35 = vadd.f32 %v8380_v22, %v4511_v61 }
0x1837   :  { %v4292_v46 = vpop.permute.xlu1 %4291  ;;  %v4517_v54 = vsel %vm521_vm8, %v4513_v35, -inf }
0x1838   :  { %v4295_v58 = vmul.f32 %v8374_v5, %v4292_v46  ;;  %4518 = vmax.xlane.f32.xlu2 %v4517_v54 }
0x183a   :  { %v4297_v63 = vadd.f32 %v4295_v58, %v4285_v53 }
0x183c   :  { %v4299_v56 = vadd.f32 %v8380_v22, %v4297_v63 }
0x183e   :  { %v4303_v33 = vsel %vm521_vm8, %v4299_v56, -inf }
0x183f   :  { %4304 = vmax.xlane.f32.xlu0 %v4303_v33 }
0x1853   :  { %4549 = vrot.lane.b32.xlu0 %v8271_v39, %s6371_s17 }
0x185b   :  { %4855 = vrot.lane.b32.xlu0 %v8136_v12, %s6377_s15 }
0x1862   :  { %v4516_v29 = vpop.xlane.xlu1 %4515 }
0x1863   :  { %v4520_v47 = vsub.f32 %v4512_v48, %v4516_v29  ;;  %4631 = vrot.lane.b32.xlu0 %v8124_v42, %s6376_s12 }
0x1865   :  { %v4522_v32 = vmul.f32 1.442695, %v4520_v47 }
0x1867   :  { %6137 = vpow2.f32 %v4522_v32 }
0x186b   :  { %4898 = vrot.lane.b32.xlu0 %v8161_v34, %s6377_s15 }
0x186d   :  { %v6138_v21 = vpop.eup %6137 }
0x186e   :  { %v4526_v26 = vsel %vm517_vm7, %v6138_v21, 0.0 }
0x186f   :  { %4527 = vadd.xlane.f32.xlu2 %v4526_v26 }
0x18a3   :  { %v4302_v17 = vpop.xlane.xlu2 %4301 }
0x18a4   :  { %v4306_v6 = vsub.f32 %v4298_v25, %v4302_v17 }
0x18a6   :  { %v4308_v20 = vmul.f32 1.442695, %v4306_v6 }
0x18a8   :  { %6139 = vpow2.f32 %v4308_v20 }
0x18ab   :  { %v4519_v45 = vpop.xlane.xlu2 %4518 }
0x18ac   :  { %v4521_v57 = vsub.f32 %v4513_v35, %v4519_v45  ;;  %v4548_v35 = vpop.permute.xlu1 %4547 }
0x18ae   :  { %v6140_v14 = vpop.eup %6139  ;;  %v4524_v48 = vmul.f32 1.442695, %v4521_v57 }
0x18af   :  { %v4312_v62 = vsel %vm517_vm7, %v6140_v14, 0.0 }
0x18b0   :  { %6141 = vpow2.f32 %v4524_v48  ;;  %4313 = vadd.xlane.f32.xlu1 %v4312_v62 }
0x18b2   :  { %v4305_v61 = vpop.xlane.xlu0 %4304 }
0x18b3   :  { %v4307_v37 = vsub.f32 %v4299_v56, %v4305_v61 }
0x18b5   :  { %v4310_v4 = vmul.f32 1.442695, %v4307_v37 }
0x18b6   :  { %v6142_v0 = vpop.eup %6141 }
0x18b7   :  { %6143 = vpow2.f32 %v4310_v4  ;;  %v4529_v46 = vsel %vm521_vm8, %v6142_v0, 0.0 }
0x18b8   :  { %4530 = vadd.xlane.f32.xlu2 %v4529_v46 }
0x18bd   :  { %v6144_v54 = vpop.eup %6143 }
0x18be   :  { %v4315_v25 = vsel %vm521_vm8, %v6144_v54, 0.0 }
0x18bf   :  { %4316 = vadd.xlane.f32.xlu1 %v4315_v25 }
0x18c5   :  { %v4550_v53 = vpop.permute.xlu0 %4549 }
0x18c6   :  { %5788 = vmatpush.msk.msrb.mxu1 %vm558_vm9, %v4550_v53 }
0x18c8   :  { %4575 = vmatpush.msrb.mxu1 %v4548_v35 }
0x18ca   :  { %4878 = vmatpush.msra.mxu1 %v8204_v55 }
0x18cd   :  { %v4856_v55 = vpop.permute.xlu0 %4855 }
0x18d0   :  { %4629 = vrot.lane.b32.xlu2 %v8136_v12, %s6376_s12 }
0x18d8   :  { %4857 = vrot.lane.b32.xlu1 %v8124_v42, %s6377_s15  ;;  %4900 = vrot.lane.b32.xlu2 %v8165_v31, %s6377_s15 }
0x18e0   :  { %4674 = vrot.lane.b32.xlu1 %v8165_v31, %s6376_s12  ;;  %4672 = vrot.lane.b32.xlu2 %v8161_v34, %s6376_s12 }
0x18e2   :  { %v4528_v58 = vpop.xlane.xlu2 %4527 }
0x18e3   :  { %6145 = vrcp.f32 %v4528_v58 }
0x18e9   :  { %v6146_v63 = vpop.eup %6145 }
0x18ea   :  { %v8411_v56 = vmul.f32 %v6146_v63, %v6138_v21 }
0x18ec   :  { %5789 = vmatmul.msk.f32.vlgmr.msrb.gmra.mxu1 %vm517_vm7, %v8411_v56 }
0x18ed   :  { %5173 = vmatpush.msrb.mxu1 %v8178_v23 }
0x18ef   :  { %5174 = vmatpush.msrb.mxu1 %v8181_v7 }
0x18f1   :  { %5175 = vmatpush.msrb.mxu1 %v8186_v1  ;;  %v4632_v1 = vpop.permute.xlu0 %4631 }
0x18f3   :  { %5176 = vmatpush.msrb.mxu1 %v8189_v49 }
0x18f9   :  { %v4899_v21 = vpop.permute.xlu0 %4898 }
0x1923   :  { %v4314_v42 = vpop.xlane.xlu1 %4313 }
0x1924   :  { %6147 = vrcp.f32 %v4314_v42 }
0x192a   :  { %v6148_v12 = vpop.eup %6147 }
0x192b   :  { %v8419_v34 = vmul.f32 %v6148_v12, %v6140_v14  ;;  %v4531_v31 = vpop.xlane.xlu2 %4530 }
0x192c   :  { %6149 = vrcp.f32 %v4531_v31 }
0x192d   :  { %5780 = vmatmul.msk.f32.vlgmr.msra.gmra.mxu2 %vm517_vm7, %v8419_v34 }
0x1932   :  { %v6150_v33 = vpop.eup %6149  ;;  %v4317_v29 = vpop.xlane.xlu1 %4316 }
0x1933   :  { %v8423_v23 = vmul.f32 %v6150_v33, %v6142_v0  ;;  %6151 = vrcp.f32 %v4317_v29  ;;  %v4630_v7 = vpop.permute.xlu2 %4629 }
0x1935   :  { %5790 = vmatmul.msk.f32.gmra.mxu1 %vm517_vm7, %v8423_v23 }
0x1939   :  { %v6152_v49 = vpop.eup %6151 }
0x193a   :  { %v8427_v47 = vmul.f32 %v6152_v49, %v6144_v54 }
0x193b   :  { %v4901_v32 = vpop.permute.xlu2 %4900 }
0x193c   :  { %5781 = vmatmul.msk.f32.gmra.mxu2 %vm517_vm7, %v8427_v47 }
0x193d   :  { %5802 = vmatpush.xpose.msk.msra.mxu2 %vm408_vm6, %v4901_v32  ;;  %5800 = vmatmul.msk.f32.vlgmr.msra.gmra.mxu1 %vm408_vm6, %v4856_v55 }
0x1941   :  { %5803 = vmatpush.xpose.msk.msra.mxu2 %vm408_vm6, %v4899_v21 }
0x1944   :  { %5791 = vmatmul.msk.f32.vlgmr.msrb.gmra.mxu2 %vm408_vm6, %v4630_v7 }
0x1945   :  { %5278 = vmatpush.msrb.mxu2 %v8233_v9  ;;  %v4673_v9 = vpop.permute.xlu2 %4672 }
0x1947   :  { %5279 = vmatpush.msrb.mxu2 %v8240_v51 }
0x1949   :  { %5280 = vmatpush.msrb.mxu2 %v8247_v50 }
0x194a   :  { %v4858_v26 = vpop.permute.xlu1 %4857 }
0x194b   :  { %5801 = vmatmul.msk.f32.gmra.mxu1 %vm408_vm6, %v4858_v26  ;;  %5281 = vmatpush.msrb.mxu2 %v8252_v40 }
0x194c   :  { %5792 = vmatmul.msk.f32.gmra.mxu2 %vm408_vm6, %v4632_v1 }
0x194d   :  { %5282 = vmatpush.msrb.mxu2 %v8256_v59 }
0x194f   :  { %5283 = vmatpush.msrb.mxu2 %v8260_v52 }
0x1951   :  { %5284 = vmatpush.msrb.mxu2 %v8264_v38 }
0x1952   :  { %v4675_v17 = vpop.permute.xlu1 %4674 }
0x1953   :  { %5793 = vmatpush.xpose.msk.msra.mxu3 %vm408_vm6, %v4675_v17  ;;  %5285 = vmatpush.msrb.mxu2 %v8268_v30 }
0x1954   :  { %5804 = vmatmul.msk.f32.vlgmr.msra.gmra.mxu2 %vm408_vm6, %v4856_v55 }
0x1957   :  { %5794 = vmatpush.xpose.msk.msra.mxu3 %vm408_vm6, %v4673_v9 }
0x195a   :  { %5795 = vmatmul.msk.f32.vlgmr.msra.gmra.mxu3 %vm408_vm6, %v4630_v7 }
0x195c   :  { %5805 = vmatmul.msk.f32.gmra.mxu2 %vm408_vm6, %v4858_v26 }
0x1962   :  { %5796 = vmatmul.msk.f32.gmra.mxu3 %vm408_vm6, %v4632_v1 }
0x1969   :  { %v8451_v51 = vpop.f32.mrf.mxu1 }
0x19b0   :  { %v8455_v59 = vpop.f32.mrf.mxu2 }
0x19b2   :  { %v8453_v50 = vpop.f32.mrf.mxu1 }
0x19ba   :  { %v4880_v40 = vpop.f32.mrf.mxu1 }
0x19bb   :  { %4942 = vperm.xlu2 %5952, %v4880_v40   ;;  %4930 = vperm.xlu1 %5957, %v4880_v40  }
0x19bc   :  { %4888 = vperm.xlu0 %5956, %v4880_v40  }
0x19bf   :  { %v8460_v52 = vpop.f32.mrf.mxu2 }
0x19c3   :  { %5958 = vset.pattern.permute.xlu2 %v6375_v19  ;;  %5959 = vset.pattern.permute.xlu1 %v6373_v11 }
0x19c4   :  { %4954 = vperm.xlu2 %5958, %v4880_v40   ;;  %5961 = vset.pattern.permute.xlu0 %v6374_v18 }
0x19c7   :  { %v4654_v30 = vpop.f32.mrf.mxu2 }
0x19c8   :  { %v4883_v38 = vpop.f32.mrf.mxu1 }
0x19c9   :  { %4946 = vperm.xlu0 %5961, %v4883_v38   ;;  %4893 = vperm.xlu1 %5959, %v4883_v38  }
0x19cc   :  { %4958 = vperm.xlu2 %5958, %v4883_v38  }
0x19cf   :  { %v4657_v6 = vpop.f32.mrf.mxu2 }
0x19d1   :  { %5963 = vset.pattern.permute.xlu0 %v6372_v10  ;;  %5960 = vset.pattern.permute.xlu1 %v6372_v10 }
0x19d2   :  { %4704 = vperm.xlu0 %5963, %v4654_v30   ;;  %4934 = vperm.xlu1 %5960, %v4883_v38  }
0x19d4   :  { %5964 = vset.pattern.permute.xlu2 %v6374_v18 }
0x19d5   :  { %4716 = vperm.xlu2 %5964, %v4654_v30  }
0x19d7   :  { %v4923_v48 = vpop.f32.mrf.mxu2 }
0x19da   :  { %5968 = vset.pattern.permute.xlu0 %v6375_v19  ;;  %5962 = vset.pattern.permute.xlu1 %v6373_v11 }
0x19db   :  { %4732 = vperm.xlu0 %5968, %v4657_v6   ;;  %4662 = vperm.xlu1 %5962, %v4654_v30  }
0x19dd   :  { %5965 = vset.pattern.permute.xlu2 %v6375_v19  ;;  %v4697_v17 = vpop.f32.mrf.mxu3 }
0x19de   :  { %4728 = vperm.xlu2 %5965, %v4654_v30  }
0x19df   :  { %v4926_v58 = vpop.f32.mrf.mxu2 }
0x19e3   :  { %4667 = vperm.xlu1 %5962, %v4657_v6  }
0x19e6   :  { %5967 = vset.pattern.permute.xlu2 %v6374_v18 }
0x19e7   :  { %4720 = vperm.xlu2 %5967, %v4657_v6  }
0x19eb   :  { %5966 = vset.pattern.permute.xlu1 %v6372_v10 }
0x19ec   :  { %4708 = vperm.xlu1 %5966, %v4657_v6  }
0x1a15   :  { %v4943_v20 = vpop.permute.xlu2 %4942 }
0x1a16   :  { %v4949_v19 = vmul.f32 %v8336_v15, %v4943_v20 }
0x1a1e   :  { %v4955_v61 = vpop.permute.xlu2 %4954 }
0x1a1f   :  { %v4961_v4 = vmul.f32 %v8344_v41, %v4955_v61 }
0x1a26   :  { %v4959_v25 = vpop.permute.xlu2 %4958 }
0x1a27   :  { %v4962_v29 = vmul.f32 %v8374_v5, %v4959_v25 }
0x1a2d   :  { %v4931_v57 = vpop.permute.xlu1 %4930 }
0x1a2e   :  { %v4889_v45 = vpop.permute.xlu0 %4888  ;;  %v4937_v11 = vmul.f32 %v8332_v27, %v4931_v57 }
0x1a2f   :  { %v4896_v14 = vmul.f32 %v8328_v43, %v4889_v45  ;;  %v4717_v31 = vpop.permute.xlu2 %4716 }
0x1a30   :  { %v4723_v6 = vmul.f32 %v8336_v15, %v4717_v31 }
0x1a31   :  { %v4924_v62 = vadd.f32 %v4923_v48, %v4896_v14 }
0x1a33   :  { %v4939_v37 = vadd.f32 %v4937_v11, %v4924_v62 }
0x1a35   :  { %v4951_v18 = vadd.f32 %v4949_v19, %v4939_v37  ;;  %v4700_v19 = vpop.f32.mrf.mxu3 }
0x1a37   :  { %v4963_v0 = vadd.f32 %v4961_v4, %v4951_v18 }
0x1a38   :  { %v4729_v30 = vpop.permute.xlu2 %4728 }
0x1a39   :  { %v4965_v10 = vadd.f32 %v8348_v28, %v4963_v0  ;;  %v4735_v45 = vmul.f32 %v8344_v41, %v4729_v30 }
0x1a3b   :  { %v4967_v46 = vsel %vm517_vm7, %v4965_v10, -inf  ;;  %v4894_v54 = vpop.permute.xlu1 %4893  ;;  %v4947_v35 = vpop.permute.xlu0 %4946 }
0x1a3c   :  { %4968 = vmax.xlane.f32.xlu1 %v4967_v46  ;;  %v4897_v53 = vmul.f32 %v8358_v3, %v4894_v54  ;;  %v4950_v55 = vmul.f32 %v8367_v60, %v4947_v35 }
0x1a3e   :  { %v4927_v42 = vadd.f32 %v4926_v58, %v4897_v53 }
0x1a41   :  { %v4721_v37 = vpop.permute.xlu2 %4720 }
0x1a42   :  { %v4724_v54 = vmul.f32 %v8367_v60, %v4721_v37  ;;  %v4595_v37 = vmul.f32 %v8336_v15, %v8411_v56 }
0x1a44   :  { %v4935_v63 = vpop.permute.xlu1 %4934  ;;  %v4705_v49 = vpop.permute.xlu0 %4704 }
0x1a45   :  { %v4938_v12 = vmul.f32 %v8363_v8, %v4935_v63  ;;  %v4711_v40 = vmul.f32 %v8332_v27, %v4705_v49 }
0x1a47   :  { %v4940_v33 = vadd.f32 %v4938_v12, %v4927_v42 }
0x1a49   :  { %v4952_v7 = vadd.f32 %v4950_v55, %v4940_v33 }
0x1a4b   :  { %v4964_v1 = vadd.f32 %v4962_v29, %v4952_v7 }
0x1a4d   :  { %v4663_v32 = vpop.permute.xlu1 %4662  ;;  %v4966_v21 = vadd.f32 %v8380_v22, %v4964_v1  ;;  %v4733_v46 = vpop.permute.xlu0 %4732 }
0x1a4e   :  { %v4670_v26 = vmul.f32 %v8328_v43, %v4663_v32  ;;  %v4736_v53 = vmul.f32 %v8374_v5, %v4733_v46 }
0x1a4f   :  { %v4970_v9 = vsel %vm521_vm8, %v4966_v21, -inf }
0x1a50   :  { %v4698_v38 = vadd.f32 %v4697_v17, %v4670_v26  ;;  %4971 = vmax.xlane.f32.xlu0 %v4970_v9 }
0x1a52   :  { %v4713_v20 = vadd.f32 %v4711_v40, %v4698_v38 }
0x1a54   :  { %v4725_v57 = vadd.f32 %v4723_v6, %v4713_v20  ;;  %v4583_v20 = vmul.f32 %v8332_v27, %v8411_v56 }
0x1a55   :  { %v4668_v14 = vpop.permute.xlu1 %4667 }
0x1a56   :  { %v4737_v48 = vadd.f32 %v4735_v45, %v4725_v57  ;;  %v4671_v61 = vmul.f32 %v8358_v3, %v4668_v14  ;;  %v4585_v45 = vsel %vm517_vm7, %v4583_v20, 0.0  ;;  %v4536_v57 = vmul.f32 %v8328_v43, %v8411_v56 }
0x1a58   :  { %v4739_v62 = vadd.f32 %v8348_v28, %v4737_v48  ;;  %v4701_v18 = vadd.f32 %v4700_v19, %v4671_v61  ;;  %v4538_v14 = vsel %vm517_vm7, %v4536_v57, 0.0  ;;  %v4323_v48 = vmul.f32 %v8358_v3, %v8427_v47 }
0x1a59   :  { %v4388_v19 = vmul.f32 %v8344_v41, %v8419_v34 }
0x1a5a   :  { %v4741_v11 = vsel %vm517_vm7, %v4739_v62, -inf }
0x1a5b   :  { %4742 = vmax.xlane.f32.xlu2 %v4741_v11  ;;  %v4327_v11 = vsel %vm521_vm8, %v4323_v48, 0.0 }
0x1a5e   :  { %v4709_v4 = vpop.permute.xlu1 %4708 }
0x1a5f   :  { %v4712_v0 = vmul.f32 %v8363_v8, %v4709_v4  ;;  %v4390_v4 = vsel %vm517_vm7, %v4388_v19, 0.0 }
0x1a61   :  { %v4714_v25 = vadd.f32 %v4712_v0, %v4701_v18  ;;  %v4597_v18 = vsel %vm517_vm7, %v4595_v37, 0.0  ;;  %v4607_v0 = vmul.f32 %v8344_v41, %v8411_v56 }
0x1a63   :  { %v4726_v35 = vadd.f32 %v4724_v54, %v4714_v25  ;;  %v4609_v46 = vsel %vm517_vm7, %v4607_v0, 0.0  ;;  %v4537_v54 = vmul.f32 %v8358_v3, %v8423_v23 }
0x1a65   :  { %v4738_v58 = vadd.f32 %v4736_v53, %v4726_v35  ;;  %v4541_v25 = vsel %vm521_vm8, %v4537_v54, 0.0  ;;  %v4584_v35 = vmul.f32 %v8363_v8, %v8423_v23  ;;  %v6271_v54 = vld [vmem:[#allocation4 + $0x38] sm:$0xff] }
0x1a67   :  { %v4740_v28 = vadd.f32 %v8380_v22, %v4738_v58  ;;  %v8548_v58 = vld [vmem:[%s8811_s2 + $0x1] ss:$0 sm:$0xff] }
0x1a68   :  { %v4109_v56 = vmul.f32 %v8548_v58, %v8339_v16 }
0x1a69   :  { %v4744_v63 = vsel %vm521_vm8, %v4740_v28, -inf }
0x1a6a   :  { %4745 = vmax.xlane.f32.xlu1 %v4744_v63 }
0x1a83   :  { %4999 = vrot.lane.b32.xlu1 %v8275_v44, %s6377_s15 }
0x1aaf   :  { %v4969_v42 = vpop.xlane.xlu1 %4968 }
0x1ab0   :  { %v4973_v12 = vsub.f32 %v4965_v10, %v4969_v42  ;;  %v8554_v42 = vld [vmem:[%s8812_s7 + $0x1] ss:$0 sm:$0xff] }
0x1ab2   :  { %v4975_v31 = vmul.f32 1.442695, %v4973_v12 }
0x1ab4   :  { %6153 = vpow2.f32 %v4975_v31 }
0x1aba   :  { %v8496_v55 = vpop.eup %6153 }
0x1abb   :  { %v4979_v33 = vsel %vm517_vm7, %v8496_v55, 0.0 }
0x1abc   :  { %4980 = vadd.xlane.f32.xlu2 %v4979_v33  ;;  %v4108_v33 = vmul.f32 %v8548_v58, %v8341_v2 }
0x1ac3   :  { %v4972_v29 = vpop.xlane.xlu0 %4971 }
0x1ac4   :  { %v4974_v7 = vsub.f32 %v4966_v21, %v4972_v29 }
0x1ac6   :  { %v4977_v1 = vmul.f32 1.442695, %v4974_v7 }
0x1ac8   :  { %6155 = vpow2.f32 %v4977_v1  ;;  %v4596_v1 = vmul.f32 %v8367_v60, %v8423_v23 }
0x1aca   :  { %v4600_v2 = vsel %vm521_vm8, %v4596_v1, 0.0 }
0x1ace   :  { %v8500_v22 = vpop.eup %6155  ;;  %v4743_v49 = vpop.xlane.xlu2 %4742 }
0x1acf   :  { %v4747_v32 = vsub.f32 %v4739_v62, %v4743_v49  ;;  %v4982_v26 = vsel %vm521_vm8, %v8500_v22, 0.0  ;;  %v4322_v62 = vmul.f32 %v8328_v43, %v8419_v34  ;;  %v4114_v49 = vadd.f32 %v8554_v42, %v4109_v56 }
0x1ad0   :  { %4983 = vadd.xlane.f32.xlu0 %v4982_v26  ;;  %v4608_v26 = vmul.f32 %v8374_v5, %v8423_v23 }
0x1ad1   :  { %v4749_v10 = vmul.f32 1.442695, %v4747_v32  ;;  %v4324_v61 = vsel %vm517_vm7, %v4322_v62, 0.0 }
0x1ad3   :  { %6157 = vpow2.f32 %v4749_v10 }
0x1ad4   :  { %5001 = vrot.lane.b32.xlu2 %v8271_v39, %s6377_s15 }
0x1ad9   :  { %v8506_v17 = vpop.eup %6157 }
0x1ada   :  { %v4753_v21 = vsel %vm517_vm7, %v8506_v17, 0.0 }
0x1adb   :  { %4754 = vadd.xlane.f32.xlu1 %v4753_v21 }
0x1add   :  { %v4746_v9 = vpop.xlane.xlu1 %4745 }
0x1ade   :  { %v4748_v40 = vsub.f32 %v4740_v28, %v4746_v9  ;;  %v4588_v28 = vsel %vm521_vm8, %v4584_v35, 0.0  ;;  %v4612_v9 = vsel %vm521_vm8, %v4608_v26, 0.0  ;;  %v6273_v35 = vld [vmem:[#allocation4 + $0x28] sm:$0xff]  ;;  %v8624_v26 = vld [vmem:[%s8804_s18 + $0x3] ss:$0 sm:$0xff] }
0x1ae0   :  { %v4751_v38 = vmul.f32 1.442695, %v4748_v40 }
0x1ae2   :  { %6159 = vpow2.f32 %v4751_v38  ;;  %v4376_v38 = vmul.f32 %v8336_v15, %v8419_v34 }
0x1ae4   :  { %4775 = vrot.lane.b32.xlu0 %v8271_v39, %s6376_s12  ;;  %v4364_v39 = vmul.f32 %v8332_v27, %v8419_v34  ;;  %v4378_v23 = vsel %vm517_vm7, %v4376_v38, 0.0  ;;  %v8628_v38 = vld [vmem:[%s8804_s18 + $0x4] ss:$0 sm:$0xff] }
0x1ae8   :  { %v8514_v30 = vpop.eup %6159 }
0x1ae9   :  { %v4756_v6 = vsel %vm521_vm8, %v8514_v30, 0.0 }
0x1af4   :  { %4773 = vrot.lane.b32.xlu1 %v8275_v44, %s6376_s12  ;;  %v4366_v44 = vsel %vm517_vm7, %v4364_v39, 0.0 }
0x1af5   :  { %v5000_v29 = vpop.permute.xlu1 %4999 }
0x1afd   :  { %4757 = vadd.xlane.f32.xlu2 %v4756_v6 }
0x1b05   :  { %4586 = vadd.xlane.f32.xlu2 %v4585_v45 }
0x1b0d   :  { %4367 = vadd.xlane.f32.xlu2 %v4366_v44 }
0x1b0e   :  { %4539 = vadd.xlane.f32.xlu0 %v4538_v14 }
0x1b15   :  { %4328 = vadd.xlane.f32.xlu2 %v4327_v11 }
0x1b16   :  { %4325 = vadd.xlane.f32.xlu0 %v4324_v61 }
0x1b1e   :  { %4391 = vadd.xlane.f32.xlu0 %v4390_v4  ;;  %4598 = vadd.xlane.f32.xlu1 %v4597_v18 }
0x1b26   :  { %4610 = vadd.xlane.f32.xlu1 %v4609_v46 }
0x1b2e   :  { %4542 = vadd.xlane.f32.xlu1 %v4541_v25 }
0x1b2f   :  { %v4981_v53 = vpop.xlane.xlu2 %4980 }
0x1b30   :  { %6161 = vrcp.f32 %v4981_v53  ;;  %v6272_v53 = vld [vmem:[#allocation4 + $0x30] sm:$0xff] }
0x1b36   :  { %v6162_v63 = vpop.eup %6161  ;;  %4589 = vadd.xlane.f32.xlu1 %v4588_v28  ;;  %v4377_v28 = vmul.f32 %v8367_v60, %v8427_v47 }
0x1b37   :  { %v4987_v12 = vmul.f32 %v6162_v63, %v8496_v55  ;;  %v5002_v31 = vpop.permute.xlu2 %5001  ;;  %v4113_v55 = vadd.f32 %v8554_v42, %v4108_v33  ;;  %v6274_v63 = vld [vmem:[#allocation4 + $0x20] sm:$0xff]  ;;  %v4389_v33 = vmul.f32 %v8374_v5, %v8427_v47 }
0x1b38   :  { %5806 = vmatpush.msk.msrb.mxu3 %vm558_vm9, %v5002_v31 }
0x1b39   :  { %v4989_v7 = vmul.f32 %v8328_v43, %v4987_v12  ;;  %v5035_v32 = vmul.f32 %v8332_v27, %v4987_v12  ;;  %v5047_v40 = vmul.f32 %v8336_v15, %v4987_v12  ;;  %v5059_v57 = vmul.f32 %v8344_v41, %v4987_v12 }
0x1b3a   :  { %5027 = vmatpush.msrb.mxu3 %v5000_v29 }
0x1b3b   :  { %5807 = vmatmul.msk.f32.vlgmr.msrb.gmra.mxu3 %vm517_vm7, %v4987_v12  ;;  %v4991_v16 = vsel %vm517_vm7, %v4989_v7, 0.0  ;;  %v5037_v21 = vsel %vm517_vm7, %v5035_v32, 0.0  ;;  %v5049_v45 = vsel %vm517_vm7, %v5047_v40, 0.0  ;;  %v5061_v14 = vsel %vm517_vm7, %v5059_v57, 0.0 }
0x1b3c   :  { %5815 = vmatpush.msk.msra.mxu3 %vm558_vm9, %v4114_v49  ;;  %4992 = vadd.xlane.f32.xlu0 %v4991_v16  ;;  %v4381_v12 = vsel %vm521_vm8, %v4377_v28, 0.0  ;;  %v4393_v7 = vsel %vm521_vm8, %v4389_v33, 0.0  ;;  %v8615_v49 = vld [vmem:[%s8804_s18 + $0x1] ss:$0 sm:$0xff] }
0x1b3e   :  { %5358 = vmatpush.msra.mxu3 %v4113_v55  ;;  %4601 = vadd.xlane.f32.xlu1 %v4600_v2 }
0x1b43   :  { %v4984_v10 = vpop.xlane.xlu0 %4983 }
0x1b44   :  { %6163 = vrcp.f32 %v4984_v10  ;;  %5038 = vadd.xlane.f32.xlu0 %v5037_v21 }
0x1b46   :  { %4613 = vadd.xlane.f32.xlu1 %v4612_v9 }
0x1b4a   :  { %v6164_v6 = vpop.eup %6163 }
0x1b4b   :  { %v4988_v20 = vmul.f32 %v6164_v6, %v8500_v22 }
0x1b4c   :  { %5050 = vadd.xlane.f32.xlu0 %v5049_v45 }
0x1b4d   :  { %5808 = vmatmul.msk.f32.gmra.mxu3 %vm517_vm7, %v4988_v20  ;;  %v5060_v44 = vmul.f32 %v8374_v5, %v4988_v20  ;;  %v4990_v11 = vmul.f32 %v8358_v3, %v4988_v20  ;;  %v5036_v4 = vmul.f32 %v8363_v8, %v4988_v20 }
0x1b4e   :  { %4379 = vadd.xlane.f32.xlu1 %v4378_v23  ;;  %v4755_v39 = vpop.xlane.xlu1 %4754 }
0x1b4f   :  { %6165 = vrcp.f32 %v4755_v39  ;;  %v5064_v22 = vsel %vm521_vm8, %v5060_v44, 0.0  ;;  %v4994_v19 = vsel %vm521_vm8, %v4990_v11, 0.0  ;;  %v5040_v18 = vsel %vm521_vm8, %v5036_v4, 0.0 }
0x1b54   :  { %5062 = vadd.xlane.f32.xlu0 %v5061_v14 }
0x1b55   :  { %v6166_v34 = vpop.eup %6165 }
0x1b56   :  { %v8586_v48 = vmul.f32 %v6166_v34, %v8506_v17  ;;  %v4776_v62 = vpop.permute.xlu0 %4775  ;;  %5065 = vadd.xlane.f32.xlu1 %v5064_v22  ;;  %v4365_v17 = vmul.f32 %v8363_v8, %v8427_v47  ;;  %v8620_v47 = vld [vmem:[%s8804_s18 + $0x2] ss:$0 sm:$0xff] }
0x1b57   :  { %5797 = vmatpush.msk.msra.mxu0 %vm558_vm9, %v4776_v62 }
0x1b58   :  { %v4763_v61 = vmul.f32 %v8328_v43, %v8586_v48  ;;  %v4369_v0 = vsel %vm521_vm8, %v4365_v17, 0.0  ;;  %v5048_v43 = vmul.f32 %v8367_v60, %v4988_v20 }
0x1b5a   :  { %v4765_v37 = vsel %vm517_vm7, %v4763_v61, 0.0  ;;  %v5052_v25 = vsel %vm521_vm8, %v5048_v43, 0.0 }
0x1b5c   :  { %4995 = vadd.xlane.f32.xlu0 %v4994_v19 }
0x1b5e   :  { %4766 = vadd.xlane.f32.xlu1 %v4765_v37 }
0x1b64   :  { %5041 = vadd.xlane.f32.xlu0 %v5040_v18 }
0x1b66   :  { %4370 = vadd.xlane.f32.xlu1 %v4369_v0  ;;  %v4774_v46 = vpop.permute.xlu1 %4773 }
0x1b67   :  { %4801 = vmatpush.msra.mxu0 %v4774_v46 }
0x1b68   :  { %5798 = vmatmul.msk.f32.vlgmr.msra.gmra.mxu0 %vm517_vm7, %v8586_v48 }
0x1b69   :  { %5101 = vmatpush.msrb.mxu0 %v6271_v54 }
0x1b6b   :  { %5102 = vmatpush.msrb.mxu0 %v6272_v53 }
0x1b6c   :  { %5053 = vadd.xlane.f32.xlu0 %v5052_v25 }
0x1b6d   :  { %5103 = vmatpush.msrb.mxu0 %v6273_v35 }
0x1b6f   :  { %5104 = vmatpush.msrb.mxu0 %v6274_v63 }
0x1b70   :  { %v4758_v56 = vpop.xlane.xlu2 %4757 }
0x1b71   :  { %6167 = vrcp.f32 %v4758_v56 }
0x1b74   :  { %4382 = vadd.xlane.f32.xlu0 %v4381_v12  ;;  %v4809_v12 = vmul.f32 %v8332_v27, %v8586_v48  ;;  %v4821_v27 = vmul.f32 %v8336_v15, %v8586_v48 }
0x1b77   :  { %v6168_v31 = vpop.eup %6167 }
0x1b78   :  { %v8609_v29 = vmul.f32 %v6168_v31, %v8514_v30  ;;  %v4587_v2 = vpop.xlane.xlu2 %4586 }
0x1b79   :  { %v4591_v30 = vmul.f32 %v8620_v47, %v4587_v2 }
0x1b7a   :  { %5799 = vmatmul.msk.f32.gmra.mxu0 %vm517_vm7, %v8609_v29 }
0x1b7c   :  { %4394 = vadd.xlane.f32.xlu0 %v4393_v7 }
0x1b80   :  { %v4368_v0 = vpop.xlane.xlu2 %4367 }
0x1b81   :  { %v4540_v1 = vpop.xlane.xlu0 %4539  ;;  %v4372_v25 = vmul.f32 %v8620_v47, %v4368_v0 }
0x1b82   :  { %v4544_v16 = vmul.f32 %v8615_v49, %v4540_v1 }
0x1b84   :  { %v4578_v32 = vadd.f32 %v8451_v51, %v4544_v16  ;;  %v4811_v16 = vsel %vm517_vm7, %v4809_v12, 0.0 }
0x1b86   :  { %v4593_v21 = vadd.f32 %v4591_v30, %v4578_v32 }
0x1b89   :  { %v4326_v45 = vpop.xlane.xlu0 %4325 }
0x1b8a   :  { %v4330_v4 = vmul.f32 %v8615_v49, %v4326_v45  ;;  %v4764_v45 = vmul.f32 %v8358_v3, %v8609_v29  ;;  %v4822_v3 = vmul.f32 %v8367_v60, %v8609_v29 }
0x1b8c   :  { %v4359_v46 = vadd.f32 %v8455_v59, %v4330_v4  ;;  %v4768_v15 = vsel %vm521_vm8, %v4764_v45, 0.0 }
0x1b8e   :  { %v4374_v63 = vadd.f32 %v4372_v25, %v4359_v46 }
0x1b91   :  { %v4599_v55 = vpop.xlane.xlu1 %4598  ;;  %v4392_v39 = vpop.xlane.xlu0 %4391 }
0x1b92   :  { %v4603_v10 = vmul.f32 %v8624_v26, %v4599_v55  ;;  %v4396_v31 = vmul.f32 %v8628_v38, %v4392_v39  ;;  %v4810_v39 = vmul.f32 %v8363_v8, %v8609_v29  ;;  %v4826_v8 = vsel %vm521_vm8, %v4822_v3, 0.0 }
0x1b94   :  { %v4605_v40 = vadd.f32 %v4603_v10, %v4593_v21  ;;  %v4823_v10 = vsel %vm517_vm7, %v4821_v27, 0.0 }
0x1b99   :  { %v4611_v9 = vpop.xlane.xlu1 %4610 }
0x1b9a   :  { %v4615_v6 = vmul.f32 %v8628_v38, %v4611_v9  ;;  %v4833_v9 = vmul.f32 %v8344_v41, %v8586_v48 }
0x1b9c   :  { %v4617_v20 = vadd.f32 %v4615_v6, %v4605_v40  ;;  %v4835_v6 = vsel %vm517_vm7, %v4833_v9, 0.0 }
0x1b9e   :  { %4621 = vrot.lane.b32.xlu2 %v4617_v20, %s6368_s1 }
0x1ba1   :  { %v4543_v51 = vpop.xlane.xlu1 %4542 }
0x1ba2   :  { %v4545_v23 = vmul.f32 %v8615_v49, %v4543_v51 }
0x1ba4   :  { %v4581_v44 = vadd.f32 %v8453_v50, %v4545_v23 }
0x1ba9   :  { %v4590_v57 = vpop.xlane.xlu1 %4589 }
0x1baa   :  { %v4592_v14 = vmul.f32 %v8620_v47, %v4590_v57  ;;  %v4329_v57 = vpop.xlane.xlu2 %4328 }
0x1bac   :  { %v4594_v34 = vadd.f32 %v4592_v14, %v4581_v44  ;;  %v4814_v44 = vsel %vm521_vm8, %v4810_v39, 0.0  ;;  %v4331_v14 = vmul.f32 %v8615_v49, %v4329_v57 }
0x1baf   :  { %v4993_v22 = vpop.xlane.xlu0 %4992 }
0x1bb0   :  { %v4997_v50 = vmul.f32 %v8615_v49, %v4993_v22  ;;  %v4362_v22 = vadd.f32 %v8460_v52, %v4331_v14 }
0x1bb1   :  { %v4602_v62 = vpop.xlane.xlu1 %4601 }
0x1bb2   :  { %v4604_v11 = vmul.f32 %v8624_v26, %v4602_v62 }
0x1bb4   :  { %v4606_v61 = vadd.f32 %v4604_v11, %v4594_v34 }
0x1bb7   :  { %v5039_v19 = vpop.xlane.xlu0 %5038 }
0x1bb8   :  { %v5043_v28 = vmul.f32 %v8620_v47, %v5039_v19 }
0x1bb9   :  { %v4614_v37 = vpop.xlane.xlu1 %4613 }
0x1bba   :  { %v4616_v17 = vmul.f32 %v8628_v38, %v4614_v37 }
0x1bbc   :  { %v8638_v18 = vadd.f32 %v4616_v17, %v4606_v61  ;;  %v4834_v17 = vmul.f32 %v8374_v5, %v8609_v29 }
0x1bbe   :  { %v5029_v43 = vpop.f32.mrf.mxu3  ;;  %v4838_v60 = vsel %vm521_vm8, %v4834_v17, 0.0  ;;  %vm8818_vm8 = vcmask 254144  }
0x1bbf   :  { %v5051_v54 = vpop.xlane.xlu0 %5050  ;;  %v5030_v53 = vadd.f32 %v5029_v43, %v4997_v50 }
0x1bc0   :  { %v5055_v59 = vmul.f32 %v8624_v26, %v5051_v54 }
0x1bc1   :  { %v4380_v35 = vpop.xlane.xlu1 %4379  ;;  %v5045_v33 = vadd.f32 %v5043_v28, %v5030_v53 }
0x1bc2   :  { %v4384_v56 = vmul.f32 %v8624_v26, %v4380_v35 }
0x1bc3   :  { %v5057_v2 = vadd.f32 %v5055_v59, %v5045_v33 }
0x1bc4   :  { %v4386_v7 = vadd.f32 %v4384_v56, %v4374_v63 }
0x1bc6   :  { %v4398_v1 = vadd.f32 %v4396_v31, %v4386_v7 }
0x1bc7   :  { %v5063_v55 = vpop.xlane.xlu0 %5062  ;;  %4812 = vadd.xlane.f32.xlu2 %v4811_v16 }
0x1bc8   :  { %4400 = vst.msk [vmem:[#allocation2] sm:$0xff] %vm408_vm6, %v4398_v1  ;;  %v5067_v32 = vmul.f32 %v8628_v38, %v5063_v55  ;;  %vm8817_vm6 = vcmask 188544  }
0x1bc9   :  { %v5066_v40 = vpop.xlane.xlu1 %5065 }
0x1bca   :  { %v5069_v30 = vadd.f32 %v5067_v32, %v5057_v2  ;;  %v5068_v29 = vmul.f32 %v8628_v38, %v5066_v40 }
0x1bcc   :  { %5073 = vrot.lane.b32.xlu0 %v5069_v30, %s6378_s22 }
0x1bcf   :  { %v4996_v21 = vpop.xlane.xlu0 %4995  ;;  %4824 = vadd.xlane.f32.xlu2 %v4823_v10 }
0x1bd0   :  { %v4998_v0 = vmul.f32 %v8615_v49, %v4996_v21  ;;  %v5032_v46 = vpop.f32.mrf.mxu3 }
0x1bd1   :  { %v4767_v51 = vpop.xlane.xlu1 %4766 }
0x1bd2   :  { %v5033_v43 = vadd.f32 %v5032_v46, %v4998_v0  ;;  %v4771_v56 = vmul.f32 %v8615_v49, %v4767_v51 }
0x1bd7   :  { %v5042_v20 = vpop.xlane.xlu0 %5041  ;;  %4836 = vadd.xlane.f32.xlu2 %v4835_v6 }
0x1bd8   :  { %v5044_v50 = vmul.f32 %v8620_v47, %v5042_v20 }
0x1bd9   :  { %v4371_v41 = vpop.xlane.xlu1 %4370 }
0x1bda   :  { %v4373_v34 = vmul.f32 %v8620_v47, %v4371_v41  ;;  %v5046_v25 = vadd.f32 %v5044_v50, %v5033_v43 }
0x1bdc   :  { %v4375_v11 = vadd.f32 %v4373_v34, %v4362_v22 }
0x1bdf   :  { %v5054_v23 = vpop.xlane.xlu0 %5053  ;;  %4769 = vadd.xlane.f32.xlu2 %v4768_v15 }
0x1be0   :  { %v5056_v54 = vmul.f32 %v8624_v26, %v5054_v23 }
0x1be2   :  { %v5058_v5 = vadd.f32 %v5056_v54, %v5046_v25 }
0x1be4   :  { %v5070_v53 = vadd.f32 %v5068_v29, %v5058_v5 }
0x1be5   :  { %v4803_v63 = vpop.f32.mrf.mxu0 }
0x1be6   :  { %v4804_v31 = vadd.f32 %v4803_v63, %v4771_v56 }
0x1be7   :  { %v4383_v48 = vpop.xlane.xlu0 %4382  ;;  %4815 = vadd.xlane.f32.xlu2 %v4814_v44  ;;  %v6279_v44 = vld [vmem:[%s8805_s5 + $0x1] ss:$0 sm:$0xff] }
0x1be8   :  { %v4385_v62 = vmul.f32 %v8624_v26, %v4383_v48 }
0x1bea   :  { %v4387_v19 = vadd.f32 %v4385_v62, %v4375_v11 }
0x1bef   :  { %v4395_v61 = vpop.xlane.xlu0 %4394  ;;  %4827 = vadd.xlane.f32.xlu2 %v4826_v8 }
0x1bf0   :  { %v4397_v37 = vmul.f32 %v8628_v38, %v4395_v61 }
0x1bf2   :  { %v4399_v4 = vadd.f32 %v4397_v37, %v4387_v19 }
0x1bf4   :  { %4401 = vst.msk [vmem:[#allocation2 + $0x8] sm:$0x1] %vm625_vm10, %v4399_v4 }
0x1bf7   :  { %4839 = vadd.xlane.f32.xlu2 %v4838_v60  ;;  %v4806_v10 = vpop.f32.mrf.mxu0 }
0x1bf8   :  { %v4622_v52 = vpop.permute.xlu2 %4621 }
0x1bf9   :  { %4627 = vst.msk [vmem:[#allocation2] sm:$0xff] %vm852_vm11, %v4622_v52 }
0x1c0f   :  { %4623 = vrot.lane.b32.xlu2 %v8638_v18, %s6368_s1 }
0x1c17   :  { %5075 = vrot.lane.b32.xlu2 %v5070_v53, %s6378_s22 }
0x1c3a   :  { %v4813_v35 = vpop.xlane.xlu2 %4812 }
0x1c3b   :  { %v4817_v12 = vmul.f32 %v8620_v47, %v4813_v35 }
0x1c3d   :  { %v4819_v59 = vadd.f32 %v4817_v12, %v4804_v31 }
0x1c42   :  { %v4825_v28 = vpop.xlane.xlu2 %4824 }
0x1c43   :  { %v4829_v33 = vmul.f32 %v8624_v26, %v4825_v28 }
0x1c45   :  { %v4831_v1 = vadd.f32 %v4829_v33, %v4819_v59 }
0x1c4a   :  { %v4837_v7 = vpop.xlane.xlu2 %4836 }
0x1c4b   :  { %v4841_v18 = vmul.f32 %v8628_v38, %v4837_v7 }
0x1c4d   :  { %v4843_v16 = vadd.f32 %v4841_v18, %v4831_v1 }
0x1c4f   :  { %4847 = vrot.lane.b32.xlu1 %v4843_v16, %s6379_s23  ;;  %v6280_v16 = vld [vmem:[%s8806_s29 + $0x1] ss:$0 sm:$0xff] }
0x1c52   :  { %v4770_v55 = vpop.xlane.xlu2 %4769 }
0x1c53   :  { %v4772_v30 = vmul.f32 %v8615_v49, %v4770_v55  ;;  %v5074_v49 = vpop.permute.xlu0 %5073 }
0x1c55   :  { %v4807_v21 = vadd.f32 %v4806_v10, %v4772_v30 }
0x1c5a   :  { %v4816_v2 = vpop.xlane.xlu2 %4815 }
0x1c5b   :  { %v4818_v27 = vmul.f32 %v8620_v47, %v4816_v2 }
0x1c5d   :  { %v4820_v40 = vadd.f32 %v4818_v27, %v4807_v21 }
0x1c62   :  { %v4828_v32 = vpop.xlane.xlu2 %4827 }
0x1c63   :  { %v4830_v9 = vmul.f32 %v8624_v26, %v4828_v32  ;;  %v6281_v32 = vld [vmem:[%s8807_s3 + $0x1] ss:$0 sm:$0xff] }
0x1c65   :  { %v4832_v20 = vadd.f32 %v4830_v9, %v4820_v40  ;;  %v6282_v9 = vld [vmem:[%s8808_s26 + $0x1] ss:$0 sm:$0xff] }
0x1c6a   :  { %v4840_v6 = vpop.xlane.xlu2 %4839 }
0x1c6b   :  { %v4842_v45 = vmul.f32 %v8628_v38, %v4840_v6 }
0x1c6d   :  { %v4844_v51 = vadd.f32 %v4842_v45, %v4832_v20 }
0x1c6f   :  { %4849 = vrot.lane.b32.xlu1 %v4844_v51, %s6379_s23 }
0x1c72   :  { %v4624_v15 = vpop.permute.xlu2 %4623 }
0x1c73   :  { %4628 = vst.msk [vmem:[#allocation2 + $0x8] sm:$0x1] %vm854_vm12, %v4624_v15 }
0x1c7a   :  { %v5076_v39 = vpop.permute.xlu2 %5075 }
0x1cc1   :  { %v4848_v23 = vpop.permute.xlu1 %4847 }
0x1cc2   :  { %4853 = vst.msk [vmem:[#allocation2] sm:$0xff] %vm1080_vm13, %v4848_v23 }
0x1cc3   :  { %5079 = vst.msk [vmem:[#allocation2] sm:$0xff] %vm1308_vm14, %v5074_v49 }
0x1cca   :  { %v5081_v47 = vld [vmem:[#allocation2] sm:$0xff] }
0x1ccb   :  { %5809 = vmatmul.msk.f32.vlgmr.msrb.gmra.mxu0 %vm184_vm0, %v5081_v47 }
0x1ce1   :  { %v4850_v26 = vpop.permute.xlu1 %4849 }
0x1ce2   :  { %4854 = vst.msk [vmem:[#allocation2 + $0x8] sm:$0x1] %vm8817_vm6, %v4850_v26 }
0x1ce3   :  { %5080 = vst.msk [vmem:[#allocation2 + $0x8] sm:$0x1] %vm8818_vm8, %v5076_v39 }
0x1cea   :  { %v5082_v38 = vld [vmem:[#allocation2 + $0x8] sm:$0x1] }
0x1ceb   :  { %5810 = vmatmul.msk.f32.gmra.mxu0 %vm184_vm0, %v5082_v38 }
0x1d48   :  { %v5106_v57 = vpop.f32.mrf.mxu0 }
0x1d49   :  { %v5107_v41 = vadd.f32 %v6279_v44, %v5106_v57 }
0x1d4b   :  { %v5112_v14 = vadd.f32 %v5107_v41, %v8040_v36 }
0x1d4d   :  { %v5114_v22 = vsel %vm184_vm0, %v5112_v14, 0.0 }
0x1d68   :  { %v5109_v48 = vpop.f32.mrf.mxu0 }
0x1d69   :  { %v5110_v34 = vadd.f32 %v6279_v44, %v5109_v48 }
0x1d6b   :  { %v5113_v3 = vadd.f32 %v5110_v34, %v8048_v13 }
0x1d6d   :  { %v5115_v62 = vsel %vm186_vm1, %v5113_v3, 0.0 }
0x1d6e   :  { %v5116_v11 = vadd.f32 %v5115_v62, %v5114_v22 }
0x1d70   :  { %v5117_v8 = vrot.slane %v5116_v11, 4 }
0x1d72   :  { %v5118_v61 = vadd.f32 %v5117_v8, %v5116_v11 }
0x1d74   :  { %v5119_v19 = vrot.slane %v5118_v61, 2 }
0x1d76   :  { %v5120_v37 = vadd.f32 %v5119_v19, %v5118_v61 }
0x1d78   :  { %v5121_v4 = vrot.slane %v5120_v37, 1 }
0x1d7a   :  { %v5122_v17 = vadd.f32 %v5121_v4, %v5120_v37 }
0x1d7c   :  { %v5123_v60 = vmul.f32 %v5122_v17, %v6561_v24 }
0x1d7e   :  { %v5124_v52 = vsub.f32 %v5112_v14, %v5123_v60  ;;  %v5125_v0 = vsub.f32 %v5113_v3, %v5123_v60 }
0x1d80   :  { %v5126_v46 = vmul.f32 %v5124_v52, %v5124_v52  ;;  %v5127_v36 = vmul.f32 %v5125_v0, %v5125_v0 }
0x1d82   :  { %v5128_v50 = vsel %vm184_vm0, %v5126_v46, 0.0  ;;  %v5129_v13 = vsel %vm186_vm1, %v5127_v36, 0.0 }
0x1d83   :  { %v5130_v43 = vadd.f32 %v5129_v13, %v5128_v50 }
0x1d85   :  { %v5131_v54 = vrot.slane %v5130_v43, 4 }
0x1d87   :  { %v5132_v25 = vadd.f32 %v5131_v54, %v5130_v43 }
0x1d89   :  { %v5133_v5 = vrot.slane %v5132_v25, 2 }
0x1d8b   :  { %v5134_v29 = vadd.f32 %v5133_v5, %v5132_v25 }
0x1d8d   :  { %v5135_v53 = vrot.slane %v5134_v29, 1 }
0x1d8f   :  { %v5136_v35 = vadd.f32 %v5135_v53, %v5134_v29 }
0x1d91   :  { %v5137_v28 = vmul.f32 %v5136_v35, %v6561_v24 }
0x1d93   :  { %v5138_v63 = vadd.f32 1e-12, %v5137_v28 }
0x1d95   :  { %6169 = vrsqrt.f32 %v5138_v63  ;;  %vm5145_vm11 = vweird.f32 %v5138_v63 }
0x1d9b   :  { %v6170_v56 = vpop.eup %6169 }
0x1d9c   :  { %v5140_v12 = vmul.f32 %v6170_v56, %v5138_v63  ;;  %vm5146_vm10 = vweird.f32 %v6170_v56 }
0x1d9d   :  { %vm5147_vm12 = vmor %vm5145_vm11, %vm5146_vm10 }
0x1d9e   :  { %v5141_v31 = vmul.f32 %v6170_v56, %v5140_v12 }
0x1da0   :  { %v5142_v33 = vmul.f32 0.5, %v5141_v31 }
0x1da2   :  { %v5143_v59 = vsub.f32 1.5, %v5142_v33 }
0x1da4   :  { %v5144_v7 = vmul.f32 %v6170_v56, %v5143_v59 }
0x1da6   :  { %v5148_v1 = vsel %vm5147_vm12, %v6170_v56, %v5144_v7 }
0x1da7   :  { %v5149_v18 = vmul.f32 %v5148_v1, %v5124_v52  ;;  %v5150_v2 = vmul.f32 %v5148_v1, %v5125_v0 }
0x1da9   :  { %v5151_v55 = vmul.f32 %v6280_v16, %v5149_v18  ;;  %v5152_v27 = vmul.f32 %v6280_v16, %v5150_v2 }
0x1dab   :  { %v8713_v30 = vadd.f32 %v6281_v32, %v5151_v55  ;;  %v8717_v10 = vadd.f32 %v6281_v32, %v5152_v27 }
0x1dad   :  { %5811 = vmatmul.msk.f32.vlgmr.msrb.gmra.mxu1 %vm184_vm0, %v8713_v30 }
0x1db5   :  { %5812 = vmatmul.msk.f32.gmra.mxu1 %vm184_vm0, %v8717_v10 }
0x1e2a   :  { %v5178_v21 = vpop.f32.mrf.mxu1 }
0x1e2b   :  { %v8722_v40 = vadd.f32 %v6282_v9, %v5178_v21 }
0x1e2d   :  { %v8725_v6 = vmul.f32 0.70710677, %v8722_v40 }
0x1e2f   :  { %v5188_v20 = vand.u32 2147483647, %v8725_v6  ;;  %vm5254_vm10 = vcmp.ge.f32.partialorder %v8725_v6, 0.0 }
0x1e31   :  { %v5190_v45 = vmul.f32 0.3275911, %v5188_v20  ;;  %v5242_v8 = vsub.f32 0.0, %v5188_v20 }
0x1e32   :  { %v5181_v51 = vpop.f32.mrf.mxu1 }
0x1e33   :  { %v5192_v15 = vadd.f32 1.0, %v5190_v45  ;;  %v8728_v23 = vadd.f32 %v6282_v9, %v5181_v51  ;;  %v5244_v60 = vmul.f32 %v5242_v8, %v5188_v20  ;;  %v5184_v20 = vmul.f32 0.5, %v8722_v40 }
0x1e35   :  { %6171 = vrcp.f32 %v5192_v15  ;;  %v8731_v49 = vmul.f32 0.70710677, %v8728_v23  ;;  %v5205_v41 = vand.u32 2147483648, %v5192_v15  ;;  %v5203_v14 = vand.u32 2147483647, %v5192_v15 }
0x1e36   :  { %vm5199_vm14 = vweird.f32 %v5192_v15  ;;  %v5246_v43 = vmul.f32 1.442695, %v5244_v60 }
0x1e37   :  { %v5189_v47 = vand.u32 2147483647, %v8731_v49  ;;  %v5206_v3 = vor.u32 1.1754944e-38, %v5205_v41  ;;  %vm5204_vm4 = vcmp.eq.f32.partialorder %v5203_v14, 8.507059e+37  ;;  %vm5255_vm11 = vcmp.ge.f32.partialorder %v8731_v49, 0.0 }
0x1e39   :  { %v5191_v26 = vmul.f32 0.3275911, %v5189_v47  ;;  %v5243_v29 = vsub.f32 0.0, %v5189_v47 }
0x1e3b   :  { %v6172_v39 = vpop.eup %6171  ;;  %v5193_v57 = vadd.f32 1.0, %v5191_v26  ;;  %v5245_v56 = vmul.f32 %v5243_v29, %v5189_v47 }
0x1e3c   :  { %v5195_v38 = vmul.f32 %v6172_v39, %v5192_v15  ;;  %vm5200_vm13 = vweird.f32 %v6172_v39 }
0x1e3d   :  { %6173 = vrcp.f32 %v5193_v57  ;;  %vm5201_vm3 = vmor %vm5199_vm14, %vm5200_vm13  ;;  %v5220_v17 = vand.u32 2147483648, %v5193_v57  ;;  %v5218_v0 = vand.u32 2147483647, %v5193_v57  ;;  %vm5214_vm15 = vweird.f32 %v5193_v57 }
0x1e3e   :  { %v5196_v44 = vsub.f32 1.0, %v5195_v38  ;;  %6175 = vpow2.f32 %v5246_v43  ;;  %v5248_v7 = vmul.f32 1.442695, %v5245_v56 }
0x1e3f   :  { %v5221_v13 = vor.u32 1.1754944e-38, %v5220_v17  ;;  %vm5219_vm8 = vcmp.eq.f32.partialorder %v5218_v0, 8.507059e+37 }
0x1e40   :  { %v5197_v48 = vmul.f32 %v6172_v39, %v5196_v44  ;;  %6177 = vpow2.f32 %v5248_v7  ;;  %v5185_v44 = vmul.f32 0.5, %v8728_v23 }
0x1e42   :  { %v5198_v34 = vadd.f32 %v6172_v39, %v5197_v48  ;;  %v6283_v48 = vld [vmem:[%s8810_s0 + $0x1] ss:$0 sm:$0xff] }
0x1e43   :  { %v6174_v22 = vpop.eup %6173 }
0x1e44   :  { %v5202_v62 = vsel %vm5201_vm3, %v6172_v39, %v5198_v34  ;;  %v5210_v61 = vmul.f32 %v6174_v22, %v5193_v57  ;;  %vm5215_vm2 = vweird.f32 %v6174_v22  ;;  %v6176_v1 = vpop.eup %6175 }
0x1e45   :  { %v5207_v11 = vsel %vm5204_vm4, %v5206_v3, %v5202_v62  ;;  %vm5216_vm6 = vmor %vm5214_vm15, %vm5215_vm2  ;;  %vm5464_vm4 = vcmask 254976  }
0x1e46   :  { %v5224_v19 = vmul.f32 1.0614054, %v5207_v11  ;;  %v5211_v37 = vsub.f32 1.0, %v5210_v61  ;;  %v6178_v15 = vpop.eup %6177 }
0x1e48   :  { %v5226_v4 = vadd.f32 -1.4531521, %v5224_v19  ;;  %v5212_v52 = vmul.f32 %v6174_v22, %v5211_v37 }
0x1e4a   :  { %v5228_v46 = vmul.f32 %v5226_v4, %v5207_v11  ;;  %v5213_v36 = vadd.f32 %v6174_v22, %v5212_v52 }
0x1e4c   :  { %v5230_v50 = vadd.f32 1.4214138, %v5228_v46  ;;  %v5217_v54 = vsel %vm5216_vm6, %v6174_v22, %v5213_v36 }
0x1e4d   :  { %v5222_v5 = vsel %vm5219_vm8, %v5221_v13, %v5217_v54 }
0x1e4e   :  { %v5232_v25 = vmul.f32 %v5230_v50, %v5207_v11  ;;  %v5225_v53 = vmul.f32 1.0614054, %v5222_v5 }
0x1e50   :  { %v5234_v35 = vadd.f32 -0.28449672, %v5232_v25  ;;  %v5227_v28 = vadd.f32 -1.4531521, %v5225_v53  ;;  %v5336_v25 = vld [vmem:[%s8819_s9] sm:$0x1] }
0x1e51   :  { %5816 = vmatmul.msk.f32.vlgmr.msra.gmra.mxu3 %vm517_vm7, %v5336_v25 }
0x1e52   :  { %v5236_v63 = vmul.f32 %v5234_v35, %v5207_v11  ;;  %v5229_v12 = vmul.f32 %v5227_v28, %v5222_v5 }
0x1e54   :  { %v5238_v31 = vadd.f32 0.2548296, %v5236_v63  ;;  %v5231_v33 = vadd.f32 1.4214138, %v5229_v12 }
0x1e56   :  { %v5240_v59 = vmul.f32 %v5238_v31, %v5207_v11  ;;  %v5233_v18 = vmul.f32 %v5231_v33, %v5222_v5 }
0x1e58   :  { %v5250_v16 = vmul.f32 %v6176_v1, %v5240_v59  ;;  %v5235_v55 = vadd.f32 -0.28449672, %v5233_v18 }
0x1e5a   :  { %v5252_v2 = vsub.f32 1.0, %v5250_v16  ;;  %v5237_v32 = vmul.f32 %v5235_v55, %v5222_v5 }
0x1e5c   :  { %v5256_v27 = vsub.f32 0.0, %v5252_v2  ;;  %v5239_v21 = vadd.f32 0.2548296, %v5237_v32  ;;  %v5364_v32 = vld [vmem:[%s8819_s9 + $0x1] sm:$0x1] }
0x1e5e   :  { %v5258_v9 = vsel %vm5254_vm10, %v5252_v2, %v5256_v27  ;;  %v5241_v51 = vmul.f32 %v5239_v21, %v5222_v5  ;;  %v5396_v21 = vld [vmem:[%s8820_s13 + $0x18] sm:$0xff]  ;;  %vm5543_vm10 = vcmask 320512  }
0x1e5f   :  { %v5260_v45 = vadd.f32 1.0, %v5258_v9  ;;  %v5395_v9 = vld [vmem:[%s8820_s13 + $0x10] sm:$0xff]  ;;  %5416 = vmatpush.msra.mxu1 %v5396_v21 }
0x1e60   :  { %v5251_v26 = vmul.f32 %v6178_v15, %v5241_v51  ;;  %v5995_v51 = vld [vmem:[%s8821_s21] ss:$0 sm:$0xff]  ;;  %v5514_v21 = vld [vmem:[%s6529_s27 + $0x10] sm:$0xff] }
0x1e61   :  { %v5262_v47 = vmul.f32 %v5260_v45, %v5184_v20  ;;  %v5394_v20 = vld [vmem:[%s8820_s13 + $0x8] sm:$0xff]  ;;  %5417 = vmatpush.msra.mxu1 %v5395_v9 }
0x1e62   :  { %v5253_v39 = vsub.f32 1.0, %v5251_v26 }
0x1e63   :  { %5813 = vmatmul.msk.f32.vlgmr.msrb.gmra.mxu2 %vm1510_vm5, %v5262_v47  ;;  %5418 = vmatpush.msra.mxu1 %v5394_v20  ;;  %v5513_v20 = vld [vmem:[%s6529_s27 + $0x8] sm:$0xff] }
0x1e64   :  { %v5257_v38 = vsub.f32 0.0, %v5253_v39 }
0x1e66   :  { %v5259_v57 = vsel %vm5255_vm11, %v5253_v39, %v5257_v38 }
0x1e67   :  { %v5261_v6 = vadd.f32 1.0, %v5259_v57 }
0x1e69   :  { %v5263_v41 = vmul.f32 %v5261_v6, %v5185_v44 }
0x1e6b   :  { %5814 = vmatmul.msk.f32.gmra.mxu2 %vm1510_vm5, %v5263_v41 }
0x1ed4   :  { %v5360_v27 = vpop.f32.mrf.mxu3 }
0x1ed5   :  { %5363 = vst.msk [vmem:[#allocation3] sm:$0x1] %vm186_vm1, %v5360_v27 }
0x1ee6   :  { %v5287_v40 = vpop.f32.mrf.mxu2 }
0x1ee7   :  { %v5288_v14 = vadd.f32 %v6283_v48, %v5287_v40 }
0x1ee9   :  { %v5293_v3 = vadd.f32 %v5288_v14, %v8713_v30 }
0x1eeb   :  { %v5295_v11 = vsel %vm184_vm0, %v5293_v3, 0.0 }
0x1eee   :  { %v5290_v34 = vpop.f32.mrf.mxu2 }
0x1eef   :  { %v5291_v22 = vadd.f32 %v6283_v48, %v5290_v34 }
0x1ef1   :  { %v5294_v62 = vadd.f32 %v5291_v22, %v8717_v10 }
0x1ef3   :  { %v5296_v49 = vsel %vm186_vm1, %v5294_v62, 0.0 }
0x1ef4   :  { %v5297_v8 = vadd.f32 %v5296_v49, %v5295_v11 }
0x1ef6   :  { %v5298_v61 = vrot.slane %v5297_v8, 4 }
0x1ef8   :  { %v5299_v23 = vadd.f32 %v5298_v61, %v5297_v8 }
0x1efa   :  { %v5300_v19 = vrot.slane %v5299_v23, 2 }
0x1efc   :  { %v5301_v37 = vadd.f32 %v5300_v19, %v5299_v23 }
0x1efe   :  { %v5302_v4 = vrot.slane %v5301_v37, 1 }
0x1f00   :  { %v5303_v17 = vadd.f32 %v5302_v4, %v5301_v37 }
0x1f02   :  { %v5304_v60 = vmul.f32 %v5303_v17, %v6561_v24 }
0x1f04   :  { %v5305_v52 = vsub.f32 %v5293_v3, %v5304_v60  ;;  %v5306_v0 = vsub.f32 %v5294_v62, %v5304_v60 }
0x1f06   :  { %v5307_v30 = vmul.f32 %v5305_v52, %v5305_v52  ;;  %v5308_v46 = vmul.f32 %v5306_v0, %v5306_v0 }
0x1f08   :  { %v5309_v10 = vsel %vm184_vm0, %v5307_v30, 0.0  ;;  %v5310_v36 = vsel %vm186_vm1, %v5308_v46, 0.0 }
0x1f09   :  { %v5311_v50 = vadd.f32 %v5310_v36, %v5309_v10 }
0x1f0b   :  { %v5312_v13 = vrot.slane %v5311_v50, 4 }
0x1f0d   :  { %v5313_v43 = vadd.f32 %v5312_v13, %v5311_v50 }
0x1f0f   :  { %v5314_v54 = vrot.slane %v5313_v43, 2 }
0x1f11   :  { %v5315_v5 = vadd.f32 %v5314_v54, %v5313_v43 }
0x1f13   :  { %v5316_v29 = vrot.slane %v5315_v5, 1 }
0x1f15   :  { %v5317_v53 = vadd.f32 %v5316_v29, %v5315_v5 }
0x1f17   :  { %v5318_v35 = vmul.f32 %v5317_v53, %v6561_v24 }
0x1f19   :  { %v5319_v28 = vadd.f32 1e-12, %v5318_v35 }
0x1f1b   :  { %6179 = vrsqrt.f32 %v5319_v28  ;;  %vm5326_vm12 = vweird.f32 %v5319_v28 }
0x1f21   :  { %v6180_v63 = vpop.eup %6179 }
0x1f22   :  { %v5321_v56 = vmul.f32 %v6180_v63, %v5319_v28  ;;  %vm5327_vm5 = vweird.f32 %v6180_v63 }
0x1f23   :  { %vm5328_vm13 = vmor %vm5326_vm12, %vm5327_vm5 }
0x1f24   :  { %v5322_v12 = vmul.f32 %v6180_v63, %v5321_v56 }
0x1f26   :  { %v5323_v31 = vmul.f32 0.5, %v5322_v12 }
0x1f28   :  { %v5324_v33 = vsub.f32 1.5, %v5323_v31 }
0x1f2a   :  { %v5325_v59 = vmul.f32 %v6180_v63, %v5324_v33 }
0x1f2c   :  { %v5329_v7 = vsel %vm5328_vm13, %v6180_v63, %v5325_v59 }
0x1f2d   :  { %v5331_v1 = vmul.f32 %v5329_v7, %v5306_v0  ;;  %v5330_v18 = vmul.f32 %v5329_v7, %v5305_v52  ;;  %v6380_v0 = vmov 2.0  }
0x1f2f   :  { %v5333_v24 = vmul.f32 %v8548_v58, %v5331_v1  ;;  %v5332_v16 = vmul.f32 %v8548_v58, %v5330_v18  ;;  %v5393_v58 = vld [vmem:[%s8820_s13] sm:$0xff] }
0x1f30   :  { %5419 = vmatpush.msra.mxu1 %v5393_v58 }
0x1f31   :  { %v5335_v55 = vadd.f32 %v8554_v42, %v5333_v24  ;;  %v5334_v2 = vadd.f32 %v8554_v42, %v5332_v16 }
0x1f33   :  { %5817 = vmatpush.msk.msra.mxu0 %vm558_vm9, %v5335_v55 }
0x1f35   :  { %5386 = vmatpush.msra.mxu0 %v5334_v2 }
0x1f36   :  { %5818 = vmatmul.msk.f32.vlgmr.msra.gmra.mxu0 %vm517_vm7, %v5364_v32  ;;  %v5515_v32 = vld [vmem:[%s6529_s27 + $0x18] sm:$0xff] }
0x1f37   :  { %5535 = vmatpush.msra.mxu2 %v5515_v32 }
0x1f39   :  { %5536 = vmatpush.msra.mxu2 %v5514_v21 }
0x1f3b   :  { %5537 = vmatpush.msra.mxu2 %v5513_v20 }
0x1fb3   :  { %v5388_v45 = vpop.f32.mrf.mxu0 }
0x1fb4   :  { %5391 = vst.msk [vmem:[#allocation3 + $0x1] sm:$0x1] %vm186_vm1, %v5388_v45  ;;  %v5512_v45 = vld [vmem:[%s6529_s27] sm:$0xff] }
0x1fb5   :  { %5538 = vmatpush.msra.mxu2 %v5512_v45 }
0x1fbb   :  { %v5392_v42 = vld [vmem:[#allocation3] sm:$0x3] }
0x1fbc   :  { %5819 = vmatmul.msk.f32.vlgmr.msra.gmra.mxu1 %vm184_vm0, %v5392_v42 }
0x2039   :  { %v5421_v15 = vpop.f32.mrf.mxu1 }
0x203a   :  { %v5422_v47 = vadd.f32 %v5995_v51, %v5421_v15 }
0x203c   :  { %v5425_v26 = vmul.f32 0.70710677, %v5422_v47  ;;  %v5424_v25 = vmul.f32 0.5, %v5422_v47 }
0x203e   :  { %v5426_v39 = vand.u32 2147483647, %v5425_v26  ;;  %vm5459_vm3 = vcmp.ge.f32.partialorder %v5425_v26, 0.0 }
0x2040   :  { %v5427_v38 = vmul.f32 0.3275911, %v5426_v39  ;;  %v5453_v11 = vsub.f32 0.0, %v5426_v39 }
0x2042   :  { %v5428_v57 = vadd.f32 1.0, %v5427_v38  ;;  %v5454_v61 = vmul.f32 %v5453_v11, %v5426_v39 }
0x2044   :  { %6181 = vrcp.f32 %v5428_v57  ;;  %v5440_v40 = vand.u32 2147483648, %v5428_v57  ;;  %v5438_v14 = vand.u32 2147483647, %v5428_v57  ;;  %vm5434_vm1 = vweird.f32 %v5428_v57 }
0x2045   :  { %v5455_v37 = vmul.f32 1.442695, %v5454_v61 }
0x2046   :  { %v5441_v3 = vor.u32 1.1754944e-38, %v5440_v40  ;;  %vm5439_vm14 = vcmp.eq.f32.partialorder %v5438_v14, 8.507059e+37  ;;  %v5997_v14 = vld [vmem:[%s6524_s20] ss:$0 sm:$0xff] }
0x2047   :  { %6183 = vpow2.f32 %v5455_v37 }
0x2048   :  { %6185 = vrcp.f32 %v6380_v0 }
0x204a   :  { %v6182_v44 = vpop.eup %6181 }
0x204b   :  { %v5430_v6 = vmul.f32 %v6182_v44, %v5428_v57  ;;  %vm5435_vm7 = vweird.f32 %v6182_v44 }
0x204c   :  { %vm5436_vm9 = vmor %vm5434_vm1, %vm5435_vm7 }
0x204d   :  { %v5431_v41 = vsub.f32 1.0, %v5430_v6  ;;  %v6184_v46 = vpop.eup %6183 }
0x204e   :  { %v6186_v36 = vpop.eup %6185 }
0x204f   :  { %v5432_v48 = vmul.f32 %v6182_v44, %v5431_v41  ;;  %v5473_v43 = vmul.f32 2.0, %v6186_v36  ;;  %vm5477_vm2 = vweird.f32 %v6186_v36  ;;  %v5996_v41 = vld [vmem:[%s8822_s8] ss:$0 sm:$0xff] }
0x2051   :  { %v5433_v34 = vadd.f32 %v6182_v44, %v5432_v48  ;;  %v5474_v53 = vsub.f32 1.0, %v5473_v43 }
0x2053   :  { %v5437_v22 = vsel %vm5436_vm9, %v6182_v44, %v5433_v34  ;;  %v5475_v63 = vmul.f32 %v6186_v36, %v5474_v53 }
0x2054   :  { %v5442_v62 = vsel %vm5439_vm14, %v5441_v3, %v5437_v22  ;;  %v5998_v22 = vld [vmem:[%s6534_s4] ss:$0 sm:$0xff] }
0x2055   :  { %v5444_v49 = vmul.f32 1.0614054, %v5442_v62  ;;  %v5476_v31 = vadd.f32 %v6186_v36, %v5475_v63 }
0x2057   :  { %v5445_v8 = vadd.f32 -1.4531521, %v5444_v49  ;;  %v5478_v7 = vsel %vm5477_vm2, %v6186_v36, %v5476_v31 }
0x2059   :  { %v5446_v23 = vmul.f32 %v5445_v8, %v5442_v62 }
0x205b   :  { %v5447_v19 = vadd.f32 1.4214138, %v5446_v23 }
0x205d   :  { %v5448_v4 = vmul.f32 %v5447_v19, %v5442_v62 }
0x205f   :  { %v5449_v17 = vadd.f32 -0.28449672, %v5448_v4 }
0x2061   :  { %v5450_v60 = vmul.f32 %v5449_v17, %v5442_v62 }
0x2063   :  { %v5451_v52 = vadd.f32 0.2548296, %v5450_v60 }
0x2065   :  { %v5452_v30 = vmul.f32 %v5451_v52, %v5442_v62 }
0x2067   :  { %v5457_v10 = vmul.f32 %v6184_v46, %v5452_v30 }
0x2069   :  { %v5458_v50 = vsub.f32 1.0, %v5457_v10 }
0x206b   :  { %v5460_v13 = vsub.f32 0.0, %v5458_v50 }
0x206d   :  { %v5461_v54 = vsel %vm5459_vm3, %v5458_v50, %v5460_v13 }
0x206e   :  { %v5462_v5 = vadd.f32 1.0, %v5461_v54 }
0x2070   :  { %v5463_v29 = vmul.f32 %v5462_v5, %v5424_v25 }
0x2072   :  { %v5465_v35 = vsel %vm5464_vm4, %v5463_v29, 0.0 }
0x2073   :  { %v5466_v28 = vrot.slane %v5465_v35, 4 }
0x2075   :  { %v5467_v56 = vadd.f32 %v5466_v28, %v5465_v35 }
0x2077   :  { %v5468_v12 = vrot.slane %v5467_v56, 2 }
0x2079   :  { %v5469_v33 = vadd.f32 %v5468_v12, %v5467_v56 }
0x207b   :  { %v5470_v59 = vrot.slane %v5469_v33, 1 }
0x207d   :  { %v5471_v1 = vadd.f32 %v5470_v59, %v5469_v33 }
0x207f   :  { %v5479_v18 = vmul.f32 %v5478_v7, %v5471_v1 }
0x2081   :  { %v5480_v24 = vsub.f32 %v5463_v29, %v5479_v18 }
0x2083   :  { %v5481_v16 = vmul.f32 %v5480_v24, %v5480_v24 }
0x2085   :  { %v5482_v55 = vsel %vm5464_vm4, %v5481_v16, 0.0 }
0x2086   :  { %v5483_v2 = vrot.slane %v5482_v55, 4 }
0x2088   :  { %v5484_v27 = vadd.f32 %v5483_v2, %v5482_v55 }
0x208a   :  { %v5485_v9 = vrot.slane %v5484_v27, 2 }
0x208c   :  { %v5486_v58 = vadd.f32 %v5485_v9, %v5484_v27 }
0x208e   :  { %v5487_v42 = vrot.slane %v5486_v58, 1 }
0x2090   :  { %v5488_v51 = vadd.f32 %v5487_v42, %v5486_v58 }
0x2092   :  { %v5489_v15 = vmul.f32 %v5488_v51, %v5478_v7 }
0x2094   :  { %v5490_v47 = vadd.f32 1e-12, %v5489_v15 }
0x2096   :  { %6187 = vrsqrt.f32 %v5490_v47  ;;  %vm5497_vm6 = vweird.f32 %v5490_v47 }
0x209c   :  { %v6188_v26 = vpop.eup %6187 }
0x209d   :  { %v5492_v39 = vmul.f32 %v6188_v26, %v5490_v47  ;;  %vm5498_vm15 = vweird.f32 %v6188_v26 }
0x209e   :  { %vm5499_vm8 = vmor %vm5497_vm6, %vm5498_vm15 }
0x209f   :  { %v5493_v38 = vmul.f32 %v6188_v26, %v5492_v39 }
0x20a1   :  { %v5494_v57 = vmul.f32 0.5, %v5493_v38 }
0x20a3   :  { %v5495_v44 = vsub.f32 1.5, %v5494_v57 }
0x20a5   :  { %v5496_v6 = vmul.f32 %v6188_v26, %v5495_v44 }
0x20a7   :  { %v5500_v40 = vsel %vm5499_vm8, %v6188_v26, %v5496_v6 }
0x20a8   :  { %v5501_v48 = vmul.f32 %v5500_v40, %v5480_v24 }
0x20aa   :  { %v5506_v34 = vmul.f32 %v5996_v41, %v5501_v48 }
0x20ac   :  { %v5511_v3 = vadd.f32 %v5997_v14, %v5506_v34 }
0x20ae   :  { %5820 = vmatmul.msk.f32.vlgmr.msra.gmra.mxu2 %vm184_vm0, %v5511_v3 }
0x2131   :  { %v5540_v62 = vpop.f32.mrf.mxu2 }
0x2132   :  { %v5541_v11 = vadd.f32 %v5998_v22, %v5540_v62 }
0x2134   :  { %5544 = vst.msk [vmem:[%s6539_s25] sm:$0x3] %vm5543_vm10, %v5541_v11 }
0x2135   :  { %5549 = vsyncpa [#allocation5], 1 }
0x2136   :  { %5550 = vsyncpa [#allocation7], 1 }

</bundles_post_ra>
